<compile_context>
chip_gen: v5e
topology: v5e:2x2
jax: 0.10.0
libtpu: 0.0.40
codegen_flags: <defaults>
</compile_context>

<pallas_src>
import jax
import jax.numpy as jnp
from jax import lax
from jax.experimental import pallas as pl
from jax.experimental.pallas import tpu as pltpu


def _make_mpnn_kernel(hoist_wf: bool):
    """hoist_wf=True: accumulate pre-projection outer products (N, D*D) and
    apply the fused message weight once at finalize (cheaper when N <= D).
    hoist_wf=False: apply the fused weight per edge tile and accumulate (N, D)
    messages (cheaper when N >> D)."""

    def kernel(idx_ref, x_ref, xt_ref, ea_ref, exp_ref, wf_ref, wn_ref,
               out_ref, acc_ref):
        split = pl.program_id(0)   # edge split (maps to a TensorCore on v7x)
        step = pl.program_id(1)    # edge tile within the split

        @pl.when(step == 0)
        def _init():
            acc_ref[...] = jnp.zeros_like(acc_ref)

        ea = ea_ref[...].astype(jnp.float32)            # (TE, D)
        src = idx_ref[0:1, :]                           # (1, TE) int32
        dst = idx_ref[1:2, :]                           # (1, TE) int32

        TE, D = ea.shape
        N = x_ref.shape[0]

        # Both one-hots in the cheap (N, TE) orientation: the (1, TE) index
        # rows broadcast along sublanes (stride-0), no lane relayout.
        iota_nt = lax.broadcasted_iota(jnp.int32, (N, TE), 0)
        onehot_src_t = (iota_nt == src).astype(jnp.float32)    # (N, TE)
        onehot_dst_t = (iota_nt == dst).astype(jnp.float32)    # (N, TE)

        # Gather x_j already in its final lane-dense (TE, D*D) layout by
        # contracting the one-hot over N against the pre-tiled x (transposed-
        # LHS MXU matmul).  Avoids the (TE, D, D) -> (TE, D*D) relayout.
        x_j_tiled = lax.dot_general(
            onehot_src_t, xt_ref[...].astype(jnp.float32),
            dimension_numbers=(((0,), (0,)), ((), ())),
            preferred_element_type=jnp.float32)                 # (TE, D*D)

        # Expand edge_attr lane-dense on the MXU: ea_exp[e, c*D+d] = ea[e, c].
        ea_exp = jnp.dot(ea, exp_ref[...],
                         preferred_element_type=jnp.float32)    # (TE, D*D)

        # z[e, c*D+d] = ea[e, c] * x[src_e, d]   (VPU, already lane-dense).
        z = ea_exp * x_j_tiled                                  # (TE, D*D)

        if hoist_wf:
            # Scatter-add the pre-projection outer products; Wf is applied
            # once at finalize (linearity of the scatter).
            acc_ref[...] += jnp.dot(onehot_dst_t, z,
                                    preferred_element_type=jnp.float32)
        else:
            m = jnp.dot(z, wf_ref[...],
                        preferred_element_type=jnp.float32)     # (TE, D)
            acc_ref[...] += jnp.dot(onehot_dst_t, m,
                                    preferred_element_type=jnp.float32)

        @pl.when(step == pl.num_programs(1) - 1)
        def _finalize():
            if hoist_wf:
                agg = jnp.dot(acc_ref[...], wf_ref[...],
                              preferred_element_type=jnp.float32)   # (N, D)
            else:
                agg = acc_ref[...]                                   # (N, D)
            node = jnp.dot(x_ref[...].astype(jnp.float32), wn_ref[...],
                           preferred_element_type=jnp.float32)       # (N, D)
            # The node-MLP term must only be added once across edge splits.
            node = jnp.where(split == 0, node, jnp.zeros_like(node))
            out_ref[0] = (agg + node).astype(out_ref.dtype)

    return kernel


def mpnn_block_forward(x, edge_index, edge_attr, w_edge, w_node, *,
                       te=512, core_splits=2, hoist_wf=None):
    """x: (N, D) f32; edge_index: (2, E) int; edge_attr: (E, D) f32;
    w_edge: (D*D, D) (PyTorch Linear layout, out x in); w_node: (D, D).

    te:          edges per grid step (sweep 512..2048).
    core_splits: number of independent edge chunks (leading "parallel" grid
                 axis; set >=2 to use both TensorCores on v7x).
    hoist_wf:    None -> auto (N <= D).
    """
    N, D = x.shape
    E = edge_attr.shape[0]
    assert w_edge.shape == (D * D, D), "module requires hidden_dim == input_dim"
    assert w_node.shape == (D, D)

    if hoist_wf is None:
        hoist_wf = N <= D   # flop crossover for the hoisted-Wf variant

    # Edge padding: padded edges get index N (matches no node -> zero one-hot
    # column) and zero attrs, so they provably contribute nothing.  (Note: any
    # genuinely out-of-range edge index also silently drops.)
    n_tiles = max(1, -(-E // te))
    steps_per_split = -(-n_tiles // core_splits)
    total_tiles = core_splits * steps_per_split
    e_pad = total_tiles * te
    pad = e_pad - E

    src = edge_index[0].astype(jnp.int32)
    dst = edge_index[1].astype(jnp.int32)
    if pad:
        src = jnp.concatenate([src, jnp.full((pad,), N, jnp.int32)])
        dst = jnp.concatenate([dst, jnp.full((pad,), N, jnp.int32)])
        edge_attr = jnp.concatenate(
            [edge_attr, jnp.zeros((pad, D), edge_attr.dtype)], axis=0)
    idx = jnp.stack([src, dst], axis=0)                      # (2, e_pad)

    # Pre-tiled x for the lane-dense gather: x_tiled[n, c*D+d] = x[n, d].
    x_tiled = jnp.tile(x, (1, D))                            # (N, D*D)
    # Lane expansion matrix: exp_mat[c, c*D+d] = 1.
    exp_mat = jnp.kron(jnp.eye(D, dtype=jnp.float32),
                       jnp.ones((1, D), jnp.float32))        # (D, D*D)
    # Fused message weight: Wf[c*D+d, k] = w_edge[d*D+k, c].
    w_fused = jnp.transpose(w_edge.reshape(D, D, D), (2, 0, 1)).reshape(D * D, D)
    # Node MLP weight pre-transposed to (in, out).
    w_node_t = jnp.transpose(w_node)

    acc_cols = D * D if hoist_wf else D
    kernel = _make_mpnn_kernel(hoist_wf)

    # Advisory cost estimate.
    per_tile = (2 * te * D * D * N        # one-hot gather (contract N)
                + 2 * te * D * D * D      # edge-attr lane expansion
                + te * D * D)             # z elementwise
    if hoist_wf:
        per_tile += 2 * N * D * D * te
        final = 2 * N * D * D * D + 2 * N * D * D
    else:
        per_tile += 2 * te * D * D * D + 2 * N * D * te
        final = 2 * N * D * D
    flops = total_tiles * per_tile + core_splits * final
    bytes_accessed = 4 * (idx.size + x.size + x_tiled.size + edge_attr.size
                          + exp_mat.size + w_fused.size + w_node_t.size
                          + core_splits * N * D)

    out = pl.pallas_call(
        kernel,
        out_shape=jax.ShapeDtypeStruct((core_splits, N, D), x.dtype),
        grid_spec=pltpu.PrefetchScalarGridSpec(
            num_scalar_prefetch=0,
            grid=(core_splits, steps_per_split),
            in_specs=[
                pl.BlockSpec((2, te),
                             lambda c, i: (0, c * steps_per_split + i)),  # src/dst
                pl.BlockSpec((N, D), lambda c, i: (0, 0)),                # x
                pl.BlockSpec((N, D * D), lambda c, i: (0, 0)),            # x tiled
                pl.BlockSpec((te, D),
                             lambda c, i: (c * steps_per_split + i, 0)),  # edge_attr
                pl.BlockSpec((D, D * D), lambda c, i: (0, 0)),            # exp_mat
                pl.BlockSpec((D * D, D), lambda c, i: (0, 0)),            # W_fused
                pl.BlockSpec((D, D), lambda c, i: (0, 0)),                # W_node^T
            ],
            out_specs=pl.BlockSpec((1, N, D), lambda c, i: (c, 0, 0)),
            scratch_shapes=[pltpu.VMEM((N, acc_cols), jnp.float32)],
        ),
        compiler_params=pltpu.CompilerParams(
            dimension_semantics=("parallel", "arbitrary"),
            # <= 48 MiB so the same tiling fits v7x's 64 MiB/TC; v5e/v6e could
            # go higher when sweeping te / N upwards.
            vmem_limit_bytes=48 * 1024 * 1024,
        ),
        cost_estimate=pl.CostEstimate(
            flops=int(flops), transcendentals=0,
            bytes_accessed=int(bytes_accessed)),
    )(idx, x, x_tiled, edge_attr, exp_mat, w_fused, w_node_t)

    # Combine per-split partial aggregations (cheap wrapper-side add).
    return jnp.sum(out, axis=0)


def mpnn_block_reference(x, edge_index, edge_attr, w_edge, w_node):
    """Plain-JAX reference mirroring the PyTorch module."""
    N, D = x.shape
    src = edge_index[0]
    dst = edge_index[1]
    ef = edge_attr @ w_edge.T                      # (E, D*D)
    ef3 = ef.reshape(-1, D, D)                     # (E, D, D)
    x_j = x[src]                                   # (E, D)
    msg = jnp.einsum("ed,edk->ek", x_j, ef3)       # (E, D)
    agg = jnp.zeros_like(x).at[dst].add(msg)       # scatter-add
    return agg + x @ w_node.T


def _make_case(key, N, E, D):
    k_x, k_ea, k_we, k_wn, k_src, k_dst = jax.random.split(key, 6)
    x = jax.random.normal(k_x, (N, D), dtype=jnp.float32)
    edge_attr = jax.random.normal(k_ea, (E, D), dtype=jnp.float32)
    w_edge = jax.random.uniform(k_we, (D * D, D), minval=-1.0, maxval=1.0,
                                dtype=jnp.float32) * (1.0 / jnp.sqrt(D))
    w_node = jax.random.uniform(k_wn, (D, D), minval=-1.0, maxval=1.0,
                                dtype=jnp.float32) * (1.0 / jnp.sqrt(D))
    src = jax.random.randint(k_src, (E,), 0, N, dtype=jnp.int32)
    dst = jax.random.randint(k_dst, (E,), 0, N, dtype=jnp.int32)
    edge_index = jnp.stack([src, dst], axis=0)     # (2, E)
    return x, edge_index, edge_attr, w_edge, w_node


if __name__ == "__main__":
    key = jax.random.PRNGKey(0)
    k1, k2 = jax.random.split(key)

    # Case 1: N <= D -> hoisted-Wf variant (also exercises the edge split).
    args1 = _make_case(k1, N=16, E=300, D=32)
    out1 = jax.block_until_ready(mpnn_block_forward(*args1))
    ref1 = mpnn_block_reference(*args1)
    assert out1.shape == ref1.shape
    assert jnp.allclose(out1, ref1, atol=1e-4, rtol=1e-4), (
        float(jnp.max(jnp.abs(out1 - ref1))))

    # Case 2: N > D -> per-tile Wf variant.
    args2 = _make_case(k2, N=64, E=700, D=32)
    out2 = jax.block_until_ready(mpnn_block_forward(*args2))
    ref2 = mpnn_block_reference(*args2)
    assert out2.shape == ref2.shape
    assert jnp.allclose(out2, ref2, atol=1e-4, rtol=1e-4), (
        float(jnp.max(jnp.abs(out2 - ref2))))

    print("KERNEL_OK")
</pallas_src>

<mosaic_0001>
module attributes {stable_mosaic.version = 11 : i64} {
  func.func @kernel(%arg0: i32, %arg1: i32, %arg2: memref<2x512xi32, #tpu.memory_space<vmem>>, %arg3: memref<16x32xf32, #tpu.memory_space<vmem>>, %arg4: memref<16x1024xf32, #tpu.memory_space<vmem>>, %arg5: memref<512x32xf32, #tpu.memory_space<vmem>>, %arg6: memref<32x1024xf32, #tpu.memory_space<vmem>>, %arg7: memref<1024x32xf32, #tpu.memory_space<vmem>>, %arg8: memref<32x32xf32, #tpu.memory_space<vmem>>, %arg9: memref<1x16x32xf32, #tpu.memory_space<vmem>>, %arg10: memref<16x1024xf32, #tpu.memory_space<vmem>>) attributes {dimension_semantics = [#tpu.dimension_semantics<parallel>, #tpu.dimension_semantics<arbitrary>], iteration_bounds = array<i64: 2, 1>, scalar_prefetch = 0 : i64, scratch_operands = 1 : i64, tpu.core_type = #tpu.core_type<tc>, window_params = [{transform_indices = @transform_0, window_bounds = array<i64: 2, 512>}, {pipeline_mode = #tpu.pipeline_mode<synchronous>, transform_indices = @transform_1, window_bounds = array<i64: 16, 32>}, {pipeline_mode = #tpu.pipeline_mode<synchronous>, transform_indices = @transform_2, window_bounds = array<i64: 16, 1024>}, {transform_indices = @transform_3, window_bounds = array<i64: 512, 32>}, {pipeline_mode = #tpu.pipeline_mode<synchronous>, transform_indices = @transform_4, window_bounds = array<i64: 32, 1024>}, {pipeline_mode = #tpu.pipeline_mode<synchronous>, transform_indices = @transform_5, window_bounds = array<i64: 1024, 32>}, {pipeline_mode = #tpu.pipeline_mode<synchronous>, transform_indices = @transform_6, window_bounds = array<i64: 32, 32>}, {transform_indices = @transform_7, window_bounds = array<i64: 1, 16, 32>}]} {
    %c0_i32 = arith.constant 0 : i32
    %0 = arith.cmpi eq, %arg1, %c0_i32 : i32
    %1 = arith.extui %0 : i1 to i32
    %c0_i32_0 = arith.constant 0 : i32
    %2 = arith.cmpi ne, %1, %c0_i32_0 : i32
    scf.if %2 {
      %cst_17 = arith.constant 0.000000e+00 : f32
      %27 = vector.broadcast %cst_17 : f32 to vector<16x1024xf32>
      %c0_18 = arith.constant 0 : index
      %c0_19 = arith.constant 0 : index
      %28 = vector.load %arg10[%c0_18, %c0_19] : memref<16x1024xf32, #tpu.memory_space<vmem>>, vector<16x1024xf32>
      tpu.vector_store %arg10[%c0_18, %c0_19], %27 {strides = array<i32>} : memref<16x1024xf32, #tpu.memory_space<vmem>>, vector<16x1024xf32>,
    } else {
    }
    %c0 = arith.constant 0 : index
    %c0_1 = arith.constant 0 : index
    %3 = vector.load %arg5[%c0, %c0_1] : memref<512x32xf32, #tpu.memory_space<vmem>>, vector<512x32xf32>
    %c0_2 = arith.constant 0 : index
    %c0_3 = arith.constant 0 : index
    %4 = vector.load %arg2[%c0_2, %c0_3] : memref<2x512xi32, #tpu.memory_space<vmem>>, vector<1x512xi32>
    %c1 = arith.constant 1 : index
    %c0_4 = arith.constant 0 : index
    %5 = vector.load %arg2[%c1, %c0_4] : memref<2x512xi32, #tpu.memory_space<vmem>>, vector<1x512xi32>
    %6 = tpu.iota {dimensions = array<i32: 0>} : vector<16x512xi32>
    %7 = vector.broadcast %4 : vector<1x512xi32> to vector<16x512xi32>
    %8 = arith.cmpi eq, %6, %7 : vector<16x512xi32>
    %9 = arith.extui %8 : vector<16x512xi1> to vector<16x512xi32>
    %10 = arith.sitofp %9 : vector<16x512xi32> to vector<16x512xf32>
    %11 = vector.broadcast %5 : vector<1x512xi32> to vector<16x512xi32>
    %12 = arith.cmpi eq, %6, %11 : vector<16x512xi32>
    %13 = arith.extui %12 : vector<16x512xi1> to vector<16x512xi32>
    %14 = arith.sitofp %13 : vector<16x512xi32> to vector<16x512xf32>
    %c0_5 = arith.constant 0 : index
    %c0_6 = arith.constant 0 : index
    %15 = vector.load %arg4[%c0_5, %c0_6] : memref<16x1024xf32, #tpu.memory_space<vmem>>, vector<16x1024xf32>
    %cst = arith.constant dense<0.000000e+00> : vector<512x1024xf32>
    %16 = tpu.matmul %10, %15, %cst {dimension_numbers = #tpu.dot_dimension_numbers<[0], [0], [1], [1], [0, 1, 1, 1], [], []>} : vector<16x512xf32>, vector<16x1024xf32>, vector<512x1024xf32> -> vector<512x1024xf32>
    %c0_7 = arith.constant 0 : index
    %c0_8 = arith.constant 0 : index
    %17 = vector.load %arg6[%c0_7, %c0_8] : memref<32x1024xf32, #tpu.memory_space<vmem>>, vector<32x1024xf32>
    %cst_9 = arith.constant dense<0.000000e+00> : vector<512x1024xf32>
    %18 = tpu.matmul %3, %17, %cst_9 {dimension_numbers = #tpu.dot_dimension_numbers<[1], [0], [0], [1], [0, 0, 1, 1], [], []>} : vector<512x32xf32>, vector<32x1024xf32>, vector<512x1024xf32> -> vector<512x1024xf32>
    %19 = arith.mulf %18, %16 : vector<512x1024xf32>
    %c0_10 = arith.constant 0 : index
    %c0_11 = arith.constant 0 : index
    %20 = vector.load %arg10[%c0_10, %c0_11] : memref<16x1024xf32, #tpu.memory_space<vmem>>, vector<16x1024xf32>
    %cst_12 = arith.constant dense<0.000000e+00> : vector<16x1024xf32>
    %21 = tpu.matmul %14, %19, %cst_12 {dimension_numbers = #tpu.dot_dimension_numbers<[1], [0], [0], [1], [0, 0, 1, 1], [], []>} : vector<16x512xf32>, vector<512x1024xf32>, vector<16x1024xf32> -> vector<16x1024xf32>
    %22 = arith.addf %20, %21 : vector<16x1024xf32>
    %c0_13 = arith.constant 0 : index
    %c0_14 = arith.constant 0 : index
    %23 = vector.load %arg10[%c0_13, %c0_14] : memref<16x1024xf32, #tpu.memory_space<vmem>>, vector<16x1024xf32>
    tpu.vector_store %arg10[%c0_13, %c0_14], %22 {strides = array<i32>} : memref<16x1024xf32, #tpu.memory_space<vmem>>, vector<16x1024xf32>,
    %c0_i32_15 = arith.constant 0 : i32
    %24 = arith.cmpi eq, %arg1, %c0_i32_15 : i32
    %25 = arith.extui %24 : i1 to i32
    %c0_i32_16 = arith.constant 0 : i32
    %26 = arith.cmpi ne, %25, %c0_i32_16 : i32
    scf.if %26 {
      %c0_17 = arith.constant 0 : index
      %c0_18 = arith.constant 0 : index
      %27 = vector.load %arg10[%c0_17, %c0_18] : memref<16x1024xf32, #tpu.memory_space<vmem>>, vector<16x1024xf32>
      %c0_19 = arith.constant 0 : index
      %c0_20 = arith.constant 0 : index
      %28 = vector.load %arg7[%c0_19, %c0_20] : memref<1024x32xf32, #tpu.memory_space<vmem>>, vector<1024x32xf32>
      %cst_21 = arith.constant dense<0.000000e+00> : vector<16x32xf32>
      %29 = tpu.matmul %27, %28, %cst_21 {dimension_numbers = #tpu.dot_dimension_numbers<[1], [0], [0], [1], [0, 0, 1, 1], [], []>} : vector<16x1024xf32>, vector<1024x32xf32>, vector<16x32xf32> -> vector<16x32xf32>
      %c0_22 = arith.constant 0 : index
      %c0_23 = arith.constant 0 : index
      %30 = vector.load %arg3[%c0_22, %c0_23] : memref<16x32xf32, #tpu.memory_space<vmem>>, vector<16x32xf32>
      %c0_24 = arith.constant 0 : index
      %c0_25 = arith.constant 0 : index
      %31 = vector.load %arg8[%c0_24, %c0_25] : memref<32x32xf32, #tpu.memory_space<vmem>>, vector<32x32xf32>
      %cst_26 = arith.constant dense<0.000000e+00> : vector<16x32xf32>
      %32 = tpu.matmul %30, %31, %cst_26 {dimension_numbers = #tpu.dot_dimension_numbers<[1], [0], [0], [1], [0, 0, 1, 1], [], []>} : vector<16x32xf32>, vector<32x32xf32>, vector<16x32xf32> -> vector<16x32xf32>
      %c0_i32_27 = arith.constant 0 : i32
      %33 = arith.cmpi eq, %arg0, %c0_i32_27 : i32
      %cst_28 = arith.constant 0.000000e+00 : f32
      %34 = vector.broadcast %cst_28 : f32 to vector<16x32xf32>
      %35 = arith.select %33, %32, %34 : vector<16x32xf32>
      %36 = arith.addf %29, %35 : vector<16x32xf32>
      %c0_29 = arith.constant 0 : index
      %c0_30 = arith.constant 0 : index
      %c0_31 = arith.constant 0 : index
      %37 = vector.load %arg9[%c0_29, %c0_30, %c0_31] : memref<1x16x32xf32, #tpu.memory_space<vmem>>, vector<1x16x32xf32>
      %38 = vector.shape_cast %37 : vector<1x16x32xf32> to vector<16x32xf32>
      %39 = vector.shape_cast %36 : vector<16x32xf32> to vector<1x16x32xf32>
      tpu.vector_store %arg9[%c0_29, %c0_30, %c0_31], %39 {strides = array<i32>} : memref<1x16x32xf32, #tpu.memory_space<vmem>>, vector<1x16x32xf32>,
    } else {
    }
    return
  }
  func.func @transform_0(%arg0: i32, %arg1: i32) -> (i32, i32) {
    %c1_i32 = arith.constant 1 : i32
    %0 = arith.muli %arg0, %c1_i32 : i32
    %1 = arith.addi %0, %arg1 : i32
    %c0_i32 = arith.constant 0 : i32
    %c0_i32_0 = arith.constant 0 : i32
    return %c0_i32, %1 : i32, i32
  }
  func.func @transform_1(%arg0: i32, %arg1: i32) -> (i32, i32) {
    %c0_i32 = arith.constant 0 : i32
    %c0_i32_0 = arith.constant 0 : i32
    %c0_i32_1 = arith.constant 0 : i32
    return %c0_i32, %c0_i32_0 : i32, i32
  }
  func.func @transform_2(%arg0: i32, %arg1: i32) -> (i32, i32) {
    %c0_i32 = arith.constant 0 : i32
    %c0_i32_0 = arith.constant 0 : i32
    %c0_i32_1 = arith.constant 0 : i32
    return %c0_i32, %c0_i32_0 : i32, i32
  }
  func.func @transform_3(%arg0: i32, %arg1: i32) -> (i32, i32) {
    %c1_i32 = arith.constant 1 : i32
    %0 = arith.muli %arg0, %c1_i32 : i32
    %1 = arith.addi %0, %arg1 : i32
    %c0_i32 = arith.constant 0 : i32
    %c0_i32_0 = arith.constant 0 : i32
    return %1, %c0_i32 : i32, i32
  }
  func.func @transform_4(%arg0: i32, %arg1: i32) -> (i32, i32) {
    %c0_i32 = arith.constant 0 : i32
    %c0_i32_0 = arith.constant 0 : i32
    %c0_i32_1 = arith.constant 0 : i32
    return %c0_i32, %c0_i32_0 : i32, i32
  }
  func.func @transform_5(%arg0: i32, %arg1: i32) -> (i32, i32) {
    %c0_i32 = arith.constant 0 : i32
    %c0_i32_0 = arith.constant 0 : i32
    %c0_i32_1 = arith.constant 0 : i32
    return %c0_i32, %c0_i32_0 : i32, i32
  }
  func.func @transform_6(%arg0: i32, %arg1: i32) -> (i32, i32) {
    %c0_i32 = arith.constant 0 : i32
    %c0_i32_0 = arith.constant 0 : i32
    %c0_i32_1 = arith.constant 0 : i32
    return %c0_i32, %c0_i32_0 : i32, i32
  }
  func.func @transform_7(%arg0: i32, %arg1: i32) -> (i32, i32, i32) {
    %c0_i32 = arith.constant 0 : i32
    %c0_i32_0 = arith.constant 0 : i32
    %c0_i32_1 = arith.constant 0 : i32
    return %arg0, %c0_i32, %c0_i32_0 : i32, i32, i32
  }
}

</mosaic_0001>

<bundles_post_ra>
// kernel: tpu_custom_call.1
= control target key start
LH: loop header
LB: loop body
LE: loop exit
PB: predicated region body
PF: predicated region fallthrough
CT: control target
= control target key end

     0   :  { %12 = vsyncpa [#allocation4], 0  ;;  %s13994_s0 = inlined_call_operand.vmem [shape: s32[2,1024], index: 0, kind: input, shape index: {}]   ;;  %s13995_s1 = inlined_call_operand.vmem [shape: f32[16,32], index: 1, kind: input, shape index: {}]   ;;  %s13996_s2 = inlined_call_operand.vmem [shape: f32[16,1024], index: 2, kind: input, shape index: {}]   ;;  %s13997_s3 = inlined_call_operand.vmem [shape: f32[1024,32], index: 3, kind: input, shape index: {}]   ;;  %s13998_s4 = inlined_call_operand.vmem [shape: f32[32,1024], index: 4, kind: input, shape index: {}]   ;;  %s13999_s5 = inlined_call_operand.vmem [shape: f32[1024,32], index: 5, kind: input, shape index: {}]   ;;  %s14000_s6 = inlined_call_operand.vmem [shape: f32[32,32], index: 6, kind: input, shape index: {}]   ;;  %s14001_s7 = inlined_call_operand.hbm [shape: f32[2,16,32], index: 7, kind: output, shape index: {}]  }
   0x1   :  { %14 = vsyncpa [#allocation4 + $0x1], 0  ;;  %s7519_s24 = smov 0   ;;  %s7521_s25 = smov 0  }
   0x2   :  { %s7523_s26 = smov 0   ;;  %s7525_s27 = smov 0  }
   0x3   :  { %s7527_s28 = smov 0   ;;  %s7529_s29 = smov 0  }
   0x4 LB: > { %s6147_s30 = sadd.s32 4294967295, %s7473_s29   ;;  %s6148_s8 = sadd.s32 4294967294, %s7473_s29   ;;  %s7473_s29 = sphi %s7529_s29, %s20_s29   ;;  %s7469_s28 = sphi %s7527_s28, %s15693_s28   ;;  %s7465_s27 = sphi %s7525_s27, %s15692_s27   ;;  %s7461_s26 = sphi %s7523_s26, %s15691_s26   ;;  %s7457_s25 = sphi %s7521_s25, %s15690_s25   ;;  %s7453_s24 = sphi %s7519_s24, %s15689_s24  }
   0x5   : > { %s32_s9 = sadd.s32 1, %s7469_s28  ;;  %s200_s10 = sadd.s32 1, %s7461_s26 }
   0x6   : > { %p34_p0 = scmp.ge.s32.totalorder %s32_s9, 2  ;;  %p210_p1 = scmp.ne.s32.totalorder %s7461_s26, %s7457_s25 }
   0x7   : > { %p211_p2 = scmp.eq.s32.totalorder %s6147_s30, 1  ;;  %p216_p3 = scmp.ne.s32.totalorder %s7457_s25, %s7453_s24 }
   0x8   : > { %s15695_s9 = smov (%p34_p0, %s32_s9), 0  ;;  %p217_p5 = scmp.eq.s32.totalorder %s6148_s8, 1 }
   0x9   : > { %p7559_p4 = por %p211_p2, %p210_p1  ;;  %s197_s12 = ssub.s32 %s7469_s28, %s15695_s9 }
   0xa   : > { %p6151_p6 = scmp.ge.s32.totalorder %s7473_s29, 1  ;;  %p198_p7 = scmp.eq.s32.totalorder %s197_s12, 0 }
   0xb   : > { %p7566_p8 = por %p217_p5, %p216_p3  ;;  %p272_p9 = scmp.lt.s32.totalorder %s7473_s29, 3 }
   0xc   : > { %s7572_s14 = scalar_select %p198_p7, %s7461_s26, %s200_s10  }
   0xd   : > { %p273_p10 = pnand %p6151_p6, %p272_p9 }
   0xf   : > { %276 = sbr.rel (%p273_p10) target bundleno = 2882 (0xb42), region = 48 }
  0x14   : > { %s6153_s15 = sshll.u32 %s7465_s27, 2  ;;  %v481_v0 = vld [vmem:[%s13996_s2 + $0x40] sm:$0xff]  ;;  %v483_v1 = vld [vmem:[%s13996_s2 + $0x50] sm:$0xff]  ;;  %v484_v2 = vld [vmem:[%s13996_s2 + $0x58] sm:$0xff]  ;;  %v414_v6 = vlaneseq  ;;  %v7475_v13 = vmov 0.0   ;;  %vm617_vm6 = vcmask 130048  }
  0x15   : > { %p313_p11 = scmp.lt.s32.totalorder %s6153_s15, 7  ;;  %824 = vmatpush.msra.mxu0 %v481_v0  ;;  %1242 = vmatpush.msra.mxu2 %v483_v1  ;;  %v473_v3 = vld [vmem:[%s13996_s2] sm:$0xff]  ;;  %v475_v4 = vld [vmem:[%s13996_s2 + $0x10] sm:$0xff]  ;;  %v476_v5 = vld [vmem:[%s13996_s2 + $0x18] sm:$0xff]  ;;  %s6155_s21 = sshll.u32 %s7465_s27, 6  ;;  %vm2514_vm9 = vcmask 261120  }
  0x16   : > { %1451 = vmatpush.msra.mxu3 %v484_v2  ;;  %7270 = vmatpush.msra.mxu1 %v481_v0  ;;  %v7598_v7 = vshrl.u32 %v414_v6, 7  ;;  %v482_v48 = vld [vmem:[%s13996_s2 + $0x48] sm:$0xff]  ;;  %v485_v59 = vld [vmem:[%s13996_s2 + $0x60] sm:$0xff]  ;;  %p321_p12 = scmp.lt.s32.totalorder %s6155_s21, 127  ;;  %p5857_p13 = scmp.eq.s32.totalorder %s7465_s27, 0 }
  0x17   : > { %s15697_s15 = smov (!%p313_p11, %s6153_s15), 7  ;;  %825 = vmatpush.msra.mxu0 %v473_v3  ;;  %1243 = vmatpush.msra.mxu2 %v475_v4  ;;  %v474_v49 = vld [vmem:[%s13996_s2 + $0x8] sm:$0xff]  ;;  %v487_v4 = vld [vmem:[%s13996_s2 + $0x70] sm:$0xff]  ;;  %s7269_s30 = sshll.u32 %s7465_s27, 4 }
  0x18   : > { %1452 = vmatpush.msra.mxu3 %v476_v5  ;;  %7271 = vmatpush.msra.mxu1 %v473_v3  ;;  %s6154_s16 = sshll.u32 %s15697_s15, 1  ;;  %14031 = vst [vmem:[#allocation6_spill] sm:$0xff] %v7598_v7  ;;  %v7607_v12 = vadd.s32 8, %v7598_v7  ;;  %v486_v63 = vld [vmem:[%s13996_s2 + $0x68] sm:$0xff]  ;;  %s15699_s21 = smov (!%p321_p12, %s6155_s21), 127 }
  0x19   : > { %s7596_s19 = scalar_lea.vmem %s13994_s0, %s6154_s16  ;;  %1660 = vmatpush.msrb.mxu0 %v485_v59  ;;  %2078 = vmatpush.msrb.mxu2 %v487_v4  ;;  %s6156_s22 = sshll.u32 %s15699_s21, 3 }
  0x1a   : > { %v7601_v8 = vld [vmem:[%s7596_s19] ss:$2 sm:$0xf]  ;;  %14032 = vst [vmem:[#allocation7_spill] sm:$0xff] %v7607_v12  ;;  %1033 = vmatpush.msrb.mxu1 %v482_v48  ;;  %s9673_s8 = scalar_lea.vmem %s13997_s3, %s6156_s22  ;;  %s308_s22 = sand.u32 1, %s7457_s25  }
  0x1b   : > { %v420_v9 = vperm.slane %v7601_v8, 3  ;;  %v417_v10 = vperm.slane %v7601_v8, 0  ;;  %v418_v11 = vperm.slane %v7601_v8, 1  ;;  %v419_v36 = vperm.slane %v7601_v8, 2  ;;  %s5858_s21 = scalar_select %p5857_p13, 1, 0 }
  0x1c   : > { %1034 = vmatpush.msrb.mxu1 %v474_v49  ;;  %s6152_s23 = sshll.u32 %s308_s22, 4  ;;  %s6061_s12 = scalar_lea.hbm %s14001_s7, %s7269_s30 }
  0x1d   : > { %vm424_vm0 = vcmp.eq.s32.totalorder %v7598_v7, %v420_v9  ;;  %vm421_vm1 = vcmp.eq.s32.totalorder %v7598_v7, %v417_v10  ;;  %vm422_vm2 = vcmp.eq.s32.totalorder %v7598_v7, %v418_v11  ;;  %vm428_vm3 = vcmp.eq.s32.totalorder %v7607_v12, %v420_v9  ;;  %s310_s10 = scalar_lea.vmem [#allocation3], %s6152_s23  ;;  %s6064_s17 = sshll.u32 %s6061_s12, 4  ;;  %s6065_s17 = int_to_ptr.hbm [resolvable:$true] %s6064_s17 }
  0x1e   : > { %v6161_v14 = vsel %vm424_vm0, 1.0, %v7475_v13  ;;  %v6158_v15 = vsel %vm421_vm1, 1.0, %v7475_v13  ;;  %v6159_v16 = vsel %vm422_vm2, 1.0, %v7475_v13  ;;  %vm425_vm4 = vcmp.eq.s32.totalorder %v7607_v12, %v417_v10  ;;  %s6062_s16 = sshll.u32 %s310_s10, 4  ;;  %s6050_s27 = scalar_lea.sflag [#allocation4], %s308_s22  ;;  %s6063_s16 = int_to_ptr.vmem [resolvable:$true] %s6062_s16 }
  0x1f   : > { %585 = vxpose.xlu0.b32.start [1/2] (short) %v6161_v14, 128  ;;  %489 = vxpose.xlu1.b32.start [1/2] (short) %v6158_v15, 128  ;;  %v6165_v17 = vsel %vm428_vm3, 1.0, %v7475_v13  ;;  %vm426_vm5 = vcmp.eq.s32.totalorder %v7607_v12, %v418_v11  ;;  %v6162_v18 = vsel %vm425_vm4, 1.0, %v7475_v13  ;;  %vm423_vm7 = vcmp.eq.s32.totalorder %v7598_v7, %v419_v36  ;;  %v488_v14 = vld [vmem:[%s13996_s2 + $0x78] sm:$0xff]  ;;  %s7409_s18 = sshra.s32 %s6065_s17, 4  ;;  %s7415_s23 = scalar_lea.hbm %s14001_s7, 32  ;;  %s7410_s18 = int_to_ptr.hbm [resolvable:$true] %s7409_s18 }
  0x20   : > { %521 = vxpose.xlu2.b32.start [1/2] (short) %v6159_v16, 128  ;;  %v6163_v19 = vsel %vm426_vm5, 1.0, %v7475_v13  ;;  %v6160_v37 = vsel %vm423_vm7, 1.0, %v7475_v13  ;;  %vm427_vm8 = vcmp.eq.s32.totalorder %v7607_v12, %v419_v36  ;;  %2287 = vmatpush.msrb.mxu3 %v488_v14  ;;  %s7411_s15 = scalar_lea.hbm %s7410_s18, 16  ;;  %p7416_p3 = scmp.lt.s32.totalorder %s7410_s18, %s14001_s7 }
  0x21   : > { %v6164_v40 = vsel %vm427_vm8, 1.0, %v7475_v13  ;;  %p7412_p0 = scmp.ne.s32.totalorder %s7410_s18, %s7411_s15  ;;  %p7417_p5 = scmp.lt.s32.totalorder %s7415_s23, %s7411_s15 }
  0x23   : > { %p7413_p1 = pnand %p7412_p0, %p7559_p4  ;;  %p7418_p6 = por %p7417_p5, %p7416_p3 }
  0x25   : > { %p7414_p2 = pneg %p7413_p1 }
  0x27   : > { %586 = vxpose.xlu0.b32.end [2/2] (short) %v6165_v17, 128  ;;  %490 = vxpose.xlu1.b32.end [2/2] (short) %v6162_v18, 128  ;;  %p7419_p7 = pnand %p7418_p6, %p7414_p2 }
  0x28   : > { %522 = vxpose.xlu2.b32.end [2/2] (short) %v6163_v19, 128 }
  0x9f   : > { %553 = vxpose.xlu0.b32.start [1/2] (short) %v6160_v37, 128 }
  0xa7   : > { %554 = vxpose.xlu0.b32.end [2/2] (short) %v6164_v40, 128 }
  0xb9   : > { %v7756_v51 = vpop.trf.xlu2 }
  0xc1   : > { %v7774_v54 = vpop.trf.xlu2 }
  0xc3   : > { %v7621_v20 = vpop.trf.xlu0  ;;  %v7623_v21 = vpop.trf.xlu1 }
  0xc4   : > { %6174 = vmatmul.msk.f32.vlgmr.msra.gmra.mxu0 %vm617_vm6, %v7623_v21  ;;  %6302 = vmatmul.msk.f32.vlgmr.msra.gmra.mxu2 %vm617_vm6, %v7623_v21 }
  0xc5   : > { %6366 = vmatmul.msk.f32.vlgmr.msra.gmra.mxu3 %vm617_vm6, %v7623_v21 }
  0xc9   : > { %v7786_v57 = vpop.trf.xlu2 }
  0xcb   : > { %v7631_v22 = vpop.trf.xlu0  ;;  %v7633_v23 = vpop.trf.xlu1 }
  0xcc   : > { %6175 = vmatmul.msk.f32.gmra.mxu0 %vm617_vm6, %v7633_v23  ;;  %6303 = vmatmul.msk.f32.gmra.mxu2 %vm617_vm6, %v7633_v23 }
  0xcd   : > { %6367 = vmatmul.msk.f32.gmra.mxu3 %vm617_vm6, %v7633_v23 }
  0xd1   : > { %v7805_v62 = vpop.trf.xlu2 }
  0xd3   : > { %v7641_v24 = vpop.trf.xlu0  ;;  %v7643_v25 = vpop.trf.xlu1 }
  0xd4   : > { %6176 = vmatmul.msk.f32.gmra.mxu0 %vm617_vm6, %v7643_v25  ;;  %6304 = vmatmul.msk.f32.gmra.mxu2 %vm617_vm6, %v7643_v25 }
  0xd5   : > { %6368 = vmatmul.msk.f32.gmra.mxu3 %vm617_vm6, %v7643_v25 }
  0xd9   : > { %v7826_v3 = vpop.trf.xlu2 }
  0xdb   : > { %v7651_v26 = vpop.trf.xlu0  ;;  %v7653_v27 = vpop.trf.xlu1 }
  0xdc   : > { %6177 = vmatmul.msk.f32.gmra.mxu0 %vm617_vm6, %v7653_v27  ;;  %6305 = vmatmul.msk.f32.gmra.mxu2 %vm617_vm6, %v7653_v27 }
  0xdd   : > { %6369 = vmatmul.msk.f32.gmra.mxu3 %vm617_vm6, %v7653_v27 }
  0xe1   : > { %v7851_v9 = vpop.trf.xlu2 }
  0xe3   : > { %v7661_v28 = vpop.trf.xlu0  ;;  %v7663_v29 = vpop.trf.xlu1 }
  0xe4   : > { %6178 = vmatmul.msk.f32.gmra.mxu0 %vm617_vm6, %v7663_v29  ;;  %6306 = vmatmul.msk.f32.gmra.mxu2 %vm617_vm6, %v7663_v29 }
  0xe5   : > { %6370 = vmatmul.msk.f32.gmra.mxu3 %vm617_vm6, %v7663_v29 }
  0xe9   : > { %v7872_v16 = vpop.trf.xlu2 }
  0xeb   : > { %v7671_v30 = vpop.trf.xlu0  ;;  %v7673_v31 = vpop.trf.xlu1 }
  0xec   : > { %6179 = vmatmul.msk.f32.gmra.mxu0 %vm617_vm6, %v7673_v31  ;;  %6307 = vmatmul.msk.f32.gmra.mxu2 %vm617_vm6, %v7673_v31 }
  0xed   : > { %6371 = vmatmul.msk.f32.gmra.mxu3 %vm617_vm6, %v7673_v31 }
  0xf1   : > { %v7892_v40 = vpop.trf.xlu2 }
  0xf3   : > { %v7681_v32 = vpop.trf.xlu0  ;;  %v7683_v33 = vpop.trf.xlu1 }
  0xf4   : > { %6180 = vmatmul.msk.f32.gmra.mxu0 %vm617_vm6, %v7683_v33  ;;  %6308 = vmatmul.msk.f32.gmra.mxu2 %vm617_vm6, %v7683_v33 }
  0xf5   : > { %6372 = vmatmul.msk.f32.gmra.mxu3 %vm617_vm6, %v7683_v33 }
  0xfb   : > { %v7691_v34 = vpop.trf.xlu0  ;;  %v7693_v35 = vpop.trf.xlu1 }
  0xfc   : > { %6181 = vmatmul.msk.f32.gmra.mxu0 %vm617_vm6, %v7693_v35  ;;  %6309 = vmatmul.msk.f32.gmra.mxu2 %vm617_vm6, %v7693_v35 }
  0xfd   : > { %6373 = vmatmul.msk.f32.gmra.mxu3 %vm617_vm6, %v7693_v35 }
 0x103   : > { %v7704_v38 = vpop.trf.xlu0  ;;  %v7706_v39 = vpop.trf.xlu1 }
 0x104   : > { %6182 = vmatmul.msk.f32.gmra.mxu0 %vm617_vm6, %v7706_v39  ;;  %6310 = vmatmul.msk.f32.gmra.mxu2 %vm617_vm6, %v7706_v39 }
 0x105   : > { %6374 = vmatmul.msk.f32.gmra.mxu3 %vm617_vm6, %v7706_v39 }
 0x10b   : > { %v7716_v41 = vpop.trf.xlu0  ;;  %v7718_v42 = vpop.trf.xlu1 }
 0x10c   : > { %6183 = vmatmul.msk.f32.gmra.mxu0 %vm617_vm6, %v7718_v42  ;;  %6311 = vmatmul.msk.f32.gmra.mxu2 %vm617_vm6, %v7718_v42 }
 0x10d   : > { %6375 = vmatmul.msk.f32.gmra.mxu3 %vm617_vm6, %v7718_v42 }
 0x113   : > { %v7726_v43 = vpop.trf.xlu0  ;;  %v7728_v44 = vpop.trf.xlu1 }
 0x114   : > { %6184 = vmatmul.msk.f32.gmra.mxu0 %vm617_vm6, %v7728_v44  ;;  %6312 = vmatmul.msk.f32.gmra.mxu2 %vm617_vm6, %v7728_v44 }
 0x115   : > { %6376 = vmatmul.msk.f32.gmra.mxu3 %vm617_vm6, %v7728_v44 }
 0x11b   : > { %v7736_v45 = vpop.trf.xlu0  ;;  %v7738_v46 = vpop.trf.xlu1 }
 0x11c   : > { %6185 = vmatmul.msk.f32.gmra.mxu0 %vm617_vm6, %v7738_v46  ;;  %6313 = vmatmul.msk.f32.gmra.mxu2 %vm617_vm6, %v7738_v46 }
 0x11d   : > { %6377 = vmatmul.msk.f32.gmra.mxu3 %vm617_vm6, %v7738_v46 }
 0x123   : > { %v7746_v47 = vpop.trf.xlu0  ;;  %v7754_v50 = vpop.trf.xlu1 }
 0x124   : > { %6186 = vmatmul.msk.f32.gmra.mxu0 %vm617_vm6, %v7754_v50  ;;  %6314 = vmatmul.msk.f32.gmra.mxu2 %vm617_vm6, %v7754_v50 }
 0x125   : > { %6378 = vmatmul.msk.f32.gmra.mxu3 %vm617_vm6, %v7754_v50 }
 0x12b   : > { %v7764_v52 = vpop.trf.xlu0  ;;  %v7766_v53 = vpop.trf.xlu1 }
 0x12c   : > { %6187 = vmatmul.msk.f32.gmra.mxu0 %vm617_vm6, %v7766_v53  ;;  %6315 = vmatmul.msk.f32.gmra.mxu2 %vm617_vm6, %v7766_v53 }
 0x12d   : > { %6379 = vmatmul.msk.f32.gmra.mxu3 %vm617_vm6, %v7766_v53 }
 0x133   : > { %v7776_v55 = vpop.trf.xlu0  ;;  %v7778_v56 = vpop.trf.xlu1 }
 0x134   : > { %6188 = vmatmul.msk.f32.gmra.mxu0 %vm617_vm6, %v7778_v56  ;;  %6316 = vmatmul.msk.f32.gmra.mxu2 %vm617_vm6, %v7778_v56 }
 0x135   : > { %6380 = vmatmul.msk.f32.gmra.mxu3 %vm617_vm6, %v7778_v56 }
 0x13b   : > { %v7788_v58 = vpop.trf.xlu0  ;;  %v7795_v60 = vpop.trf.xlu1 }
 0x13c   : > { %6237 = vmatmul.msk.f32.vlgmr.msra.gmra.mxu1 %vm617_vm6, %v7788_v58  ;;  %6189 = vmatmul.msk.f32.gmra.mxu0 %vm617_vm6, %v7795_v60 }
 0x13d   : > { %6317 = vmatmul.msk.f32.gmra.mxu2 %vm617_vm6, %v7795_v60  ;;  %6381 = vmatmul.msk.f32.gmra.mxu3 %vm617_vm6, %v7795_v60 }
 0x13e   : > { %1869 = vmatpush.msra.mxu1 %v486_v63  ;;  %v7910_v63 = vpop.trf.xlu2 }
 0x141   : > { %v7803_v61 = vpop.f32.mrf.mxu0 }
 0x142   : > { %14033 = vst [vmem:[#allocation8_spill] sm:$0xff] %v7803_v61 }
 0x144   : > { %6238 = vmatmul.msk.f32.vlgmr.msrb.gmra.mxu1 %vm617_vm6, %v7623_v21  ;;  %6190 = vmatmul.msk.f32.gmra.mxu0 %vm617_vm6, %v7756_v51 }
 0x145   : > { %6318 = vmatmul.msk.f32.gmra.mxu2 %vm617_vm6, %v7756_v51  ;;  %6382 = vmatmul.msk.f32.gmra.mxu3 %vm617_vm6, %v7756_v51 }
 0x147   : > { %v7818_v0 = vpop.f32.mrf.mxu2 }
 0x148   : > { %14034 = vst [vmem:[#allocation9_spill] sm:$0xff] %v7818_v0  ;;  %v7820_v1 = vpop.f32.mrf.mxu3 }
 0x149   : > { %14035 = vst [vmem:[#allocation10_spill] sm:$0xff] %v7820_v1  ;;  %v7822_v2 = vpop.f32.mrf.mxu0 }
 0x14a   : > { %14036 = vst [vmem:[#allocation11_spill] sm:$0xff] %v7822_v2 }
 0x14c   : > { %6239 = vmatmul.msk.f32.gmra.mxu1 %vm617_vm6, %v7633_v23  ;;  %6191 = vmatmul.msk.f32.gmra.mxu0 %vm617_vm6, %v7774_v54 }
 0x14d   : > { %6319 = vmatmul.msk.f32.gmra.mxu2 %vm617_vm6, %v7774_v54  ;;  %6383 = vmatmul.msk.f32.gmra.mxu3 %vm617_vm6, %v7774_v54 }
 0x14f   : > { %v7837_v5 = vpop.f32.mrf.mxu2 }
 0x150   : > { %14037 = vst [vmem:[#allocation12_spill] sm:$0xff] %v7837_v5  ;;  %v7839_v6 = vpop.f32.mrf.mxu3 }
 0x151   : > { %14038 = vst [vmem:[#allocation13_spill] sm:$0xff] %v7839_v6  ;;  %v7841_v8 = vpop.f32.mrf.mxu0  ;;  %v7932_v6 = vpop.trf.xlu2 }
 0x152   : > { %14039 = vst [vmem:[#allocation14_spill] sm:$0xff] %v7841_v8 }
 0x153   : > { %14055 = vst [vmem:[#allocation30_spill] sm:$0xff] %v7932_v6 }
 0x154   : > { %6240 = vmatmul.msk.f32.gmra.mxu1 %vm617_vm6, %v7643_v25  ;;  %6192 = vmatmul.msk.f32.gmra.mxu0 %vm617_vm6, %v7786_v57 }
 0x155   : > { %6320 = vmatmul.msk.f32.gmra.mxu2 %vm617_vm6, %v7786_v57  ;;  %6384 = vmatmul.msk.f32.gmra.mxu3 %vm617_vm6, %v7786_v57 }
 0x157   : > { %v7853_v10 = vpop.f32.mrf.mxu2 }
 0x158   : > { %14040 = vst [vmem:[#allocation15_spill] sm:$0xff] %v7853_v10  ;;  %v7855_v11 = vpop.f32.mrf.mxu3 }
 0x159   : > { %14041 = vst [vmem:[#allocation16_spill] sm:$0xff] %v7855_v11  ;;  %v7857_v13 = vpop.f32.mrf.mxu0 }
 0x15a   : > { %14042 = vst [vmem:[#allocation17_spill] sm:$0xff] %v7857_v13 }
 0x15c   : > { %6241 = vmatmul.msk.f32.gmra.mxu1 %vm617_vm6, %v7653_v27  ;;  %6193 = vmatmul.msk.f32.gmra.mxu0 %vm617_vm6, %v7805_v62 }
 0x15d   : > { %6321 = vmatmul.msk.f32.gmra.mxu2 %vm617_vm6, %v7805_v62  ;;  %6385 = vmatmul.msk.f32.gmra.mxu3 %vm617_vm6, %v7805_v62 }
 0x15f   : > { %v7870_v15 = vpop.f32.mrf.mxu2 }
 0x160   : > { %14043 = vst [vmem:[#allocation18_spill] sm:$0xff] %v7870_v15  ;;  %v7874_v17 = vpop.f32.mrf.mxu3 }
 0x161   : > { %14044 = vst [vmem:[#allocation19_spill] sm:$0xff] %v7874_v17  ;;  %v7876_v18 = vpop.f32.mrf.mxu0 }
 0x162   : > { %14045 = vst [vmem:[#allocation20_spill] sm:$0xff] %v7876_v18 }
 0x164   : > { %6242 = vmatmul.msk.f32.gmra.mxu1 %vm617_vm6, %v7663_v29  ;;  %6194 = vmatmul.msk.f32.gmra.mxu0 %vm617_vm6, %v7826_v3 }
 0x165   : > { %6322 = vmatmul.msk.f32.gmra.mxu2 %vm617_vm6, %v7826_v3  ;;  %6386 = vmatmul.msk.f32.gmra.mxu3 %vm617_vm6, %v7826_v3 }
 0x167   : > { %v7886_v19 = vpop.f32.mrf.mxu2 }
 0x168   : > { %14046 = vst [vmem:[#allocation21_spill] sm:$0xff] %v7886_v19  ;;  %v7888_v36 = vpop.f32.mrf.mxu3 }
 0x169   : > { %14047 = vst [vmem:[#allocation22_spill] sm:$0xff] %v7888_v36  ;;  %v7890_v37 = vpop.f32.mrf.mxu0 }
 0x16a   : > { %14048 = vst [vmem:[#allocation23_spill] sm:$0xff] %v7890_v37 }
 0x16c   : > { %6243 = vmatmul.msk.f32.gmra.mxu1 %vm617_vm6, %v7673_v31  ;;  %6195 = vmatmul.msk.f32.gmra.mxu0 %vm617_vm6, %v7851_v9 }
 0x16d   : > { %6323 = vmatmul.msk.f32.gmra.mxu2 %vm617_vm6, %v7851_v9  ;;  %6387 = vmatmul.msk.f32.gmra.mxu3 %vm617_vm6, %v7851_v9 }
 0x16f   : > { %v7902_v48 = vpop.f32.mrf.mxu2 }
 0x170   : > { %14049 = vst [vmem:[#allocation24_spill] sm:$0xff] %v7902_v48  ;;  %v7904_v49 = vpop.f32.mrf.mxu3 }
 0x171   : > { %14050 = vst [vmem:[#allocation25_spill] sm:$0xff] %v7904_v49  ;;  %v7906_v59 = vpop.f32.mrf.mxu0 }
 0x172   : > { %14051 = vst [vmem:[#allocation26_spill] sm:$0xff] %v7906_v59 }
 0x174   : > { %6244 = vmatmul.msk.f32.gmra.mxu1 %vm617_vm6, %v7683_v33  ;;  %6196 = vmatmul.msk.f32.gmra.mxu0 %vm617_vm6, %v7872_v16 }
 0x175   : > { %6324 = vmatmul.msk.f32.gmra.mxu2 %vm617_vm6, %v7872_v16  ;;  %6388 = vmatmul.msk.f32.gmra.mxu3 %vm617_vm6, %v7872_v16 }
 0x177   : > { %v7918_v4 = vpop.f32.mrf.mxu2 }
 0x178   : > { %14052 = vst [vmem:[#allocation27_spill] sm:$0xff] %v7918_v4  ;;  %v7920_v14 = vpop.f32.mrf.mxu3 }
 0x179   : > { %14053 = vst [vmem:[#allocation28_spill] sm:$0xff] %v7920_v14  ;;  %v7922_v1 = vpop.f32.mrf.mxu0  ;;  %v7950_v14 = vpop.trf.xlu2 }
 0x17a   : > { %14054 = vst [vmem:[#allocation29_spill] sm:$0xff] %v7922_v1 }
 0x17c   : > { %6245 = vmatmul.msk.f32.gmra.mxu1 %vm617_vm6, %v7693_v35  ;;  %6197 = vmatmul.msk.f32.gmra.mxu0 %vm617_vm6, %v7892_v40 }
 0x17d   : > { %6325 = vmatmul.msk.f32.gmra.mxu2 %vm617_vm6, %v7892_v40  ;;  %6389 = vmatmul.msk.f32.gmra.mxu3 %vm617_vm6, %v7892_v40 }
 0x17f   : > { %v7934_v11 = vpop.f32.mrf.mxu2 }
 0x180   : > { %14056 = vst [vmem:[#allocation31_spill] sm:$0xff] %v7934_v11  ;;  %v7936_v17 = vpop.f32.mrf.mxu3 }
 0x181   : > { %14057 = vst [vmem:[#allocation32_spill] sm:$0xff] %v7936_v17  ;;  %v7938_v36 = vpop.f32.mrf.mxu0 }
 0x182   : > { %14058 = vst [vmem:[#allocation33_spill] sm:$0xff] %v7938_v36 }
 0x184   : > { %6246 = vmatmul.msk.f32.gmra.mxu1 %vm617_vm6, %v7706_v39  ;;  %6198 = vmatmul.msk.f32.gmra.mxu0 %vm617_vm6, %v7910_v63 }
 0x185   : > { %6326 = vmatmul.msk.f32.gmra.mxu2 %vm617_vm6, %v7910_v63  ;;  %6390 = vmatmul.msk.f32.gmra.mxu3 %vm617_vm6, %v7910_v63 }
 0x187   : > { %v7948_v49 = vpop.f32.mrf.mxu2 }
 0x188   : > { %14059 = vst [vmem:[#allocation34_spill] sm:$0xff] %v7948_v49  ;;  %v7952_v0 = vpop.f32.mrf.mxu3 }
 0x189   : > { %14060 = vst [vmem:[#allocation35_spill] sm:$0xff] %v7952_v0  ;;  %v7954_v17 = vpop.f32.mrf.mxu0  ;;  %v7970_v0 = vpop.trf.xlu2 }
 0x18a   : > { %14061 = vst [vmem:[#allocation36_spill] sm:$0xff] %v7954_v17 }
 0x18b   : > { %14065 = vst [vmem:[#allocation40_spill] sm:$0xff] %v7970_v0 }
 0x18c   : > { %6247 = vmatmul.msk.f32.gmra.mxu1 %vm617_vm6, %v7718_v42  ;;  %6199 = vmatmul.msk.f32.gmra.mxu0 %vm617_vm6, %v7932_v6 }
 0x18d   : > { %6327 = vmatmul.msk.f32.gmra.mxu2 %vm617_vm6, %v7932_v6  ;;  %6391 = vmatmul.msk.f32.gmra.mxu3 %vm617_vm6, %v7932_v6 }
 0x18f   : > { %v7964_v5 = vpop.f32.mrf.mxu2 }
 0x190   : > { %14062 = vst [vmem:[#allocation37_spill] sm:$0xff] %v7964_v5  ;;  %v7966_v10 = vpop.f32.mrf.mxu3  ;;  %v8008_v5 = vpop.trf.xlu0 }
 0x191   : > { %14063 = vst [vmem:[#allocation38_spill] sm:$0xff] %v7966_v10  ;;  %v7968_v15 = vpop.f32.mrf.mxu0  ;;  %v7988_v4 = vpop.trf.xlu2 }
 0x192   : > { %14064 = vst [vmem:[#allocation39_spill] sm:$0xff] %v7968_v15 }
 0x193   : > { %14069 = vst [vmem:[#allocation44_spill] sm:$0xff] %v7988_v4 }
 0x194   : > { %6248 = vmatmul.msk.f32.gmra.mxu1 %vm617_vm6, %v7728_v44  ;;  %6200 = vmatmul.msk.f32.gmra.mxu0 %vm617_vm6, %v7950_v14 }
 0x195   : > { %6328 = vmatmul.msk.f32.gmra.mxu2 %vm617_vm6, %v7950_v14  ;;  %6392 = vmatmul.msk.f32.gmra.mxu3 %vm617_vm6, %v7950_v14 }
 0x197   : > { %v7980_v19 = vpop.f32.mrf.mxu2 }
 0x198   : > { %14066 = vst [vmem:[#allocation41_spill] sm:$0xff] %v7980_v19  ;;  %v7982_v48 = vpop.f32.mrf.mxu3  ;;  %v8026_v7 = vpop.trf.xlu0 }
 0x199   : > { %14067 = vst [vmem:[#allocation42_spill] sm:$0xff] %v7982_v48  ;;  %v7984_v10 = vpop.f32.mrf.mxu0  ;;  %v8012_v19 = vpop.trf.xlu2 }
 0x19a   : > { %14068 = vst [vmem:[#allocation43_spill] sm:$0xff] %v7984_v10 }
 0x19b   : > { %14073 = vst [vmem:[#allocation48_spill] sm:$0xff] %v8012_v19 }
 0x19c   : > { %6249 = vmatmul.msk.f32.gmra.mxu1 %vm617_vm6, %v7738_v46  ;;  %6201 = vmatmul.msk.f32.gmra.mxu0 %vm617_vm6, %v7970_v0 }
 0x19d   : > { %6329 = vmatmul.msk.f32.gmra.mxu2 %vm617_vm6, %v7970_v0  ;;  %6393 = vmatmul.msk.f32.gmra.mxu3 %vm617_vm6, %v7970_v0 }
 0x19f   : > { %v7996_v11 = vpop.f32.mrf.mxu2 }
 0x1a0   : > { %14070 = vst [vmem:[#allocation45_spill] sm:$0xff] %v7996_v11  ;;  %v7998_v49 = vpop.f32.mrf.mxu3  ;;  %v8046_v8 = vpop.trf.xlu0 }
 0x1a1   : > { %14071 = vst [vmem:[#allocation46_spill] sm:$0xff] %v7998_v49  ;;  %v8000_v48 = vpop.f32.mrf.mxu0 }
 0x1a2   : > { %14072 = vst [vmem:[#allocation47_spill] sm:$0xff] %v8000_v48 }
 0x1a4   : > { %6250 = vmatmul.msk.f32.gmra.mxu1 %vm617_vm6, %v7754_v50  ;;  %6202 = vmatmul.msk.f32.gmra.mxu0 %vm617_vm6, %v7988_v4 }
 0x1a5   : > { %6330 = vmatmul.msk.f32.gmra.mxu2 %vm617_vm6, %v7988_v4  ;;  %6394 = vmatmul.msk.f32.gmra.mxu3 %vm617_vm6, %v7988_v4 }
 0x1a7   : > { %v8014_v11 = vpop.f32.mrf.mxu2 }
 0x1a8   : > { %14074 = vst [vmem:[#allocation49_spill] sm:$0xff] %v8014_v11  ;;  %v8016_v49 = vpop.f32.mrf.mxu3  ;;  %v8032_v11 = vpop.trf.xlu2 }
 0x1a9   : > { %14075 = vst [vmem:[#allocation50_spill] sm:$0xff] %v8016_v49  ;;  %v8018_v12 = vpop.f32.mrf.mxu0  ;;  %v8072_v59 = vpop.trf.xlu0 }
 0x1aa   : > { %14076 = vst [vmem:[#allocation51_spill] sm:$0xff] %v8018_v12 }
 0x1ab   : > { %14078 = vst [vmem:[#allocation53_spill] sm:$0xff] %v8032_v11 }
 0x1ac   : > { %6251 = vmatmul.msk.f32.gmra.mxu1 %vm617_vm6, %v7766_v53  ;;  %6203 = vmatmul.msk.f32.gmra.mxu0 %vm617_vm6, %v8012_v19 }
 0x1ad   : > { %6331 = vmatmul.msk.f32.gmra.mxu2 %vm617_vm6, %v8012_v19  ;;  %6395 = vmatmul.msk.f32.gmra.mxu3 %vm617_vm6, %v8012_v19 }
 0x1af   : > { %v8030_v61 = vpop.f32.mrf.mxu2 }
 0x1b0   : > { %14077 = vst [vmem:[#allocation52_spill] sm:$0xff] %v8030_v61  ;;  %v8034_v49 = vpop.f32.mrf.mxu3  ;;  %v8056_v37 = vpop.trf.xlu2 }
 0x1b1   : > { %14079 = vst [vmem:[#allocation54_spill] sm:$0xff] %v8034_v49  ;;  %v8036_v2 = vpop.f32.mrf.mxu0 }
 0x1b2   : > { %14080 = vst [vmem:[#allocation55_spill] sm:$0xff] %v8036_v2 }
 0x1b4   : > { %6252 = vmatmul.msk.f32.gmra.mxu1 %vm617_vm6, %v7778_v56  ;;  %6204 = vmatmul.msk.f32.gmra.mxu0 %vm617_vm6, %v8032_v11 }
 0x1b5   : > { %6332 = vmatmul.msk.f32.gmra.mxu2 %vm617_vm6, %v8032_v11  ;;  %6396 = vmatmul.msk.f32.gmra.mxu3 %vm617_vm6, %v8032_v11 }
 0x1b7   : > { %v8048_v61 = vpop.f32.mrf.mxu2 }
 0x1b8   : > { %14081 = vst [vmem:[#allocation56_spill] sm:$0xff] %v8048_v61  ;;  %v8052_v49 = vpop.f32.mrf.mxu3 }
 0x1b9   : > { %v8050_v13 = vpop.f32.mrf.mxu1  ;;  %14083 = vst [vmem:[#allocation58_spill] sm:$0xff] %v8052_v49  ;;  %v8054_v18 = vpop.f32.mrf.mxu0 }
 0x1ba   : > { %14082 = vst [vmem:[#allocation57_spill] sm:$0xff] %v8050_v13 }
 0x1bb   : > { %14084 = vst [vmem:[#allocation59_spill] sm:$0xff] %v8054_v18 }
 0x1bc   : > { %6253 = vmatmul.msk.f32.gmra.mxu1 %vm617_vm6, %v7795_v60  ;;  %6205 = vmatmul.msk.f32.gmra.mxu0 %vm617_vm6, %v8056_v37 }
 0x1bd   : > { %6333 = vmatmul.msk.f32.gmra.mxu2 %vm617_vm6, %v8056_v37  ;;  %6397 = vmatmul.msk.f32.gmra.mxu3 %vm617_vm6, %v8056_v37 }
 0x1c0   : > { %v8066_v61 = vpop.f32.mrf.mxu2  ;;  %v8070_v49 = vpop.f32.mrf.mxu3 }
 0x1c1   : > { %14085 = vst [vmem:[#allocation60_spill] sm:$0xff] %v8066_v61  ;;  %v8068_v13 = vpop.f32.mrf.mxu1  ;;  %v8074_v1 = vpop.f32.mrf.mxu0 }
 0x1c2   : > { %14086 = vst [vmem:[#allocation61_spill] sm:$0xff] %v8068_v13 }
 0x1c3   : > { %14087 = vst [vmem:[#allocation62_spill] sm:$0xff] %v8070_v49 }
 0x1c4   : > { %14088 = vst [vmem:[#allocation63_spill] sm:$0xff] %v8074_v1  ;;  %6254 = vmatmul.msk.f32.gmra.mxu1 %vm617_vm6, %v7756_v51  ;;  %6206 = vmatmul.msk.f32.gmra.mxu0 %vm617_vm6, %v8008_v5  ;;  %v8094_v1 = vpop.trf.xlu0 }
 0x1c5   : > { %6334 = vmatmul.msk.f32.gmra.mxu2 %vm617_vm6, %v8008_v5  ;;  %6398 = vmatmul.msk.f32.gmra.mxu3 %vm617_vm6, %v8008_v5 }
 0x1c8   : > { %v8084_v61 = vpop.f32.mrf.mxu2  ;;  %v8088_v49 = vpop.f32.mrf.mxu3 }
 0x1c9   : > { %14089 = vst [vmem:[#allocation64_spill] sm:$0xff] %v8084_v61  ;;  %v8086_v13 = vpop.f32.mrf.mxu1  ;;  %v8090_v36 = vpop.f32.mrf.mxu0 }
 0x1ca   : > { %14090 = vst [vmem:[#allocation65_spill] sm:$0xff] %v8086_v13 }
 0x1cb   : > { %14091 = vst [vmem:[#allocation66_spill] sm:$0xff] %v8088_v49 }
 0x1cc   : > { %14092 = vst [vmem:[#allocation67_spill] sm:$0xff] %v8090_v36  ;;  %6255 = vmatmul.msk.f32.gmra.mxu1 %vm617_vm6, %v7774_v54  ;;  %6207 = vmatmul.msk.f32.gmra.mxu0 %vm617_vm6, %v8026_v7  ;;  %v8116_v17 = vpop.trf.xlu0 }
 0x1cd   : > { %6335 = vmatmul.msk.f32.gmra.mxu2 %vm617_vm6, %v8026_v7  ;;  %6399 = vmatmul.msk.f32.gmra.mxu3 %vm617_vm6, %v8026_v7 }
 0x1d0   : > { %v8102_v61 = vpop.f32.mrf.mxu2  ;;  %v8106_v49 = vpop.f32.mrf.mxu3 }
 0x1d1   : > { %14093 = vst [vmem:[#allocation68_spill] sm:$0xff] %v8102_v61  ;;  %v8104_v13 = vpop.f32.mrf.mxu1  ;;  %v8108_v36 = vpop.f32.mrf.mxu0 }
 0x1d2   : > { %14094 = vst [vmem:[#allocation69_spill] sm:$0xff] %v8104_v13 }
 0x1d3   : > { %14095 = vst [vmem:[#allocation70_spill] sm:$0xff] %v8106_v49 }
 0x1d4   : > { %14096 = vst [vmem:[#allocation71_spill] sm:$0xff] %v8108_v36  ;;  %6256 = vmatmul.msk.f32.gmra.mxu1 %vm617_vm6, %v7786_v57  ;;  %6208 = vmatmul.msk.f32.gmra.mxu0 %vm617_vm6, %v8046_v8  ;;  %v8136_v15 = vpop.trf.xlu0 }
 0x1d5   : > { %6336 = vmatmul.msk.f32.gmra.mxu2 %vm617_vm6, %v8046_v8  ;;  %6400 = vmatmul.msk.f32.gmra.mxu3 %vm617_vm6, %v8046_v8 }
 0x1d8   : > { %v8120_v61 = vpop.f32.mrf.mxu2  ;;  %v8124_v49 = vpop.f32.mrf.mxu3 }
 0x1d9   : > { %14097 = vst [vmem:[#allocation72_spill] sm:$0xff] %v8120_v61  ;;  %v8122_v13 = vpop.f32.mrf.mxu1  ;;  %v8126_v36 = vpop.f32.mrf.mxu0 }
 0x1da   : > { %14098 = vst [vmem:[#allocation73_spill] sm:$0xff] %v8122_v13 }
 0x1db   : > { %14099 = vst [vmem:[#allocation74_spill] sm:$0xff] %v8124_v49 }
 0x1dc   : > { %14100 = vst [vmem:[#allocation75_spill] sm:$0xff] %v8126_v36  ;;  %6257 = vmatmul.msk.f32.gmra.mxu1 %vm617_vm6, %v7805_v62  ;;  %6209 = vmatmul.msk.f32.gmra.mxu0 %vm617_vm6, %v8072_v59 }
 0x1dd   : > { %6337 = vmatmul.msk.f32.gmra.mxu2 %vm617_vm6, %v8072_v59  ;;  %6401 = vmatmul.msk.f32.gmra.mxu3 %vm617_vm6, %v8072_v59 }
 0x1e0   : > { %v8138_v61 = vpop.f32.mrf.mxu2  ;;  %v8142_v49 = vpop.f32.mrf.mxu3 }
 0x1e1   : > { %14101 = vst [vmem:[#allocation76_spill] sm:$0xff] %v8138_v61  ;;  %v8140_v13 = vpop.f32.mrf.mxu1  ;;  %v8144_v36 = vpop.f32.mrf.mxu0 }
 0x1e2   : > { %14102 = vst [vmem:[#allocation77_spill] sm:$0xff] %v8140_v13 }
 0x1e3   : > { %14103 = vst [vmem:[#allocation78_spill] sm:$0xff] %v8142_v49  ;;  %v8160_v49 = vpop.trf.xlu0 }
 0x1e4   : > { %14104 = vst [vmem:[#allocation79_spill] sm:$0xff] %v8144_v36  ;;  %6258 = vmatmul.msk.f32.gmra.mxu1 %vm617_vm6, %v7826_v3  ;;  %6210 = vmatmul.msk.f32.gmra.mxu0 %vm617_vm6, %v8094_v1 }
 0x1e5   : > { %6338 = vmatmul.msk.f32.gmra.mxu2 %vm617_vm6, %v8094_v1  ;;  %6402 = vmatmul.msk.f32.gmra.mxu3 %vm617_vm6, %v8094_v1 }
 0x1e8   : > { %v8154_v10 = vpop.f32.mrf.mxu2  ;;  %v8158_v13 = vpop.f32.mrf.mxu3 }
 0x1e9   : > { %14105 = vst [vmem:[#allocation80_spill] sm:$0xff] %v8154_v10  ;;  %v8156_v61 = vpop.f32.mrf.mxu1  ;;  %v8162_v36 = vpop.f32.mrf.mxu0 }
 0x1ea   : > { %14106 = vst [vmem:[#allocation81_spill] sm:$0xff] %v8156_v61 }
 0x1eb   : > { %14107 = vst [vmem:[#allocation82_spill] sm:$0xff] %v8158_v13 }
 0x1ec   : > { %14108 = vst [vmem:[#allocation83_spill] sm:$0xff] %v8162_v36  ;;  %6259 = vmatmul.msk.f32.gmra.mxu1 %vm617_vm6, %v7851_v9  ;;  %6211 = vmatmul.msk.f32.gmra.mxu0 %vm617_vm6, %v8116_v17  ;;  %v8182_v36 = vpop.trf.xlu0 }
 0x1ed   : > { %6339 = vmatmul.msk.f32.gmra.mxu2 %vm617_vm6, %v8116_v17  ;;  %6403 = vmatmul.msk.f32.gmra.mxu3 %vm617_vm6, %v8116_v17 }
 0x1f0   : > { %v8172_v10 = vpop.f32.mrf.mxu2  ;;  %v8176_v13 = vpop.f32.mrf.mxu3 }
 0x1f1   : > { %14109 = vst [vmem:[#allocation84_spill] sm:$0xff] %v8172_v10  ;;  %v8174_v61 = vpop.f32.mrf.mxu1  ;;  %v8178_v48 = vpop.f32.mrf.mxu0 }
 0x1f2   : > { %14110 = vst [vmem:[#allocation85_spill] sm:$0xff] %v8174_v61 }
 0x1f3   : > { %14111 = vst [vmem:[#allocation86_spill] sm:$0xff] %v8176_v13 }
 0x1f4   : > { %14112 = vst [vmem:[#allocation87_spill] sm:$0xff] %v8178_v48  ;;  %6260 = vmatmul.msk.f32.gmra.mxu1 %vm617_vm6, %v7872_v16  ;;  %6212 = vmatmul.msk.f32.gmra.mxu0 %vm617_vm6, %v8136_v15  ;;  %v8204_v12 = vpop.trf.xlu0 }
 0x1f5   : > { %6340 = vmatmul.msk.f32.gmra.mxu2 %vm617_vm6, %v8136_v15  ;;  %6404 = vmatmul.msk.f32.gmra.mxu3 %vm617_vm6, %v8136_v15 }
 0x1f8   : > { %v8190_v10 = vpop.f32.mrf.mxu2  ;;  %v8194_v13 = vpop.f32.mrf.mxu3 }
 0x1f9   : > { %14113 = vst [vmem:[#allocation88_spill] sm:$0xff] %v8190_v10  ;;  %v8192_v61 = vpop.f32.mrf.mxu1  ;;  %v8196_v48 = vpop.f32.mrf.mxu0 }
 0x1fa   : > { %14114 = vst [vmem:[#allocation89_spill] sm:$0xff] %v8192_v61 }
 0x1fb   : > { %14115 = vst [vmem:[#allocation90_spill] sm:$0xff] %v8194_v13 }
 0x1fc   : > { %14116 = vst [vmem:[#allocation91_spill] sm:$0xff] %v8196_v48  ;;  %6261 = vmatmul.msk.f32.gmra.mxu1 %vm617_vm6, %v7892_v40  ;;  %6213 = vmatmul.msk.f32.gmra.mxu0 %vm617_vm6, %v8160_v49  ;;  %v8224_v2 = vpop.trf.xlu0 }
 0x1fd   : > { %6341 = vmatmul.msk.f32.gmra.mxu2 %vm617_vm6, %v8160_v49  ;;  %6405 = vmatmul.msk.f32.gmra.mxu3 %vm617_vm6, %v8160_v49 }
 0x200   : > { %v8208_v10 = vpop.f32.mrf.mxu2  ;;  %v8212_v13 = vpop.f32.mrf.mxu3 }
 0x201   : > { %14117 = vst [vmem:[#allocation92_spill] sm:$0xff] %v8208_v10  ;;  %v8210_v61 = vpop.f32.mrf.mxu1  ;;  %v8214_v48 = vpop.f32.mrf.mxu0 }
 0x202   : > { %14118 = vst [vmem:[#allocation93_spill] sm:$0xff] %v8210_v61 }
 0x203   : > { %14119 = vst [vmem:[#allocation94_spill] sm:$0xff] %v8212_v13 }
 0x204   : > { %14120 = vst [vmem:[#allocation95_spill] sm:$0xff] %v8214_v48  ;;  %6262 = vmatmul.msk.f32.gmra.mxu1 %vm617_vm6, %v7910_v63  ;;  %6214 = vmatmul.msk.f32.gmra.mxu0 %vm617_vm6, %v8182_v36 }
 0x205   : > { %6342 = vmatmul.msk.f32.gmra.mxu2 %vm617_vm6, %v8182_v36  ;;  %6406 = vmatmul.msk.f32.gmra.mxu3 %vm617_vm6, %v8182_v36 }
 0x208   : > { %v8226_v10 = vpop.f32.mrf.mxu2  ;;  %v8230_v13 = vpop.f32.mrf.mxu3 }
 0x209   : > { %14121 = vst [vmem:[#allocation96_spill] sm:$0xff] %v8226_v10  ;;  %v8228_v61 = vpop.f32.mrf.mxu1  ;;  %v8232_v48 = vpop.f32.mrf.mxu0 }
 0x20a   : > { %14122 = vst [vmem:[#allocation97_spill] sm:$0xff] %v8228_v61 }
 0x20b   : > { %14123 = vst [vmem:[#allocation98_spill] sm:$0xff] %v8230_v13  ;;  %v8248_v13 = vpop.trf.xlu0 }
 0x20c   : > { %14124 = vst [vmem:[#allocation99_spill] sm:$0xff] %v8232_v48  ;;  %6263 = vmatmul.msk.f32.gmra.mxu1 %vm617_vm6, %v7932_v6  ;;  %6215 = vmatmul.msk.f32.gmra.mxu0 %vm617_vm6, %v8204_v12 }
 0x20d   : > { %6343 = vmatmul.msk.f32.gmra.mxu2 %vm617_vm6, %v8204_v12  ;;  %6407 = vmatmul.msk.f32.gmra.mxu3 %vm617_vm6, %v8204_v12 }
 0x210   : > { %v8242_v18 = vpop.f32.mrf.mxu2  ;;  %v8246_v61 = vpop.f32.mrf.mxu3 }
 0x211   : > { %14125 = vst [vmem:[#allocation100_spill] sm:$0xff] %v8242_v18  ;;  %v8244_v10 = vpop.f32.mrf.mxu1  ;;  %v8250_v48 = vpop.f32.mrf.mxu0 }
 0x212   : > { %14126 = vst [vmem:[#allocation101_spill] sm:$0xff] %v8244_v10 }
 0x213   : > { %14127 = vst [vmem:[#allocation102_spill] sm:$0xff] %v8246_v61 }
 0x214   : > { %14128 = vst [vmem:[#allocation103_spill] sm:$0xff] %v8250_v48  ;;  %6264 = vmatmul.msk.f32.gmra.mxu1 %vm617_vm6, %v7950_v14  ;;  %6216 = vmatmul.msk.f32.gmra.mxu0 %vm617_vm6, %v8224_v2  ;;  %v8270_v48 = vpop.trf.xlu0 }
 0x215   : > { %6344 = vmatmul.msk.f32.gmra.mxu2 %vm617_vm6, %v8224_v2  ;;  %6408 = vmatmul.msk.f32.gmra.mxu3 %vm617_vm6, %v8224_v2 }
 0x218   : > { %v8260_v18 = vpop.f32.mrf.mxu2  ;;  %v8264_v61 = vpop.f32.mrf.mxu3 }
 0x219   : > { %14129 = vst [vmem:[#allocation104_spill] sm:$0xff] %v8260_v18  ;;  %v8262_v10 = vpop.f32.mrf.mxu1  ;;  %v8266_v6 = vpop.f32.mrf.mxu0 }
 0x21a   : > { %14130 = vst [vmem:[#allocation105_spill] sm:$0xff] %v8262_v10 }
 0x21b   : > { %14131 = vst [vmem:[#allocation106_spill] sm:$0xff] %v8264_v61 }
 0x21c   : > { %14132 = vst [vmem:[#allocation107_spill] sm:$0xff] %v8266_v6  ;;  %6265 = vmatmul.msk.f32.gmra.mxu1 %vm617_vm6, %v7970_v0  ;;  %6217 = vmatmul.msk.f32.gmra.mxu0 %vm617_vm6, %v8248_v13  ;;  %v8292_v0 = vpop.trf.xlu0 }
 0x21d   : > { %6345 = vmatmul.msk.f32.gmra.mxu2 %vm617_vm6, %v8248_v13  ;;  %6409 = vmatmul.msk.f32.gmra.mxu3 %vm617_vm6, %v8248_v13 }
 0x220   : > { %v8278_v18 = vpop.f32.mrf.mxu2  ;;  %v8282_v61 = vpop.f32.mrf.mxu3 }
 0x221   : > { %14133 = vst [vmem:[#allocation108_spill] sm:$0xff] %v8278_v18  ;;  %v8280_v10 = vpop.f32.mrf.mxu1  ;;  %v8284_v6 = vpop.f32.mrf.mxu0 }
 0x222   : > { %14134 = vst [vmem:[#allocation109_spill] sm:$0xff] %v8280_v10 }
 0x223   : > { %14135 = vst [vmem:[#allocation110_spill] sm:$0xff] %v8282_v61 }
 0x224   : > { %14136 = vst [vmem:[#allocation111_spill] sm:$0xff] %v8284_v6  ;;  %6266 = vmatmul.msk.f32.gmra.mxu1 %vm617_vm6, %v7988_v4  ;;  %6218 = vmatmul.msk.f32.gmra.mxu0 %vm617_vm6, %v8270_v48  ;;  %v8312_v4 = vpop.trf.xlu0 }
 0x225   : > { %6346 = vmatmul.msk.f32.gmra.mxu2 %vm617_vm6, %v8270_v48  ;;  %6410 = vmatmul.msk.f32.gmra.mxu3 %vm617_vm6, %v8270_v48 }
 0x228   : > { %v8296_v18 = vpop.f32.mrf.mxu2  ;;  %v8300_v61 = vpop.f32.mrf.mxu3 }
 0x229   : > { %14137 = vst [vmem:[#allocation112_spill] sm:$0xff] %v8296_v18  ;;  %v8298_v10 = vpop.f32.mrf.mxu1  ;;  %v8302_v6 = vpop.f32.mrf.mxu0 }
 0x22a   : > { %14138 = vst [vmem:[#allocation113_spill] sm:$0xff] %v8298_v10 }
 0x22b   : > { %14139 = vst [vmem:[#allocation114_spill] sm:$0xff] %v8300_v61 }
 0x22c   : > { %14140 = vst [vmem:[#allocation115_spill] sm:$0xff] %v8302_v6  ;;  %6267 = vmatmul.msk.f32.gmra.mxu1 %vm617_vm6, %v8012_v19  ;;  %6219 = vmatmul.msk.f32.gmra.mxu0 %vm617_vm6, %v8292_v0  ;;  %v8341_v19 = vpop.trf.xlu0 }
 0x22d   : > { %6347 = vmatmul.msk.f32.gmra.mxu2 %vm617_vm6, %v8292_v0  ;;  %6411 = vmatmul.msk.f32.gmra.mxu3 %vm617_vm6, %v8292_v0 }
 0x230   : > { %v8314_v18 = vpop.f32.mrf.mxu2  ;;  %v8318_v61 = vpop.f32.mrf.mxu3 }
 0x231   : > { %14141 = vst [vmem:[#allocation116_spill] sm:$0xff] %v8314_v18  ;;  %v8316_v10 = vpop.f32.mrf.mxu1  ;;  %v8320_v6 = vpop.f32.mrf.mxu0  ;;  %v477_v18 = vld [vmem:[%s13996_s2 + $0x20] sm:$0xff] }
 0x232   : > { %14142 = vst [vmem:[#allocation117_spill] sm:$0xff] %v8316_v10  ;;  %1661 = vmatpush.msrb.mxu0 %v477_v18 }
 0x233   : > { %14143 = vst [vmem:[#allocation118_spill] sm:$0xff] %v8318_v61 }
 0x234   : > { %14144 = vst [vmem:[#allocation119_spill] sm:$0xff] %v8320_v6  ;;  %6268 = vmatmul.msk.f32.gmra.mxu1 %vm617_vm6, %v8032_v11  ;;  %6220 = vmatmul.msk.f32.gmra.mxu0 %vm617_vm6, %v8312_v4 }
 0x235   : > { %6348 = vmatmul.msk.f32.gmra.mxu2 %vm617_vm6, %v8312_v4  ;;  %6412 = vmatmul.msk.f32.gmra.mxu3 %vm617_vm6, %v8312_v4 }
 0x238   : > { %v8333_v61 = vpop.f32.mrf.mxu2  ;;  %v8337_v6 = vpop.f32.mrf.mxu3 }
 0x239   : > { %14145 = vst [vmem:[#allocation120_spill] sm:$0xff] %v8333_v61  ;;  %v8335_v10 = vpop.f32.mrf.mxu1  ;;  %v8339_v11 = vpop.f32.mrf.mxu0 }
 0x23a   : > { %14146 = vst [vmem:[#allocation121_spill] sm:$0xff] %v8335_v10 }
 0x23b   : > { %14147 = vst [vmem:[#allocation122_spill] sm:$0xff] %v8337_v6 }
 0x23c   : > { %14148 = vst [vmem:[#allocation123_spill] sm:$0xff] %v8339_v11  ;;  %6269 = vmatmul.msk.f32.gmra.mxu1 %vm617_vm6, %v8056_v37  ;;  %6221 = vmatmul.msk.f32.gmra.mxu0 %vm617_vm6, %v8341_v19  ;;  %v478_v11 = vld [vmem:[%s13996_s2 + $0x28] sm:$0xff] }
 0x23d   : > { %6349 = vmatmul.msk.f32.gmra.mxu2 %vm617_vm6, %v8341_v19  ;;  %6413 = vmatmul.msk.f32.gmra.mxu3 %vm617_vm6, %v8341_v19 }
 0x23e   : > { %1870 = vmatpush.msra.mxu1 %v478_v11  ;;  %v479_v11 = vld [vmem:[%s13996_s2 + $0x30] sm:$0xff] }
 0x23f   : > { %2079 = vmatpush.msrb.mxu2 %v479_v11 }
 0x240   : > { %v8351_v18 = vpop.f32.mrf.mxu2  ;;  %v8355_v6 = vpop.f32.mrf.mxu3 }
 0x241   : > { %14149 = vst [vmem:[#allocation124_spill] sm:$0xff] %v8351_v18  ;;  %v8353_v61 = vpop.f32.mrf.mxu1  ;;  %v8357_v10 = vpop.f32.mrf.mxu0 }
 0x242   : > { %14150 = vst [vmem:[#allocation125_spill] sm:$0xff] %v8353_v61 }
 0x243   : > { %14151 = vst [vmem:[#allocation126_spill] sm:$0xff] %v8355_v6 }
 0x244   : > { %14152 = vst [vmem:[#allocation127_spill] sm:$0xff] %v8357_v10  ;;  %6270 = vmatmul.msk.f32.gmra.mxu1 %vm617_vm6, %v8008_v5  ;;  %6222 = vmatmul.msk.f32.gmra.mxu0 %vm617_vm6, %v7621_v20 }
 0x245   : > { %6350 = vmatmul.msk.f32.gmra.mxu2 %vm617_vm6, %v7621_v20  ;;  %6414 = vmatmul.msk.f32.gmra.mxu3 %vm617_vm6, %v7621_v20 }
 0x248   : > { %v8370_v6 = vpop.f32.mrf.mxu2  ;;  %v8374_v61 = vpop.f32.mrf.mxu3 }
 0x249   : > { %14153 = vst [vmem:[#allocation128_spill] sm:$0xff] %v8370_v6  ;;  %v8372_v18 = vpop.f32.mrf.mxu1  ;;  %v8376_v10 = vpop.f32.mrf.mxu0 }
 0x24a   : > { %14154 = vst [vmem:[#allocation129_spill] sm:$0xff] %v8372_v18 }
 0x24b   : > { %14155 = vst [vmem:[#allocation130_spill] sm:$0xff] %v8374_v61 }
 0x24c   : > { %14156 = vst [vmem:[#allocation131_spill] sm:$0xff] %v8376_v10  ;;  %6271 = vmatmul.msk.f32.gmra.mxu1 %vm617_vm6, %v8026_v7  ;;  %6223 = vmatmul.msk.f32.gmra.mxu0 %vm617_vm6, %v7631_v22 }
 0x24d   : > { %6351 = vmatmul.msk.f32.gmra.mxu2 %vm617_vm6, %v7631_v22  ;;  %6415 = vmatmul.msk.f32.gmra.mxu3 %vm617_vm6, %v7631_v22 }
 0x250   : > { %v8389_v61 = vpop.f32.mrf.mxu2  ;;  %v8393_v18 = vpop.f32.mrf.mxu3 }
 0x251   : > { %14157 = vst [vmem:[#allocation132_spill] sm:$0xff] %v8389_v61  ;;  %v8391_v6 = vpop.f32.mrf.mxu1  ;;  %v8395_v10 = vpop.f32.mrf.mxu0 }
 0x252   : > { %14158 = vst [vmem:[#allocation133_spill] sm:$0xff] %v8391_v6 }
 0x253   : > { %14159 = vst [vmem:[#allocation134_spill] sm:$0xff] %v8393_v18 }
 0x254   : > { %14160 = vst [vmem:[#allocation135_spill] sm:$0xff] %v8395_v10  ;;  %6272 = vmatmul.msk.f32.gmra.mxu1 %vm617_vm6, %v8046_v8  ;;  %6224 = vmatmul.msk.f32.gmra.mxu0 %vm617_vm6, %v7641_v24 }
 0x255   : > { %6352 = vmatmul.msk.f32.gmra.mxu2 %vm617_vm6, %v7641_v24  ;;  %6416 = vmatmul.msk.f32.gmra.mxu3 %vm617_vm6, %v7641_v24 }
 0x258   : > { %v8405_v11 = vpop.f32.mrf.mxu2  ;;  %v8409_v6 = vpop.f32.mrf.mxu3 }
 0x259   : > { %14161 = vst [vmem:[#allocation136_spill] sm:$0xff] %v8405_v11  ;;  %v8407_v61 = vpop.f32.mrf.mxu1  ;;  %v8411_v18 = vpop.f32.mrf.mxu0  ;;  %v480_v11 = vld [vmem:[%s13996_s2 + $0x38] sm:$0xff] }
 0x25a   : > { %14162 = vst [vmem:[#allocation137_spill] sm:$0xff] %v8407_v61  ;;  %2288 = vmatpush.msrb.mxu3 %v480_v11 }
 0x25b   : > { %14163 = vst [vmem:[#allocation138_spill] sm:$0xff] %v8409_v6 }
 0x25c   : > { %14164 = vst [vmem:[#allocation139_spill] sm:$0xff] %v8411_v18  ;;  %6273 = vmatmul.msk.f32.gmra.mxu1 %vm617_vm6, %v8072_v59  ;;  %6225 = vmatmul.msk.f32.gmra.mxu0 %vm617_vm6, %v7651_v26 }
 0x25d   : > { %6353 = vmatmul.msk.f32.gmra.mxu2 %vm617_vm6, %v7651_v26  ;;  %6417 = vmatmul.msk.f32.gmra.mxu3 %vm617_vm6, %v7651_v26 }
 0x260   : > { %v8424_v6 = vpop.f32.mrf.mxu2  ;;  %v8428_v10 = vpop.f32.mrf.mxu3 }
 0x261   : > { %14165 = vst [vmem:[#allocation140_spill] sm:$0xff] %v8424_v6  ;;  %v8426_v61 = vpop.f32.mrf.mxu1  ;;  %v8430_v18 = vpop.f32.mrf.mxu0 }
 0x262   : > { %14166 = vst [vmem:[#allocation141_spill] sm:$0xff] %v8426_v61 }
 0x263   : > { %14167 = vst [vmem:[#allocation142_spill] sm:$0xff] %v8428_v10 }
 0x264   : > { %14168 = vst [vmem:[#allocation143_spill] sm:$0xff] %v8430_v18  ;;  %6274 = vmatmul.msk.f32.gmra.mxu1 %vm617_vm6, %v8094_v1  ;;  %6226 = vmatmul.msk.f32.gmra.mxu0 %vm617_vm6, %v7661_v28 }
 0x265   : > { %6354 = vmatmul.msk.f32.gmra.mxu2 %vm617_vm6, %v7661_v28  ;;  %6418 = vmatmul.msk.f32.gmra.mxu3 %vm617_vm6, %v7661_v28 }
 0x268   : > { %v8440_v11 = vpop.f32.mrf.mxu2  ;;  %v8444_v61 = vpop.f32.mrf.mxu3 }
 0x269   : > { %14169 = vst [vmem:[#allocation144_spill] sm:$0xff] %v8440_v11  ;;  %v8442_v6 = vpop.f32.mrf.mxu1  ;;  %v8446_v10 = vpop.f32.mrf.mxu0 }
 0x26a   : > { %14170 = vst [vmem:[#allocation145_spill] sm:$0xff] %v8442_v6 }
 0x26b   : > { %14171 = vst [vmem:[#allocation146_spill] sm:$0xff] %v8444_v61 }
 0x26c   : > { %14172 = vst [vmem:[#allocation147_spill] sm:$0xff] %v8446_v10  ;;  %6275 = vmatmul.msk.f32.gmra.mxu1 %vm617_vm6, %v8116_v17  ;;  %6227 = vmatmul.msk.f32.gmra.mxu0 %vm617_vm6, %v7671_v30 }
 0x26d   : > { %6355 = vmatmul.msk.f32.gmra.mxu2 %vm617_vm6, %v7671_v30  ;;  %6419 = vmatmul.msk.f32.gmra.mxu3 %vm617_vm6, %v7671_v30 }
 0x270   : > { %v8456_v18 = vpop.f32.mrf.mxu2  ;;  %v8460_v6 = vpop.f32.mrf.mxu3 }
 0x271   : > { %14173 = vst [vmem:[#allocation148_spill] sm:$0xff] %v8456_v18  ;;  %v8458_v11 = vpop.f32.mrf.mxu1  ;;  %v8462_v61 = vpop.f32.mrf.mxu0 }
 0x272   : > { %14174 = vst [vmem:[#allocation149_spill] sm:$0xff] %v8458_v11 }
 0x273   : > { %14175 = vst [vmem:[#allocation150_spill] sm:$0xff] %v8460_v6 }
 0x274   : > { %14176 = vst [vmem:[#allocation151_spill] sm:$0xff] %v8462_v61  ;;  %6276 = vmatmul.msk.f32.gmra.mxu1 %vm617_vm6, %v8136_v15  ;;  %6228 = vmatmul.msk.f32.gmra.mxu0 %vm617_vm6, %v7681_v32 }
 0x275   : > { %6356 = vmatmul.msk.f32.gmra.mxu2 %vm617_vm6, %v7681_v32  ;;  %6420 = vmatmul.msk.f32.gmra.mxu3 %vm617_vm6, %v7681_v32 }
 0x278   : > { %v8472_v10 = vpop.f32.mrf.mxu2  ;;  %v8476_v11 = vpop.f32.mrf.mxu3 }
 0x279   : > { %14177 = vst [vmem:[#allocation152_spill] sm:$0xff] %v8472_v10  ;;  %v8474_v18 = vpop.f32.mrf.mxu1  ;;  %v8478_v6 = vpop.f32.mrf.mxu0 }
 0x27a   : > { %14178 = vst [vmem:[#allocation153_spill] sm:$0xff] %v8474_v18 }
 0x27b   : > { %14179 = vst [vmem:[#allocation154_spill] sm:$0xff] %v8476_v11 }
 0x27c   : > { %14180 = vst [vmem:[#allocation155_spill] sm:$0xff] %v8478_v6  ;;  %6277 = vmatmul.msk.f32.gmra.mxu1 %vm617_vm6, %v8160_v49  ;;  %6229 = vmatmul.msk.f32.gmra.mxu0 %vm617_vm6, %v7691_v34 }
 0x27d   : > { %6357 = vmatmul.msk.f32.gmra.mxu2 %vm617_vm6, %v7691_v34  ;;  %6421 = vmatmul.msk.f32.gmra.mxu3 %vm617_vm6, %v7691_v34 }
 0x280   : > { %v8488_v61 = vpop.f32.mrf.mxu2  ;;  %v8492_v18 = vpop.f32.mrf.mxu3 }
 0x281   : > { %14181 = vst [vmem:[#allocation156_spill] sm:$0xff] %v8488_v61  ;;  %v8490_v10 = vpop.f32.mrf.mxu1  ;;  %v8494_v11 = vpop.f32.mrf.mxu0 }
 0x282   : > { %14182 = vst [vmem:[#allocation157_spill] sm:$0xff] %v8490_v10 }
 0x283   : > { %14183 = vst [vmem:[#allocation158_spill] sm:$0xff] %v8492_v18 }
 0x284   : > { %14184 = vst [vmem:[#allocation159_spill] sm:$0xff] %v8494_v11  ;;  %6278 = vmatmul.msk.f32.gmra.mxu1 %vm617_vm6, %v8182_v36  ;;  %6230 = vmatmul.msk.f32.gmra.mxu0 %vm617_vm6, %v7704_v38 }
 0x285   : > { %6358 = vmatmul.msk.f32.gmra.mxu2 %vm617_vm6, %v7704_v38  ;;  %6422 = vmatmul.msk.f32.gmra.mxu3 %vm617_vm6, %v7704_v38 }
 0x288   : > { %v8504_v6 = vpop.f32.mrf.mxu2  ;;  %v8508_v10 = vpop.f32.mrf.mxu3 }
 0x289   : > { %14185 = vst [vmem:[#allocation160_spill] sm:$0xff] %v8504_v6  ;;  %v8506_v61 = vpop.f32.mrf.mxu1  ;;  %v8510_v18 = vpop.f32.mrf.mxu0 }
 0x28a   : > { %14186 = vst [vmem:[#allocation161_spill] sm:$0xff] %v8506_v61 }
 0x28b   : > { %14187 = vst [vmem:[#allocation162_spill] sm:$0xff] %v8508_v10 }
 0x28c   : > { %14188 = vst [vmem:[#allocation163_spill] sm:$0xff] %v8510_v18  ;;  %6279 = vmatmul.msk.f32.gmra.mxu1 %vm617_vm6, %v8204_v12  ;;  %6231 = vmatmul.msk.f32.gmra.mxu0 %vm617_vm6, %v7716_v41 }
 0x28d   : > { %6359 = vmatmul.msk.f32.gmra.mxu2 %vm617_vm6, %v7716_v41  ;;  %6423 = vmatmul.msk.f32.gmra.mxu3 %vm617_vm6, %v7716_v41 }
 0x290   : > { %v8520_v11 = vpop.f32.mrf.mxu2  ;;  %v8524_v61 = vpop.f32.mrf.mxu3 }
 0x291   : > { %14189 = vst [vmem:[#allocation164_spill] sm:$0xff] %v8520_v11  ;;  %v8522_v6 = vpop.f32.mrf.mxu1  ;;  %v8526_v10 = vpop.f32.mrf.mxu0 }
 0x292   : > { %14190 = vst [vmem:[#allocation165_spill] sm:$0xff] %v8522_v6 }
 0x293   : > { %14191 = vst [vmem:[#allocation166_spill] sm:$0xff] %v8524_v61 }
 0x294   : > { %14192 = vst [vmem:[#allocation167_spill] sm:$0xff] %v8526_v10  ;;  %6280 = vmatmul.msk.f32.gmra.mxu1 %vm617_vm6, %v8224_v2  ;;  %6232 = vmatmul.msk.f32.gmra.mxu0 %vm617_vm6, %v7726_v43 }
 0x295   : > { %6360 = vmatmul.msk.f32.gmra.mxu2 %vm617_vm6, %v7726_v43  ;;  %6424 = vmatmul.msk.f32.gmra.mxu3 %vm617_vm6, %v7726_v43 }
 0x298   : > { %v8536_v18 = vpop.f32.mrf.mxu2  ;;  %v8540_v6 = vpop.f32.mrf.mxu3 }
 0x299   : > { %14193 = vst [vmem:[#allocation168_spill] sm:$0xff] %v8536_v18  ;;  %v8538_v11 = vpop.f32.mrf.mxu1  ;;  %v8542_v61 = vpop.f32.mrf.mxu0 }
 0x29a   : > { %14194 = vst [vmem:[#allocation169_spill] sm:$0xff] %v8538_v11 }
 0x29b   : > { %14195 = vst [vmem:[#allocation170_spill] sm:$0xff] %v8540_v6 }
 0x29c   : > { %14196 = vst [vmem:[#allocation171_spill] sm:$0xff] %v8542_v61  ;;  %6281 = vmatmul.msk.f32.gmra.mxu1 %vm617_vm6, %v8248_v13  ;;  %6233 = vmatmul.msk.f32.gmra.mxu0 %vm617_vm6, %v7736_v45 }
 0x29d   : > { %6361 = vmatmul.msk.f32.gmra.mxu2 %vm617_vm6, %v7736_v45  ;;  %6425 = vmatmul.msk.f32.gmra.mxu3 %vm617_vm6, %v7736_v45 }
 0x2a0   : > { %v8552_v10 = vpop.f32.mrf.mxu2  ;;  %v8556_v11 = vpop.f32.mrf.mxu3 }
 0x2a1   : > { %14197 = vst [vmem:[#allocation172_spill] sm:$0xff] %v8552_v10  ;;  %v8554_v18 = vpop.f32.mrf.mxu1  ;;  %v8558_v6 = vpop.f32.mrf.mxu0 }
 0x2a2   : > { %14198 = vst [vmem:[#allocation173_spill] sm:$0xff] %v8554_v18 }
 0x2a3   : > { %14199 = vst [vmem:[#allocation174_spill] sm:$0xff] %v8556_v11 }
 0x2a4   : > { %14200 = vst [vmem:[#allocation175_spill] sm:$0xff] %v8558_v6  ;;  %6282 = vmatmul.msk.f32.gmra.mxu1 %vm617_vm6, %v8270_v48  ;;  %6234 = vmatmul.msk.f32.gmra.mxu0 %vm617_vm6, %v7746_v47 }
 0x2a5   : > { %6362 = vmatmul.msk.f32.gmra.mxu2 %vm617_vm6, %v7746_v47  ;;  %6426 = vmatmul.msk.f32.gmra.mxu3 %vm617_vm6, %v7746_v47 }
 0x2a8   : > { %v8568_v61 = vpop.f32.mrf.mxu2  ;;  %v8572_v18 = vpop.f32.mrf.mxu3 }
 0x2a9   : > { %14201 = vst [vmem:[#allocation176_spill] sm:$0xff] %v8568_v61  ;;  %v8570_v10 = vpop.f32.mrf.mxu1  ;;  %v8574_v11 = vpop.f32.mrf.mxu0 }
 0x2aa   : > { %14202 = vst [vmem:[#allocation177_spill] sm:$0xff] %v8570_v10 }
 0x2ab   : > { %14203 = vst [vmem:[#allocation178_spill] sm:$0xff] %v8572_v18 }
 0x2ac   : > { %14204 = vst [vmem:[#allocation179_spill] sm:$0xff] %v8574_v11  ;;  %6283 = vmatmul.msk.f32.gmra.mxu1 %vm617_vm6, %v8292_v0  ;;  %6235 = vmatmul.msk.f32.gmra.mxu0 %vm617_vm6, %v7764_v52 }
 0x2ad   : > { %6363 = vmatmul.msk.f32.gmra.mxu2 %vm617_vm6, %v7764_v52  ;;  %6427 = vmatmul.msk.f32.gmra.mxu3 %vm617_vm6, %v7764_v52 }
 0x2b0   : > { %v8584_v6 = vpop.f32.mrf.mxu2  ;;  %v8588_v10 = vpop.f32.mrf.mxu3 }
 0x2b1   : > { %14205 = vst [vmem:[#allocation180_spill] sm:$0xff] %v8584_v6  ;;  %v8586_v61 = vpop.f32.mrf.mxu1  ;;  %v8590_v18 = vpop.f32.mrf.mxu0 }
 0x2b2   : > { %14206 = vst [vmem:[#allocation181_spill] sm:$0xff] %v8586_v61 }
 0x2b3   : > { %14207 = vst [vmem:[#allocation182_spill] sm:$0xff] %v8588_v10 }
 0x2b4   : > { %14208 = vst [vmem:[#allocation183_spill] sm:$0xff] %v8590_v18  ;;  %6284 = vmatmul.msk.f32.gmra.mxu1 %vm617_vm6, %v8312_v4  ;;  %6236 = vmatmul.msk.f32.gmra.mxu0 %vm617_vm6, %v7776_v55 }
 0x2b5   : > { %6364 = vmatmul.msk.f32.gmra.mxu2 %vm617_vm6, %v7776_v55  ;;  %6428 = vmatmul.msk.f32.gmra.mxu3 %vm617_vm6, %v7776_v55 }
 0x2b8   : > { %v8600_v11 = vpop.f32.mrf.mxu2  ;;  %v8604_v61 = vpop.f32.mrf.mxu3 }
 0x2b9   : > { %14209 = vst [vmem:[#allocation184_spill] sm:$0xff] %v8600_v11  ;;  %v8602_v6 = vpop.f32.mrf.mxu1  ;;  %v8606_v10 = vpop.f32.mrf.mxu0 }
 0x2ba   : > { %14210 = vst [vmem:[#allocation185_spill] sm:$0xff] %v8602_v6 }
 0x2bb   : > { %14211 = vst [vmem:[#allocation186_spill] sm:$0xff] %v8604_v61 }
 0x2bc   : > { %14212 = vst [vmem:[#allocation187_spill] sm:$0xff] %v8606_v10  ;;  %6285 = vmatmul.msk.f32.gmra.mxu1 %vm617_vm6, %v8341_v19  ;;  %6430 = vmatmul.msk.f32.vlgmr.msrb.gmra.mxu0 %vm617_vm6, %v7623_v21 }
 0x2bd   : > { %6365 = vmatmul.msk.f32.gmra.mxu2 %vm617_vm6, %v7788_v58  ;;  %6429 = vmatmul.msk.f32.gmra.mxu3 %vm617_vm6, %v7788_v58 }
 0x2c0   : > { %v8616_v18 = vpop.f32.mrf.mxu2  ;;  %v8620_v6 = vpop.f32.mrf.mxu3 }
 0x2c1   : > { %14213 = vst [vmem:[#allocation188_spill] sm:$0xff] %v8616_v18  ;;  %v8618_v11 = vpop.f32.mrf.mxu1  ;;  %v8622_v61 = vpop.f32.mrf.mxu0 }
 0x2c2   : > { %14214 = vst [vmem:[#allocation189_spill] sm:$0xff] %v8618_v11 }
 0x2c3   : > { %14215 = vst [vmem:[#allocation190_spill] sm:$0xff] %v8620_v6 }
 0x2c4   : > { %14216 = vst [vmem:[#allocation191_spill] sm:$0xff] %v8622_v61  ;;  %6286 = vmatmul.msk.f32.gmra.mxu1 %vm617_vm6, %v7621_v20  ;;  %6431 = vmatmul.msk.f32.gmra.mxu0 %vm617_vm6, %v7633_v23 }
 0x2c5   : > { %6558 = vmatmul.msk.f32.vlgmr.msrb.gmra.mxu2 %vm617_vm6, %v7623_v21  ;;  %6622 = vmatmul.msk.f32.vlgmr.msrb.gmra.mxu3 %vm617_vm6, %v7623_v21 }
 0x2c8   : > { %v8632_v10 = vpop.f32.mrf.mxu2  ;;  %v8636_v11 = vpop.f32.mrf.mxu3 }
 0x2c9   : > { %14217 = vst [vmem:[#allocation192_spill] sm:$0xff] %v8632_v10  ;;  %v8634_v18 = vpop.f32.mrf.mxu1  ;;  %v8638_v6 = vpop.f32.mrf.mxu0 }
 0x2ca   : > { %14218 = vst [vmem:[#allocation193_spill] sm:$0xff] %v8634_v18 }
 0x2cb   : > { %14219 = vst [vmem:[#allocation194_spill] sm:$0xff] %v8636_v11 }
 0x2cc   : > { %14220 = vst [vmem:[#allocation195_spill] sm:$0xff] %v8638_v6  ;;  %6287 = vmatmul.msk.f32.gmra.mxu1 %vm617_vm6, %v7631_v22  ;;  %6432 = vmatmul.msk.f32.gmra.mxu0 %vm617_vm6, %v7643_v25 }
 0x2cd   : > { %6559 = vmatmul.msk.f32.gmra.mxu2 %vm617_vm6, %v7633_v23  ;;  %6623 = vmatmul.msk.f32.gmra.mxu3 %vm617_vm6, %v7633_v23 }
 0x2d0   : > { %v8648_v61 = vpop.f32.mrf.mxu2  ;;  %v8652_v18 = vpop.f32.mrf.mxu3 }
 0x2d1   : > { %14221 = vst [vmem:[#allocation196_spill] sm:$0xff] %v8648_v61  ;;  %v8650_v10 = vpop.f32.mrf.mxu1  ;;  %v8654_v11 = vpop.f32.mrf.mxu0 }
 0x2d2   : > { %14222 = vst [vmem:[#allocation197_spill] sm:$0xff] %v8650_v10 }
 0x2d3   : > { %14223 = vst [vmem:[#allocation198_spill] sm:$0xff] %v8652_v18 }
 0x2d4   : > { %14224 = vst [vmem:[#allocation199_spill] sm:$0xff] %v8654_v11  ;;  %6288 = vmatmul.msk.f32.gmra.mxu1 %vm617_vm6, %v7641_v24  ;;  %6433 = vmatmul.msk.f32.gmra.mxu0 %vm617_vm6, %v7653_v27 }
 0x2d5   : > { %6560 = vmatmul.msk.f32.gmra.mxu2 %vm617_vm6, %v7643_v25  ;;  %6624 = vmatmul.msk.f32.gmra.mxu3 %vm617_vm6, %v7643_v25 }
 0x2d8   : > { %v8664_v6 = vpop.f32.mrf.mxu2  ;;  %v8668_v10 = vpop.f32.mrf.mxu3 }
 0x2d9   : > { %14225 = vst [vmem:[#allocation200_spill] sm:$0xff] %v8664_v6  ;;  %v8666_v61 = vpop.f32.mrf.mxu1  ;;  %v8670_v18 = vpop.f32.mrf.mxu0 }
 0x2da   : > { %14226 = vst [vmem:[#allocation201_spill] sm:$0xff] %v8666_v61 }
 0x2db   : > { %14227 = vst [vmem:[#allocation202_spill] sm:$0xff] %v8668_v10 }
 0x2dc   : > { %14228 = vst [vmem:[#allocation203_spill] sm:$0xff] %v8670_v18  ;;  %6289 = vmatmul.msk.f32.gmra.mxu1 %vm617_vm6, %v7651_v26  ;;  %6434 = vmatmul.msk.f32.gmra.mxu0 %vm617_vm6, %v7663_v29 }
 0x2dd   : > { %6561 = vmatmul.msk.f32.gmra.mxu2 %vm617_vm6, %v7653_v27  ;;  %6625 = vmatmul.msk.f32.gmra.mxu3 %vm617_vm6, %v7653_v27 }
 0x2e0   : > { %v8680_v11 = vpop.f32.mrf.mxu2  ;;  %v8684_v61 = vpop.f32.mrf.mxu3 }
 0x2e1   : > { %14229 = vst [vmem:[#allocation204_spill] sm:$0xff] %v8680_v11  ;;  %v8682_v6 = vpop.f32.mrf.mxu1  ;;  %v8686_v10 = vpop.f32.mrf.mxu0 }
 0x2e2   : > { %14230 = vst [vmem:[#allocation205_spill] sm:$0xff] %v8682_v6 }
 0x2e3   : > { %14231 = vst [vmem:[#allocation206_spill] sm:$0xff] %v8684_v61 }
 0x2e4   : > { %14232 = vst [vmem:[#allocation207_spill] sm:$0xff] %v8686_v10  ;;  %6290 = vmatmul.msk.f32.gmra.mxu1 %vm617_vm6, %v7661_v28  ;;  %6435 = vmatmul.msk.f32.gmra.mxu0 %vm617_vm6, %v7673_v31 }
 0x2e5   : > { %6562 = vmatmul.msk.f32.gmra.mxu2 %vm617_vm6, %v7663_v29  ;;  %6626 = vmatmul.msk.f32.gmra.mxu3 %vm617_vm6, %v7663_v29 }
 0x2e8   : > { %v8696_v18 = vpop.f32.mrf.mxu2  ;;  %v8700_v6 = vpop.f32.mrf.mxu3 }
 0x2e9   : > { %14233 = vst [vmem:[#allocation208_spill] sm:$0xff] %v8696_v18  ;;  %v8698_v11 = vpop.f32.mrf.mxu1  ;;  %v8702_v61 = vpop.f32.mrf.mxu0 }
 0x2ea   : > { %14234 = vst [vmem:[#allocation209_spill] sm:$0xff] %v8698_v11 }
 0x2eb   : > { %14235 = vst [vmem:[#allocation210_spill] sm:$0xff] %v8700_v6 }
 0x2ec   : > { %14236 = vst [vmem:[#allocation211_spill] sm:$0xff] %v8702_v61  ;;  %6291 = vmatmul.msk.f32.gmra.mxu1 %vm617_vm6, %v7671_v30  ;;  %6436 = vmatmul.msk.f32.gmra.mxu0 %vm617_vm6, %v7683_v33 }
 0x2ed   : > { %6563 = vmatmul.msk.f32.gmra.mxu2 %vm617_vm6, %v7673_v31  ;;  %6627 = vmatmul.msk.f32.gmra.mxu3 %vm617_vm6, %v7673_v31 }
 0x2f0   : > { %v8712_v10 = vpop.f32.mrf.mxu2  ;;  %v8716_v11 = vpop.f32.mrf.mxu3 }
 0x2f1   : > { %14237 = vst [vmem:[#allocation212_spill] sm:$0xff] %v8712_v10  ;;  %v8714_v18 = vpop.f32.mrf.mxu1  ;;  %v8718_v6 = vpop.f32.mrf.mxu0 }
 0x2f2   : > { %14238 = vst [vmem:[#allocation213_spill] sm:$0xff] %v8714_v18 }
 0x2f3   : > { %14239 = vst [vmem:[#allocation214_spill] sm:$0xff] %v8716_v11 }
 0x2f4   : > { %14240 = vst [vmem:[#allocation215_spill] sm:$0xff] %v8718_v6  ;;  %6292 = vmatmul.msk.f32.gmra.mxu1 %vm617_vm6, %v7681_v32  ;;  %6437 = vmatmul.msk.f32.gmra.mxu0 %vm617_vm6, %v7693_v35 }
 0x2f5   : > { %6564 = vmatmul.msk.f32.gmra.mxu2 %vm617_vm6, %v7683_v33  ;;  %6628 = vmatmul.msk.f32.gmra.mxu3 %vm617_vm6, %v7683_v33 }
 0x2f8   : > { %v8728_v61 = vpop.f32.mrf.mxu2  ;;  %v8732_v18 = vpop.f32.mrf.mxu3 }
 0x2f9   : > { %14241 = vst [vmem:[#allocation216_spill] sm:$0xff] %v8728_v61  ;;  %v8730_v10 = vpop.f32.mrf.mxu1  ;;  %v8734_v11 = vpop.f32.mrf.mxu0 }
 0x2fa   : > { %14242 = vst [vmem:[#allocation217_spill] sm:$0xff] %v8730_v10 }
 0x2fb   : > { %14243 = vst [vmem:[#allocation218_spill] sm:$0xff] %v8732_v18 }
 0x2fc   : > { %14244 = vst [vmem:[#allocation219_spill] sm:$0xff] %v8734_v11  ;;  %6293 = vmatmul.msk.f32.gmra.mxu1 %vm617_vm6, %v7691_v34  ;;  %6438 = vmatmul.msk.f32.gmra.mxu0 %vm617_vm6, %v7706_v39 }
 0x2fd   : > { %6565 = vmatmul.msk.f32.gmra.mxu2 %vm617_vm6, %v7693_v35  ;;  %6629 = vmatmul.msk.f32.gmra.mxu3 %vm617_vm6, %v7693_v35 }
 0x300   : > { %v8744_v6 = vpop.f32.mrf.mxu2  ;;  %v8748_v10 = vpop.f32.mrf.mxu3 }
 0x301   : > { %14245 = vst [vmem:[#allocation220_spill] sm:$0xff] %v8744_v6  ;;  %v8746_v61 = vpop.f32.mrf.mxu1  ;;  %v8750_v18 = vpop.f32.mrf.mxu0 }
 0x302   : > { %14246 = vst [vmem:[#allocation221_spill] sm:$0xff] %v8746_v61 }
 0x303   : > { %14247 = vst [vmem:[#allocation222_spill] sm:$0xff] %v8748_v10 }
 0x304   : > { %14248 = vst [vmem:[#allocation223_spill] sm:$0xff] %v8750_v18  ;;  %6294 = vmatmul.msk.f32.gmra.mxu1 %vm617_vm6, %v7704_v38  ;;  %6439 = vmatmul.msk.f32.gmra.mxu0 %vm617_vm6, %v7718_v42 }
 0x305   : > { %6566 = vmatmul.msk.f32.gmra.mxu2 %vm617_vm6, %v7706_v39  ;;  %6630 = vmatmul.msk.f32.gmra.mxu3 %vm617_vm6, %v7706_v39 }
 0x308   : > { %v8760_v11 = vpop.f32.mrf.mxu2  ;;  %v8764_v61 = vpop.f32.mrf.mxu3 }
 0x309   : > { %14249 = vst [vmem:[#allocation224_spill] sm:$0xff] %v8760_v11  ;;  %v8762_v6 = vpop.f32.mrf.mxu1  ;;  %v8766_v10 = vpop.f32.mrf.mxu0 }
 0x30a   : > { %14250 = vst [vmem:[#allocation225_spill] sm:$0xff] %v8762_v6 }
 0x30b   : > { %14251 = vst [vmem:[#allocation226_spill] sm:$0xff] %v8764_v61 }
 0x30c   : > { %14252 = vst [vmem:[#allocation227_spill] sm:$0xff] %v8766_v10  ;;  %6295 = vmatmul.msk.f32.gmra.mxu1 %vm617_vm6, %v7716_v41  ;;  %6440 = vmatmul.msk.f32.gmra.mxu0 %vm617_vm6, %v7728_v44 }
 0x30d   : > { %6567 = vmatmul.msk.f32.gmra.mxu2 %vm617_vm6, %v7718_v42  ;;  %6631 = vmatmul.msk.f32.gmra.mxu3 %vm617_vm6, %v7718_v42 }
 0x310   : > { %v8776_v18 = vpop.f32.mrf.mxu2  ;;  %v8780_v6 = vpop.f32.mrf.mxu3 }
 0x311   : > { %14253 = vst [vmem:[#allocation228_spill] sm:$0xff] %v8776_v18  ;;  %v8778_v11 = vpop.f32.mrf.mxu1  ;;  %v8782_v61 = vpop.f32.mrf.mxu0 }
 0x312   : > { %14254 = vst [vmem:[#allocation229_spill] sm:$0xff] %v8778_v11 }
 0x313   : > { %14255 = vst [vmem:[#allocation230_spill] sm:$0xff] %v8780_v6 }
 0x314   : > { %14256 = vst [vmem:[#allocation231_spill] sm:$0xff] %v8782_v61  ;;  %6296 = vmatmul.msk.f32.gmra.mxu1 %vm617_vm6, %v7726_v43  ;;  %6441 = vmatmul.msk.f32.gmra.mxu0 %vm617_vm6, %v7738_v46 }
 0x315   : > { %6568 = vmatmul.msk.f32.gmra.mxu2 %vm617_vm6, %v7728_v44  ;;  %6632 = vmatmul.msk.f32.gmra.mxu3 %vm617_vm6, %v7728_v44 }
 0x318   : > { %v8792_v10 = vpop.f32.mrf.mxu2  ;;  %v8796_v11 = vpop.f32.mrf.mxu3 }
 0x319   : > { %14257 = vst [vmem:[#allocation232_spill] sm:$0xff] %v8792_v10  ;;  %v8794_v18 = vpop.f32.mrf.mxu1  ;;  %v8798_v6 = vpop.f32.mrf.mxu0 }
 0x31a   : > { %14258 = vst [vmem:[#allocation233_spill] sm:$0xff] %v8794_v18 }
 0x31b   : > { %14259 = vst [vmem:[#allocation234_spill] sm:$0xff] %v8796_v11 }
 0x31c   : > { %14260 = vst [vmem:[#allocation235_spill] sm:$0xff] %v8798_v6  ;;  %6297 = vmatmul.msk.f32.gmra.mxu1 %vm617_vm6, %v7736_v45  ;;  %6442 = vmatmul.msk.f32.gmra.mxu0 %vm617_vm6, %v7754_v50 }
 0x31d   : > { %6569 = vmatmul.msk.f32.gmra.mxu2 %vm617_vm6, %v7738_v46  ;;  %6633 = vmatmul.msk.f32.gmra.mxu3 %vm617_vm6, %v7738_v46 }
 0x320   : > { %v8808_v61 = vpop.f32.mrf.mxu2  ;;  %v8812_v18 = vpop.f32.mrf.mxu3 }
 0x321   : > { %14261 = vst [vmem:[#allocation236_spill] sm:$0xff] %v8808_v61  ;;  %v8810_v10 = vpop.f32.mrf.mxu1  ;;  %v8814_v11 = vpop.f32.mrf.mxu0 }
 0x322   : > { %14262 = vst [vmem:[#allocation237_spill] sm:$0xff] %v8810_v10 }
 0x323   : > { %14263 = vst [vmem:[#allocation238_spill] sm:$0xff] %v8812_v18 }
 0x324   : > { %14264 = vst [vmem:[#allocation239_spill] sm:$0xff] %v8814_v11  ;;  %6298 = vmatmul.msk.f32.gmra.mxu1 %vm617_vm6, %v7746_v47  ;;  %6443 = vmatmul.msk.f32.gmra.mxu0 %vm617_vm6, %v7766_v53 }
 0x325   : > { %6570 = vmatmul.msk.f32.gmra.mxu2 %vm617_vm6, %v7754_v50  ;;  %6634 = vmatmul.msk.f32.gmra.mxu3 %vm617_vm6, %v7754_v50 }
 0x328   : > { %v8824_v6 = vpop.f32.mrf.mxu2  ;;  %v8828_v10 = vpop.f32.mrf.mxu3 }
 0x329   : > { %14265 = vst [vmem:[#allocation240_spill] sm:$0xff] %v8824_v6  ;;  %v8826_v61 = vpop.f32.mrf.mxu1  ;;  %v8830_v18 = vpop.f32.mrf.mxu0 }
 0x32a   : > { %14266 = vst [vmem:[#allocation241_spill] sm:$0xff] %v8826_v61 }
 0x32b   : > { %14267 = vst [vmem:[#allocation242_spill] sm:$0xff] %v8828_v10 }
 0x32c   : > { %14268 = vst [vmem:[#allocation243_spill] sm:$0xff] %v8830_v18  ;;  %6299 = vmatmul.msk.f32.gmra.mxu1 %vm617_vm6, %v7764_v52  ;;  %6444 = vmatmul.msk.f32.gmra.mxu0 %vm617_vm6, %v7778_v56  ;;  %v2506_v18 = vld [vmem:[%s13998_s4 + $0xc0] sm:$0xff] }
 0x32d   : > { %6571 = vmatmul.msk.f32.gmra.mxu2 %vm617_vm6, %v7766_v53  ;;  %6635 = vmatmul.msk.f32.gmra.mxu3 %vm617_vm6, %v7766_v53 }
 0x32e   : > { %2719 = vmatpush.msra.mxu0 %v2506_v18 }
 0x330   : > { %v8840_v11 = vpop.f32.mrf.mxu2  ;;  %v8844_v61 = vpop.f32.mrf.mxu3 }
 0x331   : > { %14269 = vst [vmem:[#allocation244_spill] sm:$0xff] %v8840_v11  ;;  %v8842_v6 = vpop.f32.mrf.mxu1  ;;  %v8846_v10 = vpop.f32.mrf.mxu0 }
 0x332   : > { %14270 = vst [vmem:[#allocation245_spill] sm:$0xff] %v8842_v6 }
 0x333   : > { %14271 = vst [vmem:[#allocation246_spill] sm:$0xff] %v8844_v61 }
 0x334   : > { %14272 = vst [vmem:[#allocation247_spill] sm:$0xff] %v8846_v10  ;;  %6300 = vmatmul.msk.f32.gmra.mxu1 %vm617_vm6, %v7776_v55  ;;  %6445 = vmatmul.msk.f32.gmra.mxu0 %vm617_vm6, %v7795_v60 }
 0x335   : > { %6572 = vmatmul.msk.f32.gmra.mxu2 %vm617_vm6, %v7778_v56  ;;  %6636 = vmatmul.msk.f32.gmra.mxu3 %vm617_vm6, %v7778_v56 }
 0x338   : > { %v8859_v61 = vpop.f32.mrf.mxu2  ;;  %v8863_v6 = vpop.f32.mrf.mxu3 }
 0x339   : > { %14273 = vst [vmem:[#allocation248_spill] sm:$0xff] %v8859_v61  ;;  %v8861_v11 = vpop.f32.mrf.mxu1  ;;  %v8865_v10 = vpop.f32.mrf.mxu0 }
 0x33a   : > { %14274 = vst [vmem:[#allocation249_spill] sm:$0xff] %v8861_v11 }
 0x33b   : > { %14275 = vst [vmem:[#allocation250_spill] sm:$0xff] %v8863_v6 }
 0x33c   : > { %14276 = vst [vmem:[#allocation251_spill] sm:$0xff] %v8865_v10  ;;  %6301 = vmatmul.msk.f32.gmra.mxu1 %vm617_vm6, %v7788_v58  ;;  %6446 = vmatmul.msk.f32.gmra.mxu0 %vm617_vm6, %v7756_v51  ;;  %v2507_v10 = vld [vmem:[%s13998_s4 + $0xc8] sm:$0xff] }
 0x33d   : > { %6573 = vmatmul.msk.f32.gmra.mxu2 %vm617_vm6, %v7795_v60  ;;  %6637 = vmatmul.msk.f32.gmra.mxu3 %vm617_vm6, %v7795_v60 }
 0x33e   : > { %2928 = vmatpush.msrb.mxu1 %v2507_v10 }
 0x340   : > { %v8875_v18 = vpop.f32.mrf.mxu2  ;;  %v8879_v11 = vpop.f32.mrf.mxu3 }
 0x341   : > { %14277 = vst [vmem:[#allocation252_spill] sm:$0xff] %v8875_v18  ;;  %v8877_v61 = vpop.f32.mrf.mxu1  ;;  %v8881_v6 = vpop.f32.mrf.mxu0 }
 0x342   : > { %14278 = vst [vmem:[#allocation253_spill] sm:$0xff] %v8877_v61 }
 0x343   : > { %14279 = vst [vmem:[#allocation254_spill] sm:$0xff] %v8879_v11 }
 0x344   : > { %14280 = vst [vmem:[#allocation255_spill] sm:$0xff] %v8881_v6  ;;  %6494 = vmatmul.msk.f32.vlgmr.msra.gmra.mxu1 %vm617_vm6, %v7623_v21  ;;  %6447 = vmatmul.msk.f32.gmra.mxu0 %vm617_vm6, %v7774_v54  ;;  %v2508_v21 = vld [vmem:[%s13998_s4 + $0xd0] sm:$0xff] }
 0x345   : > { %6574 = vmatmul.msk.f32.gmra.mxu2 %vm617_vm6, %v7756_v51  ;;  %6638 = vmatmul.msk.f32.gmra.mxu3 %vm617_vm6, %v7756_v51 }
 0x346   : > { %3137 = vmatpush.msra.mxu2 %v2508_v21 }
 0x348   : > { %v8894_v11 = vpop.f32.mrf.mxu2  ;;  %v8898_v18 = vpop.f32.mrf.mxu3 }
 0x349   : > { %14281 = vst [vmem:[#allocation256_spill] sm:$0xff] %v8894_v11  ;;  %v8896_v6 = vpop.f32.mrf.mxu1  ;;  %v8900_v61 = vpop.f32.mrf.mxu0 }
 0x34a   : > { %14282 = vst [vmem:[#allocation257_spill] sm:$0xff] %v8896_v6 }
 0x34b   : > { %14283 = vst [vmem:[#allocation258_spill] sm:$0xff] %v8898_v18 }
 0x34c   : > { %14284 = vst [vmem:[#allocation259_spill] sm:$0xff] %v8900_v61  ;;  %6495 = vmatmul.msk.f32.gmra.mxu1 %vm617_vm6, %v7633_v23  ;;  %6448 = vmatmul.msk.f32.gmra.mxu0 %vm617_vm6, %v7786_v57 }
 0x34d   : > { %6575 = vmatmul.msk.f32.gmra.mxu2 %vm617_vm6, %v7774_v54  ;;  %6639 = vmatmul.msk.f32.gmra.mxu3 %vm617_vm6, %v7774_v54 }
 0x350   : > { %v8913_v10 = vpop.f32.mrf.mxu2  ;;  %v8917_v11 = vpop.f32.mrf.mxu3 }
 0x351   : > { %14285 = vst [vmem:[#allocation260_spill] sm:$0xff] %v8913_v10  ;;  %v8915_v18 = vpop.f32.mrf.mxu1  ;;  %v8919_v23 = vpop.f32.mrf.mxu0 }
 0x352   : > { %14286 = vst [vmem:[#allocation261_spill] sm:$0xff] %v8915_v18 }
 0x353   : > { %14287 = vst [vmem:[#allocation262_spill] sm:$0xff] %v8917_v11 }
 0x354   : > { %14288 = vst [vmem:[#allocation263_spill] sm:$0xff] %v8919_v23  ;;  %6496 = vmatmul.msk.f32.gmra.mxu1 %vm617_vm6, %v7643_v25  ;;  %6449 = vmatmul.msk.f32.gmra.mxu0 %vm617_vm6, %v7805_v62  ;;  %v2509_v25 = vld [vmem:[%s13998_s4 + $0xd8] sm:$0xff] }
 0x355   : > { %6576 = vmatmul.msk.f32.gmra.mxu2 %vm617_vm6, %v7786_v57  ;;  %6640 = vmatmul.msk.f32.gmra.mxu3 %vm617_vm6, %v7786_v57 }
 0x356   : > { %3346 = vmatpush.msra.mxu3 %v2509_v25 }
 0x358   : > { %v8929_v21 = vpop.f32.mrf.mxu2  ;;  %v8933_v61 = vpop.f32.mrf.mxu3 }
 0x359   : > { %14289 = vst [vmem:[#allocation264_spill] sm:$0xff] %v8929_v21  ;;  %v8931_v10 = vpop.f32.mrf.mxu1  ;;  %v8935_v11 = vpop.f32.mrf.mxu0 }
 0x35a   : > { %14290 = vst [vmem:[#allocation265_spill] sm:$0xff] %v8931_v10 }
 0x35b   : > { %14291 = vst [vmem:[#allocation266_spill] sm:$0xff] %v8933_v61 }
 0x35c   : > { %14292 = vst [vmem:[#allocation267_spill] sm:$0xff] %v8935_v11  ;;  %6497 = vmatmul.msk.f32.gmra.mxu1 %vm617_vm6, %v7653_v27  ;;  %6450 = vmatmul.msk.f32.gmra.mxu0 %vm617_vm6, %v7826_v3 }
 0x35d   : > { %6577 = vmatmul.msk.f32.gmra.mxu2 %vm617_vm6, %v7805_v62  ;;  %6641 = vmatmul.msk.f32.gmra.mxu3 %vm617_vm6, %v7805_v62 }
 0x360   : > { %v8948_v61 = vpop.f32.mrf.mxu2  ;;  %v8952_v23 = vpop.f32.mrf.mxu3 }
 0x361   : > { %14293 = vst [vmem:[#allocation268_spill] sm:$0xff] %v8948_v61  ;;  %v8950_v21 = vpop.f32.mrf.mxu1  ;;  %v8954_v27 = vpop.f32.mrf.mxu0 }
 0x362   : > { %14294 = vst [vmem:[#allocation269_spill] sm:$0xff] %v8950_v21 }
 0x363   : > { %14295 = vst [vmem:[#allocation270_spill] sm:$0xff] %v8952_v23 }
 0x364   : > { %14296 = vst [vmem:[#allocation271_spill] sm:$0xff] %v8954_v27  ;;  %6498 = vmatmul.msk.f32.gmra.mxu1 %vm617_vm6, %v7663_v29  ;;  %6451 = vmatmul.msk.f32.gmra.mxu0 %vm617_vm6, %v7851_v9 }
 0x365   : > { %6578 = vmatmul.msk.f32.gmra.mxu2 %vm617_vm6, %v7826_v3  ;;  %6642 = vmatmul.msk.f32.gmra.mxu3 %vm617_vm6, %v7826_v3 }
 0x368   : > { %v8964_v25 = vpop.f32.mrf.mxu2  ;;  %v8968_v11 = vpop.f32.mrf.mxu3 }
 0x369   : > { %14297 = vst [vmem:[#allocation272_spill] sm:$0xff] %v8964_v25  ;;  %v8966_v61 = vpop.f32.mrf.mxu1  ;;  %v8970_v23 = vpop.f32.mrf.mxu0 }
 0x36a   : > { %14298 = vst [vmem:[#allocation273_spill] sm:$0xff] %v8966_v61 }
 0x36b   : > { %14299 = vst [vmem:[#allocation274_spill] sm:$0xff] %v8968_v11 }
 0x36c   : > { %14300 = vst [vmem:[#allocation275_spill] sm:$0xff] %v8970_v23  ;;  %6499 = vmatmul.msk.f32.gmra.mxu1 %vm617_vm6, %v7673_v31  ;;  %6452 = vmatmul.msk.f32.gmra.mxu0 %vm617_vm6, %v7872_v16 }
 0x36d   : > { %6579 = vmatmul.msk.f32.gmra.mxu2 %vm617_vm6, %v7851_v9  ;;  %6643 = vmatmul.msk.f32.gmra.mxu3 %vm617_vm6, %v7851_v9 }
 0x370   : > { %v8980_v29 = vpop.f32.mrf.mxu2  ;;  %v8984_v27 = vpop.f32.mrf.mxu3 }
 0x371   : > { %14301 = vst [vmem:[#allocation276_spill] sm:$0xff] %v8980_v29  ;;  %v8982_v25 = vpop.f32.mrf.mxu1  ;;  %v8986_v11 = vpop.f32.mrf.mxu0 }
 0x372   : > { %14302 = vst [vmem:[#allocation277_spill] sm:$0xff] %v8982_v25 }
 0x373   : > { %14303 = vst [vmem:[#allocation278_spill] sm:$0xff] %v8984_v27 }
 0x374   : > { %14304 = vst [vmem:[#allocation279_spill] sm:$0xff] %v8986_v11  ;;  %6500 = vmatmul.msk.f32.gmra.mxu1 %vm617_vm6, %v7683_v33  ;;  %6453 = vmatmul.msk.f32.gmra.mxu0 %vm617_vm6, %v7892_v40 }
 0x375   : > { %6580 = vmatmul.msk.f32.gmra.mxu2 %vm617_vm6, %v7872_v16  ;;  %6644 = vmatmul.msk.f32.gmra.mxu3 %vm617_vm6, %v7872_v16 }
 0x378   : > { %v8996_v31 = vpop.f32.mrf.mxu2  ;;  %v9000_v23 = vpop.f32.mrf.mxu3 }
 0x379   : > { %14305 = vst [vmem:[#allocation280_spill] sm:$0xff] %v8996_v31  ;;  %v8998_v29 = vpop.f32.mrf.mxu1  ;;  %v9002_v27 = vpop.f32.mrf.mxu0 }
 0x37a   : > { %14306 = vst [vmem:[#allocation281_spill] sm:$0xff] %v8998_v29 }
 0x37b   : > { %14307 = vst [vmem:[#allocation282_spill] sm:$0xff] %v9000_v23 }
 0x37c   : > { %14308 = vst [vmem:[#allocation283_spill] sm:$0xff] %v9002_v27  ;;  %6501 = vmatmul.msk.f32.gmra.mxu1 %vm617_vm6, %v7693_v35  ;;  %6454 = vmatmul.msk.f32.gmra.mxu0 %vm617_vm6, %v7910_v63  ;;  %v14313_v35 = vld [vmem:[#allocation30_spill] sm:$0xff] }
 0x37d   : > { %6581 = vmatmul.msk.f32.gmra.mxu2 %vm617_vm6, %v7892_v40  ;;  %6645 = vmatmul.msk.f32.gmra.mxu3 %vm617_vm6, %v7892_v40 }
 0x380   : > { %v9012_v33 = vpop.f32.mrf.mxu2  ;;  %v9016_v11 = vpop.f32.mrf.mxu3 }
 0x381   : > { %14309 = vst [vmem:[#allocation284_spill] sm:$0xff] %v9012_v33  ;;  %v9014_v31 = vpop.f32.mrf.mxu1  ;;  %v9018_v23 = vpop.f32.mrf.mxu0 }
 0x382   : > { %14310 = vst [vmem:[#allocation285_spill] sm:$0xff] %v9014_v31 }
 0x383   : > { %14311 = vst [vmem:[#allocation286_spill] sm:$0xff] %v9016_v11 }
 0x384   : > { %14312 = vst [vmem:[#allocation287_spill] sm:$0xff] %v9018_v23  ;;  %6502 = vmatmul.msk.f32.gmra.mxu1 %vm617_vm6, %v7706_v39  ;;  %6455 = vmatmul.msk.f32.gmra.mxu0 %vm617_vm6, %v14313_v35 }
 0x385   : > { %6582 = vmatmul.msk.f32.gmra.mxu2 %vm617_vm6, %v7910_v63  ;;  %6646 = vmatmul.msk.f32.gmra.mxu3 %vm617_vm6, %v7910_v63 }
 0x388   : > { %v9028_v27 = vpop.f32.mrf.mxu2  ;;  %v9032_v6 = vpop.f32.mrf.mxu3 }
 0x389   : > { %14314 = vst [vmem:[#allocation30_spill] sm:$0xff] %v9028_v27  ;;  %v9030_v33 = vpop.f32.mrf.mxu1  ;;  %v9034_v11 = vpop.f32.mrf.mxu0 }
 0x38a   : > { %14315 = vst [vmem:[#allocation288_spill] sm:$0xff] %v9030_v33 }
 0x38b   : > { %14316 = vst [vmem:[#allocation289_spill] sm:$0xff] %v9032_v6 }
 0x38c   : > { %14317 = vst [vmem:[#allocation290_spill] sm:$0xff] %v9034_v11  ;;  %6503 = vmatmul.msk.f32.gmra.mxu1 %vm617_vm6, %v7718_v42  ;;  %6456 = vmatmul.msk.f32.gmra.mxu0 %vm617_vm6, %v7950_v14  ;;  %v14322_v42 = vld [vmem:[#allocation40_spill] sm:$0xff] }
 0x38d   : > { %6583 = vmatmul.msk.f32.gmra.mxu2 %vm617_vm6, %v14313_v35  ;;  %6647 = vmatmul.msk.f32.gmra.mxu3 %vm617_vm6, %v14313_v35 }
 0x390   : > { %v9044_v39 = vpop.f32.mrf.mxu2  ;;  %v9048_v23 = vpop.f32.mrf.mxu3 }
 0x391   : > { %14318 = vst [vmem:[#allocation291_spill] sm:$0xff] %v9044_v39  ;;  %v9046_v27 = vpop.f32.mrf.mxu1  ;;  %v9050_v6 = vpop.f32.mrf.mxu0 }
 0x392   : > { %14319 = vst [vmem:[#allocation292_spill] sm:$0xff] %v9046_v27  ;;  %v10646_v27 = vld [vmem:[%s9673_s8 + $0x180] sm:$0xff] }
 0x393   : > { %14320 = vst [vmem:[#allocation293_spill] sm:$0xff] %v9048_v23 }
 0x394   : > { %14321 = vst [vmem:[#allocation294_spill] sm:$0xff] %v9050_v6  ;;  %6504 = vmatmul.msk.f32.gmra.mxu1 %vm617_vm6, %v7728_v44  ;;  %6457 = vmatmul.msk.f32.gmra.mxu0 %vm617_vm6, %v14322_v42  ;;  %v14327_v44 = vld [vmem:[#allocation44_spill] sm:$0xff] }
 0x395   : > { %6584 = vmatmul.msk.f32.gmra.mxu2 %vm617_vm6, %v7950_v14  ;;  %6648 = vmatmul.msk.f32.gmra.mxu3 %vm617_vm6, %v7950_v14 }
 0x398   : > { %v9060_v11 = vpop.f32.mrf.mxu2  ;;  %v9064_v18 = vpop.f32.mrf.mxu3 }
 0x399   : > { %14323 = vst [vmem:[#allocation40_spill] sm:$0xff] %v9060_v11  ;;  %v9062_v39 = vpop.f32.mrf.mxu1  ;;  %v9066_v23 = vpop.f32.mrf.mxu0 }
 0x39a   : > { %14324 = vst [vmem:[#allocation295_spill] sm:$0xff] %v9062_v39  ;;  %v10882_v39 = vld [vmem:[%s9673_s8 + $0x1d8] sm:$0xff] }
 0x39b   : > { %14325 = vst [vmem:[#allocation296_spill] sm:$0xff] %v9064_v18 }
 0x39c   : > { %14326 = vst [vmem:[#allocation297_spill] sm:$0xff] %v9066_v23  ;;  %6505 = vmatmul.msk.f32.gmra.mxu1 %vm617_vm6, %v7738_v46  ;;  %6458 = vmatmul.msk.f32.gmra.mxu0 %vm617_vm6, %v14327_v44  ;;  %v14332_v46 = vld [vmem:[#allocation48_spill] sm:$0xff] }
 0x39d   : > { %6585 = vmatmul.msk.f32.gmra.mxu2 %vm617_vm6, %v14322_v42  ;;  %6649 = vmatmul.msk.f32.gmra.mxu3 %vm617_vm6, %v14322_v42 }
 0x3a0   : > { %v9076_v6 = vpop.f32.mrf.mxu2  ;;  %v9080_v10 = vpop.f32.mrf.mxu3 }
 0x3a1   : > { %14328 = vst [vmem:[#allocation44_spill] sm:$0xff] %v9076_v6  ;;  %v9078_v11 = vpop.f32.mrf.mxu1  ;;  %v9082_v18 = vpop.f32.mrf.mxu0 }
 0x3a2   : > { %14329 = vst [vmem:[#allocation298_spill] sm:$0xff] %v9078_v11 }
 0x3a3   : > { %14330 = vst [vmem:[#allocation299_spill] sm:$0xff] %v9080_v10 }
 0x3a4   : > { %14331 = vst [vmem:[#allocation300_spill] sm:$0xff] %v9082_v18  ;;  %6506 = vmatmul.msk.f32.gmra.mxu1 %vm617_vm6, %v7754_v50  ;;  %6459 = vmatmul.msk.f32.gmra.mxu0 %vm617_vm6, %v14332_v46  ;;  %v14337_v50 = vld [vmem:[#allocation53_spill] sm:$0xff] }
 0x3a5   : > { %6586 = vmatmul.msk.f32.gmra.mxu2 %vm617_vm6, %v14327_v44  ;;  %6650 = vmatmul.msk.f32.gmra.mxu3 %vm617_vm6, %v14327_v44 }
 0x3a8   : > { %v9092_v23 = vpop.f32.mrf.mxu2  ;;  %v9096_v21 = vpop.f32.mrf.mxu3 }
 0x3a9   : > { %14333 = vst [vmem:[#allocation48_spill] sm:$0xff] %v9092_v23  ;;  %v9094_v6 = vpop.f32.mrf.mxu1  ;;  %v9098_v10 = vpop.f32.mrf.mxu0 }
 0x3aa   : > { %14334 = vst [vmem:[#allocation301_spill] sm:$0xff] %v9094_v6  ;;  %v10902_v6 = vld [vmem:[%s9673_s8 + $0x1e0] sm:$0xff] }
 0x3ab   : > { %14335 = vst [vmem:[#allocation302_spill] sm:$0xff] %v9096_v21 }
 0x3ac   : > { %14336 = vst [vmem:[#allocation303_spill] sm:$0xff] %v9098_v10  ;;  %6507 = vmatmul.msk.f32.gmra.mxu1 %vm617_vm6, %v7766_v53  ;;  %6460 = vmatmul.msk.f32.gmra.mxu0 %vm617_vm6, %v14337_v50  ;;  %v2498_v53 = vld [vmem:[%s13998_s4 + $0x80] sm:$0xff] }
 0x3ad   : > { %6587 = vmatmul.msk.f32.gmra.mxu2 %vm617_vm6, %v14332_v46  ;;  %6651 = vmatmul.msk.f32.gmra.mxu3 %vm617_vm6, %v14332_v46 }
 0x3ae   : > { %2720 = vmatpush.msra.mxu0 %v2498_v53 }
 0x3b0   : > { %v9108_v18 = vpop.f32.mrf.mxu2  ;;  %v9112_v61 = vpop.f32.mrf.mxu3 }
 0x3b1   : > { %14338 = vst [vmem:[#allocation53_spill] sm:$0xff] %v9108_v18  ;;  %v9110_v23 = vpop.f32.mrf.mxu1  ;;  %v9114_v21 = vpop.f32.mrf.mxu0 }
 0x3b2   : > { %14339 = vst [vmem:[#allocation304_spill] sm:$0xff] %v9110_v23 }
 0x3b3   : > { %14340 = vst [vmem:[#allocation305_spill] sm:$0xff] %v9112_v61 }
 0x3b4   : > { %14341 = vst [vmem:[#allocation306_spill] sm:$0xff] %v9114_v21  ;;  %6508 = vmatmul.msk.f32.gmra.mxu1 %vm617_vm6, %v7778_v56  ;;  %6461 = vmatmul.msk.f32.gmra.mxu0 %vm617_vm6, %v8056_v37 }
 0x3b5   : > { %6588 = vmatmul.msk.f32.gmra.mxu2 %vm617_vm6, %v14337_v50  ;;  %6652 = vmatmul.msk.f32.gmra.mxu3 %vm617_vm6, %v14337_v50 }
 0x3b8   : > { %v9127_v61 = vpop.f32.mrf.mxu2  ;;  %v9131_v10 = vpop.f32.mrf.mxu3 }
 0x3b9   : > { %14342 = vst [vmem:[#allocation307_spill] sm:$0xff] %v9127_v61  ;;  %v9129_v18 = vpop.f32.mrf.mxu1  ;;  %v9133_v21 = vpop.f32.mrf.mxu0 }
 0x3ba   : > { %14343 = vst [vmem:[#allocation308_spill] sm:$0xff] %v9129_v18  ;;  %v10919_v18 = vld [vmem:[%s9673_s8 + $0x1e8] sm:$0xff] }
 0x3bb   : > { %14344 = vst [vmem:[#allocation309_spill] sm:$0xff] %v9131_v10 }
 0x3bc   : > { %14345 = vst [vmem:[#allocation310_spill] sm:$0xff] %v9133_v21  ;;  %6509 = vmatmul.msk.f32.gmra.mxu1 %vm617_vm6, %v7795_v60  ;;  %6462 = vmatmul.msk.f32.gmra.mxu0 %vm617_vm6, %v8008_v5  ;;  %v2499_v60 = vld [vmem:[%s13998_s4 + $0x88] sm:$0xff] }
 0x3bd   : > { %6589 = vmatmul.msk.f32.gmra.mxu2 %vm617_vm6, %v8056_v37  ;;  %6653 = vmatmul.msk.f32.gmra.mxu3 %vm617_vm6, %v8056_v37 }
 0x3be   : > { %2929 = vmatpush.msrb.mxu1 %v2499_v60 }
 0x3c0   : > { %v9143_v56 = vpop.f32.mrf.mxu2  ;;  %v9147_v61 = vpop.f32.mrf.mxu3 }
 0x3c1   : > { %14346 = vst [vmem:[#allocation311_spill] sm:$0xff] %v9143_v56  ;;  %v9145_v53 = vpop.f32.mrf.mxu1  ;;  %v9149_v10 = vpop.f32.mrf.mxu0 }
 0x3c2   : > { %14347 = vst [vmem:[#allocation312_spill] sm:$0xff] %v9145_v53 }
 0x3c3   : > { %14348 = vst [vmem:[#allocation313_spill] sm:$0xff] %v9147_v61 }
 0x3c4   : > { %14349 = vst [vmem:[#allocation314_spill] sm:$0xff] %v9149_v10  ;;  %6510 = vmatmul.msk.f32.gmra.mxu1 %vm617_vm6, %v7756_v51  ;;  %6463 = vmatmul.msk.f32.gmra.mxu0 %vm617_vm6, %v8026_v7  ;;  %v2500_v51 = vld [vmem:[%s13998_s4 + $0x90] sm:$0xff] }
 0x3c5   : > { %6590 = vmatmul.msk.f32.gmra.mxu2 %vm617_vm6, %v8008_v5  ;;  %6654 = vmatmul.msk.f32.gmra.mxu3 %vm617_vm6, %v8008_v5 }
 0x3c6   : > { %3138 = vmatpush.msra.mxu2 %v2500_v51 }
 0x3c8   : > { %v9162_v21 = vpop.f32.mrf.mxu2  ;;  %v9166_v61 = vpop.f32.mrf.mxu3 }
 0x3c9   : > { %14350 = vst [vmem:[#allocation315_spill] sm:$0xff] %v9162_v21  ;;  %v9164_v10 = vpop.f32.mrf.mxu1  ;;  %v9168_v56 = vpop.f32.mrf.mxu0 }
 0x3ca   : > { %14351 = vst [vmem:[#allocation316_spill] sm:$0xff] %v9164_v10 }
 0x3cb   : > { %14352 = vst [vmem:[#allocation317_spill] sm:$0xff] %v9166_v61 }
 0x3cc   : > { %14353 = vst [vmem:[#allocation318_spill] sm:$0xff] %v9168_v56  ;;  %6511 = vmatmul.msk.f32.gmra.mxu1 %vm617_vm6, %v7774_v54  ;;  %6464 = vmatmul.msk.f32.gmra.mxu0 %vm617_vm6, %v8046_v8 }
 0x3cd   : > { %6591 = vmatmul.msk.f32.gmra.mxu2 %vm617_vm6, %v8026_v7  ;;  %6655 = vmatmul.msk.f32.gmra.mxu3 %vm617_vm6, %v8026_v7 }
 0x3d0   : > { %v9181_v60 = vpop.f32.mrf.mxu2  ;;  %v9185_v21 = vpop.f32.mrf.mxu3 }
 0x3d1   : > { %14354 = vst [vmem:[#allocation319_spill] sm:$0xff] %v9181_v60  ;;  %v9183_v61 = vpop.f32.mrf.mxu1  ;;  %v9187_v54 = vpop.f32.mrf.mxu0 }
 0x3d2   : > { %14355 = vst [vmem:[#allocation320_spill] sm:$0xff] %v9183_v61  ;;  %v9994_v61 = vld [vmem:[%s9673_s8 + $0x80] sm:$0xff] }
 0x3d3   : > { %14356 = vst [vmem:[#allocation321_spill] sm:$0xff] %v9185_v21 }
 0x3d4   : > { %14357 = vst [vmem:[#allocation322_spill] sm:$0xff] %v9187_v54  ;;  %6512 = vmatmul.msk.f32.gmra.mxu1 %vm617_vm6, %v7786_v57  ;;  %6465 = vmatmul.msk.f32.gmra.mxu0 %vm617_vm6, %v8072_v59  ;;  %v2501_v57 = vld [vmem:[%s13998_s4 + $0x98] sm:$0xff] }
 0x3d5   : > { %6592 = vmatmul.msk.f32.gmra.mxu2 %vm617_vm6, %v8046_v8  ;;  %6656 = vmatmul.msk.f32.gmra.mxu3 %vm617_vm6, %v8046_v8 }
 0x3d6   : > { %3347 = vmatpush.msra.mxu3 %v2501_v57 }
 0x3d8   : > { %v9197_v51 = vpop.f32.mrf.mxu2  ;;  %v9201_v56 = vpop.f32.mrf.mxu3 }
 0x3d9   : > { %14358 = vst [vmem:[#allocation323_spill] sm:$0xff] %v9197_v51  ;;  %v9199_v60 = vpop.f32.mrf.mxu1  ;;  %v9203_v21 = vpop.f32.mrf.mxu0 }
 0x3da   : > { %14359 = vst [vmem:[#allocation324_spill] sm:$0xff] %v9199_v60  ;;  %v10035_v60 = vld [vmem:[%s9673_s8 + $0x90] sm:$0xff] }
 0x3db   : > { %14360 = vst [vmem:[#allocation325_spill] sm:$0xff] %v9201_v56 }
 0x3dc   : > { %14361 = vst [vmem:[#allocation326_spill] sm:$0xff] %v9203_v21  ;;  %6513 = vmatmul.msk.f32.gmra.mxu1 %vm617_vm6, %v7805_v62  ;;  %6466 = vmatmul.msk.f32.gmra.mxu0 %vm617_vm6, %v8094_v1 }
 0x3dd   : > { %6593 = vmatmul.msk.f32.gmra.mxu2 %vm617_vm6, %v8072_v59  ;;  %6657 = vmatmul.msk.f32.gmra.mxu3 %vm617_vm6, %v8072_v59 }
 0x3e0   : > { %v9216_v56 = vpop.f32.mrf.mxu2  ;;  %v9220_v54 = vpop.f32.mrf.mxu3 }
 0x3e1   : > { %14362 = vst [vmem:[#allocation327_spill] sm:$0xff] %v9216_v56  ;;  %v9218_v51 = vpop.f32.mrf.mxu1  ;;  %v9222_v62 = vpop.f32.mrf.mxu0 }
 0x3e2   : > { %14363 = vst [vmem:[#allocation328_spill] sm:$0xff] %v9218_v51 }
 0x3e3   : > { %14364 = vst [vmem:[#allocation329_spill] sm:$0xff] %v9220_v54 }
 0x3e4   : > { %14365 = vst [vmem:[#allocation330_spill] sm:$0xff] %v9222_v62  ;;  %6514 = vmatmul.msk.f32.gmra.mxu1 %vm617_vm6, %v7826_v3  ;;  %6467 = vmatmul.msk.f32.gmra.mxu0 %vm617_vm6, %v8116_v17 }
 0x3e5   : > { %6594 = vmatmul.msk.f32.gmra.mxu2 %vm617_vm6, %v8094_v1  ;;  %6658 = vmatmul.msk.f32.gmra.mxu3 %vm617_vm6, %v8094_v1 }
 0x3e8   : > { %v9232_v57 = vpop.f32.mrf.mxu2  ;;  %v9236_v21 = vpop.f32.mrf.mxu3 }
 0x3e9   : > { %14366 = vst [vmem:[#allocation331_spill] sm:$0xff] %v9232_v57  ;;  %v9234_v56 = vpop.f32.mrf.mxu1  ;;  %v9238_v54 = vpop.f32.mrf.mxu0 }
 0x3ea   : > { %14367 = vst [vmem:[#allocation332_spill] sm:$0xff] %v9234_v56  ;;  %v10057_v56 = vld [vmem:[%s9673_s8 + $0x98] sm:$0xff] }
 0x3eb   : > { %14368 = vst [vmem:[#allocation333_spill] sm:$0xff] %v9236_v21 }
 0x3ec   : > { %14369 = vst [vmem:[#allocation334_spill] sm:$0xff] %v9238_v54  ;;  %6515 = vmatmul.msk.f32.gmra.mxu1 %vm617_vm6, %v7851_v9  ;;  %6468 = vmatmul.msk.f32.gmra.mxu0 %vm617_vm6, %v8136_v15 }
 0x3ed   : > { %6595 = vmatmul.msk.f32.gmra.mxu2 %vm617_vm6, %v8116_v17  ;;  %6659 = vmatmul.msk.f32.gmra.mxu3 %vm617_vm6, %v8116_v17 }
 0x3f0   : > { %v9248_v3 = vpop.f32.mrf.mxu2  ;;  %v9252_v62 = vpop.f32.mrf.mxu3 }
 0x3f1   : > { %14370 = vst [vmem:[#allocation335_spill] sm:$0xff] %v9248_v3  ;;  %v9250_v57 = vpop.f32.mrf.mxu1  ;;  %v9254_v21 = vpop.f32.mrf.mxu0 }
 0x3f2   : > { %14371 = vst [vmem:[#allocation336_spill] sm:$0xff] %v9250_v57 }
 0x3f3   : > { %14372 = vst [vmem:[#allocation337_spill] sm:$0xff] %v9252_v62 }
 0x3f4   : > { %14373 = vst [vmem:[#allocation338_spill] sm:$0xff] %v9254_v21  ;;  %6516 = vmatmul.msk.f32.gmra.mxu1 %vm617_vm6, %v7872_v16  ;;  %6469 = vmatmul.msk.f32.gmra.mxu0 %vm617_vm6, %v8160_v49 }
 0x3f5   : > { %6596 = vmatmul.msk.f32.gmra.mxu2 %vm617_vm6, %v8136_v15  ;;  %6660 = vmatmul.msk.f32.gmra.mxu3 %vm617_vm6, %v8136_v15 }
 0x3f8   : > { %v9264_v9 = vpop.f32.mrf.mxu2  ;;  %v9268_v54 = vpop.f32.mrf.mxu3 }
 0x3f9   : > { %14374 = vst [vmem:[#allocation339_spill] sm:$0xff] %v9264_v9  ;;  %v9266_v3 = vpop.f32.mrf.mxu1  ;;  %v9270_v62 = vpop.f32.mrf.mxu0 }
 0x3fa   : > { %14375 = vst [vmem:[#allocation340_spill] sm:$0xff] %v9266_v3 }
 0x3fb   : > { %14376 = vst [vmem:[#allocation341_spill] sm:$0xff] %v9268_v54 }
 0x3fc   : > { %14377 = vst [vmem:[#allocation342_spill] sm:$0xff] %v9270_v62  ;;  %6517 = vmatmul.msk.f32.gmra.mxu1 %vm617_vm6, %v7892_v40  ;;  %6470 = vmatmul.msk.f32.gmra.mxu0 %vm617_vm6, %v8182_v36 }
 0x3fd   : > { %6597 = vmatmul.msk.f32.gmra.mxu2 %vm617_vm6, %v8160_v49  ;;  %6661 = vmatmul.msk.f32.gmra.mxu3 %vm617_vm6, %v8160_v49 }
 0x400   : > { %v9280_v16 = vpop.f32.mrf.mxu2  ;;  %v9284_v21 = vpop.f32.mrf.mxu3 }
 0x401   : > { %14378 = vst [vmem:[#allocation343_spill] sm:$0xff] %v9280_v16  ;;  %v9282_v9 = vpop.f32.mrf.mxu1  ;;  %v9286_v54 = vpop.f32.mrf.mxu0 }
 0x402   : > { %14379 = vst [vmem:[#allocation344_spill] sm:$0xff] %v9282_v9  ;;  %v10076_v9 = vld [vmem:[%s9673_s8 + $0xa0] sm:$0xff] }
 0x403   : > { %14380 = vst [vmem:[#allocation345_spill] sm:$0xff] %v9284_v21 }
 0x404   : > { %14381 = vst [vmem:[#allocation346_spill] sm:$0xff] %v9286_v54  ;;  %6518 = vmatmul.msk.f32.gmra.mxu1 %vm617_vm6, %v7910_v63  ;;  %6471 = vmatmul.msk.f32.gmra.mxu0 %vm617_vm6, %v8204_v12 }
 0x405   : > { %6598 = vmatmul.msk.f32.gmra.mxu2 %vm617_vm6, %v8182_v36  ;;  %6662 = vmatmul.msk.f32.gmra.mxu3 %vm617_vm6, %v8182_v36 }
 0x408   : > { %v9296_v40 = vpop.f32.mrf.mxu2  ;;  %v9300_v62 = vpop.f32.mrf.mxu3 }
 0x409   : > { %14382 = vst [vmem:[#allocation347_spill] sm:$0xff] %v9296_v40  ;;  %v9298_v16 = vpop.f32.mrf.mxu1  ;;  %v9302_v21 = vpop.f32.mrf.mxu0 }
 0x40a   : > { %14383 = vst [vmem:[#allocation348_spill] sm:$0xff] %v9298_v16 }
 0x40b   : > { %14384 = vst [vmem:[#allocation349_spill] sm:$0xff] %v9300_v62 }
 0x40c   : > { %14385 = vst [vmem:[#allocation350_spill] sm:$0xff] %v9302_v21  ;;  %6519 = vmatmul.msk.f32.gmra.mxu1 %vm617_vm6, %v14313_v35  ;;  %6472 = vmatmul.msk.f32.gmra.mxu0 %vm617_vm6, %v8224_v2 }
 0x40d   : > { %6599 = vmatmul.msk.f32.gmra.mxu2 %vm617_vm6, %v8204_v12  ;;  %6663 = vmatmul.msk.f32.gmra.mxu3 %vm617_vm6, %v8204_v12 }
 0x410   : > { %v9312_v63 = vpop.f32.mrf.mxu2  ;;  %v9316_v54 = vpop.f32.mrf.mxu3 }
 0x411   : > { %14386 = vst [vmem:[#allocation351_spill] sm:$0xff] %v9312_v63  ;;  %v9314_v40 = vpop.f32.mrf.mxu1  ;;  %v9318_v62 = vpop.f32.mrf.mxu0 }
 0x412   : > { %14387 = vst [vmem:[#allocation352_spill] sm:$0xff] %v9314_v40 }
 0x413   : > { %14388 = vst [vmem:[#allocation353_spill] sm:$0xff] %v9316_v54 }
 0x414   : > { %14389 = vst [vmem:[#allocation354_spill] sm:$0xff] %v9318_v62  ;;  %6520 = vmatmul.msk.f32.gmra.mxu1 %vm617_vm6, %v7950_v14  ;;  %6473 = vmatmul.msk.f32.gmra.mxu0 %vm617_vm6, %v8248_v13 }
 0x415   : > { %6600 = vmatmul.msk.f32.gmra.mxu2 %vm617_vm6, %v8224_v2  ;;  %6664 = vmatmul.msk.f32.gmra.mxu3 %vm617_vm6, %v8224_v2 }
 0x418   : > { %v9328_v35 = vpop.f32.mrf.mxu2  ;;  %v9332_v21 = vpop.f32.mrf.mxu3 }
 0x419   : > { %14390 = vst [vmem:[#allocation355_spill] sm:$0xff] %v9328_v35  ;;  %v9330_v63 = vpop.f32.mrf.mxu1  ;;  %v9334_v54 = vpop.f32.mrf.mxu0 }
 0x41a   : > { %14391 = vst [vmem:[#allocation356_spill] sm:$0xff] %v9330_v63  ;;  %v10098_v63 = vld [vmem:[%s9673_s8 + $0xa8] sm:$0xff] }
 0x41b   : > { %14392 = vst [vmem:[#allocation357_spill] sm:$0xff] %v9332_v21 }
 0x41c   : > { %14393 = vst [vmem:[#allocation358_spill] sm:$0xff] %v9334_v54  ;;  %6521 = vmatmul.msk.f32.gmra.mxu1 %vm617_vm6, %v14322_v42  ;;  %6474 = vmatmul.msk.f32.gmra.mxu0 %vm617_vm6, %v8270_v48 }
 0x41d   : > { %6601 = vmatmul.msk.f32.gmra.mxu2 %vm617_vm6, %v8248_v13  ;;  %6665 = vmatmul.msk.f32.gmra.mxu3 %vm617_vm6, %v8248_v13 }
 0x420   : > { %v9344_v14 = vpop.f32.mrf.mxu2  ;;  %v9348_v62 = vpop.f32.mrf.mxu3 }
 0x421   : > { %14394 = vst [vmem:[#allocation359_spill] sm:$0xff] %v9344_v14  ;;  %v9346_v35 = vpop.f32.mrf.mxu1  ;;  %v9350_v21 = vpop.f32.mrf.mxu0 }
 0x422   : > { %14395 = vst [vmem:[#allocation360_spill] sm:$0xff] %v9346_v35 }
 0x423   : > { %14396 = vst [vmem:[#allocation361_spill] sm:$0xff] %v9348_v62 }
 0x424   : > { %14397 = vst [vmem:[#allocation362_spill] sm:$0xff] %v9350_v21  ;;  %6522 = vmatmul.msk.f32.gmra.mxu1 %vm617_vm6, %v14327_v44  ;;  %6475 = vmatmul.msk.f32.gmra.mxu0 %vm617_vm6, %v8292_v0 }
 0x425   : > { %6602 = vmatmul.msk.f32.gmra.mxu2 %vm617_vm6, %v8270_v48  ;;  %6666 = vmatmul.msk.f32.gmra.mxu3 %vm617_vm6, %v8270_v48 }
 0x428   : > { %v9360_v42 = vpop.f32.mrf.mxu2  ;;  %v9364_v54 = vpop.f32.mrf.mxu3 }
 0x429   : > { %14398 = vst [vmem:[#allocation363_spill] sm:$0xff] %v9360_v42  ;;  %v9362_v14 = vpop.f32.mrf.mxu1  ;;  %v9366_v62 = vpop.f32.mrf.mxu0 }
 0x42a   : > { %14399 = vst [vmem:[#allocation364_spill] sm:$0xff] %v9362_v14 }
 0x42b   : > { %14400 = vst [vmem:[#allocation365_spill] sm:$0xff] %v9364_v54 }
 0x42c   : > { %14401 = vst [vmem:[#allocation366_spill] sm:$0xff] %v9366_v62  ;;  %6523 = vmatmul.msk.f32.gmra.mxu1 %vm617_vm6, %v14332_v46  ;;  %6476 = vmatmul.msk.f32.gmra.mxu0 %vm617_vm6, %v8312_v4  ;;  %v2490_v46 = vld [vmem:[%s13998_s4 + $0x40] sm:$0xff] }
 0x42d   : > { %6603 = vmatmul.msk.f32.gmra.mxu2 %vm617_vm6, %v8292_v0  ;;  %6667 = vmatmul.msk.f32.gmra.mxu3 %vm617_vm6, %v8292_v0 }
 0x42e   : > { %2721 = vmatpush.msra.mxu0 %v2490_v46 }
 0x430   : > { %v9376_v44 = vpop.f32.mrf.mxu2  ;;  %v9380_v21 = vpop.f32.mrf.mxu3 }
 0x431   : > { %14402 = vst [vmem:[#allocation367_spill] sm:$0xff] %v9376_v44  ;;  %v9378_v42 = vpop.f32.mrf.mxu1  ;;  %v9382_v54 = vpop.f32.mrf.mxu0 }
 0x432   : > { %14403 = vst [vmem:[#allocation368_spill] sm:$0xff] %v9378_v42  ;;  %v10136_v42 = vld [vmem:[%s9673_s8 + $0xb8] sm:$0xff] }
 0x433   : > { %14404 = vst [vmem:[#allocation369_spill] sm:$0xff] %v9380_v21 }
 0x434   : > { %14405 = vst [vmem:[#allocation370_spill] sm:$0xff] %v9382_v54  ;;  %6524 = vmatmul.msk.f32.gmra.mxu1 %vm617_vm6, %v14337_v50  ;;  %6477 = vmatmul.msk.f32.gmra.mxu0 %vm617_vm6, %v8341_v19 }
 0x435   : > { %6604 = vmatmul.msk.f32.gmra.mxu2 %vm617_vm6, %v8312_v4  ;;  %6668 = vmatmul.msk.f32.gmra.mxu3 %vm617_vm6, %v8312_v4 }
 0x438   : > { %v9395_v21 = vpop.f32.mrf.mxu2  ;;  %v9399_v62 = vpop.f32.mrf.mxu3 }
 0x439   : > { %14406 = vst [vmem:[#allocation371_spill] sm:$0xff] %v9395_v21  ;;  %v9397_v44 = vpop.f32.mrf.mxu1  ;;  %v9401_v54 = vpop.f32.mrf.mxu0 }
 0x43a   : > { %14407 = vst [vmem:[#allocation372_spill] sm:$0xff] %v9397_v44 }
 0x43b   : > { %14408 = vst [vmem:[#allocation373_spill] sm:$0xff] %v9399_v62 }
 0x43c   : > { %14409 = vst [vmem:[#allocation374_spill] sm:$0xff] %v9401_v54  ;;  %6525 = vmatmul.msk.f32.gmra.mxu1 %vm617_vm6, %v8056_v37  ;;  %6478 = vmatmul.msk.f32.gmra.mxu0 %vm617_vm6, %v7621_v20  ;;  %v2491_v37 = vld [vmem:[%s13998_s4 + $0x48] sm:$0xff] }
 0x43d   : > { %6605 = vmatmul.msk.f32.gmra.mxu2 %vm617_vm6, %v8341_v19  ;;  %6669 = vmatmul.msk.f32.gmra.mxu3 %vm617_vm6, %v8341_v19 }
 0x43e   : > { %2930 = vmatpush.msrb.mxu1 %v2491_v37 }
 0x440   : > { %v9411_v50 = vpop.f32.mrf.mxu2  ;;  %v9415_v21 = vpop.f32.mrf.mxu3 }
 0x441   : > { %14410 = vst [vmem:[#allocation375_spill] sm:$0xff] %v9411_v50  ;;  %v9413_v46 = vpop.f32.mrf.mxu1  ;;  %v9417_v62 = vpop.f32.mrf.mxu0 }
 0x442   : > { %14411 = vst [vmem:[#allocation376_spill] sm:$0xff] %v9413_v46 }
 0x443   : > { %14412 = vst [vmem:[#allocation377_spill] sm:$0xff] %v9415_v21 }
 0x444   : > { %14413 = vst [vmem:[#allocation378_spill] sm:$0xff] %v9417_v62  ;;  %6526 = vmatmul.msk.f32.gmra.mxu1 %vm617_vm6, %v8008_v5  ;;  %6479 = vmatmul.msk.f32.gmra.mxu0 %vm617_vm6, %v7631_v22  ;;  %v2492_v5 = vld [vmem:[%s13998_s4 + $0x50] sm:$0xff] }
 0x445   : > { %6606 = vmatmul.msk.f32.gmra.mxu2 %vm617_vm6, %v7621_v20  ;;  %6670 = vmatmul.msk.f32.gmra.mxu3 %vm617_vm6, %v7621_v20  ;;  %v10117_v62 = vld [vmem:[%s9673_s8 + $0xb0] sm:$0xff] }
 0x446   : > { %3139 = vmatpush.msra.mxu2 %v2492_v5 }
 0x448   : > { %v9430_v21 = vpop.f32.mrf.mxu2  ;;  %v9434_v46 = vpop.f32.mrf.mxu3 }
 0x449   : > { %14414 = vst [vmem:[#allocation379_spill] sm:$0xff] %v9430_v21  ;;  %v9432_v50 = vpop.f32.mrf.mxu1  ;;  %v9436_v53 = vpop.f32.mrf.mxu0 }
 0x44a   : > { %14415 = vst [vmem:[#allocation380_spill] sm:$0xff] %v9432_v50 }
 0x44b   : > { %14416 = vst [vmem:[#allocation381_spill] sm:$0xff] %v9434_v46 }
 0x44c   : > { %14417 = vst [vmem:[#allocation382_spill] sm:$0xff] %v9436_v53  ;;  %6527 = vmatmul.msk.f32.gmra.mxu1 %vm617_vm6, %v8026_v7  ;;  %6480 = vmatmul.msk.f32.gmra.mxu0 %vm617_vm6, %v7641_v24 }
 0x44d   : > { %6607 = vmatmul.msk.f32.gmra.mxu2 %vm617_vm6, %v7631_v22  ;;  %6671 = vmatmul.msk.f32.gmra.mxu3 %vm617_vm6, %v7631_v22 }
 0x450   : > { %v9449_v37 = vpop.f32.mrf.mxu2  ;;  %v9453_v46 = vpop.f32.mrf.mxu3 }
 0x451   : > { %14418 = vst [vmem:[#allocation383_spill] sm:$0xff] %v9449_v37  ;;  %v9451_v50 = vpop.f32.mrf.mxu1  ;;  %v9455_v7 = vpop.f32.mrf.mxu0 }
 0x452   : > { %14419 = vst [vmem:[#allocation384_spill] sm:$0xff] %v9451_v50 }
 0x453   : > { %14420 = vst [vmem:[#allocation385_spill] sm:$0xff] %v9453_v46 }
 0x454   : > { %14421 = vst [vmem:[#allocation386_spill] sm:$0xff] %v9455_v7  ;;  %6528 = vmatmul.msk.f32.gmra.mxu1 %vm617_vm6, %v8046_v8  ;;  %6481 = vmatmul.msk.f32.gmra.mxu0 %vm617_vm6, %v7651_v26  ;;  %v2493_v8 = vld [vmem:[%s13998_s4 + $0x58] sm:$0xff] }
 0x455   : > { %6608 = vmatmul.msk.f32.gmra.mxu2 %vm617_vm6, %v7641_v24  ;;  %6672 = vmatmul.msk.f32.gmra.mxu3 %vm617_vm6, %v7641_v24 }
 0x456   : > { %3348 = vmatpush.msra.mxu3 %v2493_v8 }
 0x458   : > { %v9465_v5 = vpop.f32.mrf.mxu2  ;;  %v9469_v50 = vpop.f32.mrf.mxu3 }
 0x459   : > { %14422 = vst [vmem:[#allocation387_spill] sm:$0xff] %v9465_v5  ;;  %v9467_v21 = vpop.f32.mrf.mxu1  ;;  %v9471_v46 = vpop.f32.mrf.mxu0 }
 0x45a   : > { %14423 = vst [vmem:[#allocation388_spill] sm:$0xff] %v9467_v21 }
 0x45b   : > { %14424 = vst [vmem:[#allocation389_spill] sm:$0xff] %v9469_v50 }
 0x45c   : > { %14425 = vst [vmem:[#allocation390_spill] sm:$0xff] %v9471_v46  ;;  %6529 = vmatmul.msk.f32.gmra.mxu1 %vm617_vm6, %v8072_v59  ;;  %6482 = vmatmul.msk.f32.gmra.mxu0 %vm617_vm6, %v7661_v28  ;;  %v10155_v46 = vld [vmem:[%s9673_s8 + $0xc0] sm:$0xff] }
 0x45d   : > { %6609 = vmatmul.msk.f32.gmra.mxu2 %vm617_vm6, %v7651_v26  ;;  %6673 = vmatmul.msk.f32.gmra.mxu3 %vm617_vm6, %v7651_v26 }
 0x460   : > { %v9484_v21 = vpop.f32.mrf.mxu2  ;;  %v9488_v37 = vpop.f32.mrf.mxu3 }
 0x461   : > { %14426 = vst [vmem:[#allocation391_spill] sm:$0xff] %v9484_v21  ;;  %v9486_v50 = vpop.f32.mrf.mxu1  ;;  %v9490_v59 = vpop.f32.mrf.mxu0 }
 0x462   : > { %14427 = vst [vmem:[#allocation392_spill] sm:$0xff] %v9486_v50 }
 0x463   : > { %14428 = vst [vmem:[#allocation393_spill] sm:$0xff] %v9488_v37 }
 0x464   : > { %14429 = vst [vmem:[#allocation394_spill] sm:$0xff] %v9490_v59  ;;  %6530 = vmatmul.msk.f32.gmra.mxu1 %vm617_vm6, %v8094_v1  ;;  %6483 = vmatmul.msk.f32.gmra.mxu0 %vm617_vm6, %v7671_v30 }
 0x465   : > { %6610 = vmatmul.msk.f32.gmra.mxu2 %vm617_vm6, %v7661_v28  ;;  %6674 = vmatmul.msk.f32.gmra.mxu3 %vm617_vm6, %v7661_v28 }
 0x468   : > { %v9500_v8 = vpop.f32.mrf.mxu2  ;;  %v9504_v50 = vpop.f32.mrf.mxu3 }
 0x469   : > { %14430 = vst [vmem:[#allocation395_spill] sm:$0xff] %v9500_v8  ;;  %v9502_v5 = vpop.f32.mrf.mxu1  ;;  %v9506_v37 = vpop.f32.mrf.mxu0 }
 0x46a   : > { %14431 = vst [vmem:[#allocation396_spill] sm:$0xff] %v9502_v5 }
 0x46b   : > { %14432 = vst [vmem:[#allocation397_spill] sm:$0xff] %v9504_v50 }
 0x46c   : > { %14433 = vst [vmem:[#allocation398_spill] sm:$0xff] %v9506_v37  ;;  %6531 = vmatmul.msk.f32.gmra.mxu1 %vm617_vm6, %v8116_v17  ;;  %6484 = vmatmul.msk.f32.gmra.mxu0 %vm617_vm6, %v7681_v32 }
 0x46d   : > { %6611 = vmatmul.msk.f32.gmra.mxu2 %vm617_vm6, %v7671_v30  ;;  %6675 = vmatmul.msk.f32.gmra.mxu3 %vm617_vm6, %v7671_v30 }
 0x470   : > { %v9516_v1 = vpop.f32.mrf.mxu2  ;;  %v9520_v5 = vpop.f32.mrf.mxu3 }
 0x471   : > { %14434 = vst [vmem:[#allocation399_spill] sm:$0xff] %v9516_v1  ;;  %v9518_v21 = vpop.f32.mrf.mxu1  ;;  %v9522_v50 = vpop.f32.mrf.mxu0 }
 0x472   : > { %14435 = vst [vmem:[#allocation400_spill] sm:$0xff] %v9518_v21 }
 0x473   : > { %14436 = vst [vmem:[#allocation401_spill] sm:$0xff] %v9520_v5 }
 0x474   : > { %14437 = vst [vmem:[#allocation402_spill] sm:$0xff] %v9522_v50  ;;  %6532 = vmatmul.msk.f32.gmra.mxu1 %vm617_vm6, %v8136_v15  ;;  %6485 = vmatmul.msk.f32.gmra.mxu0 %vm617_vm6, %v7691_v34  ;;  %v10174_v50 = vld [vmem:[%s9673_s8 + $0xc8] sm:$0xff] }
 0x475   : > { %6612 = vmatmul.msk.f32.gmra.mxu2 %vm617_vm6, %v7681_v32  ;;  %6676 = vmatmul.msk.f32.gmra.mxu3 %vm617_vm6, %v7681_v32 }
 0x478   : > { %v9532_v17 = vpop.f32.mrf.mxu2  ;;  %v9536_v21 = vpop.f32.mrf.mxu3 }
 0x479   : > { %14438 = vst [vmem:[#allocation403_spill] sm:$0xff] %v9532_v17  ;;  %v9534_v8 = vpop.f32.mrf.mxu1  ;;  %v9538_v5 = vpop.f32.mrf.mxu0 }
 0x47a   : > { %14439 = vst [vmem:[#allocation404_spill] sm:$0xff] %v9534_v8 }
 0x47b   : > { %14440 = vst [vmem:[#allocation405_spill] sm:$0xff] %v9536_v21 }
 0x47c   : > { %14441 = vst [vmem:[#allocation406_spill] sm:$0xff] %v9538_v5  ;;  %6533 = vmatmul.msk.f32.gmra.mxu1 %vm617_vm6, %v8160_v49  ;;  %6486 = vmatmul.msk.f32.gmra.mxu0 %vm617_vm6, %v7704_v38 }
 0x47d   : > { %6613 = vmatmul.msk.f32.gmra.mxu2 %vm617_vm6, %v7691_v34  ;;  %6677 = vmatmul.msk.f32.gmra.mxu3 %vm617_vm6, %v7691_v34 }
 0x480   : > { %v9548_v15 = vpop.f32.mrf.mxu2  ;;  %v9552_v8 = vpop.f32.mrf.mxu3 }
 0x481   : > { %14442 = vst [vmem:[#allocation407_spill] sm:$0xff] %v9548_v15  ;;  %v9550_v1 = vpop.f32.mrf.mxu1  ;;  %v9554_v21 = vpop.f32.mrf.mxu0 }
 0x482   : > { %14443 = vst [vmem:[#allocation408_spill] sm:$0xff] %v9550_v1 }
 0x483   : > { %14444 = vst [vmem:[#allocation409_spill] sm:$0xff] %v9552_v8 }
 0x484   : > { %14445 = vst [vmem:[#allocation410_spill] sm:$0xff] %v9554_v21  ;;  %6534 = vmatmul.msk.f32.gmra.mxu1 %vm617_vm6, %v8182_v36  ;;  %6487 = vmatmul.msk.f32.gmra.mxu0 %vm617_vm6, %v7716_v41 }
 0x485   : > { %6614 = vmatmul.msk.f32.gmra.mxu2 %vm617_vm6, %v7704_v38  ;;  %6678 = vmatmul.msk.f32.gmra.mxu3 %vm617_vm6, %v7704_v38 }
 0x488   : > { %v9564_v49 = vpop.f32.mrf.mxu2  ;;  %v9568_v1 = vpop.f32.mrf.mxu3 }
 0x489   : > { %14446 = vst [vmem:[#allocation411_spill] sm:$0xff] %v9564_v49  ;;  %v9566_v17 = vpop.f32.mrf.mxu1  ;;  %v9570_v8 = vpop.f32.mrf.mxu0 }
 0x48a   : > { %14447 = vst [vmem:[#allocation412_spill] sm:$0xff] %v9566_v17 }
 0x48b   : > { %14448 = vst [vmem:[#allocation413_spill] sm:$0xff] %v9568_v1 }
 0x48c   : > { %14449 = vst [vmem:[#allocation414_spill] sm:$0xff] %v9570_v8  ;;  %6535 = vmatmul.msk.f32.gmra.mxu1 %vm617_vm6, %v8204_v12  ;;  %6488 = vmatmul.msk.f32.gmra.mxu0 %vm617_vm6, %v7726_v43  ;;  %v10193_v8 = vld [vmem:[%s9673_s8 + $0xd0] sm:$0xff] }
 0x48d   : > { %6615 = vmatmul.msk.f32.gmra.mxu2 %vm617_vm6, %v7716_v41  ;;  %6679 = vmatmul.msk.f32.gmra.mxu3 %vm617_vm6, %v7716_v41 }
 0x490   : > { %v9580_v36 = vpop.f32.mrf.mxu2  ;;  %v9584_v17 = vpop.f32.mrf.mxu3 }
 0x491   : > { %14450 = vst [vmem:[#allocation415_spill] sm:$0xff] %v9580_v36  ;;  %v9582_v15 = vpop.f32.mrf.mxu1  ;;  %v9586_v1 = vpop.f32.mrf.mxu0 }
 0x492   : > { %14451 = vst [vmem:[#allocation416_spill] sm:$0xff] %v9582_v15 }
 0x493   : > { %14452 = vst [vmem:[#allocation417_spill] sm:$0xff] %v9584_v17 }
 0x494   : > { %14453 = vst [vmem:[#allocation418_spill] sm:$0xff] %v9586_v1  ;;  %6536 = vmatmul.msk.f32.gmra.mxu1 %vm617_vm6, %v8224_v2  ;;  %6489 = vmatmul.msk.f32.gmra.mxu0 %vm617_vm6, %v7736_v45  ;;  %v2482_v2 = vld [vmem:[%s13998_s4] sm:$0xff] }
 0x495   : > { %6616 = vmatmul.msk.f32.gmra.mxu2 %vm617_vm6, %v7726_v43  ;;  %6680 = vmatmul.msk.f32.gmra.mxu3 %vm617_vm6, %v7726_v43  ;;  %v2502_v1 = vld [vmem:[%s13998_s4 + $0xa0] sm:$0xff] }
 0x496   : > { %2722 = vmatpush.msra.mxu0 %v2482_v2  ;;  %v2485_v2 = vld [vmem:[%s13998_s4 + $0x18] sm:$0xff] }
 0x497   : > { %3349 = vmatpush.msra.mxu3 %v2485_v2 }
 0x498   : > { %v9596_v12 = vpop.f32.mrf.mxu2  ;;  %v9600_v15 = vpop.f32.mrf.mxu3 }
 0x499   : > { %14454 = vst [vmem:[#allocation419_spill] sm:$0xff] %v9596_v12  ;;  %v9598_v49 = vpop.f32.mrf.mxu1  ;;  %v9602_v17 = vpop.f32.mrf.mxu0 }
 0x49a   : > { %14455 = vst [vmem:[#allocation420_spill] sm:$0xff] %v9598_v49 }
 0x49b   : > { %14456 = vst [vmem:[#allocation421_spill] sm:$0xff] %v9600_v15 }
 0x49c   : > { %14457 = vst [vmem:[#allocation422_spill] sm:$0xff] %v9602_v17  ;;  %6537 = vmatmul.msk.f32.gmra.mxu1 %vm617_vm6, %v8248_v13  ;;  %6490 = vmatmul.msk.f32.gmra.mxu0 %vm617_vm6, %v7746_v47  ;;  %v2484_v13 = vld [vmem:[%s13998_s4 + $0x10] sm:$0xff] }
 0x49d   : > { %6617 = vmatmul.msk.f32.gmra.mxu2 %vm617_vm6, %v7736_v45  ;;  %6681 = vmatmul.msk.f32.gmra.mxu3 %vm617_vm6, %v7736_v45 }
 0x49e   : > { %3140 = vmatpush.msra.mxu2 %v2484_v13 }
 0x4a0   : > { %v9615_v49 = vpop.f32.mrf.mxu2  ;;  %v9619_v36 = vpop.f32.mrf.mxu3 }
 0x4a1   : > { %14458 = vst [vmem:[#allocation423_spill] sm:$0xff] %v9615_v49  ;;  %v9617_v15 = vpop.f32.mrf.mxu1  ;;  %v9621_v12 = vpop.f32.mrf.mxu0 }
 0x4a2   : > { %14459 = vst [vmem:[#allocation424_spill] sm:$0xff] %v9617_v15 }
 0x4a3   : > { %14460 = vst [vmem:[#allocation425_spill] sm:$0xff] %v9619_v36 }
 0x4a4   : > { %14461 = vst [vmem:[#allocation426_spill] sm:$0xff] %v9621_v12  ;;  %6538 = vmatmul.msk.f32.gmra.mxu1 %vm617_vm6, %v8270_v48  ;;  %6491 = vmatmul.msk.f32.gmra.mxu0 %vm617_vm6, %v7764_v52  ;;  %v10213_v12 = vld [vmem:[%s9673_s8 + $0xd8] sm:$0xff] }
 0x4a5   : > { %6618 = vmatmul.msk.f32.gmra.mxu2 %vm617_vm6, %v7746_v47  ;;  %6682 = vmatmul.msk.f32.gmra.mxu3 %vm617_vm6, %v7746_v47 }
 0x4a8   : > { %v9637_v15 = vpop.f32.mrf.mxu2  ;;  %v9641_v49 = vpop.f32.mrf.mxu3 }
 0x4a9   : > { %14462 = vst [vmem:[#allocation427_spill] sm:$0xff] %v9637_v15  ;;  %v9639_v36 = vpop.f32.mrf.mxu1  ;;  %v9644_v10 = vpop.f32.mrf.mxu0 }
 0x4aa   : > { %14463 = vst [vmem:[#allocation428_spill] sm:$0xff] %v9639_v36 }
 0x4ab   : > { %14464 = vst [vmem:[#allocation429_spill] sm:$0xff] %v9641_v49 }
 0x4ac   : > { %14465 = vst [vmem:[#allocation430_spill] sm:$0xff] %v9644_v10  ;;  %6539 = vmatmul.msk.f32.gmra.mxu1 %vm617_vm6, %v8292_v0  ;;  %6492 = vmatmul.msk.f32.gmra.mxu0 %vm617_vm6, %v7776_v55  ;;  %v2494_v10 = vld [vmem:[%s13998_s4 + $0x60] sm:$0xff] }
 0x4ad   : > { %6619 = vmatmul.msk.f32.gmra.mxu2 %vm617_vm6, %v7764_v52  ;;  %6683 = vmatmul.msk.f32.gmra.mxu3 %vm617_vm6, %v7764_v52 }
 0x4b0   : > { %v9654_v48 = vpop.f32.mrf.mxu2  ;;  %v9658_v2 = vpop.f32.mrf.mxu3 }
 0x4b1   : > { %14466 = vst [vmem:[#allocation431_spill] sm:$0xff] %v9654_v48  ;;  %v9656_v13 = vpop.f32.mrf.mxu1  ;;  %v9660_v36 = vpop.f32.mrf.mxu0 }
 0x4b2   : > { %14467 = vst [vmem:[#allocation432_spill] sm:$0xff] %v9656_v13 }
 0x4b3   : > { %14468 = vst [vmem:[#allocation433_spill] sm:$0xff] %v9658_v2  ;;  %v9684_v2 = vld [vmem:[%s9673_s8] sm:$0xff] }
 0x4b4   : > { %14469 = vst [vmem:[#allocation434_spill] sm:$0xff] %v9660_v36  ;;  %6540 = vmatmul.msk.f32.gmra.mxu1 %vm617_vm6, %v8312_v4  ;;  %6493 = vmatmul.msk.f32.gmra.mxu0 %vm617_vm6, %v7788_v58 }
 0x4b5   : > { %6620 = vmatmul.msk.f32.gmra.mxu2 %vm617_vm6, %v7776_v55  ;;  %6684 = vmatmul.msk.f32.gmra.mxu3 %vm617_vm6, %v7776_v55 }
 0x4b8   : > { %v9675_v0 = vpop.f32.mrf.mxu2  ;;  %v9679_v13 = vpop.f32.mrf.mxu3 }
 0x4b9   : > { %14470 = vst [vmem:[#allocation435_spill] sm:$0xff] %v9675_v0  ;;  %v9677_v4 = vpop.f32.mrf.mxu1  ;;  %v9681_v49 = vpop.f32.mrf.mxu0  ;;  %v9703_v0 = vld [vmem:[%s9673_s8 + $0x8] sm:$0xff] }
 0x4ba   : > { %14471 = vst [vmem:[#allocation436_spill] sm:$0xff] %v9677_v4 }
 0x4bb   : > { %14472 = vst [vmem:[#allocation437_spill] sm:$0xff] %v9679_v13 }
 0x4bc   : > { %14473 = vst [vmem:[#allocation438_spill] sm:$0xff] %v9681_v49  ;;  %6541 = vmatmul.msk.f32.gmra.mxu1 %vm617_vm6, %v8341_v19  ;;  %6686 = vmatmul.msk.f32.vlgmr.msra.gmra.mxu0 %vm2514_vm9, %v9684_v2  ;;  %v2483_v19 = vld [vmem:[%s13998_s4 + $0x8] sm:$0xff] }
 0x4bd   : > { %6621 = vmatmul.msk.f32.gmra.mxu2 %vm617_vm6, %v7788_v58  ;;  %6685 = vmatmul.msk.f32.gmra.mxu3 %vm617_vm6, %v7788_v58 }
 0x4be   : > { %2931 = vmatpush.msrb.mxu1 %v2483_v19 }
 0x4c0   : > { %v9694_v4 = vpop.f32.mrf.mxu2  ;;  %v9698_v15 = vpop.f32.mrf.mxu3 }
 0x4c1   : > { %14474 = vst [vmem:[#allocation439_spill] sm:$0xff] %v9694_v4  ;;  %v9696_v13 = vpop.f32.mrf.mxu1  ;;  %v9700_v48 = vpop.f32.mrf.mxu0 }
 0x4c2   : > { %14475 = vst [vmem:[#allocation440_spill] sm:$0xff] %v9696_v13 }
 0x4c3   : > { %14476 = vst [vmem:[#allocation441_spill] sm:$0xff] %v9698_v15 }
 0x4c4   : > { %14477 = vst [vmem:[#allocation442_spill] sm:$0xff] %v9700_v48  ;;  %6542 = vmatmul.msk.f32.gmra.mxu1 %vm617_vm6, %v7621_v20  ;;  %6687 = vmatmul.msk.f32.gmra.mxu0 %vm2514_vm9, %v9703_v0  ;;  %v9725_v20 = vld [vmem:[%s9673_s8 + $0x10] sm:$0xff]  ;;  %v9744_v48 = vld [vmem:[%s9673_s8 + $0x18] sm:$0xff] }
 0x4c5   : > { %6814 = vmatmul.msk.f32.vlgmr.msra.gmra.mxu2 %vm2514_vm9, %v9684_v2  ;;  %6878 = vmatmul.msk.f32.vlgmr.msra.gmra.mxu3 %vm2514_vm9, %v9684_v2 }
 0x4c8   : > { %v9716_v15 = vpop.f32.mrf.mxu2  ;;  %v9720_v13 = vpop.f32.mrf.mxu3 }
 0x4c9   : > { %14478 = vst [vmem:[#allocation443_spill] sm:$0xff] %v9716_v15  ;;  %v9718_v4 = vpop.f32.mrf.mxu1  ;;  %v9722_v49 = vpop.f32.mrf.mxu0 }
 0x4ca   : > { %14479 = vst [vmem:[#allocation444_spill] sm:$0xff] %v9718_v4 }
 0x4cb   : > { %14480 = vst [vmem:[#allocation445_spill] sm:$0xff] %v9720_v13 }
 0x4cc   : > { %14481 = vst [vmem:[#allocation446_spill] sm:$0xff] %v9722_v49  ;;  %6543 = vmatmul.msk.f32.gmra.mxu1 %vm617_vm6, %v7631_v22  ;;  %6688 = vmatmul.msk.f32.gmra.mxu0 %vm2514_vm9, %v9725_v20  ;;  %v9763_v49 = vld [vmem:[%s9673_s8 + $0x20] sm:$0xff] }
 0x4cd   : > { %6815 = vmatmul.msk.f32.gmra.mxu2 %vm2514_vm9, %v9703_v0  ;;  %6879 = vmatmul.msk.f32.gmra.mxu3 %vm2514_vm9, %v9703_v0 }
 0x4d0   : > { %v9735_v19 = vpop.f32.mrf.mxu2  ;;  %v9739_v15 = vpop.f32.mrf.mxu3 }
 0x4d1   : > { %14482 = vst [vmem:[#allocation447_spill] sm:$0xff] %v9735_v19  ;;  %v9737_v13 = vpop.f32.mrf.mxu1  ;;  %v9741_v4 = vpop.f32.mrf.mxu0 }
 0x4d2   : > { %14483 = vst [vmem:[#allocation448_spill] sm:$0xff] %v9737_v13 }
 0x4d3   : > { %14484 = vst [vmem:[#allocation449_spill] sm:$0xff] %v9739_v15 }
 0x4d4   : > { %14485 = vst [vmem:[#allocation450_spill] sm:$0xff] %v9741_v4  ;;  %6544 = vmatmul.msk.f32.gmra.mxu1 %vm617_vm6, %v7641_v24  ;;  %6689 = vmatmul.msk.f32.gmra.mxu0 %vm2514_vm9, %v9744_v48  ;;  %v9782_v4 = vld [vmem:[%s9673_s8 + $0x28] sm:$0xff] }
 0x4d5   : > { %6816 = vmatmul.msk.f32.gmra.mxu2 %vm2514_vm9, %v9725_v20  ;;  %6880 = vmatmul.msk.f32.gmra.mxu3 %vm2514_vm9, %v9725_v20 }
 0x4d8   : > { %v9754_v22 = vpop.f32.mrf.mxu2  ;;  %v9758_v19 = vpop.f32.mrf.mxu3 }
 0x4d9   : > { %14486 = vst [vmem:[#allocation451_spill] sm:$0xff] %v9754_v22  ;;  %v9756_v15 = vpop.f32.mrf.mxu1  ;;  %v9760_v13 = vpop.f32.mrf.mxu0 }
 0x4da   : > { %14487 = vst [vmem:[#allocation452_spill] sm:$0xff] %v9756_v15 }
 0x4db   : > { %14488 = vst [vmem:[#allocation453_spill] sm:$0xff] %v9758_v19 }
 0x4dc   : > { %14489 = vst [vmem:[#allocation454_spill] sm:$0xff] %v9760_v13  ;;  %6545 = vmatmul.msk.f32.gmra.mxu1 %vm617_vm6, %v7651_v26  ;;  %6690 = vmatmul.msk.f32.gmra.mxu0 %vm2514_vm9, %v9763_v49  ;;  %v9801_v13 = vld [vmem:[%s9673_s8 + $0x30] sm:$0xff] }
 0x4dd   : > { %6817 = vmatmul.msk.f32.gmra.mxu2 %vm2514_vm9, %v9744_v48  ;;  %6881 = vmatmul.msk.f32.gmra.mxu3 %vm2514_vm9, %v9744_v48 }
 0x4e0   : > { %v9773_v24 = vpop.f32.mrf.mxu2  ;;  %v9777_v22 = vpop.f32.mrf.mxu3 }
 0x4e1   : > { %14490 = vst [vmem:[#allocation455_spill] sm:$0xff] %v9773_v24  ;;  %v9775_v19 = vpop.f32.mrf.mxu1  ;;  %v9779_v15 = vpop.f32.mrf.mxu0 }
 0x4e2   : > { %14491 = vst [vmem:[#allocation456_spill] sm:$0xff] %v9775_v19 }
 0x4e3   : > { %14492 = vst [vmem:[#allocation457_spill] sm:$0xff] %v9777_v22 }
 0x4e4   : > { %14493 = vst [vmem:[#allocation458_spill] sm:$0xff] %v9779_v15  ;;  %6546 = vmatmul.msk.f32.gmra.mxu1 %vm617_vm6, %v7661_v28  ;;  %6691 = vmatmul.msk.f32.gmra.mxu0 %vm2514_vm9, %v9782_v4  ;;  %v9820_v15 = vld [vmem:[%s9673_s8 + $0x38] sm:$0xff] }
 0x4e5   : > { %6818 = vmatmul.msk.f32.gmra.mxu2 %vm2514_vm9, %v9763_v49  ;;  %6882 = vmatmul.msk.f32.gmra.mxu3 %vm2514_vm9, %v9763_v49 }
 0x4e8   : > { %v9792_v26 = vpop.f32.mrf.mxu2  ;;  %v9796_v24 = vpop.f32.mrf.mxu3 }
 0x4e9   : > { %14494 = vst [vmem:[#allocation459_spill] sm:$0xff] %v9792_v26  ;;  %v9794_v22 = vpop.f32.mrf.mxu1  ;;  %v9798_v19 = vpop.f32.mrf.mxu0 }
 0x4ea   : > { %14495 = vst [vmem:[#allocation460_spill] sm:$0xff] %v9794_v22 }
 0x4eb   : > { %14496 = vst [vmem:[#allocation461_spill] sm:$0xff] %v9796_v24 }
 0x4ec   : > { %14497 = vst [vmem:[#allocation462_spill] sm:$0xff] %v9798_v19  ;;  %6547 = vmatmul.msk.f32.gmra.mxu1 %vm617_vm6, %v7671_v30  ;;  %6692 = vmatmul.msk.f32.gmra.mxu0 %vm2514_vm9, %v9801_v13  ;;  %v9839_v19 = vld [vmem:[%s9673_s8 + $0x40] sm:$0xff] }
 0x4ed   : > { %6819 = vmatmul.msk.f32.gmra.mxu2 %vm2514_vm9, %v9782_v4  ;;  %6883 = vmatmul.msk.f32.gmra.mxu3 %vm2514_vm9, %v9782_v4 }
 0x4f0   : > { %v9811_v28 = vpop.f32.mrf.mxu2  ;;  %v9815_v26 = vpop.f32.mrf.mxu3 }
 0x4f1   : > { %14498 = vst [vmem:[#allocation463_spill] sm:$0xff] %v9811_v28  ;;  %v9813_v24 = vpop.f32.mrf.mxu1  ;;  %v9817_v22 = vpop.f32.mrf.mxu0 }
 0x4f2   : > { %14499 = vst [vmem:[#allocation464_spill] sm:$0xff] %v9813_v24 }
 0x4f3   : > { %14500 = vst [vmem:[#allocation465_spill] sm:$0xff] %v9815_v26 }
 0x4f4   : > { %14501 = vst [vmem:[#allocation466_spill] sm:$0xff] %v9817_v22  ;;  %6548 = vmatmul.msk.f32.gmra.mxu1 %vm617_vm6, %v7681_v32  ;;  %6693 = vmatmul.msk.f32.gmra.mxu0 %vm2514_vm9, %v9820_v15  ;;  %v9858_v22 = vld [vmem:[%s9673_s8 + $0x48] sm:$0xff] }
 0x4f5   : > { %6820 = vmatmul.msk.f32.gmra.mxu2 %vm2514_vm9, %v9801_v13  ;;  %6884 = vmatmul.msk.f32.gmra.mxu3 %vm2514_vm9, %v9801_v13 }
 0x4f8   : > { %v9830_v30 = vpop.f32.mrf.mxu2  ;;  %v9834_v28 = vpop.f32.mrf.mxu3 }
 0x4f9   : > { %14502 = vst [vmem:[#allocation467_spill] sm:$0xff] %v9830_v30  ;;  %v9832_v26 = vpop.f32.mrf.mxu1  ;;  %v9836_v24 = vpop.f32.mrf.mxu0 }
 0x4fa   : > { %14503 = vst [vmem:[#allocation468_spill] sm:$0xff] %v9832_v26 }
 0x4fb   : > { %14504 = vst [vmem:[#allocation469_spill] sm:$0xff] %v9834_v28 }
 0x4fc   : > { %14505 = vst [vmem:[#allocation470_spill] sm:$0xff] %v9836_v24  ;;  %6549 = vmatmul.msk.f32.gmra.mxu1 %vm617_vm6, %v7691_v34  ;;  %6694 = vmatmul.msk.f32.gmra.mxu0 %vm2514_vm9, %v9839_v19  ;;  %v9877_v24 = vld [vmem:[%s9673_s8 + $0x50] sm:$0xff] }
 0x4fd   : > { %6821 = vmatmul.msk.f32.gmra.mxu2 %vm2514_vm9, %v9820_v15  ;;  %6885 = vmatmul.msk.f32.gmra.mxu3 %vm2514_vm9, %v9820_v15 }
 0x500   : > { %v9849_v32 = vpop.f32.mrf.mxu2  ;;  %v9853_v30 = vpop.f32.mrf.mxu3 }
 0x501   : > { %14506 = vst [vmem:[#allocation471_spill] sm:$0xff] %v9849_v32  ;;  %v9851_v28 = vpop.f32.mrf.mxu1  ;;  %v9855_v26 = vpop.f32.mrf.mxu0 }
 0x502   : > { %14507 = vst [vmem:[#allocation472_spill] sm:$0xff] %v9851_v28 }
 0x503   : > { %14508 = vst [vmem:[#allocation473_spill] sm:$0xff] %v9853_v30 }
 0x504   : > { %14509 = vst [vmem:[#allocation474_spill] sm:$0xff] %v9855_v26  ;;  %6550 = vmatmul.msk.f32.gmra.mxu1 %vm617_vm6, %v7704_v38  ;;  %6695 = vmatmul.msk.f32.gmra.mxu0 %vm2514_vm9, %v9858_v22  ;;  %v9896_v26 = vld [vmem:[%s9673_s8 + $0x58] sm:$0xff] }
 0x505   : > { %6822 = vmatmul.msk.f32.gmra.mxu2 %vm2514_vm9, %v9839_v19  ;;  %6886 = vmatmul.msk.f32.gmra.mxu3 %vm2514_vm9, %v9839_v19 }
 0x508   : > { %v9868_v34 = vpop.f32.mrf.mxu2  ;;  %v9872_v32 = vpop.f32.mrf.mxu3 }
 0x509   : > { %14510 = vst [vmem:[#allocation475_spill] sm:$0xff] %v9868_v34  ;;  %v9870_v30 = vpop.f32.mrf.mxu1  ;;  %v9874_v28 = vpop.f32.mrf.mxu0 }
 0x50a   : > { %14511 = vst [vmem:[#allocation476_spill] sm:$0xff] %v9870_v30 }
 0x50b   : > { %14512 = vst [vmem:[#allocation477_spill] sm:$0xff] %v9872_v32 }
 0x50c   : > { %14513 = vst [vmem:[#allocation478_spill] sm:$0xff] %v9874_v28  ;;  %6551 = vmatmul.msk.f32.gmra.mxu1 %vm617_vm6, %v7716_v41  ;;  %6696 = vmatmul.msk.f32.gmra.mxu0 %vm2514_vm9, %v9877_v24  ;;  %v9915_v28 = vld [vmem:[%s9673_s8 + $0x60] sm:$0xff] }
 0x50d   : > { %6823 = vmatmul.msk.f32.gmra.mxu2 %vm2514_vm9, %v9858_v22  ;;  %6887 = vmatmul.msk.f32.gmra.mxu3 %vm2514_vm9, %v9858_v22 }
 0x510   : > { %v9887_v38 = vpop.f32.mrf.mxu2  ;;  %v9891_v34 = vpop.f32.mrf.mxu3 }
 0x511   : > { %14514 = vst [vmem:[#allocation479_spill] sm:$0xff] %v9887_v38  ;;  %v9889_v32 = vpop.f32.mrf.mxu1  ;;  %v9893_v30 = vpop.f32.mrf.mxu0 }
 0x512   : > { %14515 = vst [vmem:[#allocation480_spill] sm:$0xff] %v9889_v32 }
 0x513   : > { %14516 = vst [vmem:[#allocation481_spill] sm:$0xff] %v9891_v34 }
 0x514   : > { %14517 = vst [vmem:[#allocation482_spill] sm:$0xff] %v9893_v30  ;;  %6552 = vmatmul.msk.f32.gmra.mxu1 %vm617_vm6, %v7726_v43  ;;  %6697 = vmatmul.msk.f32.gmra.mxu0 %vm2514_vm9, %v9896_v26  ;;  %v9934_v30 = vld [vmem:[%s9673_s8 + $0x68] sm:$0xff] }
 0x515   : > { %6824 = vmatmul.msk.f32.gmra.mxu2 %vm2514_vm9, %v9877_v24  ;;  %6888 = vmatmul.msk.f32.gmra.mxu3 %vm2514_vm9, %v9877_v24 }
 0x518   : > { %v9906_v41 = vpop.f32.mrf.mxu2  ;;  %v9910_v38 = vpop.f32.mrf.mxu3 }
 0x519   : > { %14518 = vst [vmem:[#allocation483_spill] sm:$0xff] %v9906_v41  ;;  %v9908_v34 = vpop.f32.mrf.mxu1  ;;  %v9912_v32 = vpop.f32.mrf.mxu0 }
 0x51a   : > { %14519 = vst [vmem:[#allocation484_spill] sm:$0xff] %v9908_v34 }
 0x51b   : > { %14520 = vst [vmem:[#allocation485_spill] sm:$0xff] %v9910_v38 }
 0x51c   : > { %14521 = vst [vmem:[#allocation486_spill] sm:$0xff] %v9912_v32  ;;  %6553 = vmatmul.msk.f32.gmra.mxu1 %vm617_vm6, %v7736_v45  ;;  %6698 = vmatmul.msk.f32.gmra.mxu0 %vm2514_vm9, %v9915_v28  ;;  %v9953_v32 = vld [vmem:[%s9673_s8 + $0x70] sm:$0xff] }
 0x51d   : > { %6825 = vmatmul.msk.f32.gmra.mxu2 %vm2514_vm9, %v9896_v26  ;;  %6889 = vmatmul.msk.f32.gmra.mxu3 %vm2514_vm9, %v9896_v26 }
 0x520   : > { %v9925_v43 = vpop.f32.mrf.mxu2  ;;  %v9929_v41 = vpop.f32.mrf.mxu3 }
 0x521   : > { %14522 = vst [vmem:[#allocation487_spill] sm:$0xff] %v9925_v43  ;;  %v9927_v38 = vpop.f32.mrf.mxu1  ;;  %v9931_v34 = vpop.f32.mrf.mxu0 }
 0x522   : > { %14523 = vst [vmem:[#allocation488_spill] sm:$0xff] %v9927_v38 }
 0x523   : > { %14524 = vst [vmem:[#allocation489_spill] sm:$0xff] %v9929_v41 }
 0x524   : > { %14525 = vst [vmem:[#allocation490_spill] sm:$0xff] %v9931_v34  ;;  %6554 = vmatmul.msk.f32.gmra.mxu1 %vm617_vm6, %v7746_v47  ;;  %6699 = vmatmul.msk.f32.gmra.mxu0 %vm2514_vm9, %v9934_v30  ;;  %v9972_v34 = vld [vmem:[%s9673_s8 + $0x78] sm:$0xff] }
 0x525   : > { %6826 = vmatmul.msk.f32.gmra.mxu2 %vm2514_vm9, %v9915_v28  ;;  %6890 = vmatmul.msk.f32.gmra.mxu3 %vm2514_vm9, %v9915_v28 }
 0x528   : > { %v9944_v45 = vpop.f32.mrf.mxu2  ;;  %v9948_v43 = vpop.f32.mrf.mxu3 }
 0x529   : > { %14526 = vst [vmem:[#allocation491_spill] sm:$0xff] %v9944_v45  ;;  %v9946_v41 = vpop.f32.mrf.mxu1  ;;  %v9950_v38 = vpop.f32.mrf.mxu0 }
 0x52a   : > { %14527 = vst [vmem:[#allocation492_spill] sm:$0xff] %v9946_v41 }
 0x52b   : > { %14528 = vst [vmem:[#allocation493_spill] sm:$0xff] %v9948_v43 }
 0x52c   : > { %14529 = vst [vmem:[#allocation494_spill] sm:$0xff] %v9950_v38  ;;  %6555 = vmatmul.msk.f32.gmra.mxu1 %vm617_vm6, %v7764_v52  ;;  %6700 = vmatmul.msk.f32.gmra.mxu0 %vm2514_vm9, %v9953_v32  ;;  %v2510_v52 = vld [vmem:[%s13998_s4 + $0xe0] sm:$0xff]  ;;  %v10013_v38 = vld [vmem:[%s9673_s8 + $0x88] sm:$0xff] }
 0x52d   : > { %6827 = vmatmul.msk.f32.gmra.mxu2 %vm2514_vm9, %v9934_v30  ;;  %6891 = vmatmul.msk.f32.gmra.mxu3 %vm2514_vm9, %v9934_v30 }
 0x52e   : > { %3555 = vmatpush.msrb.mxu0 %v2510_v52 }
 0x530   : > { %v9963_v47 = vpop.f32.mrf.mxu2  ;;  %v9967_v45 = vpop.f32.mrf.mxu3  ;;  %3556 = vmatpush.msrb.mxu0 %v2502_v1 }
 0x531   : > { %14530 = vst [vmem:[#allocation495_spill] sm:$0xff] %v9963_v47  ;;  %v9965_v43 = vpop.f32.mrf.mxu1  ;;  %v9969_v41 = vpop.f32.mrf.mxu0 }
 0x532   : > { %14531 = vst [vmem:[#allocation496_spill] sm:$0xff] %v9965_v43  ;;  %3557 = vmatpush.msrb.mxu0 %v2494_v10 }
 0x533   : > { %14532 = vst [vmem:[#allocation497_spill] sm:$0xff] %v9967_v45 }
 0x534   : > { %14533 = vst [vmem:[#allocation498_spill] sm:$0xff] %v9969_v41  ;;  %6556 = vmatmul.msk.f32.gmra.mxu1 %vm617_vm6, %v7776_v55  ;;  %6701 = vmatmul.msk.f32.gmra.mxu0 %vm2514_vm9, %v9972_v34 }
 0x535   : > { %6828 = vmatmul.msk.f32.gmra.mxu2 %vm2514_vm9, %v9953_v32  ;;  %6892 = vmatmul.msk.f32.gmra.mxu3 %vm2514_vm9, %v9953_v32 }
 0x538   : > { %v9985_v45 = vpop.f32.mrf.mxu2  ;;  %v9989_v55 = vpop.f32.mrf.mxu3 }
 0x539   : > { %14534 = vst [vmem:[#allocation499_spill] sm:$0xff] %v9985_v45  ;;  %v9987_v47 = vpop.f32.mrf.mxu1  ;;  %v9991_v43 = vpop.f32.mrf.mxu0 }
 0x53a   : > { %14535 = vst [vmem:[#allocation500_spill] sm:$0xff] %v9987_v47 }
 0x53b   : > { %14536 = vst [vmem:[#allocation501_spill] sm:$0xff] %v9989_v55 }
 0x53c   : > { %6557 = vmatmul.msk.f32.gmra.mxu1 %vm617_vm6, %v7788_v58  ;;  %6702 = vmatmul.msk.f32.gmra.mxu0 %vm2514_vm9, %v9994_v61  ;;  %v2511_v58 = vld [vmem:[%s13998_s4 + $0xe8] sm:$0xff] }
 0x53d   : > { %6829 = vmatmul.msk.f32.gmra.mxu2 %vm2514_vm9, %v9972_v34  ;;  %6893 = vmatmul.msk.f32.gmra.mxu3 %vm2514_vm9, %v9972_v34 }
 0x53e   : > { %3764 = vmatpush.msra.mxu1 %v2511_v58  ;;  %v2512_v58 = vld [vmem:[%s13998_s4 + $0xf0] sm:$0xff] }
 0x53f   : > { %3973 = vmatpush.msrb.mxu2 %v2512_v58 }
 0x540   : > { %v10004_v52 = vpop.f32.mrf.mxu2  ;;  %v10008_v45 = vpop.f32.mrf.mxu3 }
 0x541   : > { %14537 = vst [vmem:[#allocation502_spill] sm:$0xff] %v10004_v52  ;;  %v10006_v55 = vpop.f32.mrf.mxu1  ;;  %v10010_v47 = vpop.f32.mrf.mxu0 }
 0x542   : > { %14538 = vst [vmem:[#allocation503_spill] sm:$0xff] %v10006_v55 }
 0x543   : > { %14539 = vst [vmem:[#allocation504_spill] sm:$0xff] %v10008_v45 }
 0x544   : > { %6750 = vmatmul.msk.f32.vlgmr.msrb.gmra.mxu1 %vm2514_vm9, %v9684_v2  ;;  %6703 = vmatmul.msk.f32.gmra.mxu0 %vm2514_vm9, %v10013_v38 }
 0x545   : > { %6830 = vmatmul.msk.f32.gmra.mxu2 %vm2514_vm9, %v9994_v61  ;;  %6894 = vmatmul.msk.f32.gmra.mxu3 %vm2514_vm9, %v9994_v61 }
 0x548   : > { %v10026_v45 = vpop.f32.mrf.mxu2  ;;  %v10030_v2 = vpop.f32.mrf.mxu3 }
 0x549   : > { %14540 = vst [vmem:[#allocation505_spill] sm:$0xff] %v10026_v45  ;;  %v10028_v52 = vpop.f32.mrf.mxu1  ;;  %v10032_v55 = vpop.f32.mrf.mxu0 }
 0x54a   : > { %14541 = vst [vmem:[#allocation506_spill] sm:$0xff] %v10028_v52 }
 0x54b   : > { %14542 = vst [vmem:[#allocation507_spill] sm:$0xff] %v10030_v2  ;;  %v10236_v2 = vld [vmem:[%s9673_s8 + $0xe0] sm:$0xff] }
 0x54c   : > { %6751 = vmatmul.msk.f32.gmra.mxu1 %vm2514_vm9, %v9703_v0  ;;  %6704 = vmatmul.msk.f32.gmra.mxu0 %vm2514_vm9, %v10035_v60 }
 0x54d   : > { %6831 = vmatmul.msk.f32.gmra.mxu2 %vm2514_vm9, %v10013_v38  ;;  %6895 = vmatmul.msk.f32.gmra.mxu3 %vm2514_vm9, %v10013_v38 }
 0x550   : > { %v10048_v52 = vpop.f32.mrf.mxu2  ;;  %v10052_v0 = vpop.f32.mrf.mxu3 }
 0x551   : > { %14543 = vst [vmem:[#allocation508_spill] sm:$0xff] %v10048_v52  ;;  %v10050_v41 = vpop.f32.mrf.mxu1  ;;  %v10054_v51 = vpop.f32.mrf.mxu0 }
 0x552   : > { %14544 = vst [vmem:[#allocation509_spill] sm:$0xff] %v10050_v41 }
 0x553   : > { %14545 = vst [vmem:[#allocation510_spill] sm:$0xff] %v10052_v0 }
 0x554   : > { %6752 = vmatmul.msk.f32.gmra.mxu1 %vm2514_vm9, %v9725_v20  ;;  %6705 = vmatmul.msk.f32.gmra.mxu0 %vm2514_vm9, %v10057_v56  ;;  %v2513_v20 = vld [vmem:[%s13998_s4 + $0xf8] sm:$0xff] }
 0x555   : > { %6832 = vmatmul.msk.f32.gmra.mxu2 %vm2514_vm9, %v10035_v60  ;;  %6896 = vmatmul.msk.f32.gmra.mxu3 %vm2514_vm9, %v10035_v60 }
 0x556   : > { %4182 = vmatpush.msrb.mxu3 %v2513_v20 }
 0x558   : > { %v10067_v58 = vpop.f32.mrf.mxu2  ;;  %v10071_v57 = vpop.f32.mrf.mxu3 }
 0x559   : > { %14546 = vst [vmem:[#allocation511_spill] sm:$0xff] %v10067_v58  ;;  %v10069_v41 = vpop.f32.mrf.mxu1  ;;  %v10073_v3 = vpop.f32.mrf.mxu0 }
 0x55a   : > { %14547 = vst [vmem:[#allocation512_spill] sm:$0xff] %v10069_v41 }
 0x55b   : > { %14548 = vst [vmem:[#allocation513_spill] sm:$0xff] %v10071_v57 }
 0x55c   : > { %6753 = vmatmul.msk.f32.gmra.mxu1 %vm2514_vm9, %v9744_v48  ;;  %6706 = vmatmul.msk.f32.gmra.mxu0 %vm2514_vm9, %v10076_v9 }
 0x55d   : > { %6833 = vmatmul.msk.f32.gmra.mxu2 %vm2514_vm9, %v10057_v56  ;;  %6897 = vmatmul.msk.f32.gmra.mxu3 %vm2514_vm9, %v10057_v56 }
 0x560   : > { %v10089_v41 = vpop.f32.mrf.mxu2  ;;  %v10093_v48 = vpop.f32.mrf.mxu3 }
 0x561   : > { %14549 = vst [vmem:[#allocation514_spill] sm:$0xff] %v10089_v41  ;;  %v10091_v16 = vpop.f32.mrf.mxu1  ;;  %v10095_v40 = vpop.f32.mrf.mxu0  ;;  %v10310_v41 = vld [vmem:[%s9673_s8 + $0x100] sm:$0xff] }
 0x562   : > { %14550 = vst [vmem:[#allocation515_spill] sm:$0xff] %v10091_v16 }
 0x563   : > { %14551 = vst [vmem:[#allocation516_spill] sm:$0xff] %v10093_v48  ;;  %v10253_v48 = vld [vmem:[%s9673_s8 + $0xe8] sm:$0xff] }
 0x564   : > { %6754 = vmatmul.msk.f32.gmra.mxu1 %vm2514_vm9, %v9763_v49  ;;  %6707 = vmatmul.msk.f32.gmra.mxu0 %vm2514_vm9, %v10098_v63 }
 0x565   : > { %6834 = vmatmul.msk.f32.gmra.mxu2 %vm2514_vm9, %v10076_v9  ;;  %6898 = vmatmul.msk.f32.gmra.mxu3 %vm2514_vm9, %v10076_v9 }
 0x568   : > { %v10108_v20 = vpop.f32.mrf.mxu2  ;;  %v10112_v54 = vpop.f32.mrf.mxu3 }
 0x569   : > { %14552 = vst [vmem:[#allocation517_spill] sm:$0xff] %v10108_v20  ;;  %v10110_v16 = vpop.f32.mrf.mxu1  ;;  %v10114_v35 = vpop.f32.mrf.mxu0 }
 0x56a   : > { %14553 = vst [vmem:[#allocation518_spill] sm:$0xff] %v10110_v16 }
 0x56b   : > { %14554 = vst [vmem:[#allocation519_spill] sm:$0xff] %v10112_v54 }
 0x56c   : > { %6755 = vmatmul.msk.f32.gmra.mxu1 %vm2514_vm9, %v9782_v4  ;;  %6708 = vmatmul.msk.f32.gmra.mxu0 %vm2514_vm9, %v10117_v62 }
 0x56d   : > { %6835 = vmatmul.msk.f32.gmra.mxu2 %vm2514_vm9, %v10098_v63  ;;  %6899 = vmatmul.msk.f32.gmra.mxu3 %vm2514_vm9, %v10098_v63 }
 0x570   : > { %v10127_v49 = vpop.f32.mrf.mxu2  ;;  %v10131_v14 = vpop.f32.mrf.mxu3 }
 0x571   : > { %14555 = vst [vmem:[#allocation520_spill] sm:$0xff] %v10127_v49  ;;  %v10129_v16 = vpop.f32.mrf.mxu1  ;;  %v10133_v53 = vpop.f32.mrf.mxu0  ;;  %v10549_v49 = vld [vmem:[%s9673_s8 + $0x158] sm:$0xff] }
 0x572   : > { %14556 = vst [vmem:[#allocation521_spill] sm:$0xff] %v10129_v16 }
 0x573   : > { %14557 = vst [vmem:[#allocation522_spill] sm:$0xff] %v10131_v14 }
 0x574   : > { %6756 = vmatmul.msk.f32.gmra.mxu1 %vm2514_vm9, %v9801_v13  ;;  %6709 = vmatmul.msk.f32.gmra.mxu0 %vm2514_vm9, %v10136_v42 }
 0x575   : > { %6836 = vmatmul.msk.f32.gmra.mxu2 %vm2514_vm9, %v10117_v62  ;;  %6900 = vmatmul.msk.f32.gmra.mxu3 %vm2514_vm9, %v10117_v62 }
 0x578   : > { %v10146_v4 = vpop.f32.mrf.mxu2  ;;  %v10150_v7 = vpop.f32.mrf.mxu3 }
 0x579   : > { %14558 = vst [vmem:[#allocation523_spill] sm:$0xff] %v10146_v4  ;;  %v10148_v16 = vpop.f32.mrf.mxu1  ;;  %v10152_v44 = vpop.f32.mrf.mxu0  ;;  %v2487_v4 = vld [vmem:[%s13998_s4 + $0x28] sm:$0xff] }
 0x57a   : > { %14559 = vst [vmem:[#allocation524_spill] sm:$0xff] %v10148_v16 }
 0x57b   : > { %14560 = vst [vmem:[#allocation525_spill] sm:$0xff] %v10150_v7  ;;  %v10270_v7 = vld [vmem:[%s9673_s8 + $0xf0] sm:$0xff] }
 0x57c   : > { %6757 = vmatmul.msk.f32.gmra.mxu1 %vm2514_vm9, %v9820_v15  ;;  %6710 = vmatmul.msk.f32.gmra.mxu0 %vm2514_vm9, %v10155_v46 }
 0x57d   : > { %6837 = vmatmul.msk.f32.gmra.mxu2 %vm2514_vm9, %v10136_v42  ;;  %6901 = vmatmul.msk.f32.gmra.mxu3 %vm2514_vm9, %v10136_v42 }
 0x580   : > { %v10165_v13 = vpop.f32.mrf.mxu2  ;;  %v10169_v59 = vpop.f32.mrf.mxu3 }
 0x581   : > { %14561 = vst [vmem:[#allocation526_spill] sm:$0xff] %v10165_v13  ;;  %v10167_v16 = vpop.f32.mrf.mxu1  ;;  %v10171_v37 = vpop.f32.mrf.mxu0 }
 0x582   : > { %14562 = vst [vmem:[#allocation527_spill] sm:$0xff] %v10167_v16 }
 0x583   : > { %14563 = vst [vmem:[#allocation528_spill] sm:$0xff] %v10169_v59 }
 0x584   : > { %6758 = vmatmul.msk.f32.gmra.mxu1 %vm2514_vm9, %v9839_v19  ;;  %6711 = vmatmul.msk.f32.gmra.mxu0 %vm2514_vm9, %v10174_v50 }
 0x585   : > { %6838 = vmatmul.msk.f32.gmra.mxu2 %vm2514_vm9, %v10155_v46  ;;  %6902 = vmatmul.msk.f32.gmra.mxu3 %vm2514_vm9, %v10155_v46 }
 0x588   : > { %v10184_v15 = vpop.f32.mrf.mxu2  ;;  %v10188_v5 = vpop.f32.mrf.mxu3 }
 0x589   : > { %14564 = vst [vmem:[#allocation529_spill] sm:$0xff] %v10184_v15  ;;  %v10186_v16 = vpop.f32.mrf.mxu1  ;;  %v10190_v21 = vpop.f32.mrf.mxu0  ;;  %v10572_v15 = vld [vmem:[%s9673_s8 + $0x160] sm:$0xff] }
 0x58a   : > { %14565 = vst [vmem:[#allocation530_spill] sm:$0xff] %v10186_v16 }
 0x58b   : > { %14566 = vst [vmem:[#allocation531_spill] sm:$0xff] %v10188_v5 }
 0x58c   : > { %6759 = vmatmul.msk.f32.gmra.mxu1 %vm2514_vm9, %v9858_v22  ;;  %6712 = vmatmul.msk.f32.gmra.mxu0 %vm2514_vm9, %v10193_v8 }
 0x58d   : > { %6839 = vmatmul.msk.f32.gmra.mxu2 %vm2514_vm9, %v10174_v50  ;;  %6903 = vmatmul.msk.f32.gmra.mxu3 %vm2514_vm9, %v10174_v50 }
 0x590   : > { %v10203_v19 = vpop.f32.mrf.mxu2  ;;  %v10210_v17 = vpop.f32.mrf.mxu3 }
 0x591   : > { %14567 = vst [vmem:[#allocation532_spill] sm:$0xff] %v10203_v19  ;;  %v10205_v16 = vpop.f32.mrf.mxu1  ;;  %v2757_v22 = vpop.f32.mrf.mxu0  ;;  %v10589_v19 = vld [vmem:[%s9673_s8 + $0x168] sm:$0xff] }
 0x592   : > { %14568 = vst [vmem:[#allocation533_spill] sm:$0xff] %v10205_v16  ;;  %v2486_v16 = vld [vmem:[%s13998_s4 + $0x20] sm:$0xff] }
 0x593   : > { %14569 = vst [vmem:[#allocation534_spill] sm:$0xff] %v10210_v17  ;;  %3558 = vmatpush.msrb.mxu0 %v2486_v16  ;;  %v10287_v17 = vld [vmem:[%s9673_s8 + $0xf8] sm:$0xff] }
 0x594   : > { %6760 = vmatmul.msk.f32.gmra.mxu1 %vm2514_vm9, %v9877_v24  ;;  %6713 = vmatmul.msk.f32.gmra.mxu0 %vm2514_vm9, %v10213_v12 }
 0x595   : > { %6840 = vmatmul.msk.f32.gmra.mxu2 %vm2514_vm9, %v10193_v8  ;;  %6904 = vmatmul.msk.f32.gmra.mxu3 %vm2514_vm9, %v10193_v8 }
 0x598   : > { %v10229_v1 = vpop.f32.mrf.mxu2  ;;  %v10233_v10 = vpop.f32.mrf.mxu3 }
 0x599   : > { %14570 = vst [vmem:[#allocation535_spill] sm:$0xff] %v10229_v1  ;;  %v10231_v36 = vpop.f32.mrf.mxu1  ;;  %v2760_v24 = vpop.f32.mrf.mxu0 }
 0x59a   : > { %14571 = vst [vmem:[#allocation536_spill] sm:$0xff] %v10231_v36 }
 0x59b   : > { %14572 = vst [vmem:[#allocation537_spill] sm:$0xff] %v10233_v10  ;;  %v14582_v10 = vld [vmem:[#allocation59_spill] sm:$0xff] }
 0x59c   : > { %6761 = vmatmul.msk.f32.gmra.mxu1 %vm2514_vm9, %v9896_v26  ;;  %6714 = vmatmul.msk.f32.gmra.mxu0 %vm2514_vm9, %v10236_v2 }
 0x59d   : > { %6841 = vmatmul.msk.f32.gmra.mxu2 %vm2514_vm9, %v10213_v12  ;;  %6905 = vmatmul.msk.f32.gmra.mxu3 %vm2514_vm9, %v10213_v12 }
 0x5a0   : > { %v10246_v16 = vpop.f32.mrf.mxu2  ;;  %v10250_v0 = vpop.f32.mrf.mxu3 }
 0x5a1   : > { %14573 = vst [vmem:[#allocation538_spill] sm:$0xff] %v10246_v16  ;;  %v10248_v36 = vpop.f32.mrf.mxu1  ;;  %v2763_v57 = vpop.f32.mrf.mxu0  ;;  %v10606_v16 = vld [vmem:[%s9673_s8 + $0x170] sm:$0xff] }
 0x5a2   : > { %14574 = vst [vmem:[#allocation539_spill] sm:$0xff] %v10248_v36 }
 0x5a3   : > { %14575 = vst [vmem:[#allocation540_spill] sm:$0xff] %v10250_v0  ;;  %v14583_v0 = vld [vmem:[#allocation55_spill] sm:$0xff] }
 0x5a4   : > { %6762 = vmatmul.msk.f32.gmra.mxu1 %vm2514_vm9, %v9915_v28  ;;  %6715 = vmatmul.msk.f32.gmra.mxu0 %vm2514_vm9, %v10253_v48 }
 0x5a5   : > { %6842 = vmatmul.msk.f32.gmra.mxu2 %vm2514_vm9, %v10236_v2  ;;  %6906 = vmatmul.msk.f32.gmra.mxu3 %vm2514_vm9, %v10236_v2 }
 0x5a8   : > { %v10263_v26 = vpop.f32.mrf.mxu2  ;;  %v10267_v54 = vpop.f32.mrf.mxu3 }
 0x5a9   : > { %14576 = vst [vmem:[#allocation541_spill] sm:$0xff] %v10263_v26  ;;  %v10265_v36 = vpop.f32.mrf.mxu1  ;;  %v2766_v14 = vpop.f32.mrf.mxu0 }
 0x5aa   : > { %14577 = vst [vmem:[#allocation542_spill] sm:$0xff] %v10265_v36 }
 0x5ab   : > { %14578 = vst [vmem:[#allocation543_spill] sm:$0xff] %v10267_v54  ;;  %v4491_v54 = vmul.f32 %v2766_v14, %v14583_v0  ;;  %v14589_v14 = vld [vmem:[#allocation43_spill] sm:$0xff] }
 0x5ac   : > { %6763 = vmatmul.msk.f32.gmra.mxu1 %vm2514_vm9, %v9934_v30  ;;  %6716 = vmatmul.msk.f32.gmra.mxu0 %vm2514_vm9, %v10270_v7 }
 0x5ad   : > { %6843 = vmatmul.msk.f32.gmra.mxu2 %vm2514_vm9, %v10253_v48  ;;  %6907 = vmatmul.msk.f32.gmra.mxu3 %vm2514_vm9, %v10253_v48 }
 0x5b0   : > { %v10280_v28 = vpop.f32.mrf.mxu2  ;;  %v10284_v59 = vpop.f32.mrf.mxu3 }
 0x5b1   : > { %14579 = vst [vmem:[#allocation544_spill] sm:$0xff] %v10280_v28  ;;  %v10282_v36 = vpop.f32.mrf.mxu1  ;;  %v2769_v5 = vpop.f32.mrf.mxu0  ;;  %v10623_v28 = vld [vmem:[%s9673_s8 + $0x178] sm:$0xff] }
 0x5b2   : > { %14580 = vst [vmem:[#allocation545_spill] sm:$0xff] %v10282_v36  ;;  %v4499_v30 = vmul.f32 %v2769_v5, %v14582_v10  ;;  %v14584_v36 = vld [vmem:[#allocation51_spill] sm:$0xff] }
 0x5b3   : > { %14581 = vst [vmem:[#allocation546_spill] sm:$0xff] %v10284_v59  ;;  %v4483_v59 = vmul.f32 %v2763_v57, %v14584_v36  ;;  %v14588_v10 = vld [vmem:[#allocation47_spill] sm:$0xff]  ;;  %v4467_v57 = vmul.f32 %v2757_v22, %v14589_v14  ;;  %v14591_v36 = vld [vmem:[#allocation36_spill] sm:$0xff]  ;;  %v14595_v14 = vld [vmem:[#allocation29_spill] sm:$0xff] }
 0x5b4   : > { %6764 = vmatmul.msk.f32.gmra.mxu1 %vm2514_vm9, %v9953_v32  ;;  %6717 = vmatmul.msk.f32.gmra.mxu0 %vm2514_vm9, %v10287_v17  ;;  %v4475_v52 = vmul.f32 %v2760_v24, %v14588_v10  ;;  %v14594_v24 = vld [vmem:[#allocation33_spill] sm:$0xff] }
 0x5b5   : > { %6844 = vmatmul.msk.f32.gmra.mxu2 %vm2514_vm9, %v10270_v7  ;;  %6908 = vmatmul.msk.f32.gmra.mxu3 %vm2514_vm9, %v10270_v7 }
 0x5b6   : > { %4907 = vmatpush.msra.mxu0 %v4499_v30  ;;  %v4443_v30 = vmul.f32 %v10152_v44, %v14594_v24  ;;  %v14596_v44 = vld [vmem:[#allocation26_spill] sm:$0xff]  ;;  %v14600_v24 = vld [vmem:[#allocation20_spill] sm:$0xff] }
 0x5b8   : > { %4908 = vmatpush.msra.mxu0 %v4491_v54  ;;  %v10300_v45 = vpop.f32.mrf.mxu2  ;;  %v10304_v32 = vpop.f32.mrf.mxu3  ;;  %v14590_v54 = vld [vmem:[#allocation39_spill] sm:$0xff] }
 0x5b9   : > { %14585 = vst [vmem:[#allocation59_spill] sm:$0xff] %v10300_v45  ;;  %v10302_v5 = vpop.f32.mrf.mxu1  ;;  %v10307_v58 = vpop.f32.mrf.mxu0  ;;  %v14631_v45 = vld [vmem:[#allocation123_spill] sm:$0xff] }
 0x5ba   : > { %14586 = vst [vmem:[#allocation55_spill] sm:$0xff] %v10302_v5  ;;  %4909 = vmatpush.msra.mxu0 %v4483_v59  ;;  %v4459_v59 = vmul.f32 %v10190_v21, %v14590_v54  ;;  %v10336_v21 = vld [vmem:[%s9673_s8 + $0x108] sm:$0xff]  ;;  %v4427_v54 = vmul.f32 %v10114_v35, %v14596_v44  ;;  %v10366_v35 = vld [vmem:[%s9673_s8 + $0x110] sm:$0xff] }
 0x5bb   : > { %14587 = vst [vmem:[#allocation51_spill] sm:$0xff] %v10304_v32 }
 0x5bc   : > { %6765 = vmatmul.msk.f32.gmra.mxu1 %vm2514_vm9, %v9972_v34  ;;  %4910 = vmatpush.msra.mxu0 %v4475_v52  ;;  %v4451_v34 = vmul.f32 %v10171_v37, %v14591_v36  ;;  %v2503_v37 = vld [vmem:[%s13998_s4 + $0xa8] sm:$0xff] }
 0x5bd   : > { %6718 = vmatmul.msk.f32.gmra.mxu0 %vm2514_vm9, %v10310_v41  ;;  %6845 = vmatmul.msk.f32.gmra.mxu2 %vm2514_vm9, %v10287_v17 }
 0x5be   : > { %6909 = vmatmul.msk.f32.gmra.mxu3 %vm2514_vm9, %v10287_v17  ;;  %4911 = vmatpush.msra.mxu0 %v4467_v57  ;;  %v4435_v57 = vmul.f32 %v10133_v53, %v14595_v14  ;;  %v14601_v14 = vld [vmem:[#allocation17_spill] sm:$0xff] }
 0x5bf   : > { %3765 = vmatpush.msra.mxu1 %v2503_v37 }
 0x5c0   : > { %4912 = vmatpush.msra.mxu0 %v4459_v59  ;;  %v10325_v0 = vpop.f32.mrf.mxu2  ;;  %v10329_v22 = vpop.f32.mrf.mxu3 }
 0x5c1   : > { %14592 = vst [vmem:[#allocation47_spill] sm:$0xff] %v10325_v0  ;;  %v10327_v52 = vpop.f32.mrf.mxu1  ;;  %v10333_v10 = vpop.f32.mrf.mxu0 }
 0x5c2   : > { %14593 = vst [vmem:[#allocation43_spill] sm:$0xff] %v10329_v22  ;;  %4913 = vmatpush.msra.mxu0 %v4451_v34  ;;  %v10532_v22 = vld [vmem:[%s9673_s8 + $0x150] sm:$0xff] }
 0x5c4   : > { %6766 = vmatmul.msk.f32.gmra.mxu1 %vm2514_vm9, %v9994_v61  ;;  %4914 = vmatpush.msra.mxu0 %v4443_v30  ;;  %v14597_v61 = vld [vmem:[#allocation23_spill] sm:$0xff]  ;;  %v4411_v30 = vmul.f32 %v10073_v3, %v14600_v24  ;;  %v14602_v3 = vld [vmem:[#allocation14_spill] sm:$0xff] }
 0x5c5   : > { %6719 = vmatmul.msk.f32.gmra.mxu0 %vm2514_vm9, %v10336_v21  ;;  %6846 = vmatmul.msk.f32.gmra.mxu2 %vm2514_vm9, %v10310_v41  ;;  %v4419_v59 = vmul.f32 %v10095_v40, %v14597_v61  ;;  %v4403_v40 = vmul.f32 %v10054_v51, %v14601_v14  ;;  %v14603_v51 = vld [vmem:[#allocation11_spill] sm:$0xff]  ;;  %v10396_v14 = vld [vmem:[%s9673_s8 + $0x118] sm:$0xff] }
 0x5c6   : > { %6910 = vmatmul.msk.f32.gmra.mxu3 %vm2514_vm9, %v10310_v41  ;;  %4915 = vmatpush.msra.mxu0 %v4435_v57  ;;  %v4395_v57 = vmul.f32 %v10032_v55, %v14602_v3  ;;  %v4387_v44 = vmul.f32 %v10010_v47, %v14603_v51  ;;  %v14606_v55 = vld [vmem:[#allocation8_spill] sm:$0xff] }
 0x5c7   : > { %v4379_v24 = vmul.f32 %v9991_v43, %v14606_v55  ;;  %v10437_v55 = vld [vmem:[%s9673_s8 + $0x128] sm:$0xff] }
 0x5c8   : > { %4916 = vmatpush.msra.mxu0 %v4427_v54  ;;  %v10355_v53 = vpop.f32.mrf.mxu2  ;;  %v10359_v34 = vpop.f32.mrf.mxu3 }
 0x5c9   : > { %14598 = vst [vmem:[#allocation39_spill] sm:$0xff] %v10355_v53  ;;  %v10357_v36 = vpop.f32.mrf.mxu1  ;;  %v10363_v37 = vpop.f32.mrf.mxu0  ;;  %v10475_v53 = vld [vmem:[%s9673_s8 + $0x138] sm:$0xff] }
 0x5ca   : > { %14599 = vst [vmem:[#allocation36_spill] sm:$0xff] %v10359_v34  ;;  %4917 = vmatpush.msra.mxu0 %v4419_v59 }
 0x5cc   : > { %6767 = vmatmul.msk.f32.gmra.mxu1 %vm2514_vm9, %v10013_v38  ;;  %4918 = vmatpush.msra.mxu0 %v4411_v30  ;;  %v2504_v38 = vld [vmem:[%s13998_s4 + $0xb0] sm:$0xff] }
 0x5cd   : > { %6720 = vmatmul.msk.f32.gmra.mxu0 %vm2514_vm9, %v10366_v35  ;;  %6847 = vmatmul.msk.f32.gmra.mxu2 %vm2514_vm9, %v10336_v21 }
 0x5ce   : > { %6911 = vmatmul.msk.f32.gmra.mxu3 %vm2514_vm9, %v10336_v21  ;;  %4919 = vmatpush.msra.mxu0 %v4403_v40 }
 0x5cf   : > { %3974 = vmatpush.msrb.mxu2 %v2504_v38 }
 0x5d0   : > { %4920 = vmatpush.msra.mxu0 %v4395_v57  ;;  %v10385_v54 = vpop.f32.mrf.mxu2  ;;  %v10389_v59 = vpop.f32.mrf.mxu3  ;;  %v2505_v57 = vld [vmem:[%s13998_s4 + $0xb8] sm:$0xff] }
 0x5d1   : > { %14604 = vst [vmem:[#allocation33_spill] sm:$0xff] %v10385_v54  ;;  %v10387_v61 = vpop.f32.mrf.mxu1  ;;  %v10393_v30 = vpop.f32.mrf.mxu0  ;;  %4183 = vmatpush.msrb.mxu3 %v2505_v57 }
 0x5d2   : > { %14605 = vst [vmem:[#allocation29_spill] sm:$0xff] %v10389_v59  ;;  %4921 = vmatpush.msra.mxu0 %v4387_v44  ;;  %v10456_v59 = vld [vmem:[%s9673_s8 + $0x130] sm:$0xff] }
 0x5d4   : > { %6768 = vmatmul.msk.f32.gmra.mxu1 %vm2514_vm9, %v10035_v60  ;;  %4922 = vmatpush.msra.mxu0 %v4379_v24  ;;  %v10415_v60 = vld [vmem:[%s9673_s8 + $0x120] sm:$0xff] }
 0x5d5   : > { %6721 = vmatmul.msk.f32.gmra.mxu0 %vm2514_vm9, %v10396_v14  ;;  %6848 = vmatmul.msk.f32.gmra.mxu2 %vm2514_vm9, %v10366_v35 }
 0x5d6   : > { %6912 = vmatmul.msk.f32.gmra.mxu3 %vm2514_vm9, %v10366_v35 }
 0x5d8   : > { %v10406_v43 = vpop.f32.mrf.mxu2  ;;  %v10410_v40 = vpop.f32.mrf.mxu3 }
 0x5d9   : > { %14607 = vst [vmem:[#allocation26_spill] sm:$0xff] %v10406_v43  ;;  %v10408_v47 = vpop.f32.mrf.mxu1  ;;  %v10412_v3 = vpop.f32.mrf.mxu0 }
 0x5da   : > { %14608 = vst [vmem:[#allocation23_spill] sm:$0xff] %v10410_v40 }
 0x5dc   : > { %6769 = vmatmul.msk.f32.gmra.mxu1 %vm2514_vm9, %v10057_v56 }
 0x5dd   : > { %6722 = vmatmul.msk.f32.gmra.mxu0 %vm2514_vm9, %v10415_v60  ;;  %6849 = vmatmul.msk.f32.gmra.mxu2 %vm2514_vm9, %v10396_v14 }
 0x5de   : > { %6913 = vmatmul.msk.f32.gmra.mxu3 %vm2514_vm9, %v10396_v14 }
 0x5e0   : > { %v10428_v38 = vpop.f32.mrf.mxu2  ;;  %v10432_v56 = vpop.f32.mrf.mxu3 }
 0x5e1   : > { %14609 = vst [vmem:[#allocation20_spill] sm:$0xff] %v10428_v38  ;;  %v10430_v51 = vpop.f32.mrf.mxu1  ;;  %v10434_v44 = vpop.f32.mrf.mxu0  ;;  %v10494_v38 = vld [vmem:[%s9673_s8 + $0x140] sm:$0xff] }
 0x5e2   : > { %14610 = vst [vmem:[#allocation17_spill] sm:$0xff] %v10432_v56 }
 0x5e4   : > { %6770 = vmatmul.msk.f32.gmra.mxu1 %vm2514_vm9, %v10076_v9 }
 0x5e5   : > { %6723 = vmatmul.msk.f32.gmra.mxu0 %vm2514_vm9, %v10437_v55  ;;  %6850 = vmatmul.msk.f32.gmra.mxu2 %vm2514_vm9, %v10415_v60 }
 0x5e6   : > { %6914 = vmatmul.msk.f32.gmra.mxu3 %vm2514_vm9, %v10415_v60 }
 0x5e8   : > { %v10447_v24 = vpop.f32.mrf.mxu2  ;;  %v10451_v5 = vpop.f32.mrf.mxu3 }
 0x5e9   : > { %14611 = vst [vmem:[#allocation14_spill] sm:$0xff] %v10447_v24  ;;  %v10449_v57 = vpop.f32.mrf.mxu1  ;;  %v10453_v34 = vpop.f32.mrf.mxu0 }
 0x5ea   : > { %14612 = vst [vmem:[#allocation11_spill] sm:$0xff] %v10451_v5 }
 0x5ec   : > { %6771 = vmatmul.msk.f32.gmra.mxu1 %vm2514_vm9, %v10098_v63 }
 0x5ed   : > { %6724 = vmatmul.msk.f32.gmra.mxu0 %vm2514_vm9, %v10456_v59  ;;  %6851 = vmatmul.msk.f32.gmra.mxu2 %vm2514_vm9, %v10437_v55 }
 0x5ee   : > { %6915 = vmatmul.msk.f32.gmra.mxu3 %vm2514_vm9, %v10437_v55 }
 0x5f0   : > { %v10466_v9 = vpop.f32.mrf.mxu2  ;;  %v10470_v56 = vpop.f32.mrf.mxu3 }
 0x5f1   : > { %14613 = vst [vmem:[#allocation8_spill] sm:$0xff] %v10466_v9  ;;  %v10468_v40 = vpop.f32.mrf.mxu1  ;;  %v10472_v5 = vpop.f32.mrf.mxu0 }
 0x5f2   : > { %14614 = vst [vmem:[#allocation547_spill] sm:$0xff] %v10470_v56 }
 0x5f4   : > { %6772 = vmatmul.msk.f32.gmra.mxu1 %vm2514_vm9, %v10117_v62 }
 0x5f5   : > { %6725 = vmatmul.msk.f32.gmra.mxu0 %vm2514_vm9, %v10475_v53  ;;  %6852 = vmatmul.msk.f32.gmra.mxu2 %vm2514_vm9, %v10456_v59 }
 0x5f6   : > { %6916 = vmatmul.msk.f32.gmra.mxu3 %vm2514_vm9, %v10456_v59 }
 0x5f8   : > { %v10485_v63 = vpop.f32.mrf.mxu2  ;;  %v10489_v54 = vpop.f32.mrf.mxu3 }
 0x5f9   : > { %14615 = vst [vmem:[#allocation548_spill] sm:$0xff] %v10485_v63  ;;  %v10487_v56 = vpop.f32.mrf.mxu1  ;;  %v10491_v43 = vpop.f32.mrf.mxu0  ;;  %v10513_v63 = vld [vmem:[%s9673_s8 + $0x148] sm:$0xff] }
 0x5fa   : > { %14616 = vst [vmem:[#allocation549_spill] sm:$0xff] %v10489_v54 }
 0x5fc   : > { %6773 = vmatmul.msk.f32.gmra.mxu1 %vm2514_vm9, %v10136_v42 }
 0x5fd   : > { %6726 = vmatmul.msk.f32.gmra.mxu0 %vm2514_vm9, %v10494_v38  ;;  %6853 = vmatmul.msk.f32.gmra.mxu2 %vm2514_vm9, %v10475_v53 }
 0x5fe   : > { %6917 = vmatmul.msk.f32.gmra.mxu3 %vm2514_vm9, %v10475_v53 }
 0x600   : > { %v10504_v62 = vpop.f32.mrf.mxu2  ;;  %v10508_v24 = vpop.f32.mrf.mxu3 }
 0x601   : > { %14617 = vst [vmem:[#allocation550_spill] sm:$0xff] %v10504_v62  ;;  %v10506_v54 = vpop.f32.mrf.mxu1  ;;  %v10510_v9 = vpop.f32.mrf.mxu0 }
 0x602   : > { %14618 = vst [vmem:[#allocation551_spill] sm:$0xff] %v10508_v24 }
 0x604   : > { %6774 = vmatmul.msk.f32.gmra.mxu1 %vm2514_vm9, %v10155_v46 }
 0x605   : > { %6727 = vmatmul.msk.f32.gmra.mxu0 %vm2514_vm9, %v10513_v63  ;;  %6854 = vmatmul.msk.f32.gmra.mxu2 %vm2514_vm9, %v10494_v38 }
 0x606   : > { %6918 = vmatmul.msk.f32.gmra.mxu3 %vm2514_vm9, %v10494_v38 }
 0x608   : > { %v10523_v42 = vpop.f32.mrf.mxu2  ;;  %v10527_v62 = vpop.f32.mrf.mxu3 }
 0x609   : > { %14619 = vst [vmem:[#allocation552_spill] sm:$0xff] %v10523_v42  ;;  %v10525_v24 = vpop.f32.mrf.mxu1  ;;  %v10529_v32 = vpop.f32.mrf.mxu0 }
 0x60a   : > { %14620 = vst [vmem:[#allocation553_spill] sm:$0xff] %v10527_v62 }
 0x60c   : > { %6775 = vmatmul.msk.f32.gmra.mxu1 %vm2514_vm9, %v10174_v50  ;;  %v2495_v50 = vld [vmem:[%s13998_s4 + $0x68] sm:$0xff] }
 0x60d   : > { %6728 = vmatmul.msk.f32.gmra.mxu0 %vm2514_vm9, %v10532_v22  ;;  %6855 = vmatmul.msk.f32.gmra.mxu2 %vm2514_vm9, %v10513_v63 }
 0x60e   : > { %6919 = vmatmul.msk.f32.gmra.mxu3 %vm2514_vm9, %v10513_v63  ;;  %3766 = vmatpush.msra.mxu1 %v2495_v50 }
 0x610   : > { %v10542_v46 = vpop.f32.mrf.mxu2  ;;  %v10546_v62 = vpop.f32.mrf.mxu3  ;;  %3767 = vmatpush.msra.mxu1 %v2487_v4 }
 0x611   : > { %14621 = vst [vmem:[#allocation554_spill] sm:$0xff] %v10542_v46  ;;  %v10544_v42 = vpop.f32.mrf.mxu1  ;;  %v2805_v20 = vpop.f32.mrf.mxu0 }
 0x612   : > { %14622 = vst [vmem:[#allocation555_spill] sm:$0xff] %v10546_v62 }
 0x614   : > { %6776 = vmatmul.msk.f32.gmra.mxu1 %vm2514_vm9, %v10193_v8 }
 0x615   : > { %6729 = vmatmul.msk.f32.gmra.mxu0 %vm2514_vm9, %v10549_v49  ;;  %6856 = vmatmul.msk.f32.gmra.mxu2 %vm2514_vm9, %v10532_v22 }
 0x616   : > { %6920 = vmatmul.msk.f32.gmra.mxu3 %vm2514_vm9, %v10532_v22 }
 0x618   : > { %v10565_v62 = vpop.f32.mrf.mxu2  ;;  %v10569_v8 = vpop.f32.mrf.mxu3 }
 0x619   : > { %14623 = vst [vmem:[#allocation556_spill] sm:$0xff] %v10565_v62  ;;  %v10567_v46 = vpop.f32.mrf.mxu1  ;;  %v2808_v13 = vpop.f32.mrf.mxu0 }
 0x61a   : > { %14624 = vst [vmem:[#allocation557_spill] sm:$0xff] %v10569_v8 }
 0x61c   : > { %6777 = vmatmul.msk.f32.gmra.mxu1 %vm2514_vm9, %v10213_v12 }
 0x61d   : > { %6730 = vmatmul.msk.f32.gmra.mxu0 %vm2514_vm9, %v10572_v15  ;;  %6857 = vmatmul.msk.f32.gmra.mxu2 %vm2514_vm9, %v10549_v49 }
 0x61e   : > { %6921 = vmatmul.msk.f32.gmra.mxu3 %vm2514_vm9, %v10549_v49 }
 0x620   : > { %v10582_v4 = vpop.f32.mrf.mxu2  ;;  %v10586_v8 = vpop.f32.mrf.mxu3 }
 0x621   : > { %14625 = vst [vmem:[#allocation558_spill] sm:$0xff] %v10582_v4  ;;  %v10584_v50 = vpop.f32.mrf.mxu1  ;;  %v2811_v62 = vpop.f32.mrf.mxu0 }
 0x622   : > { %14626 = vst [vmem:[#allocation559_spill] sm:$0xff] %v10586_v8 }
 0x624   : > { %6778 = vmatmul.msk.f32.gmra.mxu1 %vm2514_vm9, %v10236_v2 }
 0x625   : > { %6731 = vmatmul.msk.f32.gmra.mxu0 %vm2514_vm9, %v10589_v19  ;;  %6858 = vmatmul.msk.f32.gmra.mxu2 %vm2514_vm9, %v10572_v15 }
 0x626   : > { %6922 = vmatmul.msk.f32.gmra.mxu3 %vm2514_vm9, %v10572_v15 }
 0x628   : > { %v10599_v12 = vpop.f32.mrf.mxu2  ;;  %v10603_v8 = vpop.f32.mrf.mxu3 }
 0x629   : > { %14627 = vst [vmem:[#allocation560_spill] sm:$0xff] %v10599_v12  ;;  %v10601_v4 = vpop.f32.mrf.mxu1  ;;  %v2814_v1 = vpop.f32.mrf.mxu0 }
 0x62a   : > { %14628 = vst [vmem:[#allocation561_spill] sm:$0xff] %v10603_v8 }
 0x62c   : > { %6779 = vmatmul.msk.f32.gmra.mxu1 %vm2514_vm9, %v10253_v48 }
 0x62d   : > { %6732 = vmatmul.msk.f32.gmra.mxu0 %vm2514_vm9, %v10606_v16  ;;  %6859 = vmatmul.msk.f32.gmra.mxu2 %vm2514_vm9, %v10589_v19 }
 0x62e   : > { %6923 = vmatmul.msk.f32.gmra.mxu3 %vm2514_vm9, %v10589_v19 }
 0x630   : > { %v10616_v2 = vpop.f32.mrf.mxu2  ;;  %v10620_v8 = vpop.f32.mrf.mxu3 }
 0x631   : > { %14629 = vst [vmem:[#allocation562_spill] sm:$0xff] %v10616_v2  ;;  %v10618_v12 = vpop.f32.mrf.mxu1  ;;  %v2817_v26 = vpop.f32.mrf.mxu0  ;;  %v14632_v2 = vld [vmem:[#allocation119_spill] sm:$0xff] }
 0x632   : > { %14630 = vst [vmem:[#allocation563_spill] sm:$0xff] %v10620_v8  ;;  %v4627_v48 = vmul.f32 %v2817_v26, %v14631_v45  ;;  %v4619_v0 = vmul.f32 %v2814_v1, %v14632_v2  ;;  %v14633_v8 = vld [vmem:[#allocation115_spill] sm:$0xff] }
 0x633   : > { %v4611_v25 = vmul.f32 %v2811_v62, %v14633_v8  ;;  %v14636_v26 = vld [vmem:[#allocation111_spill] sm:$0xff] }
 0x634   : > { %6780 = vmatmul.msk.f32.gmra.mxu1 %vm2514_vm9, %v10270_v7  ;;  %v4603_v31 = vmul.f32 %v2808_v13, %v14636_v26  ;;  %v14637_v1 = vld [vmem:[#allocation107_spill] sm:$0xff] }
 0x635   : > { %6733 = vmatmul.msk.f32.gmra.mxu0 %vm2514_vm9, %v10623_v28  ;;  %6860 = vmatmul.msk.f32.gmra.mxu2 %vm2514_vm9, %v10606_v16  ;;  %v4595_v62 = vmul.f32 %v2805_v20, %v14637_v1  ;;  %v14639_v13 = vld [vmem:[#allocation99_spill] sm:$0xff] }
 0x636   : > { %6924 = vmatmul.msk.f32.gmra.mxu3 %vm2514_vm9, %v10606_v16  ;;  %4930 = vmatpush.msrb.mxu1 %v4627_v48  ;;  %v14643_v2 = vld [vmem:[#allocation95_spill] sm:$0xff] }
 0x637   : > { %v4571_v48 = vmul.f32 %v10491_v43, %v14643_v2  ;;  %v14644_v1 = vld [vmem:[#allocation91_spill] sm:$0xff] }
 0x638   : > { %4931 = vmatpush.msrb.mxu1 %v4619_v0  ;;  %v10636_v29 = vpop.f32.mrf.mxu2  ;;  %v10640_v7 = vpop.f32.mrf.mxu3  ;;  %v14638_v0 = vld [vmem:[#allocation103_spill] sm:$0xff] }
 0x639   : > { %14634 = vst [vmem:[#allocation123_spill] sm:$0xff] %v10636_v29  ;;  %v10638_v45 = vpop.f32.mrf.mxu1  ;;  %v14645_v43 = vld [vmem:[#allocation87_spill] sm:$0xff]  ;;  %v10789_v29 = vld [vmem:[%s9673_s8 + $0x1b0] sm:$0xff] }
 0x63a   : > { %14635 = vst [vmem:[#allocation119_spill] sm:$0xff] %v10640_v7  ;;  %4932 = vmatpush.msrb.mxu1 %v4611_v25  ;;  %v10643_v33 = vpop.f32.mrf.mxu0  ;;  %v4587_v25 = vmul.f32 %v10529_v32, %v14638_v0  ;;  %v10672_v32 = vld [vmem:[%s9673_s8 + $0x188] sm:$0xff] }
 0x63b   : > { %v14646_v0 = vld [vmem:[#allocation83_spill] sm:$0xff] }
 0x63c   : > { %6781 = vmatmul.msk.f32.gmra.mxu1 %vm2514_vm9, %v10287_v17  ;;  %v4579_v17 = vmul.f32 %v10510_v9, %v14639_v13  ;;  %v4563_v9 = vmul.f32 %v10472_v5, %v14644_v1  ;;  %v14651_v1 = vld [vmem:[#allocation75_spill] sm:$0xff] }
 0x63d   : > { %4933 = vmatpush.msrb.mxu1 %v4603_v31  ;;  %6734 = vmatmul.msk.f32.gmra.mxu0 %vm2514_vm9, %v10646_v27 }
 0x63e   : > { %6861 = vmatmul.msk.f32.gmra.mxu2 %vm2514_vm9, %v10623_v28  ;;  %6925 = vmatmul.msk.f32.gmra.mxu3 %vm2514_vm9, %v10623_v28 }
 0x63f   : > { %4934 = vmatpush.msrb.mxu1 %v4595_v62  ;;  %v4555_v62 = vmul.f32 %v10453_v34, %v14645_v43  ;;  %v10699_v34 = vld [vmem:[%s9673_s8 + $0x190] sm:$0xff] }
 0x640   : > { %v10661_v8 = vpop.f32.mrf.mxu2 }
 0x641   : > { %4935 = vmatpush.msrb.mxu1 %v4587_v25  ;;  %14640 = vst [vmem:[#allocation115_spill] sm:$0xff] %v10661_v8  ;;  %v10663_v31 = vpop.f32.mrf.mxu1  ;;  %v10665_v20 = vpop.f32.mrf.mxu3 }
 0x642   : > { %14641 = vst [vmem:[#allocation111_spill] sm:$0xff] %v10663_v31  ;;  %v10669_v26 = vpop.f32.mrf.mxu0 }
 0x643   : > { %14642 = vst [vmem:[#allocation107_spill] sm:$0xff] %v10665_v20  ;;  %4936 = vmatpush.msrb.mxu1 %v4579_v17  ;;  %v14650_v17 = vld [vmem:[#allocation79_spill] sm:$0xff] }
 0x644   : > { %6782 = vmatmul.msk.f32.gmra.mxu1 %vm2514_vm9, %v10310_v41  ;;  %v4547_v41 = vmul.f32 %v10434_v44, %v14646_v0  ;;  %v4539_v2 = vmul.f32 %v10412_v3, %v14650_v17  ;;  %v4531_v44 = vmul.f32 %v10393_v30, %v14651_v1  ;;  %v14652_v3 = vld [vmem:[#allocation71_spill] sm:$0xff]  ;;  %v10729_v1 = vld [vmem:[%s9673_s8 + $0x198] sm:$0xff] }
 0x645   : > { %4937 = vmatpush.msrb.mxu1 %v4571_v48  ;;  %6735 = vmatmul.msk.f32.gmra.mxu0 %vm2514_vm9, %v10672_v32  ;;  %v14653_v30 = vld [vmem:[#allocation67_spill] sm:$0xff] }
 0x646   : > { %6862 = vmatmul.msk.f32.gmra.mxu2 %vm2514_vm9, %v10646_v27  ;;  %6926 = vmatmul.msk.f32.gmra.mxu3 %vm2514_vm9, %v10646_v27  ;;  %v4515_v43 = vmul.f32 %v10333_v10, %v14653_v30 }
 0x647   : > { %4938 = vmatpush.msrb.mxu1 %v4563_v9  ;;  %v4523_v9 = vmul.f32 %v10363_v37, %v14652_v3  ;;  %v14657_v37 = vld [vmem:[#allocation63_spill] sm:$0xff] }
 0x648   : > { %v10688_v25 = vpop.f32.mrf.mxu2  ;;  %v4507_v17 = vmul.f32 %v10307_v58, %v14657_v37  ;;  %v10770_v37 = vld [vmem:[%s9673_s8 + $0x1a8] sm:$0xff] }
 0x649   : > { %4939 = vmatpush.msrb.mxu1 %v4555_v62  ;;  %14647 = vst [vmem:[#allocation103_spill] sm:$0xff] %v10688_v25  ;;  %v10690_v5 = vpop.f32.mrf.mxu1  ;;  %v10692_v13 = vpop.f32.mrf.mxu3  ;;  %v10827_v25 = vld [vmem:[%s9673_s8 + $0x1c0] sm:$0xff] }
 0x64a   : > { %14648 = vst [vmem:[#allocation99_spill] sm:$0xff] %v10690_v5  ;;  %v10696_v48 = vpop.f32.mrf.mxu0  ;;  %v10939_v5 = vld [vmem:[%s9673_s8 + $0x1f0] sm:$0xff] }
 0x64b   : > { %14649 = vst [vmem:[#allocation95_spill] sm:$0xff] %v10692_v13  ;;  %4940 = vmatpush.msrb.mxu1 %v4547_v41 }
 0x64c   : > { %6783 = vmatmul.msk.f32.gmra.mxu1 %vm2514_vm9, %v10336_v21  ;;  %v2496_v21 = vld [vmem:[%s13998_s4 + $0x70] sm:$0xff] }
 0x64d   : > { %4941 = vmatpush.msrb.mxu1 %v4539_v2  ;;  %6736 = vmatmul.msk.f32.gmra.mxu0 %vm2514_vm9, %v10699_v34 }
 0x64e   : > { %6863 = vmatmul.msk.f32.gmra.mxu2 %vm2514_vm9, %v10672_v32  ;;  %6927 = vmatmul.msk.f32.gmra.mxu3 %vm2514_vm9, %v10672_v32 }
 0x64f   : > { %4942 = vmatpush.msrb.mxu1 %v4531_v44  ;;  %3975 = vmatpush.msrb.mxu2 %v2496_v21 }
 0x650   : > { %v10718_v62 = vpop.f32.mrf.mxu2 }
 0x651   : > { %4943 = vmatpush.msrb.mxu1 %v4523_v9  ;;  %14654 = vst [vmem:[#allocation91_spill] sm:$0xff] %v10718_v62  ;;  %v10720_v0 = vpop.f32.mrf.mxu1  ;;  %v10722_v41 = vpop.f32.mrf.mxu3  ;;  %v2497_v9 = vld [vmem:[%s13998_s4 + $0x78] sm:$0xff] }
 0x652   : > { %14655 = vst [vmem:[#allocation87_spill] sm:$0xff] %v10720_v0  ;;  %v10726_v2 = vpop.f32.mrf.mxu0  ;;  %4184 = vmatpush.msrb.mxu3 %v2497_v9 }
 0x653   : > { %14656 = vst [vmem:[#allocation83_spill] sm:$0xff] %v10722_v41  ;;  %4944 = vmatpush.msrb.mxu1 %v4515_v43 }
 0x654   : > { %6784 = vmatmul.msk.f32.gmra.mxu1 %vm2514_vm9, %v10366_v35  ;;  %v10748_v35 = vld [vmem:[%s9673_s8 + $0x1a0] sm:$0xff] }
 0x655   : > { %4945 = vmatpush.msrb.mxu1 %v4507_v17  ;;  %6737 = vmatmul.msk.f32.gmra.mxu0 %vm2514_vm9, %v10729_v1 }
 0x656   : > { %6864 = vmatmul.msk.f32.gmra.mxu2 %vm2514_vm9, %v10699_v34  ;;  %6928 = vmatmul.msk.f32.gmra.mxu3 %vm2514_vm9, %v10699_v34 }
 0x658   : > { %v10739_v58 = vpop.f32.mrf.mxu2 }
 0x659   : > { %14658 = vst [vmem:[#allocation79_spill] sm:$0xff] %v10739_v58  ;;  %v10741_v10 = vpop.f32.mrf.mxu1  ;;  %v10743_v44 = vpop.f32.mrf.mxu3 }
 0x65a   : > { %14659 = vst [vmem:[#allocation75_spill] sm:$0xff] %v10741_v10  ;;  %v10745_v3 = vpop.f32.mrf.mxu0  ;;  %v10956_v10 = vld [vmem:[%s9673_s8 + $0x1f8] sm:$0xff] }
 0x65b   : > { %14660 = vst [vmem:[#allocation71_spill] sm:$0xff] %v10743_v44  ;;  %v10808_v44 = vld [vmem:[%s9673_s8 + $0x1b8] sm:$0xff] }
 0x65c   : > { %6785 = vmatmul.msk.f32.gmra.mxu1 %vm2514_vm9, %v10396_v14 }
 0x65d   : > { %6738 = vmatmul.msk.f32.gmra.mxu0 %vm2514_vm9, %v10748_v35 }
 0x65e   : > { %6865 = vmatmul.msk.f32.gmra.mxu2 %vm2514_vm9, %v10729_v1  ;;  %6929 = vmatmul.msk.f32.gmra.mxu3 %vm2514_vm9, %v10729_v1 }
 0x660   : > { %v10761_v21 = vpop.f32.mrf.mxu2 }
 0x661   : > { %14661 = vst [vmem:[#allocation67_spill] sm:$0xff] %v10761_v21  ;;  %v10763_v30 = vpop.f32.mrf.mxu1  ;;  %v10765_v14 = vpop.f32.mrf.mxu3  ;;  %v10846_v21 = vld [vmem:[%s9673_s8 + $0x1c8] sm:$0xff] }
 0x662   : > { %14662 = vst [vmem:[#allocation63_spill] sm:$0xff] %v10763_v30  ;;  %v10767_v43 = vpop.f32.mrf.mxu0  ;;  %v14689_v30 = vld [vmem:[#allocation187_spill] sm:$0xff] }
 0x663   : > { %14663 = vst [vmem:[#allocation564_spill] sm:$0xff] %v10765_v14 }
 0x664   : > { %6786 = vmatmul.msk.f32.gmra.mxu1 %vm2514_vm9, %v10415_v60 }
 0x665   : > { %6739 = vmatmul.msk.f32.gmra.mxu0 %vm2514_vm9, %v10770_v37 }
 0x666   : > { %6866 = vmatmul.msk.f32.gmra.mxu2 %vm2514_vm9, %v10748_v35  ;;  %6930 = vmatmul.msk.f32.gmra.mxu3 %vm2514_vm9, %v10748_v35 }
 0x668   : > { %v10780_v17 = vpop.f32.mrf.mxu2 }
 0x669   : > { %14664 = vst [vmem:[#allocation565_spill] sm:$0xff] %v10780_v17  ;;  %v10782_v9 = vpop.f32.mrf.mxu1  ;;  %v10784_v7 = vpop.f32.mrf.mxu3 }
 0x66a   : > { %14665 = vst [vmem:[#allocation566_spill] sm:$0xff] %v10782_v9  ;;  %v10786_v20 = vpop.f32.mrf.mxu0  ;;  %v14690_v9 = vld [vmem:[#allocation183_spill] sm:$0xff] }
 0x66b   : > { %14666 = vst [vmem:[#allocation567_spill] sm:$0xff] %v10784_v7 }
 0x66c   : > { %6787 = vmatmul.msk.f32.gmra.mxu1 %vm2514_vm9, %v10437_v55 }
 0x66d   : > { %6740 = vmatmul.msk.f32.gmra.mxu0 %vm2514_vm9, %v10789_v29 }
 0x66e   : > { %6867 = vmatmul.msk.f32.gmra.mxu2 %vm2514_vm9, %v10770_v37  ;;  %6931 = vmatmul.msk.f32.gmra.mxu3 %vm2514_vm9, %v10770_v37 }
 0x670   : > { %v10799_v60 = vpop.f32.mrf.mxu2 }
 0x671   : > { %14667 = vst [vmem:[#allocation568_spill] sm:$0xff] %v10799_v60  ;;  %v10801_v8 = vpop.f32.mrf.mxu1  ;;  %v10803_v13 = vpop.f32.mrf.mxu3 }
 0x672   : > { %14668 = vst [vmem:[#allocation569_spill] sm:$0xff] %v10801_v8  ;;  %v10805_v41 = vpop.f32.mrf.mxu0 }
 0x673   : > { %14669 = vst [vmem:[#allocation570_spill] sm:$0xff] %v10803_v13 }
 0x674   : > { %6788 = vmatmul.msk.f32.gmra.mxu1 %vm2514_vm9, %v10456_v59 }
 0x675   : > { %6741 = vmatmul.msk.f32.gmra.mxu0 %vm2514_vm9, %v10808_v44 }
 0x676   : > { %6868 = vmatmul.msk.f32.gmra.mxu2 %vm2514_vm9, %v10789_v29  ;;  %6932 = vmatmul.msk.f32.gmra.mxu3 %vm2514_vm9, %v10789_v29 }
 0x678   : > { %v10818_v55 = vpop.f32.mrf.mxu2 }
 0x679   : > { %14670 = vst [vmem:[#allocation571_spill] sm:$0xff] %v10818_v55  ;;  %v10820_v14 = vpop.f32.mrf.mxu1  ;;  %v10822_v7 = vpop.f32.mrf.mxu3  ;;  %v10865_v55 = vld [vmem:[%s9673_s8 + $0x1d0] sm:$0xff] }
 0x67a   : > { %14671 = vst [vmem:[#allocation572_spill] sm:$0xff] %v10820_v14  ;;  %v10824_v13 = vpop.f32.mrf.mxu0  ;;  %v14694_v14 = vld [vmem:[#allocation175_spill] sm:$0xff] }
 0x67b   : > { %14672 = vst [vmem:[#allocation573_spill] sm:$0xff] %v10822_v7 }
 0x67c   : > { %6789 = vmatmul.msk.f32.gmra.mxu1 %vm2514_vm9, %v10475_v53 }
 0x67d   : > { %6742 = vmatmul.msk.f32.gmra.mxu0 %vm2514_vm9, %v10827_v25 }
 0x67e   : > { %6869 = vmatmul.msk.f32.gmra.mxu2 %vm2514_vm9, %v10808_v44  ;;  %6933 = vmatmul.msk.f32.gmra.mxu3 %vm2514_vm9, %v10808_v44 }
 0x680   : > { %v10837_v59 = vpop.f32.mrf.mxu2 }
 0x681   : > { %14673 = vst [vmem:[#allocation574_spill] sm:$0xff] %v10837_v59  ;;  %v10839_v7 = vpop.f32.mrf.mxu1  ;;  %v10841_v62 = vpop.f32.mrf.mxu3 }
 0x682   : > { %14674 = vst [vmem:[#allocation575_spill] sm:$0xff] %v10839_v7  ;;  %v10843_v58 = vpop.f32.mrf.mxu0 }
 0x683   : > { %14675 = vst [vmem:[#allocation576_spill] sm:$0xff] %v10841_v62 }
 0x684   : > { %6790 = vmatmul.msk.f32.gmra.mxu1 %vm2514_vm9, %v10494_v38 }
 0x685   : > { %6743 = vmatmul.msk.f32.gmra.mxu0 %vm2514_vm9, %v10846_v21 }
 0x686   : > { %6870 = vmatmul.msk.f32.gmra.mxu2 %vm2514_vm9, %v10827_v25  ;;  %6934 = vmatmul.msk.f32.gmra.mxu3 %vm2514_vm9, %v10827_v25 }
 0x688   : > { %v10856_v53 = vpop.f32.mrf.mxu2 }
 0x689   : > { %14676 = vst [vmem:[#allocation577_spill] sm:$0xff] %v10856_v53  ;;  %v10858_v62 = vpop.f32.mrf.mxu1  ;;  %v10860_v17 = vpop.f32.mrf.mxu3 }
 0x68a   : > { %14677 = vst [vmem:[#allocation578_spill] sm:$0xff] %v10858_v62  ;;  %v10862_v60 = vpop.f32.mrf.mxu0 }
 0x68b   : > { %14678 = vst [vmem:[#allocation579_spill] sm:$0xff] %v10860_v17 }
 0x68c   : > { %6791 = vmatmul.msk.f32.gmra.mxu1 %vm2514_vm9, %v10513_v63  ;;  %v2488_v63 = vld [vmem:[%s13998_s4 + $0x30] sm:$0xff] }
 0x68d   : > { %6744 = vmatmul.msk.f32.gmra.mxu0 %vm2514_vm9, %v10865_v55  ;;  %3976 = vmatpush.msrb.mxu2 %v2488_v63 }
 0x68e   : > { %6871 = vmatmul.msk.f32.gmra.mxu2 %vm2514_vm9, %v10846_v21  ;;  %6935 = vmatmul.msk.f32.gmra.mxu3 %vm2514_vm9, %v10846_v21 }
 0x690   : > { %v10875_v38 = vpop.f32.mrf.mxu2 }
 0x691   : > { %14679 = vst [vmem:[#allocation580_spill] sm:$0xff] %v10875_v38  ;;  %v10877_v17 = vpop.f32.mrf.mxu1  ;;  %v10879_v59 = vpop.f32.mrf.mxu3 }
 0x692   : > { %14680 = vst [vmem:[#allocation581_spill] sm:$0xff] %v10879_v59  ;;  %v2853_v53 = vpop.f32.mrf.mxu0 }
 0x694   : > { %6792 = vmatmul.msk.f32.gmra.mxu1 %vm2514_vm9, %v10532_v22 }
 0x695   : > { %6745 = vmatmul.msk.f32.gmra.mxu0 %vm2514_vm9, %v10882_v39 }
 0x696   : > { %6872 = vmatmul.msk.f32.gmra.mxu2 %vm2514_vm9, %v10865_v55  ;;  %6936 = vmatmul.msk.f32.gmra.mxu3 %vm2514_vm9, %v10865_v55 }
 0x698   : > { %v10895_v59 = vpop.f32.mrf.mxu2 }
 0x699   : > { %14681 = vst [vmem:[#allocation582_spill] sm:$0xff] %v10895_v59  ;;  %v10897_v38 = vpop.f32.mrf.mxu1  ;;  %v10899_v22 = vpop.f32.mrf.mxu3 }
 0x69a   : > { %14682 = vst [vmem:[#allocation583_spill] sm:$0xff] %v10899_v22  ;;  %v2856_v11 = vpop.f32.mrf.mxu0 }
 0x69b   : > { %v4731_v7 = vmul.f32 %v2856_v11, %v14694_v14  ;;  %v14697_v11 = vld [vmem:[#allocation167_spill] sm:$0xff] }
 0x69c   : > { %6793 = vmatmul.msk.f32.gmra.mxu1 %vm2514_vm9, %v10549_v49  ;;  %v2489_v49 = vld [vmem:[%s13998_s4 + $0x38] sm:$0xff] }
 0x69d   : > { %6746 = vmatmul.msk.f32.gmra.mxu0 %vm2514_vm9, %v10902_v6  ;;  %4185 = vmatpush.msrb.mxu3 %v2489_v49 }
 0x69e   : > { %6873 = vmatmul.msk.f32.gmra.mxu2 %vm2514_vm9, %v10882_v39  ;;  %6937 = vmatmul.msk.f32.gmra.mxu3 %vm2514_vm9, %v10882_v39 }
 0x6a0   : > { %v10912_v63 = vpop.f32.mrf.mxu2 }
 0x6a1   : > { %14683 = vst [vmem:[#allocation584_spill] sm:$0xff] %v10912_v63  ;;  %v10914_v59 = vpop.f32.mrf.mxu1  ;;  %v10916_v22 = vpop.f32.mrf.mxu3 }
 0x6a2   : > { %14684 = vst [vmem:[#allocation585_spill] sm:$0xff] %v10916_v22  ;;  %v2859_v23 = vpop.f32.mrf.mxu0 }
 0x6a4   : > { %6794 = vmatmul.msk.f32.gmra.mxu1 %vm2514_vm9, %v10572_v15 }
 0x6a5   : > { %6747 = vmatmul.msk.f32.gmra.mxu0 %vm2514_vm9, %v10919_v18 }
 0x6a6   : > { %6874 = vmatmul.msk.f32.gmra.mxu2 %vm2514_vm9, %v10902_v6  ;;  %6938 = vmatmul.msk.f32.gmra.mxu3 %vm2514_vm9, %v10902_v6 }
 0x6a8   : > { %v10932_v22 = vpop.f32.mrf.mxu2 }
 0x6a9   : > { %14685 = vst [vmem:[#allocation586_spill] sm:$0xff] %v10932_v22  ;;  %v10934_v63 = vpop.f32.mrf.mxu1  ;;  %v10936_v15 = vpop.f32.mrf.mxu3 }
 0x6aa   : > { %14686 = vst [vmem:[#allocation587_spill] sm:$0xff] %v10936_v15  ;;  %v2862_v31 = vpop.f32.mrf.mxu0 }
 0x6ac   : > { %6795 = vmatmul.msk.f32.gmra.mxu1 %vm2514_vm9, %v10589_v19 }
 0x6ad   : > { %6748 = vmatmul.msk.f32.gmra.mxu0 %vm2514_vm9, %v10939_v5 }
 0x6ae   : > { %6875 = vmatmul.msk.f32.gmra.mxu2 %vm2514_vm9, %v10919_v18  ;;  %6939 = vmatmul.msk.f32.gmra.mxu3 %vm2514_vm9, %v10919_v18 }
 0x6b0   : > { %v10949_v49 = vpop.f32.mrf.mxu2 }
 0x6b1   : > { %14687 = vst [vmem:[#allocation588_spill] sm:$0xff] %v10949_v49  ;;  %v10951_v22 = vpop.f32.mrf.mxu1  ;;  %v10953_v15 = vpop.f32.mrf.mxu3  ;;  %v4747_v49 = vmul.f32 %v2862_v31, %v14690_v9  ;;  %v14695_v31 = vld [vmem:[#allocation171_spill] sm:$0xff] }
 0x6b2   : > { %14688 = vst [vmem:[#allocation589_spill] sm:$0xff] %v10953_v15  ;;  %v2865_v0 = vpop.f32.mrf.mxu0  ;;  %v14691_v15 = vld [vmem:[#allocation179_spill] sm:$0xff]  ;;  %v4723_v9 = vmul.f32 %v2853_v53, %v14695_v31  ;;  %v14701_v31 = vld [vmem:[#allocation113_spill] sm:$0xff] }
 0x6b3   : > { %v4755_v19 = vmul.f32 %v2865_v0, %v14689_v30  ;;  %v4739_v8 = vmul.f32 %v2859_v23, %v14691_v15  ;;  %v10986_v15 = vld [vmem:[%s9673_s8] sm:$0xff] }
 0x6b4   : > { %6796 = vmatmul.msk.f32.gmra.mxu1 %vm2514_vm9, %v10606_v16 }
 0x6b5   : > { %6749 = vmatmul.msk.f32.gmra.mxu0 %vm2514_vm9, %v10956_v10  ;;  %4953 = vmatpush.msra.mxu2 %v4755_v19  ;;  %v14696_v19 = vld [vmem:[#allocation121_spill] sm:$0xff] }
 0x6b6   : > { %6876 = vmatmul.msk.f32.gmra.mxu2 %vm2514_vm9, %v10939_v5  ;;  %6940 = vmatmul.msk.f32.gmra.mxu3 %vm2514_vm9, %v10939_v5  ;;  %v4500_v23 = vmul.f32 %v10638_v45, %v14696_v19  ;;  %v14699_v45 = vld [vmem:[#allocation163_spill] sm:$0xff] }
 0x6b7   : > { %4954 = vmatpush.msra.mxu2 %v4747_v49  ;;  %v4707_v14 = vmul.f32 %v10843_v58, %v14699_v45  ;;  %v14708_v45 = vld [vmem:[#allocation151_spill] sm:$0xff] }
 0x6b8   : > { %v10969_v0 = vpop.f32.mrf.mxu2 }
 0x6b9   : > { %14692 = vst [vmem:[#allocation187_spill] sm:$0xff] %v10969_v0  ;;  %v10971_v30 = vpop.f32.mrf.mxu1  ;;  %v10973_v16 = vpop.f32.mrf.mxu3  ;;  %4955 = vmatpush.msra.mxu2 %v4739_v8  ;;  %v4715_v8 = vmul.f32 %v10862_v60, %v14697_v11  ;;  %v4484_v60 = vmul.f32 %v10601_v4, %v14701_v31  ;;  %v14710_v31 = vld [vmem:[#allocation97_spill] sm:$0xff] }
 0x6ba   : > { %14693 = vst [vmem:[#allocation183_spill] sm:$0xff] %v10973_v16  ;;  %v10976_v62 = vpop.f32.mrf.mxu0 }
 0x6bb   : > { %4956 = vmatpush.msra.mxu2 %v4731_v7 }
 0x6bc   : > { %6797 = vmatmul.msk.f32.gmra.mxu1 %vm2514_vm9, %v10623_v28  ;;  %v14698_v28 = vld [vmem:[#allocation117_spill] sm:$0xff] }
 0x6bd   : > { %6942 = vmatmul.msk.f32.vlgmr.msrb.gmra.mxu0 %vm2514_vm9, %v10986_v15  ;;  %4957 = vmatpush.msra.mxu2 %v4723_v9  ;;  %v4492_v7 = vmul.f32 %v10618_v12, %v14698_v28  ;;  %v14703_v9 = vld [vmem:[#allocation159_spill] sm:$0xff] }
 0x6be   : > { %6877 = vmatmul.msk.f32.gmra.mxu2 %vm2514_vm9, %v10956_v10  ;;  %6941 = vmatmul.msk.f32.gmra.mxu3 %vm2514_vm9, %v10956_v10  ;;  %v4699_v11 = vmul.f32 %v10824_v13, %v14703_v9  ;;  %v14706_v28 = vld [vmem:[#allocation155_spill] sm:$0xff] }
 0x6bf   : > { %4999 = vmatpush.msrb.mxu0 %v4500_v23  ;;  %4958 = vmatpush.msra.mxu2 %v4715_v8  ;;  %v14704_v23 = vld [vmem:[#allocation109_spill] sm:$0xff]  ;;  %v11021_v13 = vld [vmem:[%s9673_s8 + $0x8] sm:$0xff] }
 0x6c0   : > { %v4476_v58 = vmul.f32 %v10584_v50, %v14704_v23  ;;  %v14705_v8 = vld [vmem:[#allocation105_spill] sm:$0xff]  ;;  %v14711_v9 = vld [vmem:[#allocation147_spill] sm:$0xff] }
 0x6c1   : > { %v10998_v53 = vpop.f32.mrf.mxu2  ;;  %v11000_v49 = vpop.f32.mrf.mxu1  ;;  %5000 = vmatpush.msrb.mxu0 %v4492_v7  ;;  %4959 = vmatpush.msra.mxu2 %v4707_v14  ;;  %v4468_v4 = vmul.f32 %v10567_v46, %v14705_v8  ;;  %v4691_v7 = vmul.f32 %v10805_v41, %v14706_v28  ;;  %v4683_v46 = vmul.f32 %v10786_v20, %v14708_v45  ;;  %v14713_v20 = vld [vmem:[#allocation93_spill] sm:$0xff]  ;;  %v14714_v8 = vld [vmem:[#allocation143_spill] sm:$0xff] }
 0x6c2   : > { %14700 = vst [vmem:[#allocation179_spill] sm:$0xff] %v10998_v53  ;;  %v11004_v19 = vpop.f32.mrf.mxu3  ;;  %v11008_v12 = vpop.f32.mrf.mxu0  ;;  %v14716_v28 = vld [vmem:[#allocation89_spill] sm:$0xff]  ;;  %v14720_v45 = vld [vmem:[#allocation131_spill] sm:$0xff] }
 0x6c3   : > { %14702 = vst [vmem:[#allocation175_spill] sm:$0xff] %v11004_v19  ;;  %5001 = vmatpush.msrb.mxu0 %v4484_v60  ;;  %4960 = vmatpush.msra.mxu2 %v4699_v11  ;;  %v4452_v60 = vmul.f32 %v10525_v24, %v14710_v31  ;;  %v4675_v11 = vmul.f32 %v10767_v43, %v14711_v9  ;;  %v14715_v24 = vld [vmem:[#allocation139_spill] sm:$0xff]  ;;  %v14762_v53 = vld [vmem:[#allocation245_spill] sm:$0xff] }
 0x6c4   : > { %6798 = vmatmul.msk.f32.gmra.mxu1 %vm2514_vm9, %v10646_v27  ;;  %v14707_v27 = vld [vmem:[#allocation101_spill] sm:$0xff]  ;;  %v4659_v43 = vmul.f32 %v10726_v2, %v14715_v24 }
 0x6c5   : > { %5002 = vmatpush.msrb.mxu0 %v4476_v58  ;;  %v4460_v50 = vmul.f32 %v10544_v42, %v14707_v27  ;;  %4961 = vmatpush.msra.mxu2 %v4691_v7  ;;  %v4444_v58 = vmul.f32 %v10506_v54, %v14713_v20  ;;  %v4436_v7 = vmul.f32 %v10487_v56, %v14716_v28  ;;  %v11054_v27 = vld [vmem:[%s9673_s8 + $0x10] sm:$0xff]  ;;  %v14717_v54 = vld [vmem:[#allocation135_spill] sm:$0xff]  ;;  %v14724_v20 = vld [vmem:[#allocation77_spill] sm:$0xff] }
 0x6c6   : > { %7070 = vmatmul.msk.f32.vlgmr.msrb.gmra.mxu2 %vm2514_vm9, %v10986_v15  ;;  %6943 = vmatmul.msk.f32.gmra.mxu0 %vm2514_vm9, %v11021_v13  ;;  %v14729_v24 = vld [vmem:[#allocation65_spill] sm:$0xff] }
 0x6c7   : > { %7134 = vmatmul.msk.f32.vlgmr.msrb.gmra.mxu3 %vm2514_vm9, %v10986_v15  ;;  %5003 = vmatpush.msrb.mxu0 %v4468_v4  ;;  %v4667_v4 = vmul.f32 %v10745_v3, %v14714_v8  ;;  %v4651_v3 = vmul.f32 %v10696_v48, %v14717_v54  ;;  %v14722_v48 = vld [vmem:[#allocation81_spill] sm:$0xff] }
 0x6c8   : > { %4962 = vmatpush.msra.mxu2 %v4683_v46  ;;  %v4643_v46 = vmul.f32 %v10669_v26, %v14720_v45  ;;  %v14725_v26 = vld [vmem:[#allocation73_spill] sm:$0xff] }
 0x6c9   : > { %v11031_v41 = vpop.f32.mrf.mxu2  ;;  %v11033_v14 = vpop.f32.mrf.mxu1  ;;  %5004 = vmatpush.msrb.mxu0 %v4460_v50  ;;  %v4404_v8 = vmul.f32 %v10408_v47, %v14725_v26 }
 0x6ca   : > { %14709 = vst [vmem:[#allocation171_spill] sm:$0xff] %v11031_v41  ;;  %v11039_v23 = vpop.f32.mrf.mxu3  ;;  %v11041_v42 = vpop.f32.mrf.mxu0  ;;  %4963 = vmatpush.msra.mxu2 %v4675_v11  ;;  %v14723_v11 = vld [vmem:[#allocation127_spill] sm:$0xff] }
 0x6cb   : > { %14712 = vst [vmem:[#allocation121_spill] sm:$0xff] %v11039_v23  ;;  %5005 = vmatpush.msrb.mxu0 %v4452_v60  ;;  %v4420_v60 = vmul.f32 %v10449_v57, %v14722_v48  ;;  %v11089_v57 = vld [vmem:[%s9673_s8 + $0x18] sm:$0xff] }
 0x6cc   : > { %6799 = vmatmul.msk.f32.gmra.mxu1 %vm2514_vm9, %v10672_v32  ;;  %4964 = vmatpush.msra.mxu2 %v4667_v4  ;;  %v14718_v32 = vld [vmem:[#allocation85_spill] sm:$0xff] }
 0x6cd   : > { %5006 = vmatpush.msrb.mxu0 %v4444_v58  ;;  %v4428_v2 = vmul.f32 %v10468_v40, %v14718_v32  ;;  %v4635_v40 = vmul.f32 %v10643_v33, %v14723_v11  ;;  %v4412_v58 = vmul.f32 %v10430_v51, %v14724_v20  ;;  %v14726_v33 = vld [vmem:[#allocation69_spill] sm:$0xff]  ;;  %v11133_v32 = vld [vmem:[%s9673_s8 + $0x28] sm:$0xff] }
 0x6ce   : > { %6944 = vmatmul.msk.f32.gmra.mxu0 %vm2514_vm9, %v11054_v27  ;;  %7071 = vmatmul.msk.f32.gmra.mxu2 %vm2514_vm9, %v11021_v13  ;;  %v4396_v51 = vmul.f32 %v10387_v61, %v14726_v33  ;;  %v11114_v61 = vld [vmem:[%s9673_s8 + $0x20] sm:$0xff] }
 0x6cf   : > { %7135 = vmatmul.msk.f32.gmra.mxu3 %vm2514_vm9, %v11021_v13  ;;  %4965 = vmatpush.msra.mxu2 %v4659_v43  ;;  %v4388_v43 = vmul.f32 %v10357_v36, %v14729_v24 }
 0x6d0   : > { %5007 = vmatpush.msrb.mxu0 %v4436_v7  ;;  %v14730_v7 = vld [vmem:[#allocation61_spill] sm:$0xff] }
 0x6d1   : > { %v11066_v56 = vpop.f32.mrf.mxu2  ;;  %v11068_v50 = vpop.f32.mrf.mxu1  ;;  %4966 = vmatpush.msra.mxu2 %v4651_v3  ;;  %v4380_v54 = vmul.f32 %v10327_v52, %v14730_v7 }
 0x6d2   : > { %14719 = vst [vmem:[#allocation167_spill] sm:$0xff] %v11066_v56  ;;  %v11072_v31 = vpop.f32.mrf.mxu3  ;;  %5008 = vmatpush.msrb.mxu0 %v4428_v2  ;;  %v11076_v9 = vpop.f32.mrf.mxu0 }
 0x6d3   : > { %14721 = vst [vmem:[#allocation117_spill] sm:$0xff] %v11072_v31  ;;  %4967 = vmatpush.msra.mxu2 %v4643_v46 }
 0x6d4   : > { %5009 = vmatpush.msrb.mxu0 %v4420_v60  ;;  %6800 = vmatmul.msk.f32.gmra.mxu1 %vm2514_vm9, %v10699_v34 }
 0x6d5   : > { %4968 = vmatpush.msra.mxu2 %v4635_v40 }
 0x6d6   : > { %5010 = vmatpush.msrb.mxu0 %v4412_v58  ;;  %7072 = vmatmul.msk.f32.gmra.mxu2 %vm2514_vm9, %v11054_v27 }
 0x6d7   : > { %6945 = vmatmul.msk.f32.gmra.mxu0 %vm2514_vm9, %v11089_v57  ;;  %7136 = vmatmul.msk.f32.gmra.mxu3 %vm2514_vm9, %v11054_v27 }
 0x6d8   : > { %5011 = vmatpush.msrb.mxu0 %v4404_v8 }
 0x6d9   : > { %v11097_v34 = vpop.f32.mrf.mxu2  ;;  %v11099_v47 = vpop.f32.mrf.mxu1 }
 0x6da   : > { %14727 = vst [vmem:[#allocation163_spill] sm:$0xff] %v11097_v34  ;;  %v11101_v4 = vpop.f32.mrf.mxu3  ;;  %5012 = vmatpush.msrb.mxu0 %v4396_v51  ;;  %v11105_v28 = vpop.f32.mrf.mxu0 }
 0x6db   : > { %14728 = vst [vmem:[#allocation113_spill] sm:$0xff] %v11101_v4 }
 0x6dc   : > { %5013 = vmatpush.msrb.mxu0 %v4388_v43  ;;  %6801 = vmatmul.msk.f32.gmra.mxu1 %vm2514_vm9, %v10729_v1 }
 0x6de   : > { %5014 = vmatpush.msrb.mxu0 %v4380_v54  ;;  %7073 = vmatmul.msk.f32.gmra.mxu2 %vm2514_vm9, %v11089_v57 }
 0x6df   : > { %6946 = vmatmul.msk.f32.gmra.mxu0 %vm2514_vm9, %v11114_v61  ;;  %7137 = vmatmul.msk.f32.gmra.mxu3 %vm2514_vm9, %v11089_v57 }
 0x6e1   : > { %v11120_v36 = vpop.f32.mrf.mxu2  ;;  %v11122_v52 = vpop.f32.mrf.mxu1 }
 0x6e2   : > { %14731 = vst [vmem:[#allocation159_spill] sm:$0xff] %v11120_v36  ;;  %v11124_v3 = vpop.f32.mrf.mxu3  ;;  %v11126_v1 = vpop.f32.mrf.mxu0 }
 0x6e3   : > { %14732 = vst [vmem:[#allocation109_spill] sm:$0xff] %v11124_v3 }
 0x6e4   : > { %6802 = vmatmul.msk.f32.gmra.mxu1 %vm2514_vm9, %v10748_v35  ;;  %v11152_v35 = vld [vmem:[%s9673_s8 + $0x30] sm:$0xff] }
 0x6e6   : > { %7074 = vmatmul.msk.f32.gmra.mxu2 %vm2514_vm9, %v11114_v61 }
 0x6e7   : > { %6947 = vmatmul.msk.f32.gmra.mxu0 %vm2514_vm9, %v11133_v32  ;;  %7138 = vmatmul.msk.f32.gmra.mxu3 %vm2514_vm9, %v11114_v61 }
 0x6e9   : > { %v11139_v2 = vpop.f32.mrf.mxu2  ;;  %v11141_v45 = vpop.f32.mrf.mxu1 }
 0x6ea   : > { %14733 = vst [vmem:[#allocation105_spill] sm:$0xff] %v11139_v2  ;;  %v11143_v46 = vpop.f32.mrf.mxu3  ;;  %v11145_v48 = vpop.f32.mrf.mxu0 }
 0x6eb   : > { %14734 = vst [vmem:[#allocation155_spill] sm:$0xff] %v11143_v46 }
 0x6ec   : > { %6803 = vmatmul.msk.f32.gmra.mxu1 %vm2514_vm9, %v10770_v37  ;;  %v11171_v37 = vld [vmem:[%s9673_s8 + $0x38] sm:$0xff] }
 0x6ee   : > { %7075 = vmatmul.msk.f32.gmra.mxu2 %vm2514_vm9, %v11133_v32 }
 0x6ef   : > { %6948 = vmatmul.msk.f32.gmra.mxu0 %vm2514_vm9, %v11152_v35  ;;  %7139 = vmatmul.msk.f32.gmra.mxu3 %vm2514_vm9, %v11133_v32 }
 0x6f1   : > { %v11158_v60 = vpop.f32.mrf.mxu2  ;;  %v11160_v11 = vpop.f32.mrf.mxu1 }
 0x6f2   : > { %14735 = vst [vmem:[#allocation101_spill] sm:$0xff] %v11158_v60  ;;  %v11162_v40 = vpop.f32.mrf.mxu3  ;;  %v11164_v20 = vpop.f32.mrf.mxu0 }
 0x6f3   : > { %14736 = vst [vmem:[#allocation151_spill] sm:$0xff] %v11162_v40 }
 0x6f4   : > { %6804 = vmatmul.msk.f32.gmra.mxu1 %vm2514_vm9, %v10789_v29  ;;  %v11190_v29 = vld [vmem:[%s9673_s8 + $0x40] sm:$0xff] }
 0x6f6   : > { %7076 = vmatmul.msk.f32.gmra.mxu2 %vm2514_vm9, %v11152_v35 }
 0x6f7   : > { %6949 = vmatmul.msk.f32.gmra.mxu0 %vm2514_vm9, %v11171_v37  ;;  %7140 = vmatmul.msk.f32.gmra.mxu3 %vm2514_vm9, %v11152_v35 }
 0x6f9   : > { %v11177_v58 = vpop.f32.mrf.mxu2  ;;  %v11179_v26 = vpop.f32.mrf.mxu1 }
 0x6fa   : > { %14737 = vst [vmem:[#allocation97_spill] sm:$0xff] %v11177_v58  ;;  %v11181_v8 = vpop.f32.mrf.mxu3  ;;  %v11183_v33 = vpop.f32.mrf.mxu0 }
 0x6fb   : > { %14738 = vst [vmem:[#allocation147_spill] sm:$0xff] %v11181_v8 }
 0x6fc   : > { %6805 = vmatmul.msk.f32.gmra.mxu1 %vm2514_vm9, %v10808_v44  ;;  %v11209_v44 = vld [vmem:[%s9673_s8 + $0x48] sm:$0xff] }
 0x6fe   : > { %7077 = vmatmul.msk.f32.gmra.mxu2 %vm2514_vm9, %v11171_v37 }
 0x6ff   : > { %6950 = vmatmul.msk.f32.gmra.mxu0 %vm2514_vm9, %v11190_v29  ;;  %7141 = vmatmul.msk.f32.gmra.mxu3 %vm2514_vm9, %v11171_v37 }
 0x701   : > { %v11196_v51 = vpop.f32.mrf.mxu2  ;;  %v11198_v24 = vpop.f32.mrf.mxu1 }
 0x702   : > { %14739 = vst [vmem:[#allocation93_spill] sm:$0xff] %v11196_v51  ;;  %v11200_v43 = vpop.f32.mrf.mxu3  ;;  %v11202_v7 = vpop.f32.mrf.mxu0 }
 0x703   : > { %14740 = vst [vmem:[#allocation143_spill] sm:$0xff] %v11200_v43 }
 0x704   : > { %6806 = vmatmul.msk.f32.gmra.mxu1 %vm2514_vm9, %v10827_v25  ;;  %v11228_v25 = vld [vmem:[%s9673_s8 + $0x50] sm:$0xff] }
 0x706   : > { %7078 = vmatmul.msk.f32.gmra.mxu2 %vm2514_vm9, %v11190_v29 }
 0x707   : > { %6951 = vmatmul.msk.f32.gmra.mxu0 %vm2514_vm9, %v11209_v44  ;;  %7142 = vmatmul.msk.f32.gmra.mxu3 %vm2514_vm9, %v11190_v29 }
 0x709   : > { %v11215_v54 = vpop.f32.mrf.mxu2  ;;  %v11217_v23 = vpop.f32.mrf.mxu1 }
 0x70a   : > { %14741 = vst [vmem:[#allocation139_spill] sm:$0xff] %v11215_v54  ;;  %v11219_v31 = vpop.f32.mrf.mxu3  ;;  %v11221_v4 = vpop.f32.mrf.mxu0  ;;  %v14756_v54 = vld [vmem:[#allocation57_spill] sm:$0xff] }
 0x70b   : > { %14742 = vst [vmem:[#allocation89_spill] sm:$0xff] %v11219_v31 }
 0x70c   : > { %6807 = vmatmul.msk.f32.gmra.mxu1 %vm2514_vm9, %v10846_v21  ;;  %v11245_v21 = vld [vmem:[%s9673_s8 + $0x58] sm:$0xff] }
 0x70e   : > { %7079 = vmatmul.msk.f32.gmra.mxu2 %vm2514_vm9, %v11209_v44 }
 0x70f   : > { %6952 = vmatmul.msk.f32.gmra.mxu0 %vm2514_vm9, %v11228_v25  ;;  %7143 = vmatmul.msk.f32.gmra.mxu3 %vm2514_vm9, %v11209_v44 }
 0x711   : > { %v11234_v3 = vpop.f32.mrf.mxu2  ;;  %v11236_v46 = vpop.f32.mrf.mxu1 }
 0x712   : > { %14743 = vst [vmem:[#allocation135_spill] sm:$0xff] %v11234_v3  ;;  %v11238_v40 = vpop.f32.mrf.mxu3  ;;  %v2901_v8 = vpop.f32.mrf.mxu0 }
 0x713   : > { %14744 = vst [vmem:[#allocation85_spill] sm:$0xff] %v11238_v40 }
 0x714   : > { %6808 = vmatmul.msk.f32.gmra.mxu1 %vm2514_vm9, %v10865_v55  ;;  %v11262_v55 = vld [vmem:[%s9673_s8 + $0x60] sm:$0xff] }
 0x715   : > { %14747 = vst [vmem:[#allocation127_spill] sm:$0xff] %v11262_v55 }
 0x716   : > { %7080 = vmatmul.msk.f32.gmra.mxu2 %vm2514_vm9, %v11228_v25 }
 0x717   : > { %6953 = vmatmul.msk.f32.gmra.mxu0 %vm2514_vm9, %v11245_v21  ;;  %7144 = vmatmul.msk.f32.gmra.mxu3 %vm2514_vm9, %v11228_v25 }
 0x719   : > { %v11251_v43 = vpop.f32.mrf.mxu2  ;;  %v11253_v31 = vpop.f32.mrf.mxu1 }
 0x71a   : > { %14745 = vst [vmem:[#allocation131_spill] sm:$0xff] %v11251_v43  ;;  %v11255_v40 = vpop.f32.mrf.mxu3  ;;  %v2904_v16 = vpop.f32.mrf.mxu0 }
 0x71b   : > { %14746 = vst [vmem:[#allocation81_spill] sm:$0xff] %v11255_v40 }
 0x71c   : > { %6809 = vmatmul.msk.f32.gmra.mxu1 %vm2514_vm9, %v10882_v39  ;;  %v11277_v39 = vld [vmem:[%s9673_s8 + $0x68] sm:$0xff] }
 0x71d   : > { %14750 = vst [vmem:[#allocation69_spill] sm:$0xff] %v11277_v39 }
 0x71e   : > { %7081 = vmatmul.msk.f32.gmra.mxu2 %vm2514_vm9, %v11245_v21 }
 0x71f   : > { %6954 = vmatmul.msk.f32.gmra.mxu0 %vm2514_vm9, %v11262_v55  ;;  %7145 = vmatmul.msk.f32.gmra.mxu3 %vm2514_vm9, %v11245_v21 }
 0x721   : > { %v11268_v19 = vpop.f32.mrf.mxu2  ;;  %v3065_v41 = vpop.f32.mrf.mxu1 }
 0x722   : > { %14748 = vst [vmem:[#allocation77_spill] sm:$0xff] %v11268_v19  ;;  %v11270_v40 = vpop.f32.mrf.mxu3  ;;  %v2907_v56 = vpop.f32.mrf.mxu0  ;;  %v11309_v19 = vld [vmem:[%s9673_s8 + $0x78] sm:$0xff] }
 0x723   : > { %14749 = vst [vmem:[#allocation73_spill] sm:$0xff] %v11270_v40 }
 0x724   : > { %6810 = vmatmul.msk.f32.gmra.mxu1 %vm2514_vm9, %v10902_v6  ;;  %v11292_v6 = vld [vmem:[%s9673_s8 + $0x70] sm:$0xff] }
 0x725   : > { %14753 = vst [vmem:[#allocation590_spill] sm:$0xff] %v11292_v6 }
 0x726   : > { %7082 = vmatmul.msk.f32.gmra.mxu2 %vm2514_vm9, %v11262_v55 }
 0x727   : > { %6955 = vmatmul.msk.f32.gmra.mxu0 %vm2514_vm9, %v11277_v39  ;;  %7146 = vmatmul.msk.f32.gmra.mxu3 %vm2514_vm9, %v11262_v55 }
 0x729   : > { %v11283_v34 = vpop.f32.mrf.mxu2  ;;  %v3068_v36 = vpop.f32.mrf.mxu1 }
 0x72a   : > { %14751 = vst [vmem:[#allocation65_spill] sm:$0xff] %v11283_v34  ;;  %v11285_v2 = vpop.f32.mrf.mxu3  ;;  %v2910_v40 = vpop.f32.mrf.mxu0 }
 0x72b   : > { %14752 = vst [vmem:[#allocation61_spill] sm:$0xff] %v11285_v2 }
 0x72c   : > { %6811 = vmatmul.msk.f32.gmra.mxu1 %vm2514_vm9, %v10919_v18  ;;  %v14757_v18 = vld [vmem:[#allocation247_spill] sm:$0xff] }
 0x72d   : > { %v4875_v43 = vmul.f32 %v2910_v40, %v14757_v18  ;;  %v14759_v40 = vld [vmem:[#allocation249_spill] sm:$0xff]  ;;  %v14760_v18 = vld [vmem:[#allocation239_spill] sm:$0xff] }
 0x72e   : > { %7083 = vmatmul.msk.f32.gmra.mxu2 %vm2514_vm9, %v11277_v39 }
 0x72f   : > { %6956 = vmatmul.msk.f32.gmra.mxu0 %vm2514_vm9, %v11292_v6  ;;  %7147 = vmatmul.msk.f32.gmra.mxu3 %vm2514_vm9, %v11277_v39 }
 0x731   : > { %v11298_v60 = vpop.f32.mrf.mxu2  ;;  %v3071_v58 = vpop.f32.mrf.mxu1 }
 0x732   : > { %14754 = vst [vmem:[#allocation591_spill] sm:$0xff] %v11298_v60  ;;  %v11300_v2 = vpop.f32.mrf.mxu3  ;;  %v2913_v51 = vpop.f32.mrf.mxu0  ;;  %v4859_v60 = vmul.f32 %v2904_v16, %v14760_v18  ;;  %v4748_v39 = vmul.f32 %v3071_v58, %v14762_v53  ;;  %v11334_v16 = vld [vmem:[%s9673_s8 + $0x80] sm:$0xff]  ;;  %v14766_v53 = vld [vmem:[#allocation227_spill] sm:$0xff] }
 0x733   : > { %14755 = vst [vmem:[#allocation592_spill] sm:$0xff] %v11300_v2  ;;  %v4883_v3 = vmul.f32 %v2913_v51, %v14756_v54  ;;  %v14758_v2 = vld [vmem:[#allocation243_spill] sm:$0xff] }
 0x734   : > { %6812 = vmatmul.msk.f32.gmra.mxu1 %vm2514_vm9, %v10939_v5  ;;  %v4867_v34 = vmul.f32 %v2907_v56, %v14758_v2  ;;  %v14764_v56 = vld [vmem:[#allocation231_spill] sm:$0xff] }
 0x735   : > { %4976 = vmatpush.msra.mxu3 %v4883_v3  ;;  %v4843_v2 = vmul.f32 %v11221_v4, %v14764_v56 }
 0x736   : > { %7084 = vmatmul.msk.f32.gmra.mxu2 %vm2514_vm9, %v11292_v6 }
 0x737   : > { %6957 = vmatmul.msk.f32.gmra.mxu0 %vm2514_vm9, %v11309_v19  ;;  %7148 = vmatmul.msk.f32.gmra.mxu3 %vm2514_vm9, %v11292_v6  ;;  %v14763_v6 = vld [vmem:[#allocation235_spill] sm:$0xff] }
 0x738   : > { %4977 = vmatpush.msra.mxu3 %v4875_v43  ;;  %v4851_v55 = vmul.f32 %v2901_v8, %v14763_v6  ;;  %v14765_v43 = vld [vmem:[#allocation241_spill] sm:$0xff]  ;;  %v14768_v8 = vld [vmem:[#allocation223_spill] sm:$0xff] }
 0x739   : > { %v11316_v51 = vpop.f32.mrf.mxu2  ;;  %v3074_v5 = vpop.f32.mrf.mxu1 }
 0x73a   : > { %v11318_v3 = vpop.f32.mrf.mxu3  ;;  %v4756_v54 = vmul.f32 %v3074_v5, %v14759_v40  ;;  %4978 = vmatpush.msra.mxu3 %v4867_v34  ;;  %v11322_v0 = vpop.f32.mrf.mxu0  ;;  %v4740_v5 = vmul.f32 %v3068_v36, %v14765_v43  ;;  %v14767_v34 = vld [vmem:[#allocation237_spill] sm:$0xff] }
 0x73b   : > { %14761 = vst [vmem:[#allocation57_spill] sm:$0xff] %v11322_v0 }
 0x73c   : > { %5045 = vmatpush.msrb.mxu2 %v4756_v54  ;;  %4979 = vmatpush.msra.mxu3 %v4859_v60  ;;  %v4732_v60 = vmul.f32 %v3065_v41, %v14767_v34  ;;  %v14771_v54 = vld [vmem:[#allocation219_spill] sm:$0xff] }
 0x73d   : > { %6813 = vmatmul.msk.f32.gmra.mxu1 %vm2514_vm9, %v10956_v10  ;;  %v4835_v10 = vmul.f32 %v11202_v7, %v14766_v53  ;;  %v14770_v7 = vld [vmem:[#allocation233_spill] sm:$0xff]  ;;  %v4819_v18 = vmul.f32 %v11164_v20, %v14771_v54  ;;  %v11370_v20 = vld [vmem:[%s9673_s8 + $0x88] sm:$0xff] }
 0x73e   : > { %5046 = vmatpush.msrb.mxu2 %v4748_v39  ;;  %4980 = vmatpush.msra.mxu3 %v4851_v55  ;;  %v4827_v55 = vmul.f32 %v11183_v33, %v14768_v8  ;;  %v14769_v39 = vld [vmem:[#allocation185_spill] sm:$0xff]  ;;  %v4724_v41 = vmul.f32 %v11253_v31, %v14770_v7 }
 0x73f   : > { %7085 = vmatmul.msk.f32.gmra.mxu2 %vm2514_vm9, %v11309_v19  ;;  %6958 = vmatmul.msk.f32.gmra.mxu0 %vm2514_vm9, %v11334_v16  ;;  %v4628_v6 = vmul.f32 %v10971_v30, %v14769_v39  ;;  %v14772_v33 = vld [vmem:[#allocation181_spill] sm:$0xff]  ;;  %v14781_v39 = vld [vmem:[#allocation207_spill] sm:$0xff] }
 0x740   : > { %7149 = vmatmul.msk.f32.gmra.mxu3 %vm2514_vm9, %v11309_v19  ;;  %5047 = vmatpush.msrb.mxu2 %v4740_v5  ;;  %v4620_v56 = vmul.f32 %v10951_v22, %v14772_v33  ;;  %v14774_v31 = vld [vmem:[#allocation229_spill] sm:$0xff]  ;;  %v14776_v5 = vld [vmem:[#allocation211_spill] sm:$0xff] }
 0x741   : > { %4981 = vmatpush.msra.mxu3 %v4843_v2  ;;  %v11343_v4 = vpop.f32.mrf.mxu2  ;;  %v11345_v36 = vpop.f32.mrf.mxu1  ;;  %v14773_v2 = vld [vmem:[#allocation215_spill] sm:$0xff]  ;;  %v4716_v43 = vmul.f32 %v11236_v46, %v14774_v31  ;;  %v14780_v8 = vld [vmem:[#allocation173_spill] sm:$0xff] }
 0x742   : > { %v11347_v58 = vpop.f32.mrf.mxu3  ;;  %5048 = vmatpush.msrb.mxu2 %v4732_v60  ;;  %v4811_v30 = vmul.f32 %v11145_v48, %v14773_v2  ;;  %v4803_v48 = vmul.f32 %v11126_v1, %v14776_v5  ;;  %v14782_v1 = vld [vmem:[#allocation221_spill] sm:$0xff]  ;;  %v14789_v2 = vld [vmem:[#allocation195_spill] sm:$0xff] }
 0x743   : > { %4982 = vmatpush.msra.mxu3 %v4835_v10  ;;  %v11355_v40 = vpop.f32.mrf.mxu0  ;;  %v14778_v10 = vld [vmem:[#allocation225_spill] sm:$0xff] }
 0x744   : > { %5049 = vmatpush.msrb.mxu2 %v4724_v41  ;;  %v4708_v46 = vmul.f32 %v11217_v23, %v14778_v10  ;;  %v14783_v23 = vld [vmem:[#allocation203_spill] sm:$0xff]  ;;  %v14785_v54 = vld [vmem:[#allocation217_spill] sm:$0xff] }
 0x745   : > { %4983 = vmatpush.msra.mxu3 %v4827_v55  ;;  %7006 = vmatmul.msk.f32.vlgmr.msra.gmra.mxu1 %vm2514_vm9, %v10986_v15  ;;  %v14775_v15 = vld [vmem:[#allocation177_spill] sm:$0xff]  ;;  %v4604_v55 = vmul.f32 %v10914_v59, %v14780_v8  ;;  %v4787_v41 = vmul.f32 %v11076_v9, %v14783_v23  ;;  %v11409_v9 = vld [vmem:[%s9673_s8 + $0x90] sm:$0xff] }
 0x746   : > { %5022 = vmatpush.msra.mxu1 %v4628_v6  ;;  %v4612_v22 = vmul.f32 %v10934_v63, %v14775_v15  ;;  %5050 = vmatpush.msrb.mxu2 %v4716_v43  ;;  %v4795_v63 = vmul.f32 %v11105_v28, %v14781_v39  ;;  %v4700_v6 = vmul.f32 %v11198_v24, %v14782_v1  ;;  %v14784_v59 = vld [vmem:[#allocation169_spill] sm:$0xff]  ;;  %v14786_v24 = vld [vmem:[#allocation199_spill] sm:$0xff]  ;;  %v14792_v15 = vld [vmem:[#allocation578_spill] sm:$0xff] }
 0x747   : > { %7086 = vmatmul.msk.f32.gmra.mxu2 %vm2514_vm9, %v11334_v16  ;;  %4984 = vmatpush.msra.mxu3 %v4819_v18  ;;  %v4596_v28 = vmul.f32 %v10897_v38, %v14784_v59  ;;  %v4692_v18 = vmul.f32 %v11179_v26, %v14785_v54  ;;  %v4779_v33 = vmul.f32 %v11041_v42, %v14786_v24  ;;  %v14791_v43 = vld [vmem:[#allocation161_spill] sm:$0xff]  ;;  %v14800_v1 = vld [vmem:[#allocation572_spill] sm:$0xff] }
 0x748   : > { %6959 = vmatmul.msk.f32.gmra.mxu0 %vm2514_vm9, %v11370_v20  ;;  %7150 = vmatmul.msk.f32.gmra.mxu3 %vm2514_vm9, %v11334_v16  ;;  %v14793_v5 = vld [vmem:[#allocation209_spill] sm:$0xff] }
 0x749   : > { %4985 = vmatpush.msra.mxu3 %v4811_v30  ;;  %5023 = vmatpush.msra.mxu1 %v4620_v56  ;;  %v11380_v53 = vpop.f32.mrf.mxu2  ;;  %v11386_v60 = vpop.f32.mrf.mxu1  ;;  %v14788_v56 = vld [vmem:[#allocation213_spill] sm:$0xff]  ;;  %v4771_v30 = vmul.f32 %v11008_v12, %v14789_v2 }
 0x74a   : > { %14777 = vst [vmem:[#allocation247_spill] sm:$0xff] %v11380_v53  ;;  %v11384_v34 = vpop.f32.mrf.mxu3  ;;  %5051 = vmatpush.msrb.mxu2 %v4708_v46  ;;  %v4684_v26 = vmul.f32 %v11160_v11, %v14788_v56  ;;  %v14795_v11 = vld [vmem:[#allocation191_spill] sm:$0xff]  ;;  %v14796_v12 = vld [vmem:[#allocation157_spill] sm:$0xff] }
 0x74b   : > { %14779 = vst [vmem:[#allocation243_spill] sm:$0xff] %v11384_v34  ;;  %4986 = vmatpush.msra.mxu3 %v4803_v48  ;;  %5024 = vmatpush.msra.mxu1 %v4612_v22  ;;  %v11394_v7 = vpop.f32.mrf.mxu0  ;;  %v4580_v22 = vmul.f32 %v14792_v15, %v14791_v43  ;;  %v4676_v48 = vmul.f32 %v11141_v45, %v14793_v5  ;;  %v14797_v46 = vld [vmem:[#allocation575_spill] sm:$0xff]  ;;  %v14799_v45 = vld [vmem:[#allocation153_spill] sm:$0xff] }
 0x74c   : > { %5052 = vmatpush.msrb.mxu2 %v4700_v6  ;;  %v4763_v10 = vmul.f32 %v10976_v62, %v14795_v11  ;;  %v4572_v8 = vmul.f32 %v14797_v46, %v14796_v12  ;;  %v4564_v6 = vmul.f32 %v14800_v1, %v14799_v45  ;;  %v14801_v62 = vld [vmem:[#allocation201_spill] sm:$0xff] }
 0x74d   : > { %4987 = vmatpush.msra.mxu3 %v4795_v63  ;;  %5025 = vmatpush.msra.mxu1 %v4604_v55  ;;  %v14798_v55 = vld [vmem:[#allocation205_spill] sm:$0xff]  ;;  %v4660_v23 = vmul.f32 %v11099_v47, %v14801_v62  ;;  %v14822_v62 = vld [vmem:[#allocation111_spill] sm:$0xff] }
 0x74e   : > { %7007 = vmatmul.msk.f32.gmra.mxu1 %vm2514_vm9, %v11021_v13  ;;  %v14787_v13 = vld [vmem:[#allocation165_spill] sm:$0xff]  ;;  %5053 = vmatpush.msrb.mxu2 %v4692_v18  ;;  %v4668_v39 = vmul.f32 %v11122_v52, %v14798_v55 }
 0x74f   : > { %7087 = vmatmul.msk.f32.gmra.mxu2 %vm2514_vm9, %v11370_v20  ;;  %4988 = vmatpush.msra.mxu3 %v4787_v41  ;;  %v4588_v38 = vmul.f32 %v10877_v17, %v14787_v13  ;;  %v11446_v41 = vld [vmem:[%s9673_s8 + $0x98] sm:$0xff] }
 0x750   : > { %6960 = vmatmul.msk.f32.gmra.mxu0 %vm2514_vm9, %v11409_v9  ;;  %7151 = vmatmul.msk.f32.gmra.mxu3 %vm2514_vm9, %v11370_v20  ;;  %v14802_v52 = vld [vmem:[#allocation149_spill] sm:$0xff] }
 0x751   : > { %5026 = vmatpush.msra.mxu1 %v4596_v28  ;;  %4989 = vmatpush.msra.mxu3 %v4779_v33  ;;  %v11421_v42 = vpop.f32.mrf.mxu2  ;;  %v11423_v31 = vpop.f32.mrf.mxu1  ;;  %v14803_v59 = vld [vmem:[#allocation569_spill] sm:$0xff]  ;;  %v14807_v33 = vld [vmem:[#allocation566_spill] sm:$0xff] }
 0x752   : > { %14790 = vst [vmem:[#allocation249_spill] sm:$0xff] %v11421_v42  ;;  %5054 = vmatpush.msrb.mxu2 %v4684_v26  ;;  %v11429_v17 = vpop.f32.mrf.mxu3  ;;  %v4556_v28 = vmul.f32 %v14803_v59, %v14802_v52  ;;  %v14806_v24 = vld [vmem:[#allocation145_spill] sm:$0xff]  ;;  %v11504_v52 = vld [vmem:[%s9673_s8 + $0xa8] sm:$0xff] }
 0x753   : > { %5027 = vmatpush.msra.mxu1 %v4588_v38  ;;  %14794 = vst [vmem:[#allocation239_spill] sm:$0xff] %v11429_v17  ;;  %4990 = vmatpush.msra.mxu3 %v4771_v30  ;;  %v4548_v13 = vmul.f32 %v14807_v33, %v14806_v24  ;;  %v14809_v56 = vld [vmem:[#allocation193_spill] sm:$0xff]  ;;  %v14811_v30 = vld [vmem:[#allocation63_spill] sm:$0xff] }
 0x754   : > { %5055 = vmatpush.msrb.mxu2 %v4676_v48  ;;  %v11437_v63 = vpop.f32.mrf.mxu0  ;;  %v4644_v26 = vmul.f32 %v11033_v14, %v14809_v56  ;;  %v14810_v2 = vld [vmem:[#allocation141_spill] sm:$0xff]  ;;  %v14814_v48 = vld [vmem:[#allocation75_spill] sm:$0xff]  ;;  %v11479_v14 = vld [vmem:[%s9673_s8 + $0xa0] sm:$0xff] }
 0x755   : > { %5028 = vmatpush.msra.mxu1 %v4580_v22  ;;  %4991 = vmatpush.msra.mxu3 %v4763_v10  ;;  %v4540_v43 = vmul.f32 %v14811_v30, %v14810_v2  ;;  %v14812_v15 = vld [vmem:[#allocation189_spill] sm:$0xff]  ;;  %v14816_v10 = vld [vmem:[#allocation87_spill] sm:$0xff] }
 0x756   : > { %7008 = vmatmul.msk.f32.gmra.mxu1 %vm2514_vm9, %v11054_v27  ;;  %5056 = vmatpush.msrb.mxu2 %v4668_v39  ;;  %v14804_v27 = vld [vmem:[#allocation197_spill] sm:$0xff]  ;;  %v4636_v22 = vmul.f32 %v11000_v49, %v14812_v15  ;;  %v14820_v39 = vld [vmem:[#allocation99_spill] sm:$0xff] }
 0x757   : > { %5029 = vmatpush.msra.mxu1 %v4572_v8  ;;  %7088 = vmatmul.msk.f32.gmra.mxu2 %vm2514_vm9, %v11409_v9  ;;  %v4652_v54 = vmul.f32 %v11068_v50, %v14804_v27  ;;  %v14813_v5 = vld [vmem:[#allocation137_spill] sm:$0xff] }
 0x758   : > { %6961 = vmatmul.msk.f32.gmra.mxu0 %vm2514_vm9, %v11446_v41  ;;  %7152 = vmatmul.msk.f32.gmra.mxu3 %vm2514_vm9, %v11409_v9  ;;  %v4532_v11 = vmul.f32 %v14814_v48, %v14813_v5  ;;  %v14815_v49 = vld [vmem:[#allocation133_spill] sm:$0xff] }
 0x759   : > { %5030 = vmatpush.msra.mxu1 %v4564_v6  ;;  %5057 = vmatpush.msrb.mxu2 %v4660_v23  ;;  %v11458_v47 = vpop.f32.mrf.mxu2  ;;  %v11460_v18 = vpop.f32.mrf.mxu1  ;;  %v14819_v55 = vld [vmem:[#allocation129_spill] sm:$0xff] }
 0x75a   : > { %14805 = vst [vmem:[#allocation245_spill] sm:$0xff] %v11458_v47  ;;  %v11464_v38 = vpop.f32.mrf.mxu3  ;;  %v4516_v45 = vmul.f32 %v14820_v39, %v14819_v55  ;;  %v14821_v6 = vld [vmem:[#allocation125_spill] sm:$0xff] }
 0x75b   : > { %5031 = vmatpush.msra.mxu1 %v4556_v28  ;;  %14808 = vst [vmem:[#allocation235_spill] sm:$0xff] %v11464_v38  ;;  %5058 = vmatpush.msrb.mxu2 %v4652_v54  ;;  %v4508_v23 = vmul.f32 %v14822_v62, %v14821_v6  ;;  %v11523_v54 = vld [vmem:[%s9673_s8 + $0xb0] sm:$0xff] }
 0x75c   : > { %v11470_v50 = vpop.f32.mrf.mxu0 }
 0x75d   : > { %5032 = vmatpush.msra.mxu1 %v4548_v13  ;;  %5059 = vmatpush.msrb.mxu2 %v4644_v26 }
 0x75e   : > { %7009 = vmatmul.msk.f32.gmra.mxu1 %vm2514_vm9, %v11089_v57  ;;  %v4524_v57 = vmul.f32 %v14816_v10, %v14815_v49 }
 0x75f   : > { %5033 = vmatpush.msra.mxu1 %v4540_v43  ;;  %5060 = vmatpush.msrb.mxu2 %v4636_v22 }
 0x760   : > { %6962 = vmatmul.msk.f32.gmra.mxu0 %vm2514_vm9, %v11479_v14  ;;  %7089 = vmatmul.msk.f32.gmra.mxu2 %vm2514_vm9, %v11446_v41 }
 0x761   : > { %7153 = vmatmul.msk.f32.gmra.mxu3 %vm2514_vm9, %v11446_v41  ;;  %5034 = vmatpush.msra.mxu1 %v4532_v11  ;;  %v11489_v12 = vpop.f32.mrf.mxu2  ;;  %v11491_v46 = vpop.f32.mrf.mxu1 }
 0x762   : > { %14817 = vst [vmem:[#allocation231_spill] sm:$0xff] %v11489_v12  ;;  %v11493_v8 = vpop.f32.mrf.mxu3  ;;  %v14844_v12 = vld [vmem:[#allocation590_spill] sm:$0xff] }
 0x763   : > { %14818 = vst [vmem:[#allocation241_spill] sm:$0xff] %v11493_v8  ;;  %5035 = vmatpush.msra.mxu1 %v4524_v57 }
 0x764   : > { %v11497_v1 = vpop.f32.mrf.mxu0 }
 0x765   : > { %5036 = vmatpush.msra.mxu1 %v4516_v45 }
 0x766   : > { %7010 = vmatmul.msk.f32.gmra.mxu1 %vm2514_vm9, %v11114_v61 }
 0x767   : > { %5037 = vmatpush.msra.mxu1 %v4508_v23 }
 0x768   : > { %6963 = vmatmul.msk.f32.gmra.mxu0 %vm2514_vm9, %v11504_v52  ;;  %7090 = vmatmul.msk.f32.gmra.mxu2 %vm2514_vm9, %v11479_v14 }
 0x769   : > { %7154 = vmatmul.msk.f32.gmra.mxu3 %vm2514_vm9, %v11479_v14  ;;  %v11512_v59 = vpop.f32.mrf.mxu2  ;;  %v11514_v28 = vpop.f32.mrf.mxu1 }
 0x76a   : > { %14823 = vst [vmem:[#allocation227_spill] sm:$0xff] %v11512_v59  ;;  %v11516_v27 = vpop.f32.mrf.mxu3 }
 0x76b   : > { %14824 = vst [vmem:[#allocation237_spill] sm:$0xff] %v11516_v27 }
 0x76c   : > { %v11518_v61 = vpop.f32.mrf.mxu0 }
 0x76e   : > { %7011 = vmatmul.msk.f32.gmra.mxu1 %vm2514_vm9, %v11133_v32  ;;  %v11542_v32 = vld [vmem:[%s9673_s8 + $0xb8] sm:$0xff] }
 0x770   : > { %6964 = vmatmul.msk.f32.gmra.mxu0 %vm2514_vm9, %v11523_v54  ;;  %7091 = vmatmul.msk.f32.gmra.mxu2 %vm2514_vm9, %v11504_v52 }
 0x771   : > { %7155 = vmatmul.msk.f32.gmra.mxu3 %vm2514_vm9, %v11504_v52  ;;  %v11531_v24 = vpop.f32.mrf.mxu2  ;;  %v11533_v33 = vpop.f32.mrf.mxu1 }
 0x772   : > { %14825 = vst [vmem:[#allocation223_spill] sm:$0xff] %v11531_v24  ;;  %v11535_v13 = vpop.f32.mrf.mxu3  ;;  %v14846_v24 = vld [vmem:[#allocation308_spill] sm:$0xff] }
 0x773   : > { %14826 = vst [vmem:[#allocation185_spill] sm:$0xff] %v11535_v13 }
 0x774   : > { %v11537_v56 = vpop.f32.mrf.mxu0 }
 0x776   : > { %7012 = vmatmul.msk.f32.gmra.mxu1 %vm2514_vm9, %v11152_v35  ;;  %v11561_v35 = vld [vmem:[%s9673_s8 + $0xc0] sm:$0xff] }
 0x778   : > { %6965 = vmatmul.msk.f32.gmra.mxu0 %vm2514_vm9, %v11542_v32  ;;  %7092 = vmatmul.msk.f32.gmra.mxu2 %vm2514_vm9, %v11523_v54 }
 0x779   : > { %7156 = vmatmul.msk.f32.gmra.mxu3 %vm2514_vm9, %v11523_v54  ;;  %v11550_v26 = vpop.f32.mrf.mxu2  ;;  %v11552_v2 = vpop.f32.mrf.mxu1 }
 0x77a   : > { %14827 = vst [vmem:[#allocation233_spill] sm:$0xff] %v11550_v26  ;;  %v11554_v30 = vpop.f32.mrf.mxu3 }
 0x77b   : > { %14828 = vst [vmem:[#allocation219_spill] sm:$0xff] %v11554_v30  ;;  %v11652_v30 = vld [vmem:[%s9673_s8 + $0xe8] sm:$0xff] }
 0x77c   : > { %v11556_v43 = vpop.f32.mrf.mxu0 }
 0x77e   : > { %7013 = vmatmul.msk.f32.gmra.mxu1 %vm2514_vm9, %v11171_v37  ;;  %v11580_v37 = vld [vmem:[%s9673_s8 + $0xc8] sm:$0xff] }
 0x780   : > { %6966 = vmatmul.msk.f32.gmra.mxu0 %vm2514_vm9, %v11561_v35  ;;  %7093 = vmatmul.msk.f32.gmra.mxu2 %vm2514_vm9, %v11542_v32 }
 0x781   : > { %7157 = vmatmul.msk.f32.gmra.mxu3 %vm2514_vm9, %v11542_v32  ;;  %v11569_v15 = vpop.f32.mrf.mxu2  ;;  %v11571_v22 = vpop.f32.mrf.mxu1 }
 0x782   : > { %14829 = vst [vmem:[#allocation181_spill] sm:$0xff] %v11569_v15  ;;  %v11573_v5 = vpop.f32.mrf.mxu3  ;;  %v14847_v15 = vld [vmem:[#allocation304_spill] sm:$0xff] }
 0x783   : > { %14830 = vst [vmem:[#allocation215_spill] sm:$0xff] %v11573_v5 }
 0x784   : > { %v11575_v48 = vpop.f32.mrf.mxu0 }
 0x786   : > { %7014 = vmatmul.msk.f32.gmra.mxu1 %vm2514_vm9, %v11190_v29  ;;  %v11599_v29 = vld [vmem:[%s9673_s8 + $0xd0] sm:$0xff] }
 0x788   : > { %6967 = vmatmul.msk.f32.gmra.mxu0 %vm2514_vm9, %v11580_v37  ;;  %7094 = vmatmul.msk.f32.gmra.mxu2 %vm2514_vm9, %v11561_v35 }
 0x789   : > { %7158 = vmatmul.msk.f32.gmra.mxu3 %vm2514_vm9, %v11561_v35  ;;  %v11588_v11 = vpop.f32.mrf.mxu2  ;;  %v11590_v49 = vpop.f32.mrf.mxu1 }
 0x78a   : > { %14831 = vst [vmem:[#allocation229_spill] sm:$0xff] %v11588_v11  ;;  %v11592_v10 = vpop.f32.mrf.mxu3 }
 0x78b   : > { %14832 = vst [vmem:[#allocation177_spill] sm:$0xff] %v11592_v10 }
 0x78c   : > { %v11594_v57 = vpop.f32.mrf.mxu0 }
 0x78e   : > { %7015 = vmatmul.msk.f32.gmra.mxu1 %vm2514_vm9, %v11209_v44  ;;  %v11618_v44 = vld [vmem:[%s9673_s8 + $0xd8] sm:$0xff] }
 0x790   : > { %6968 = vmatmul.msk.f32.gmra.mxu0 %vm2514_vm9, %v11599_v29  ;;  %7095 = vmatmul.msk.f32.gmra.mxu2 %vm2514_vm9, %v11580_v37 }
 0x791   : > { %7159 = vmatmul.msk.f32.gmra.mxu3 %vm2514_vm9, %v11580_v37  ;;  %v11607_v55 = vpop.f32.mrf.mxu2  ;;  %v11609_v39 = vpop.f32.mrf.mxu1 }
 0x792   : > { %14833 = vst [vmem:[#allocation211_spill] sm:$0xff] %v11607_v55  ;;  %v11611_v45 = vpop.f32.mrf.mxu3 }
 0x793   : > { %14834 = vst [vmem:[#allocation225_spill] sm:$0xff] %v11611_v45 }
 0x794   : > { %v11613_v6 = vpop.f32.mrf.mxu0 }
 0x796   : > { %7016 = vmatmul.msk.f32.gmra.mxu1 %vm2514_vm9, %v11228_v25  ;;  %v11635_v25 = vld [vmem:[%s9673_s8 + $0xe0] sm:$0xff] }
 0x798   : > { %6969 = vmatmul.msk.f32.gmra.mxu0 %vm2514_vm9, %v11618_v44  ;;  %7096 = vmatmul.msk.f32.gmra.mxu2 %vm2514_vm9, %v11599_v29 }
 0x799   : > { %7160 = vmatmul.msk.f32.gmra.mxu3 %vm2514_vm9, %v11599_v29  ;;  %v11626_v62 = vpop.f32.mrf.mxu2  ;;  %v3110_v23 = vpop.f32.mrf.mxu1 }
 0x79a   : > { %14835 = vst [vmem:[#allocation173_spill] sm:$0xff] %v11626_v62  ;;  %v11628_v34 = vpop.f32.mrf.mxu3 }
 0x79b   : > { %14836 = vst [vmem:[#allocation207_spill] sm:$0xff] %v11628_v34  ;;  %v14841_v34 = vld [vmem:[#allocation69_spill] sm:$0xff] }
 0x79c   : > { %v11630_v17 = vpop.f32.mrf.mxu0 }
 0x79e   : > { %7017 = vmatmul.msk.f32.gmra.mxu1 %vm2514_vm9, %v11245_v21  ;;  %v14839_v21 = vld [vmem:[#allocation127_spill] sm:$0xff] }
 0x7a0   : > { %6970 = vmatmul.msk.f32.gmra.mxu0 %vm2514_vm9, %v11635_v25  ;;  %7097 = vmatmul.msk.f32.gmra.mxu2 %vm2514_vm9, %v11618_v44 }
 0x7a1   : > { %7161 = vmatmul.msk.f32.gmra.mxu3 %vm2514_vm9, %v11618_v44  ;;  %v11643_v38 = vpop.f32.mrf.mxu2  ;;  %v3113_v8 = vpop.f32.mrf.mxu1 }
 0x7a2   : > { %14837 = vst [vmem:[#allocation221_spill] sm:$0xff] %v11643_v38  ;;  %v11647_v13 = vpop.f32.mrf.mxu3 }
 0x7a3   : > { %14838 = vst [vmem:[#allocation203_spill] sm:$0xff] %v11647_v13  ;;  %v11669_v13 = vld [vmem:[%s9673_s8 + $0xf0] sm:$0xff] }
 0x7a4   : > { %v11645_v27 = vpop.f32.mrf.mxu0 }
 0x7a6   : > { %7018 = vmatmul.msk.f32.gmra.mxu1 %vm2514_vm9, %v14839_v21 }
 0x7a8   : > { %6971 = vmatmul.msk.f32.gmra.mxu0 %vm2514_vm9, %v11652_v30  ;;  %7098 = vmatmul.msk.f32.gmra.mxu2 %vm2514_vm9, %v11635_v25 }
 0x7a9   : > { %7162 = vmatmul.msk.f32.gmra.mxu3 %vm2514_vm9, %v11635_v25  ;;  %v3116_v5 = vpop.f32.mrf.mxu1  ;;  %v11660_v10 = vpop.f32.mrf.mxu2 }
 0x7aa   : > { %14840 = vst [vmem:[#allocation169_spill] sm:$0xff] %v11660_v10  ;;  %v11666_v21 = vpop.f32.mrf.mxu3  ;;  %v11704_v10 = vld [vmem:[%s9673_s8 + $0x100] sm:$0xff] }
 0x7ab   : > { %14842 = vst [vmem:[#allocation217_spill] sm:$0xff] %v11666_v21 }
 0x7ac   : > { %v11662_v45 = vpop.f32.mrf.mxu0 }
 0x7ae   : > { %7019 = vmatmul.msk.f32.gmra.mxu1 %vm2514_vm9, %v14841_v34  ;;  %v11684_v34 = vld [vmem:[%s9673_s8 + $0xf8] sm:$0xff] }
 0x7b0   : > { %6972 = vmatmul.msk.f32.gmra.mxu0 %vm2514_vm9, %v11669_v13  ;;  %7099 = vmatmul.msk.f32.gmra.mxu2 %vm2514_vm9, %v11652_v30 }
 0x7b1   : > { %7163 = vmatmul.msk.f32.gmra.mxu3 %vm2514_vm9, %v11652_v30  ;;  %v3119_v53 = vpop.f32.mrf.mxu1  ;;  %v11679_v47 = vpop.f32.mrf.mxu2 }
 0x7b2   : > { %14843 = vst [vmem:[#allocation199_spill] sm:$0xff] %v11679_v47  ;;  %v11692_v21 = vpop.f32.mrf.mxu3  ;;  %v4876_v11 = vmul.f32 %v3119_v53, %v14847_v15  ;;  %v14851_v53 = vld [vmem:[#allocation298_spill] sm:$0xff] }
 0x7b3   : > { %14845 = vst [vmem:[#allocation165_spill] sm:$0xff] %v11692_v21  ;;  %v12092_v47 = vld [vmem:[%s9673_s8 + $0x1a0] sm:$0xff] }
 0x7b4   : > { %v11677_v42 = vpop.f32.mrf.mxu0 }
 0x7b6   : > { %7020 = vmatmul.msk.f32.gmra.mxu1 %vm2514_vm9, %v14844_v12  ;;  %v14849_v12 = vld [vmem:[#allocation301_spill] sm:$0xff] }
 0x7b7   : > { %v4868_v62 = vmul.f32 %v3116_v5, %v14849_v12 }
 0x7b8   : > { %6973 = vmatmul.msk.f32.gmra.mxu0 %vm2514_vm9, %v11684_v34  ;;  %7100 = vmatmul.msk.f32.gmra.mxu2 %vm2514_vm9, %v11669_v13 }
 0x7b9   : > { %7164 = vmatmul.msk.f32.gmra.mxu3 %vm2514_vm9, %v11669_v13  ;;  %v11701_v38 = vpop.f32.mrf.mxu2 }
 0x7ba   : > { %v3122_v59 = vpop.f32.mrf.mxu1  ;;  %14850 = vst [vmem:[#allocation195_spill] sm:$0xff] %v11701_v38  ;;  %v11716_v15 = vpop.f32.mrf.mxu3 }
 0x7bb   : > { %v4884_v26 = vmul.f32 %v3122_v59, %v14846_v24  ;;  %v4860_v59 = vmul.f32 %v3113_v8, %v14851_v53  ;;  %v14853_v24 = vld [vmem:[#allocation295_spill] sm:$0xff]  ;;  %14854 = vst [vmem:[#allocation578_spill] sm:$0xff] %v11716_v15  ;;  %v12056_v15 = vld [vmem:[%s9673_s8 + $0x190] sm:$0xff] }
 0x7bc   : > { %v11696_v55 = vpop.f32.mrf.mxu0 }
 0x7bd   : > { %14848 = vst [vmem:[#allocation213_spill] sm:$0xff] %v11696_v55  ;;  %5068 = vmatpush.msrb.mxu3 %v4884_v26  ;;  %v4852_v26 = vmul.f32 %v3110_v23, %v14853_v24  ;;  %v14857_v55 = vld [vmem:[#allocation288_spill] sm:$0xff]  ;;  %v14863_v24 = vld [vmem:[#allocation277_spill] sm:$0xff] }
 0x7be   : > { %7021 = vmatmul.msk.f32.gmra.mxu1 %vm2514_vm9, %v11309_v19  ;;  %v4836_v8 = vmul.f32 %v11590_v49, %v14857_v55  ;;  %v14861_v55 = vld [vmem:[#allocation281_spill] sm:$0xff] }
 0x7bf   : > { %5069 = vmatpush.msrb.mxu3 %v4876_v11  ;;  %v14856_v11 = vld [vmem:[#allocation292_spill] sm:$0xff]  ;;  %v4820_v53 = vmul.f32 %v11552_v2, %v14861_v55 }
 0x7c0   : > { %6974 = vmatmul.msk.f32.gmra.mxu0 %vm2514_vm9, %v11704_v10  ;;  %7101 = vmatmul.msk.f32.gmra.mxu2 %vm2514_vm9, %v11684_v34  ;;  %v4844_v12 = vmul.f32 %v11609_v39, %v14856_v11  ;;  %v14858_v39 = vld [vmem:[#allocation285_spill] sm:$0xff] }
 0x7c1   : > { %7165 = vmatmul.msk.f32.gmra.mxu3 %vm2514_vm9, %v11684_v34  ;;  %v4828_v23 = vmul.f32 %v11571_v22, %v14858_v39  ;;  %v14865_v22 = vld [vmem:[#allocation273_spill] sm:$0xff] }
 0x7c2   : > { %5070 = vmatpush.msrb.mxu3 %v4868_v62  ;;  %v11713_v19 = vpop.f32.mrf.mxu1  ;;  %v11727_v62 = vld [vmem:[%s9673_s8 + $0x108] sm:$0xff] }
 0x7c3   : > { %14852 = vst [vmem:[#allocation161_spill] sm:$0xff] %v11713_v19  ;;  %v11747_v11 = vpop.f32.mrf.mxu3  ;;  %v12147_v19 = vld [vmem:[%s9673_s8 + $0x1b8] sm:$0xff] }
 0x7c4   : > { %5071 = vmatpush.msrb.mxu3 %v4860_v59  ;;  %14864 = vst [vmem:[#allocation205_spill] sm:$0xff] %v11747_v11 }
 0x7c5   : > { %v11718_v5 = vpop.f32.mrf.mxu0 }
 0x7c6   : > { %14855 = vst [vmem:[#allocation209_spill] sm:$0xff] %v11718_v5  ;;  %5072 = vmatpush.msrb.mxu3 %v4852_v26  ;;  %7022 = vmatmul.msk.f32.gmra.mxu1 %vm2514_vm9, %v11334_v16  ;;  %v11737_v16 = vpop.f32.mrf.mxu2  ;;  %v4812_v26 = vmul.f32 %v11533_v33, %v14863_v24  ;;  %v14866_v33 = vld [vmem:[#allocation269_spill] sm:$0xff] }
 0x7c7   : > { %14859 = vst [vmem:[#allocation191_spill] sm:$0xff] %v11737_v16  ;;  %v4796_v2 = vmul.f32 %v11491_v46, %v14866_v33  ;;  %v14872_v46 = vld [vmem:[#allocation257_spill] sm:$0xff] }
 0x7c8   : > { %6975 = vmatmul.msk.f32.gmra.mxu0 %vm2514_vm9, %v11727_v62  ;;  %5073 = vmatpush.msrb.mxu3 %v4844_v12  ;;  %v4804_v12 = vmul.f32 %v11514_v28, %v14865_v22  ;;  %v14868_v28 = vld [vmem:[#allocation265_spill] sm:$0xff] }
 0x7c9   : > { %7102 = vmatmul.msk.f32.gmra.mxu2 %vm2514_vm9, %v11704_v10  ;;  %7166 = vmatmul.msk.f32.gmra.mxu3 %vm2514_vm9, %v11704_v10  ;;  %v4788_v39 = vmul.f32 %v11460_v18, %v14868_v28 }
 0x7ca   : > { %5074 = vmatpush.msrb.mxu3 %v4836_v8  ;;  %v11754_v8 = vld [vmem:[%s9673_s8 + $0x110] sm:$0xff] }
 0x7cb   : > { %v11739_v49 = vpop.f32.mrf.mxu1  ;;  %v11778_v22 = vpop.f32.mrf.mxu3 }
 0x7cc   : > { %14860 = vst [vmem:[#allocation157_spill] sm:$0xff] %v11739_v49  ;;  %5075 = vmatpush.msrb.mxu3 %v4828_v23 }
 0x7cd   : > { %v11743_v59 = vpop.f32.mrf.mxu0  ;;  %14873 = vst [vmem:[#allocation149_spill] sm:$0xff] %v11778_v22 }
 0x7ce   : > { %14862 = vst [vmem:[#allocation575_spill] sm:$0xff] %v11743_v59  ;;  %5076 = vmatpush.msrb.mxu3 %v4820_v53  ;;  %7023 = vmatmul.msk.f32.gmra.mxu1 %vm2514_vm9, %v11370_v20  ;;  %v11768_v23 = vpop.f32.mrf.mxu2  ;;  %v14871_v53 = vld [vmem:[#allocation261_spill] sm:$0xff]  ;;  %v11910_v59 = vld [vmem:[%s9673_s8 + $0x150] sm:$0xff] }
 0x7cf   : > { %14869 = vst [vmem:[#allocation572_spill] sm:$0xff] %v11768_v23  ;;  %v4780_v24 = vmul.f32 %v11423_v31, %v14871_v53  ;;  %v14874_v31 = vld [vmem:[#allocation253_spill] sm:$0xff]  ;;  %v11819_v53 = vld [vmem:[%s9673_s8 + $0x128] sm:$0xff] }
 0x7d0   : > { %6976 = vmatmul.msk.f32.gmra.mxu0 %vm2514_vm9, %v11754_v8  ;;  %5077 = vmatpush.msrb.mxu3 %v4812_v26  ;;  %v4772_v26 = vmul.f32 %v11386_v60, %v14872_v46 }
 0x7d1   : > { %7103 = vmatmul.msk.f32.gmra.mxu2 %vm2514_vm9, %v11727_v62  ;;  %7167 = vmatmul.msk.f32.gmra.mxu3 %vm2514_vm9, %v11727_v62 }
 0x7d2   : > { %5078 = vmatpush.msrb.mxu3 %v4804_v12  ;;  %v11781_v12 = vld [vmem:[%s9673_s8 + $0x118] sm:$0xff] }
 0x7d3   : > { %v11764_v20 = vpop.f32.mrf.mxu1 }
 0x7d4   : > { %14867 = vst [vmem:[#allocation153_spill] sm:$0xff] %v11764_v20  ;;  %5079 = vmatpush.msrb.mxu3 %v4796_v2  ;;  %v11800_v2 = vld [vmem:[%s9673_s8 + $0x120] sm:$0xff]  ;;  %v12183_v20 = vld [vmem:[%s9673_s8 + $0x1c8] sm:$0xff] }
 0x7d5   : > { %v11770_v55 = vpop.f32.mrf.mxu0 }
 0x7d6   : > { %14870 = vst [vmem:[#allocation201_spill] sm:$0xff] %v11770_v55  ;;  %5080 = vmatpush.msrb.mxu3 %v4788_v39  ;;  %7024 = vmatmul.msk.f32.gmra.mxu1 %vm2514_vm9, %v11409_v9  ;;  %v4764_v9 = vmul.f32 %v11345_v36, %v14874_v31  ;;  %v11795_v33 = vpop.f32.mrf.mxu2  ;;  %v11808_v36 = vpop.f32.mrf.mxu3 }
 0x7d7   : > { %14877 = vst [vmem:[#allocation145_spill] sm:$0xff] %v11795_v33  ;;  %v11874_v33 = vld [vmem:[%s9673_s8 + $0x140] sm:$0xff] }
 0x7d8   : > { %6977 = vmatmul.msk.f32.gmra.mxu0 %vm2514_vm9, %v11781_v12  ;;  %5081 = vmatpush.msrb.mxu3 %v4780_v24  ;;  %14878 = vst [vmem:[#allocation566_spill] sm:$0xff] %v11808_v36 }
 0x7d9   : > { %7104 = vmatmul.msk.f32.gmra.mxu2 %vm2514_vm9, %v11754_v8  ;;  %7168 = vmatmul.msk.f32.gmra.mxu3 %vm2514_vm9, %v11754_v8 }
 0x7da   : > { %5082 = vmatpush.msrb.mxu3 %v4772_v26 }
 0x7db   : > { %v11791_v60 = vpop.f32.mrf.mxu1 }
 0x7dc   : > { %14875 = vst [vmem:[#allocation569_spill] sm:$0xff] %v11791_v60  ;;  %5083 = vmatpush.msrb.mxu3 %v4764_v9 }
 0x7dd   : > { %v11793_v18 = vpop.f32.mrf.mxu0 }
 0x7de   : > { %14876 = vst [vmem:[#allocation197_spill] sm:$0xff] %v11793_v18  ;;  %7025 = vmatmul.msk.f32.gmra.mxu1 %vm2514_vm9, %v11446_v41  ;;  %v11816_v41 = vpop.f32.mrf.mxu2  ;;  %v11827_v24 = vpop.f32.mrf.mxu3 }
 0x7df   : > { %14881 = vst [vmem:[#allocation63_spill] sm:$0xff] %v11816_v41 }
 0x7e0   : > { %6978 = vmatmul.msk.f32.gmra.mxu0 %vm2514_vm9, %v11800_v2  ;;  %14882 = vst [vmem:[#allocation189_spill] sm:$0xff] %v11827_v24 }
 0x7e1   : > { %7105 = vmatmul.msk.f32.gmra.mxu2 %vm2514_vm9, %v11781_v12  ;;  %7169 = vmatmul.msk.f32.gmra.mxu3 %vm2514_vm9, %v11781_v12 }
 0x7e3   : > { %v11812_v39 = vpop.f32.mrf.mxu1 }
 0x7e4   : > { %14880 = vst [vmem:[#allocation141_spill] sm:$0xff] %v11812_v39 }
 0x7e5   : > { %v11810_v28 = vpop.f32.mrf.mxu0 }
 0x7e6   : > { %14879 = vst [vmem:[#allocation193_spill] sm:$0xff] %v11810_v28  ;;  %7026 = vmatmul.msk.f32.gmra.mxu1 %vm2514_vm9, %v11479_v14  ;;  %v11836_v14 = vld [vmem:[%s9673_s8 + $0x130] sm:$0xff]  ;;  %v11844_v31 = vpop.f32.mrf.mxu2  ;;  %v11850_v36 = vpop.f32.mrf.mxu3 }
 0x7e7   : > { %14885 = vst [vmem:[#allocation133_spill] sm:$0xff] %v11844_v31 }
 0x7e8   : > { %6979 = vmatmul.msk.f32.gmra.mxu0 %vm2514_vm9, %v11819_v53  ;;  %14888 = vst [vmem:[#allocation99_spill] sm:$0xff] %v11850_v36 }
 0x7e9   : > { %7106 = vmatmul.msk.f32.gmra.mxu2 %vm2514_vm9, %v11800_v2  ;;  %7170 = vmatmul.msk.f32.gmra.mxu3 %vm2514_vm9, %v11800_v2 }
 0x7eb   : > { %v11831_v26 = vpop.f32.mrf.mxu1 }
 0x7ec   : > { %14884 = vst [vmem:[#allocation75_spill] sm:$0xff] %v11831_v26  ;;  %v12238_v26 = vld [vmem:[%s9673_s8 + $0x1e0] sm:$0xff] }
 0x7ed   : > { %v11829_v46 = vpop.f32.mrf.mxu0  ;;  %14959 = vst [vmem:[#allocation642_spill] sm:$0xff] %v12238_v26 }
 0x7ee   : > { %14883 = vst [vmem:[#allocation137_spill] sm:$0xff] %v11829_v46  ;;  %7027 = vmatmul.msk.f32.gmra.mxu1 %vm2514_vm9, %v11504_v52  ;;  %v11855_v52 = vld [vmem:[%s9673_s8 + $0x138] sm:$0xff]  ;;  %v11863_v24 = vpop.f32.mrf.mxu2 }
 0x7ef   : > { %14889 = vst [vmem:[#allocation125_spill] sm:$0xff] %v11863_v24 }
 0x7f0   : > { %6980 = vmatmul.msk.f32.gmra.mxu0 %vm2514_vm9, %v11836_v14 }
 0x7f1   : > { %7107 = vmatmul.msk.f32.gmra.mxu2 %vm2514_vm9, %v11819_v53  ;;  %7171 = vmatmul.msk.f32.gmra.mxu3 %vm2514_vm9, %v11819_v53 }
 0x7f3   : > { %v11848_v22 = vpop.f32.mrf.mxu1 }
 0x7f4   : > { %14887 = vst [vmem:[#allocation129_spill] sm:$0xff] %v11848_v22 }
 0x7f5   : > { %v11846_v9 = vpop.f32.mrf.mxu0 }
 0x7f6   : > { %14886 = vst [vmem:[#allocation87_spill] sm:$0xff] %v11846_v9  ;;  %7028 = vmatmul.msk.f32.gmra.mxu1 %vm2514_vm9, %v11523_v54  ;;  %v11871_v54 = vpop.f32.mrf.mxu3  ;;  %v11886_v24 = vpop.f32.mrf.mxu2 }
 0x7f7   : > { %14892 = vst [vmem:[#allocation69_spill] sm:$0xff] %v11871_v54 }
 0x7f8   : > { %6981 = vmatmul.msk.f32.gmra.mxu0 %vm2514_vm9, %v11855_v52  ;;  %14895 = vst [vmem:[#allocation304_spill] sm:$0xff] %v11886_v24 }
 0x7f9   : > { %7108 = vmatmul.msk.f32.gmra.mxu2 %vm2514_vm9, %v11836_v14  ;;  %7172 = vmatmul.msk.f32.gmra.mxu3 %vm2514_vm9, %v11836_v14 }
 0x7fb   : > { %v11867_v36 = vpop.f32.mrf.mxu1 }
 0x7fc   : > { %14891 = vst [vmem:[#allocation127_spill] sm:$0xff] %v11867_v36  ;;  %v12274_v36 = vld [vmem:[%s9673_s8 + $0x1f0] sm:$0xff] }
 0x7fd   : > { %v11865_v23 = vpop.f32.mrf.mxu0  ;;  %14966 = vst [vmem:[#allocation649_spill] sm:$0xff] %v12274_v36 }
 0x7fe   : > { %14890 = vst [vmem:[#allocation111_spill] sm:$0xff] %v11865_v23  ;;  %7029 = vmatmul.msk.f32.gmra.mxu1 %vm2514_vm9, %v11542_v32  ;;  %v11891_v32 = vld [vmem:[%s9673_s8 + $0x148] sm:$0xff]  ;;  %v11899_v54 = vpop.f32.mrf.mxu3 }
 0x7ff   : > { %14896 = vst [vmem:[#allocation301_spill] sm:$0xff] %v11899_v54  ;;  %v11965_v23 = vld [vmem:[%s9673_s8 + $0x168] sm:$0xff] }
 0x800   : > { %6982 = vmatmul.msk.f32.gmra.mxu0 %vm2514_vm9, %v11874_v33 }
 0x801   : > { %7109 = vmatmul.msk.f32.gmra.mxu2 %vm2514_vm9, %v11855_v52  ;;  %7173 = vmatmul.msk.f32.gmra.mxu3 %vm2514_vm9, %v11855_v52 }
 0x803   : > { %v11884_v31 = vpop.f32.mrf.mxu1 }
 0x804   : > { %14894 = vst [vmem:[#allocation308_spill] sm:$0xff] %v11884_v31 }
 0x805   : > { %v11882_v41 = vpop.f32.mrf.mxu0 }
 0x806   : > { %14893 = vst [vmem:[#allocation590_spill] sm:$0xff] %v11882_v41  ;;  %7030 = vmatmul.msk.f32.gmra.mxu1 %vm2514_vm9, %v11561_v35  ;;  %v11907_v35 = vpop.f32.mrf.mxu2  ;;  %v11918_v54 = vpop.f32.mrf.mxu3 }
 0x807   : > { %14899 = vst [vmem:[#allocation292_spill] sm:$0xff] %v11907_v35 }
 0x808   : > { %6983 = vmatmul.msk.f32.gmra.mxu0 %vm2514_vm9, %v11891_v32  ;;  %14900 = vst [vmem:[#allocation288_spill] sm:$0xff] %v11918_v54 }
 0x809   : > { %7110 = vmatmul.msk.f32.gmra.mxu2 %vm2514_vm9, %v11874_v33  ;;  %7174 = vmatmul.msk.f32.gmra.mxu3 %vm2514_vm9, %v11874_v33 }
 0x80b   : > { %v11903_v24 = vpop.f32.mrf.mxu1 }
 0x80c   : > { %14898 = vst [vmem:[#allocation295_spill] sm:$0xff] %v11903_v24 }
 0x80d   : > { %v11901_v5 = vpop.f32.mrf.mxu0 }
 0x80e   : > { %14897 = vst [vmem:[#allocation298_spill] sm:$0xff] %v11901_v5  ;;  %7031 = vmatmul.msk.f32.gmra.mxu1 %vm2514_vm9, %v11580_v37  ;;  %v11927_v37 = vld [vmem:[%s9673_s8 + $0x158] sm:$0xff]  ;;  %v11935_v54 = vpop.f32.mrf.mxu2  ;;  %v11941_v46 = vpop.f32.mrf.mxu3 }
 0x80f   : > { %14903 = vst [vmem:[#allocation277_spill] sm:$0xff] %v11935_v54 }
 0x810   : > { %6984 = vmatmul.msk.f32.gmra.mxu0 %vm2514_vm9, %v11910_v59  ;;  %14906 = vst [vmem:[#allocation265_spill] sm:$0xff] %v11941_v46 }
 0x811   : > { %7111 = vmatmul.msk.f32.gmra.mxu2 %vm2514_vm9, %v11891_v32  ;;  %7175 = vmatmul.msk.f32.gmra.mxu3 %vm2514_vm9, %v11891_v32 }
 0x813   : > { %v11922_v18 = vpop.f32.mrf.mxu1 }
 0x814   : > { %14902 = vst [vmem:[#allocation281_spill] sm:$0xff] %v11922_v18 }
 0x815   : > { %v11920_v55 = vpop.f32.mrf.mxu0 }
 0x816   : > { %14901 = vst [vmem:[#allocation285_spill] sm:$0xff] %v11920_v55  ;;  %7032 = vmatmul.msk.f32.gmra.mxu1 %vm2514_vm9, %v11599_v29  ;;  %v11946_v29 = vld [vmem:[%s9673_s8 + $0x160] sm:$0xff]  ;;  %v11954_v54 = vpop.f32.mrf.mxu2 }
 0x817   : > { %14907 = vst [vmem:[#allocation261_spill] sm:$0xff] %v11954_v54 }
 0x818   : > { %6985 = vmatmul.msk.f32.gmra.mxu0 %vm2514_vm9, %v11927_v37 }
 0x819   : > { %7112 = vmatmul.msk.f32.gmra.mxu2 %vm2514_vm9, %v11910_v59  ;;  %7176 = vmatmul.msk.f32.gmra.mxu3 %vm2514_vm9, %v11910_v59 }
 0x81b   : > { %v11939_v28 = vpop.f32.mrf.mxu1 }
 0x81c   : > { %14905 = vst [vmem:[#allocation269_spill] sm:$0xff] %v11939_v28  ;;  %v14977_v28 = vld [vmem:[#allocation60_spill] sm:$0xff] }
 0x81d   : > { %v11937_v35 = vpop.f32.mrf.mxu0 }
 0x81e   : > { %14904 = vst [vmem:[#allocation273_spill] sm:$0xff] %v11937_v35  ;;  %7033 = vmatmul.msk.f32.gmra.mxu1 %vm2514_vm9, %v11618_v44  ;;  %v11962_v44 = vpop.f32.mrf.mxu3  ;;  %v11977_v5 = vpop.f32.mrf.mxu2  ;;  %v12001_v35 = vld [vmem:[%s9673_s8 + $0x178] sm:$0xff] }
 0x81f   : > { %14910 = vst [vmem:[#allocation593_spill] sm:$0xff] %v11962_v44 }
 0x820   : > { %6986 = vmatmul.msk.f32.gmra.mxu0 %vm2514_vm9, %v11946_v29  ;;  %14913 = vst [vmem:[#allocation596_spill] sm:$0xff] %v11977_v5 }
 0x821   : > { %7113 = vmatmul.msk.f32.gmra.mxu2 %vm2514_vm9, %v11927_v37  ;;  %7177 = vmatmul.msk.f32.gmra.mxu3 %vm2514_vm9, %v11927_v37 }
 0x823   : > { %v11958_v46 = vpop.f32.mrf.mxu1 }
 0x824   : > { %14909 = vst [vmem:[#allocation253_spill] sm:$0xff] %v11958_v46 }
 0x825   : > { %v11956_v9 = vpop.f32.mrf.mxu0 }
 0x826   : > { %14908 = vst [vmem:[#allocation257_spill] sm:$0xff] %v11956_v9  ;;  %7034 = vmatmul.msk.f32.gmra.mxu1 %vm2514_vm9, %v11635_v25  ;;  %v11982_v25 = vld [vmem:[%s9673_s8 + $0x170] sm:$0xff]  ;;  %v11990_v44 = vpop.f32.mrf.mxu3 }
 0x827   : > { %14914 = vst [vmem:[#allocation597_spill] sm:$0xff] %v11990_v44 }
 0x828   : > { %6987 = vmatmul.msk.f32.gmra.mxu0 %vm2514_vm9, %v11965_v23 }
 0x829   : > { %7114 = vmatmul.msk.f32.gmra.mxu2 %vm2514_vm9, %v11946_v29  ;;  %7178 = vmatmul.msk.f32.gmra.mxu3 %vm2514_vm9, %v11946_v29 }
 0x82b   : > { %v11975_v41 = vpop.f32.mrf.mxu1 }
 0x82c   : > { %14912 = vst [vmem:[#allocation595_spill] sm:$0xff] %v11975_v41 }
 0x82d   : > { %v11973_v54 = vpop.f32.mrf.mxu0 }
 0x82e   : > { %14911 = vst [vmem:[#allocation594_spill] sm:$0xff] %v11973_v54  ;;  %7035 = vmatmul.msk.f32.gmra.mxu1 %vm2514_vm9, %v11652_v30  ;;  %v11998_v30 = vpop.f32.mrf.mxu2  ;;  %v12009_v44 = vpop.f32.mrf.mxu3 }
 0x82f   : > { %14917 = vst [vmem:[#allocation600_spill] sm:$0xff] %v11998_v30 }
 0x830   : > { %6988 = vmatmul.msk.f32.gmra.mxu0 %vm2514_vm9, %v11982_v25  ;;  %14918 = vst [vmem:[#allocation601_spill] sm:$0xff] %v12009_v44 }
 0x831   : > { %7115 = vmatmul.msk.f32.gmra.mxu2 %vm2514_vm9, %v11965_v23  ;;  %7179 = vmatmul.msk.f32.gmra.mxu3 %vm2514_vm9, %v11965_v23 }
 0x833   : > { %v11994_v5 = vpop.f32.mrf.mxu1 }
 0x834   : > { %14916 = vst [vmem:[#allocation599_spill] sm:$0xff] %v11994_v5  ;;  %v14999_v5 = vld [vmem:[#allocation252_spill] sm:$0xff] }
 0x835   : > { %v11992_v55 = vpop.f32.mrf.mxu0 }
 0x836   : > { %14915 = vst [vmem:[#allocation598_spill] sm:$0xff] %v11992_v55  ;;  %7036 = vmatmul.msk.f32.gmra.mxu1 %vm2514_vm9, %v11669_v13  ;;  %v12018_v13 = vld [vmem:[%s9673_s8 + $0x180] sm:$0xff]  ;;  %v12026_v44 = vpop.f32.mrf.mxu2  ;;  %v12032_v21 = vpop.f32.mrf.mxu3 }
 0x837   : > { %14921 = vst [vmem:[#allocation604_spill] sm:$0xff] %v12026_v44 }
 0x838   : > { %6989 = vmatmul.msk.f32.gmra.mxu0 %vm2514_vm9, %v12001_v35  ;;  %14924 = vst [vmem:[#allocation607_spill] sm:$0xff] %v12032_v21 }
 0x839   : > { %7116 = vmatmul.msk.f32.gmra.mxu2 %vm2514_vm9, %v11982_v25  ;;  %7180 = vmatmul.msk.f32.gmra.mxu3 %vm2514_vm9, %v11982_v25 }
 0x83b   : > { %v12013_v54 = vpop.f32.mrf.mxu1 }
 0x83c   : > { %14920 = vst [vmem:[#allocation603_spill] sm:$0xff] %v12013_v54  ;;  %v15009_v54 = vld [vmem:[#allocation180_spill] sm:$0xff] }
 0x83d   : > { %v12011_v9 = vpop.f32.mrf.mxu0 }
 0x83e   : > { %14919 = vst [vmem:[#allocation602_spill] sm:$0xff] %v12011_v9  ;;  %7037 = vmatmul.msk.f32.gmra.mxu1 %vm2514_vm9, %v11684_v34  ;;  %v12037_v34 = vld [vmem:[%s9673_s8 + $0x188] sm:$0xff]  ;;  %v12045_v44 = vpop.f32.mrf.mxu2 }
 0x83f   : > { %14925 = vst [vmem:[#allocation608_spill] sm:$0xff] %v12045_v44  ;;  %v14978_v9 = vld [vmem:[#allocation47_spill] sm:$0xff] }
 0x840   : > { %6990 = vmatmul.msk.f32.gmra.mxu0 %vm2514_vm9, %v12018_v13  ;;  %v4501_v46 = vmul.f32 %v14978_v9, %v14977_v28  ;;  %v14981_v28 = vld [vmem:[#allocation52_spill] sm:$0xff] }
 0x841   : > { %7117 = vmatmul.msk.f32.gmra.mxu2 %vm2514_vm9, %v12001_v35  ;;  %7181 = vmatmul.msk.f32.gmra.mxu3 %vm2514_vm9, %v12001_v35  ;;  %v14982_v9 = vld [vmem:[#allocation544_spill] sm:$0xff] }
 0x843   : > { %v12030_v55 = vpop.f32.mrf.mxu1 }
 0x844   : > { %14923 = vst [vmem:[#allocation606_spill] sm:$0xff] %v12030_v55 }
 0x845   : > { %v12028_v30 = vpop.f32.mrf.mxu0 }
 0x846   : > { %14922 = vst [vmem:[#allocation605_spill] sm:$0xff] %v12028_v30  ;;  %7038 = vmatmul.msk.f32.gmra.mxu1 %vm2514_vm9, %v11704_v10  ;;  %v12053_v10 = vpop.f32.mrf.mxu3  ;;  %v12068_v11 = vpop.f32.mrf.mxu2  ;;  %v4485_v30 = vmul.f32 %v14982_v9, %v14981_v28 }
 0x847   : > { %14928 = vst [vmem:[#allocation611_spill] sm:$0xff] %v12053_v10 }
 0x848   : > { %6991 = vmatmul.msk.f32.gmra.mxu0 %vm2514_vm9, %v12037_v34  ;;  %14931 = vst [vmem:[#allocation614_spill] sm:$0xff] %v12068_v11 }
 0x849   : > { %7118 = vmatmul.msk.f32.gmra.mxu2 %vm2514_vm9, %v12018_v13  ;;  %7182 = vmatmul.msk.f32.gmra.mxu3 %vm2514_vm9, %v12018_v13 }
 0x84b   : > { %v12049_v21 = vpop.f32.mrf.mxu1 }
 0x84c   : > { %14927 = vst [vmem:[#allocation610_spill] sm:$0xff] %v12049_v21 }
 0x84d   : > { %v12047_v55 = vpop.f32.mrf.mxu0 }
 0x84e   : > { %14926 = vst [vmem:[#allocation609_spill] sm:$0xff] %v12047_v55  ;;  %7039 = vmatmul.msk.f32.gmra.mxu1 %vm2514_vm9, %v11727_v62  ;;  %v12073_v62 = vld [vmem:[%s9673_s8 + $0x198] sm:$0xff]  ;;  %v12081_v10 = vpop.f32.mrf.mxu3  ;;  %v14997_v55 = vld [vmem:[#allocation188_spill] sm:$0xff] }
 0x84f   : > { %14932 = vst [vmem:[#allocation615_spill] sm:$0xff] %v12081_v10 }
 0x850   : > { %6992 = vmatmul.msk.f32.gmra.mxu0 %vm2514_vm9, %v12056_v15 }
 0x851   : > { %7119 = vmatmul.msk.f32.gmra.mxu2 %vm2514_vm9, %v12037_v34  ;;  %7183 = vmatmul.msk.f32.gmra.mxu3 %vm2514_vm9, %v12037_v34 }
 0x853   : > { %v12066_v21 = vpop.f32.mrf.mxu1 }
 0x854   : > { %14930 = vst [vmem:[#allocation613_spill] sm:$0xff] %v12066_v21 }
 0x855   : > { %v12064_v44 = vpop.f32.mrf.mxu0 }
 0x856   : > { %14929 = vst [vmem:[#allocation612_spill] sm:$0xff] %v12064_v44  ;;  %7040 = vmatmul.msk.f32.gmra.mxu1 %vm2514_vm9, %v11754_v8  ;;  %v12089_v8 = vpop.f32.mrf.mxu2  ;;  %v12100_v10 = vpop.f32.mrf.mxu3  ;;  %v4885_v44 = vmul.f32 %v11343_v4, %v14999_v5  ;;  %v15007_v5 = vld [vmem:[#allocation37_spill] sm:$0xff] }
 0x857   : > { %14935 = vst [vmem:[#allocation618_spill] sm:$0xff] %v12089_v8 }
 0x858   : > { %6993 = vmatmul.msk.f32.gmra.mxu0 %vm2514_vm9, %v12073_v62  ;;  %14936 = vst [vmem:[#allocation619_spill] sm:$0xff] %v12100_v10 }
 0x859   : > { %7120 = vmatmul.msk.f32.gmra.mxu2 %vm2514_vm9, %v12056_v15  ;;  %7184 = vmatmul.msk.f32.gmra.mxu3 %vm2514_vm9, %v12056_v15 }
 0x85b   : > { %v12085_v11 = vpop.f32.mrf.mxu1 }
 0x85c   : > { %14934 = vst [vmem:[#allocation617_spill] sm:$0xff] %v12085_v11 }
 0x85d   : > { %v12083_v21 = vpop.f32.mrf.mxu0 }
 0x85e   : > { %14933 = vst [vmem:[#allocation616_spill] sm:$0xff] %v12083_v21  ;;  %7041 = vmatmul.msk.f32.gmra.mxu1 %vm2514_vm9, %v11781_v12  ;;  %v12109_v12 = vld [vmem:[%s9673_s8 + $0x1a8] sm:$0xff]  ;;  %v12117_v10 = vpop.f32.mrf.mxu2  ;;  %v12123_v16 = vpop.f32.mrf.mxu3  ;;  %v15010_v21 = vld [vmem:[#allocation588_spill] sm:$0xff] }
 0x85f   : > { %14939 = vst [vmem:[#allocation622_spill] sm:$0xff] %v12117_v10  ;;  %v4741_v0 = vmul.f32 %v15010_v21, %v15009_v54  ;;  %v15020_v21 = vld [vmem:[#allocation586_spill] sm:$0xff] }
 0x860   : > { %6994 = vmatmul.msk.f32.gmra.mxu0 %vm2514_vm9, %v12092_v47  ;;  %14941 = vst [vmem:[#allocation624_spill] sm:$0xff] %v12123_v16 }
 0x861   : > { %7121 = vmatmul.msk.f32.gmra.mxu2 %vm2514_vm9, %v12073_v62  ;;  %7185 = vmatmul.msk.f32.gmra.mxu3 %vm2514_vm9, %v12073_v62 }
 0x863   : > { %v12104_v38 = vpop.f32.mrf.mxu1 }
 0x864   : > { %14938 = vst [vmem:[#allocation621_spill] sm:$0xff] %v12104_v38 }
 0x865   : > { %v12102_v11 = vpop.f32.mrf.mxu0 }
 0x866   : > { %14937 = vst [vmem:[#allocation620_spill] sm:$0xff] %v12102_v11  ;;  %7042 = vmatmul.msk.f32.gmra.mxu1 %vm2514_vm9, %v11800_v2  ;;  %v12128_v2 = vld [vmem:[%s9673_s8 + $0x1b0] sm:$0xff]  ;;  %v12136_v10 = vpop.f32.mrf.mxu2 }
 0x867   : > { %14942 = vst [vmem:[#allocation625_spill] sm:$0xff] %v12136_v10 }
 0x868   : > { %6995 = vmatmul.msk.f32.gmra.mxu0 %vm2514_vm9, %v12109_v12 }
 0x869   : > { %7122 = vmatmul.msk.f32.gmra.mxu2 %vm2514_vm9, %v12092_v47  ;;  %7186 = vmatmul.msk.f32.gmra.mxu3 %vm2514_vm9, %v12092_v47 }
 0x86b   : > { %v12121_v38 = vpop.f32.mrf.mxu1 }
 0x86c   : > { %14940 = vst [vmem:[#allocation623_spill] sm:$0xff] %v12121_v38 }
 0x86d   : > { %v12119_v8 = vpop.f32.mrf.mxu0 }
 0x86e   : > { %7043 = vmatmul.msk.f32.gmra.mxu1 %vm2514_vm9, %v11819_v53  ;;  %v12144_v53 = vpop.f32.mrf.mxu3  ;;  %v12159_v49 = vpop.f32.mrf.mxu2 }
 0x86f   : > { %14944 = vst [vmem:[#allocation627_spill] sm:$0xff] %v12144_v53 }
 0x870   : > { %6996 = vmatmul.msk.f32.gmra.mxu0 %vm2514_vm9, %v12128_v2  ;;  %14946 = vst [vmem:[#allocation629_spill] sm:$0xff] %v12159_v49 }
 0x871   : > { %7123 = vmatmul.msk.f32.gmra.mxu2 %vm2514_vm9, %v12109_v12  ;;  %7187 = vmatmul.msk.f32.gmra.mxu3 %vm2514_vm9, %v12109_v12 }
 0x873   : > { %v12140_v16 = vpop.f32.mrf.mxu1 }
 0x874   : > { %14943 = vst [vmem:[#allocation626_spill] sm:$0xff] %v12140_v16 }
 0x875   : > { %v12138_v38 = vpop.f32.mrf.mxu0 }
 0x876   : > { %7044 = vmatmul.msk.f32.gmra.mxu1 %vm2514_vm9, %v11836_v14  ;;  %v12164_v14 = vld [vmem:[%s9673_s8 + $0x1c0] sm:$0xff]  ;;  %v12172_v53 = vpop.f32.mrf.mxu3 }
 0x877   : > { %14947 = vst [vmem:[#allocation630_spill] sm:$0xff] %v12172_v53 }
 0x878   : > { %6997 = vmatmul.msk.f32.gmra.mxu0 %vm2514_vm9, %v12147_v19 }
 0x879   : > { %7124 = vmatmul.msk.f32.gmra.mxu2 %vm2514_vm9, %v12128_v2  ;;  %7188 = vmatmul.msk.f32.gmra.mxu3 %vm2514_vm9, %v12128_v2 }
 0x87b   : > { %v12157_v16 = vpop.f32.mrf.mxu1 }
 0x87c   : > { %14945 = vst [vmem:[#allocation628_spill] sm:$0xff] %v12157_v16 }
 0x87d   : > { %v12155_v10 = vpop.f32.mrf.mxu0 }
 0x87e   : > { %7045 = vmatmul.msk.f32.gmra.mxu1 %vm2514_vm9, %v11855_v52  ;;  %v12180_v52 = vpop.f32.mrf.mxu2  ;;  %v12191_v53 = vpop.f32.mrf.mxu3 }
 0x87f   : > { %14949 = vst [vmem:[#allocation632_spill] sm:$0xff] %v12180_v52 }
 0x880   : > { %6998 = vmatmul.msk.f32.gmra.mxu0 %vm2514_vm9, %v12164_v14  ;;  %14950 = vst [vmem:[#allocation633_spill] sm:$0xff] %v12191_v53 }
 0x881   : > { %7125 = vmatmul.msk.f32.gmra.mxu2 %vm2514_vm9, %v12147_v19  ;;  %7189 = vmatmul.msk.f32.gmra.mxu3 %vm2514_vm9, %v12147_v19 }
 0x883   : > { %v12176_v49 = vpop.f32.mrf.mxu1 }
 0x884   : > { %14948 = vst [vmem:[#allocation631_spill] sm:$0xff] %v12176_v49 }
 0x885   : > { %v12174_v16 = vpop.f32.mrf.mxu0 }
 0x886   : > { %7046 = vmatmul.msk.f32.gmra.mxu1 %vm2514_vm9, %v11874_v33  ;;  %v12200_v33 = vld [vmem:[%s9673_s8 + $0x1d0] sm:$0xff]  ;;  %v12208_v53 = vpop.f32.mrf.mxu2  ;;  %v12214_v39 = vpop.f32.mrf.mxu3 }
 0x887   : > { %14952 = vst [vmem:[#allocation635_spill] sm:$0xff] %v12208_v53 }
 0x888   : > { %6999 = vmatmul.msk.f32.gmra.mxu0 %vm2514_vm9, %v12183_v20  ;;  %14954 = vst [vmem:[#allocation637_spill] sm:$0xff] %v12214_v39 }
 0x889   : > { %7126 = vmatmul.msk.f32.gmra.mxu2 %vm2514_vm9, %v12164_v14  ;;  %7190 = vmatmul.msk.f32.gmra.mxu3 %vm2514_vm9, %v12164_v14 }
 0x88b   : > { %v12195_v60 = vpop.f32.mrf.mxu1 }
 0x88c   : > { %14951 = vst [vmem:[#allocation634_spill] sm:$0xff] %v12195_v60 }
 0x88d   : > { %v12193_v49 = vpop.f32.mrf.mxu0 }
 0x88e   : > { %7047 = vmatmul.msk.f32.gmra.mxu1 %vm2514_vm9, %v11891_v32  ;;  %v12219_v32 = vld [vmem:[%s9673_s8 + $0x1d8] sm:$0xff]  ;;  %v12227_v53 = vpop.f32.mrf.mxu2 }
 0x88f   : > { %14955 = vst [vmem:[#allocation638_spill] sm:$0xff] %v12219_v32 }
 0x890   : > { %7000 = vmatmul.msk.f32.gmra.mxu0 %vm2514_vm9, %v12200_v33  ;;  %14956 = vst [vmem:[#allocation639_spill] sm:$0xff] %v12227_v53 }
 0x891   : > { %7127 = vmatmul.msk.f32.gmra.mxu2 %vm2514_vm9, %v12183_v20  ;;  %7191 = vmatmul.msk.f32.gmra.mxu3 %vm2514_vm9, %v12183_v20 }
 0x893   : > { %v12212_v60 = vpop.f32.mrf.mxu1 }
 0x894   : > { %14953 = vst [vmem:[#allocation636_spill] sm:$0xff] %v12212_v60 }
 0x895   : > { %v12210_v52 = vpop.f32.mrf.mxu0 }
 0x896   : > { %7048 = vmatmul.msk.f32.gmra.mxu1 %vm2514_vm9, %v11910_v59  ;;  %v12235_v59 = vpop.f32.mrf.mxu3  ;;  %v12250_v22 = vpop.f32.mrf.mxu2 }
 0x897   : > { %14958 = vst [vmem:[#allocation641_spill] sm:$0xff] %v12235_v59 }
 0x898   : > { %7001 = vmatmul.msk.f32.gmra.mxu0 %vm2514_vm9, %v12219_v32  ;;  %14961 = vst [vmem:[#allocation644_spill] sm:$0xff] %v12250_v22 }
 0x899   : > { %7128 = vmatmul.msk.f32.gmra.mxu2 %vm2514_vm9, %v12200_v33  ;;  %7192 = vmatmul.msk.f32.gmra.mxu3 %vm2514_vm9, %v12200_v33 }
 0x89b   : > { %v12231_v39 = vpop.f32.mrf.mxu1 }
 0x89c   : > { %14957 = vst [vmem:[#allocation640_spill] sm:$0xff] %v12231_v39 }
 0x89d   : > { %v12229_v60 = vpop.f32.mrf.mxu0 }
 0x89e   : > { %7049 = vmatmul.msk.f32.gmra.mxu1 %vm2514_vm9, %v11927_v37  ;;  %v12255_v37 = vld [vmem:[%s9673_s8 + $0x1e8] sm:$0xff]  ;;  %v12263_v59 = vpop.f32.mrf.mxu3 }
 0x89f   : > { %14962 = vst [vmem:[#allocation645_spill] sm:$0xff] %v12255_v37 }
 0x8a0   : > { %7002 = vmatmul.msk.f32.gmra.mxu0 %vm2514_vm9, %v12238_v26  ;;  %14963 = vst [vmem:[#allocation646_spill] sm:$0xff] %v12263_v59 }
 0x8a1   : > { %7129 = vmatmul.msk.f32.gmra.mxu2 %vm2514_vm9, %v12219_v32  ;;  %7193 = vmatmul.msk.f32.gmra.mxu3 %vm2514_vm9, %v12219_v32 }
 0x8a3   : > { %v12248_v39 = vpop.f32.mrf.mxu1 }
 0x8a4   : > { %14960 = vst [vmem:[#allocation643_spill] sm:$0xff] %v12248_v39 }
 0x8a5   : > { %v12246_v53 = vpop.f32.mrf.mxu0 }
 0x8a6   : > { %7050 = vmatmul.msk.f32.gmra.mxu1 %vm2514_vm9, %v11946_v29  ;;  %v12271_v29 = vpop.f32.mrf.mxu2  ;;  %v12282_v59 = vpop.f32.mrf.mxu3 }
 0x8a7   : > { %14965 = vst [vmem:[#allocation648_spill] sm:$0xff] %v12271_v29  ;;  %v12294_v29 = vld [vmem:[%s9673_s8 + $0x1f8] sm:$0xff] }
 0x8a8   : > { %7003 = vmatmul.msk.f32.gmra.mxu0 %vm2514_vm9, %v12255_v37  ;;  %14967 = vst [vmem:[#allocation650_spill] sm:$0xff] %v12282_v59 }
 0x8a9   : > { %7130 = vmatmul.msk.f32.gmra.mxu2 %vm2514_vm9, %v12238_v26  ;;  %7194 = vmatmul.msk.f32.gmra.mxu3 %vm2514_vm9, %v12238_v26  ;;  %14969 = vst [vmem:[#allocation652_spill] sm:$0xff] %v12294_v29 }
 0x8ab   : > { %v12267_v22 = vpop.f32.mrf.mxu1 }
 0x8ac   : > { %14964 = vst [vmem:[#allocation647_spill] sm:$0xff] %v12267_v22 }
 0x8ad   : > { %v12265_v39 = vpop.f32.mrf.mxu0 }
 0x8ae   : > { %7051 = vmatmul.msk.f32.gmra.mxu1 %vm2514_vm9, %v11965_v23  ;;  %v12289_v23 = vld [vmem:[%s7596_s19 + $0x1] ss:$2 sm:$0xf]  ;;  %v12303_v59 = vpop.f32.mrf.mxu2  ;;  %v12314_v18 = vpop.f32.mrf.mxu3 }
 0x8af   : > { %v445_v26 = vperm.slane %v12289_v23, 0  ;;  %14970 = vst [vmem:[#allocation653_spill] sm:$0xff] %v12303_v59  ;;  %v14979_v59 = vld [vmem:[#allocation56_spill] sm:$0xff] }
 0x8b0   : > { %7004 = vmatmul.msk.f32.gmra.mxu0 %vm2514_vm9, %v12274_v36  ;;  %14976 = vst [vmem:[#allocation656_spill] sm:$0xff] %v12314_v18  ;;  %v14026_v18 = vperm.slane %v12289_v23, 3 }
 0x8b1   : > { %7131 = vmatmul.msk.f32.gmra.mxu2 %vm2514_vm9, %v12255_v37  ;;  %7195 = vmatmul.msk.f32.gmra.mxu3 %vm2514_vm9, %v12255_v37 }
 0x8b3   : > { %v12286_v22 = vpop.f32.mrf.mxu1 }
 0x8b4   : > { %14968 = vst [vmem:[#allocation651_spill] sm:$0xff] %v12286_v22  ;;  %v14971_v22 = vld [vmem:[#allocation6_spill] sm:$0xff] }
 0x8b5   : > { %v12284_v31 = vpop.f32.mrf.mxu0  ;;  %vm12306_vm10 = vcmp.eq.s32.totalorder %v14971_v22, %v445_v26  ;;  %vm12347_vm12 = vcmp.eq.s32.totalorder %v14971_v22, %v14026_v18  ;;  %v14998_v18 = vld [vmem:[#allocation179_spill] sm:$0xff] }
 0x8b6   : > { %7052 = vmatmul.msk.f32.gmra.mxu1 %vm2514_vm9, %v11982_v25  ;;  %v12333_v32 = vpop.f32.mrf.mxu2 }
 0x8b7   : > { %14983 = vst [vmem:[#allocation60_spill] sm:$0xff] %v12333_v32  ;;  %v14995_v32 = vld [vmem:[#allocation45_spill] sm:$0xff] }
 0x8b8   : > { %7005 = vmatmul.msk.f32.gmra.mxu0 %vm2514_vm9, %v12294_v29 }
 0x8b9   : > { %7132 = vmatmul.msk.f32.gmra.mxu2 %vm2514_vm9, %v12274_v36  ;;  %7196 = vmatmul.msk.f32.gmra.mxu3 %vm2514_vm9, %v12274_v36  ;;  %v14023_v36 = vmov 1.0  }
 0x8bb   : > { %v12312_v24 = vpop.f32.mrf.mxu1 }
 0x8bc   : > { %14975 = vst [vmem:[#allocation655_spill] sm:$0xff] %v12312_v24  ;;  %v447_v24 = vperm.slane %v12289_v23, 2 }
 0x8bd   : > { %v12310_v25 = vpop.f32.mrf.mxu0 }
 0x8be   : > { %14974 = vst [vmem:[#allocation654_spill] sm:$0xff] %v12310_v25  ;;  %7053 = vmatmul.msk.f32.gmra.mxu1 %vm2514_vm9, %v12001_v35  ;;  %v14980_v35 = vld [vmem:[#allocation59_spill] sm:$0xff]  ;;  %vm12340_vm11 = vcmp.eq.s32.totalorder %v14971_v22, %v447_v24  ;;  %v4757_v22 = vmul.f32 %v14998_v18, %v14997_v55  ;;  %v15006_v18 = vld [vmem:[#allocation248_spill] sm:$0xff] }
 0x8bf   : > { %v4493_v25 = vmul.f32 %v14980_v35, %v14979_v59  ;;  %v14990_v59 = vld [vmem:[#allocation49_spill] sm:$0xff]  ;;  %v4877_v4 = vmul.f32 %v11316_v51, %v15006_v18 }
 0x8c0   : > { %7198 = vmatmul.msk.f32.vlgmr.msra.gmra.mxu0 %vm12306_vm10, %v14023_v36  ;;  %v14991_v35 = vld [vmem:[#allocation541_spill] sm:$0xff] }
 0x8c1   : > { %7133 = vmatmul.msk.f32.gmra.mxu2 %vm2514_vm9, %v12294_v29  ;;  %7197 = vmatmul.msk.f32.gmra.mxu3 %vm2514_vm9, %v12294_v29  ;;  %v4477_v28 = vmul.f32 %v14991_v35, %v14990_v59  ;;  %v12366_v59 = vpop.f32.mrf.mxu3  ;;  %v15005_v35 = vld [vmem:[#allocation187_spill] sm:$0xff]  ;;  %v15537_v29 = vld [vmem:[#allocation310_spill] sm:$0xff] }
 0x8c2   : > { %5091 = vmatpush.msra.mxu0 %v4501_v46  ;;  %15000 = vst [vmem:[#allocation59_spill] sm:$0xff] %v12366_v59  ;;  %v5739_v46 = vld [vmem:[%s13999_s5 + $0x168] sm:$0xff] }
 0x8c3   : > { %v12337_v41 = vpop.f32.mrf.mxu1 }
 0x8c4   : > { %5092 = vmatpush.msra.mxu0 %v4493_v25  ;;  %14985 = vst [vmem:[#allocation56_spill] sm:$0xff] %v12337_v41  ;;  %v14992_v25 = vld [vmem:[#allocation7_spill] sm:$0xff]  ;;  %v14996_v41 = vld [vmem:[#allocation538_spill] sm:$0xff] }
 0x8c5   : > { %v12335_v36 = vpop.f32.mrf.mxu0  ;;  %vm12356_vm13 = vcmp.eq.s32.totalorder %v14992_v25, %v445_v26  ;;  %v15002_v26 = vld [vmem:[#allocation41_spill] sm:$0xff]  ;;  %vm12394_vm14 = vcmp.eq.s32.totalorder %v14992_v25, %v447_v24  ;;  %v15024_v24 = vld [vmem:[#allocation31_spill] sm:$0xff] }
 0x8c6   : > { %14984 = vst [vmem:[#allocation47_spill] sm:$0xff] %v12335_v36  ;;  %5093 = vmatpush.msra.mxu0 %v4485_v30  ;;  %7054 = vmatmul.msk.f32.gmra.mxu1 %vm2514_vm9, %v12018_v13  ;;  %v4469_v36 = vmul.f32 %v14996_v41, %v14995_v32  ;;  %v15001_v30 = vmov 1.0   ;;  %v15003_v13 = vld [vmem:[#allocation535_spill] sm:$0xff]  ;;  %v15004_v32 = vld [vmem:[#allocation184_spill] sm:$0xff] }
 0x8c7   : > { %v4461_v41 = vmul.f32 %v15003_v13, %v15002_v26  ;;  %v4749_v55 = vmul.f32 %v15005_v35, %v15004_v32  ;;  %v15011_v26 = vld [vmem:[#allocation244_spill] sm:$0xff]  ;;  %v15012_v13 = vld [vmem:[#allocation591_spill] sm:$0xff]  ;;  %v15017_v32 = vld [vmem:[#allocation34_spill] sm:$0xff] }
 0x8c8   : > { %5094 = vmatpush.msra.mxu0 %v4477_v28  ;;  %v15008_v28 = vld [vmem:[#allocation532_spill] sm:$0xff]  ;;  %v15018_v35 = vld [vmem:[#allocation529_spill] sm:$0xff] }
 0x8c9   : > { %7202 = vmatmul.msk.f32.vlgmr.msra.gmra.mxu2 %vm12340_vm11, %v15001_v30  ;;  %7204 = vmatmul.msk.f32.vlgmr.msra.gmra.mxu3 %vm12347_vm12, %v15001_v30  ;;  %v4453_v59 = vmul.f32 %v15008_v28, %v15007_v5  ;;  %v4445_v18 = vmul.f32 %v15018_v35, %v15017_v32  ;;  %v15019_v5 = vld [vmem:[#allocation176_spill] sm:$0xff]  ;;  %v12404_v28 = vpop.f32.mrf.mxu2 }
 0x8ca   : > { %5095 = vmatpush.msra.mxu0 %v4469_v36  ;;  %5137 = vmatpush.msra.mxu2 %v4757_v22  ;;  %v4869_v36 = vmul.f32 %v15012_v13, %v15011_v26  ;;  %v4733_v54 = vmul.f32 %v15020_v21, %v15019_v5  ;;  %15023 = vst [vmem:[#allocation49_spill] sm:$0xff] %v12404_v28  ;;  %v15025_v26 = vld [vmem:[#allocation526_spill] sm:$0xff]  ;;  %v15028_v35 = vld [vmem:[#allocation236_spill] sm:$0xff]  ;;  %v15031_v5 = vld [vmem:[#allocation523_spill] sm:$0xff] }
 0x8cb   : > { %5160 = vmatpush.msra.mxu3 %v4885_v44  ;;  %7199 = vmatmul.msk.f32.gmra.mxu0 %vm12356_vm13, %v15001_v30  ;;  %v12391_v51 = vpop.f32.mrf.mxu1  ;;  %v4437_v13 = vmul.f32 %v15025_v26, %v15024_v24  ;;  %v15034_v24 = vld [vmem:[#allocation232_spill] sm:$0xff]  ;;  %v15046_v28 = vld [vmem:[#allocation577_spill] sm:$0xff] }
 0x8cc   : > { %5096 = vmatpush.msra.mxu0 %v4461_v41  ;;  %5138 = vmatpush.msra.mxu2 %v4749_v55  ;;  %15014 = vst [vmem:[#allocation544_spill] sm:$0xff] %v12391_v51  ;;  %v15021_v41 = vld [vmem:[#allocation240_spill] sm:$0xff]  ;;  %v15022_v55 = vld [vmem:[#allocation65_spill] sm:$0xff] }
 0x8cd   : > { %5161 = vmatpush.msra.mxu3 %v4877_v4  ;;  %v12389_v22 = vpop.f32.mrf.mxu0  ;;  %v4861_v4 = vmul.f32 %v15022_v55, %v15021_v41  ;;  %v15026_v51 = vld [vmem:[#allocation172_spill] sm:$0xff]  ;;  %v15033_v41 = vld [vmem:[#allocation582_spill] sm:$0xff] }
 0x8ce   : > { %15013 = vst [vmem:[#allocation52_spill] sm:$0xff] %v12389_v22  ;;  %5097 = vmatpush.msra.mxu0 %v4453_v59  ;;  %5139 = vmatpush.msra.mxu2 %v4741_v0  ;;  %v15027_v22 = vld [vmem:[#allocation584_spill] sm:$0xff]  ;;  %v15029_v59 = vld [vmem:[#allocation77_spill] sm:$0xff] }
 0x8cf   : > { %5162 = vmatpush.msra.mxu3 %v4869_v36  ;;  %7055 = vmatmul.msk.f32.gmra.mxu1 %vm2514_vm9, %v12037_v34  ;;  %v4725_v32 = vmul.f32 %v15027_v22, %v15026_v51  ;;  %v4853_v0 = vmul.f32 %v15029_v59, %v15028_v35  ;;  %v15030_v36 = vld [vmem:[#allocation27_spill] sm:$0xff]  ;;  %v15032_v34 = vld [vmem:[#allocation168_spill] sm:$0xff] }
 0x8d0   : > { %5098 = vmatpush.msra.mxu0 %v4445_v18  ;;  %5140 = vmatpush.msra.mxu2 %v4733_v54  ;;  %v4429_v21 = vmul.f32 %v15031_v5, %v15030_v36  ;;  %v4717_v55 = vmul.f32 %v15033_v41, %v15032_v34  ;;  %v15035_v22 = vld [vmem:[#allocation131_spill] sm:$0xff]  ;;  %v15036_v18 = vld [vmem:[#allocation24_spill] sm:$0xff]  ;;  %v15044_v41 = vld [vmem:[#allocation517_spill] sm:$0xff] }
 0x8d1   : > { %5163 = vmatpush.msra.mxu3 %v4861_v4  ;;  %7203 = vmatmul.msk.f32.gmra.mxu2 %vm12394_vm14, %v15001_v30  ;;  %v4845_v51 = vmul.f32 %v15035_v22, %v15034_v24  ;;  %v15037_v54 = vld [vmem:[#allocation520_spill] sm:$0xff]  ;;  %v15041_v5 = vld [vmem:[#allocation135_spill] sm:$0xff] }
 0x8d2   : > { %5099 = vmatpush.msra.mxu0 %v4437_v13  ;;  %5141 = vmatpush.msra.mxu2 %v4725_v32  ;;  %v4421_v4 = vmul.f32 %v15037_v54, %v15036_v18  ;;  %v15038_v26 = vld [vmem:[#allocation164_spill] sm:$0xff]  ;;  %v15048_v54 = vld [vmem:[#allocation139_spill] sm:$0xff] }
 0x8d3   : > { %5164 = vmatpush.msra.mxu3 %v4853_v0  ;;  %7206 = vmatmul.msk.f32.vlgmr.msrb.gmra.mxu0 %vm12306_vm10, %v15001_v30  ;;  %v15039_v35 = vld [vmem:[#allocation580_spill] sm:$0xff]  ;;  %v12434_v34 = vpop.f32.mrf.mxu1  ;;  %v15043_v0 = vld [vmem:[#allocation21_spill] sm:$0xff] }
 0x8d4   : > { %v4709_v59 = vmul.f32 %v15039_v35, %v15038_v26  ;;  %5100 = vmatpush.msra.mxu0 %v4429_v21  ;;  %5142 = vmatpush.msra.mxu2 %v4717_v55  ;;  %v15040_v36 = vld [vmem:[#allocation228_spill] sm:$0xff]  ;;  %15042 = vst [vmem:[#allocation541_spill] sm:$0xff] %v12434_v34  ;;  %v4413_v24 = vmul.f32 %v15044_v41, %v15043_v0  ;;  %v15049_v55 = vld [vmem:[#allocation18_spill] sm:$0xff]  ;;  %v15054_v41 = vld [vmem:[#allocation93_spill] sm:$0xff] }
 0x8d5   : > { %v4837_v13 = vmul.f32 %v15041_v5, %v15040_v36  ;;  %5165 = vmatpush.msra.mxu3 %v4845_v51  ;;  %v12432_v32 = vpop.f32.mrf.mxu0  ;;  %v15045_v22 = vld [vmem:[#allocation160_spill] sm:$0xff]  ;;  %v15050_v51 = vld [vmem:[#allocation514_spill] sm:$0xff] }
 0x8d6   : > { %v4701_v11 = vmul.f32 %v15046_v28, %v15045_v22  ;;  %5101 = vmatpush.msra.mxu0 %v4421_v4  ;;  %5143 = vmatpush.msra.mxu2 %v4709_v59  ;;  %v15047_v18 = vld [vmem:[#allocation224_spill] sm:$0xff]  ;;  %v4405_v26 = vmul.f32 %v15050_v51, %v15049_v55  ;;  %v15052_v36 = vld [vmem:[#allocation574_spill] sm:$0xff]  ;;  %v12450_v4 = vpop.f32.mrf.mxu2  ;;  %v15056_v59 = vld [vmem:[#allocation15_spill] sm:$0xff]  ;;  %v12459_v55 = vpop.f32.mrf.mxu3 }
 0x8d7   : > { %v4829_v21 = vmul.f32 %v15048_v54, %v15047_v18  ;;  %5166 = vmatpush.msra.mxu3 %v4837_v13  ;;  %7056 = vmatmul.msk.f32.gmra.mxu1 %vm2514_vm9, %v12056_v15  ;;  %v15051_v35 = vld [vmem:[#allocation156_spill] sm:$0xff]  ;;  %15055 = vst [vmem:[#allocation45_spill] sm:$0xff] %v12450_v4  ;;  %v15057_v15 = vld [vmem:[#allocation511_spill] sm:$0xff]  ;;  %v15073_v4 = vld [vmem:[#allocation565_spill] sm:$0xff] }
 0x8d8   : > { %v4693_v5 = vmul.f32 %v15052_v36, %v15051_v35  ;;  %5102 = vmatpush.msra.mxu0 %v4413_v24  ;;  %5144 = vmatpush.msra.mxu2 %v4701_v11  ;;  %v15053_v0 = vld [vmem:[#allocation220_spill] sm:$0xff]  ;;  %v4397_v13 = vmul.f32 %v15057_v15, %v15056_v59  ;;  %v15059_v18 = vld [vmem:[#allocation571_spill] sm:$0xff]  ;;  %15060 = vst [vmem:[#allocation538_spill] sm:$0xff] %v12459_v55  ;;  %v15062_v24 = vld [vmem:[#allocation97_spill] sm:$0xff] }
 0x8d9   : > { %v4821_v28 = vmul.f32 %v15054_v41, %v15053_v0  ;;  %5167 = vmatpush.msra.mxu3 %v4829_v21  ;;  %7210 = vmatmul.msk.f32.vlgmr.msrb.gmra.mxu2 %vm12340_vm11, %v15001_v30  ;;  %v15058_v22 = vld [vmem:[#allocation152_spill] sm:$0xff] }
 0x8da   : > { %v4685_v54 = vmul.f32 %v15059_v18, %v15058_v22  ;;  %5103 = vmatpush.msra.mxu0 %v4405_v26  ;;  %5145 = vmatpush.msra.mxu2 %v4693_v5  ;;  %v15061_v11 = vld [vmem:[#allocation216_spill] sm:$0xff]  ;;  %v15068_v22 = vld [vmem:[#allocation101_spill] sm:$0xff] }
 0x8db   : > { %v4813_v51 = vmul.f32 %v15062_v24, %v15061_v11  ;;  %5168 = vmatpush.msra.mxu3 %v4821_v28  ;;  %7207 = vmatmul.msk.f32.gmra.mxu0 %vm12356_vm13, %v15001_v30  ;;  %v15063_v21 = vld [vmem:[#allocation12_spill] sm:$0xff]  ;;  %v12474_v18 = vpop.f32.mrf.mxu1  ;;  %v15070_v28 = vld [vmem:[#allocation9_spill] sm:$0xff] }
 0x8dc   : > { %v15064_v35 = vld [vmem:[#allocation508_spill] sm:$0xff]  ;;  %5104 = vmatpush.msra.mxu0 %v4397_v13  ;;  %5146 = vmatpush.msra.mxu2 %v4685_v54  ;;  %15069 = vst [vmem:[#allocation188_spill] sm:$0xff] %v12474_v18  ;;  %v15071_v11 = vld [vmem:[#allocation505_spill] sm:$0xff]  ;;  %v15077_v54 = vld [vmem:[#allocation62_spill] sm:$0xff] }
 0x8dd   : > { %v4389_v36 = vmul.f32 %v15064_v35, %v15063_v21  ;;  %v15065_v0 = vld [vmem:[#allocation148_spill] sm:$0xff]  ;;  %5169 = vmatpush.msra.mxu3 %v4813_v51  ;;  %v12472_v5 = vpop.f32.mrf.mxu0  ;;  %v4381_v24 = vmul.f32 %v15071_v11, %v15070_v28  ;;  %v15074_v21 = vperm.slane %v12289_v23, 3  ;;  %v15078_v51 = vld [vmem:[#allocation43_spill] sm:$0xff] }
 0x8de   : > { %v15066_v41 = vld [vmem:[#allocation568_spill] sm:$0xff]  ;;  %v4502_v35 = vmul.f32 %v15078_v51, %v15077_v54  ;;  %v15088_v51 = vld [vmem:[#allocation79_spill] sm:$0xff] }
 0x8df   : > { %v4677_v59 = vmul.f32 %v15066_v41, %v15065_v0  ;;  %v15067_v15 = vld [vmem:[#allocation212_spill] sm:$0xff]  ;;  %5105 = vmatpush.msra.mxu0 %v4389_v36  ;;  %vm12483_vm15 = vcmp.eq.s32.totalorder %v14992_v25, %v15074_v21  ;;  %v15080_v41 = vld [vmem:[#allocation105_spill] sm:$0xff]  ;;  %7057 = vmatmul.msk.f32.gmra.mxu1 %vm2514_vm9, %v12073_v62  ;;  %v15086_v21 = vld [vmem:[#allocation159_spill] sm:$0xff] }
 0x8e0   : > { %v4805_v26 = vmul.f32 %v15068_v22, %v15067_v15  ;;  %v15072_v55 = vld [vmem:[#allocation144_spill] sm:$0xff]  ;;  %v15084_v22 = vld [vmem:[#allocation51_spill] sm:$0xff]  ;;  %7205 = vmatmul.msk.f32.gmra.mxu3 %vm12483_vm15, %v15001_v30  ;;  %v15089_v62 = vld [vmem:[#allocation54_spill] sm:$0xff] }
 0x8e1   : > { %v4669_v34 = vmul.f32 %v15073_v4, %v15072_v55  ;;  %5147 = vmatpush.msra.mxu2 %v4677_v59  ;;  %v15079_v0 = vld [vmem:[#allocation208_spill] sm:$0xff]  ;;  %v15082_v55 = vld [vmem:[#allocation67_spill] sm:$0xff]  ;;  %5106 = vmatpush.msra.mxu0 %v4381_v24  ;;  %v15083_v59 = vld [vmem:[#allocation58_spill] sm:$0xff] }
 0x8e2   : > { %v4797_v15 = vmul.f32 %v15080_v41, %v15079_v0  ;;  %5170 = vmatpush.msra.mxu3 %v4805_v26  ;;  %v15081_v4 = vld [vmem:[#allocation140_spill] sm:$0xff]  ;;  %v4494_v28 = vmul.f32 %v15084_v22, %v15083_v59  ;;  %v15090_v26 = vld [vmem:[#allocation546_spill] sm:$0xff]  ;;  %v15092_v41 = vld [vmem:[#allocation163_spill] sm:$0xff] }
 0x8e3   : > { %v4661_v36 = vmul.f32 %v15082_v55, %v15081_v4  ;;  %5148 = vmatpush.msra.mxu2 %v4669_v34  ;;  %v15085_v11 = vld [vmem:[#allocation204_spill] sm:$0xff]  ;;  %5183 = vmatpush.msrb.mxu0 %v4502_v35  ;;  %v4486_v24 = vmul.f32 %v15090_v26, %v15089_v62  ;;  %v15094_v59 = vld [vmem:[#allocation91_spill] sm:$0xff]  ;;  %v12510_v35 = vpop.f32.mrf.mxu3  ;;  %v15096_v22 = vld [vmem:[#allocation50_spill] sm:$0xff] }
 0x8e4   : > { %v4789_v18 = vmul.f32 %v15086_v21, %v15085_v11  ;;  %5171 = vmatpush.msra.mxu3 %v4797_v15  ;;  %v15087_v54 = vld [vmem:[#allocation136_spill] sm:$0xff]  ;;  %15095 = vst [vmem:[#allocation179_spill] sm:$0xff] %v12510_v35  ;;  %7214 = vmatmul.msk.f32.vlgmr.msra.gmra.mxu0 %vm12306_vm10, %v15001_v30  ;;  %v15102_v26 = vld [vmem:[#allocation103_spill] sm:$0xff]  ;;  %v15490_v9 = vld [vmem:[#allocation538_spill] sm:$0xff] }
 0x8e5   : > { %v4653_v0 = vmul.f32 %v15088_v51, %v15087_v54  ;;  %5149 = vmatpush.msra.mxu2 %v4661_v36  ;;  %v15091_v34 = vld [vmem:[#allocation200_spill] sm:$0xff]  ;;  %5184 = vmatpush.msrb.mxu0 %v4494_v28  ;;  %v15097_v36 = vld [vmem:[#allocation543_spill] sm:$0xff]  ;;  %v12521_v28 = vpop.f32.mrf.mxu1 }
 0x8e6   : > { %v4781_v4 = vmul.f32 %v15092_v41, %v15091_v34  ;;  %5172 = vmatpush.msra.mxu3 %v4789_v18  ;;  %v15093_v55 = vld [vmem:[#allocation132_spill] sm:$0xff]  ;;  %v4478_v11 = vmul.f32 %v15097_v36, %v15096_v22  ;;  %v15099_v54 = vld [vmem:[#allocation167_spill] sm:$0xff]  ;;  %v12519_v18 = vpop.f32.mrf.mxu0  ;;  %15100 = vst [vmem:[#allocation252_spill] sm:$0xff] %v12521_v28  ;;  %v15107_v22 = vld [vmem:[#allocation190_spill] sm:$0xff] }
 0x8e7   : > { %v4645_v15 = vmul.f32 %v15094_v59, %v15093_v55  ;;  %5150 = vmatpush.msra.mxu2 %v4653_v0  ;;  %v15098_v21 = vld [vmem:[#allocation196_spill] sm:$0xff]  ;;  %5185 = vmatpush.msrb.mxu0 %v4486_v24  ;;  %v15103_v0 = vld [vmem:[#allocation46_spill] sm:$0xff]  ;;  %v15106_v35 = vld [vmem:[#allocation171_spill] sm:$0xff] }
 0x8e8   : > { %v4773_v51 = vmul.f32 %v15099_v54, %v15098_v21  ;;  %5173 = vmatpush.msra.mxu3 %v4781_v4  ;;  %v15101_v62 = vld [vmem:[#allocation128_spill] sm:$0xff]  ;;  %v15108_v36 = vld [vmem:[#allocation175_spill] sm:$0xff]  ;;  %7058 = vmatmul.msk.f32.gmra.mxu1 %vm2514_vm9, %v12092_v47  ;;  %v15109_v24 = vld [vmem:[#allocation42_spill] sm:$0xff] }
 0x8e9   : > { %v4637_v34 = vmul.f32 %v15102_v26, %v15101_v62  ;;  %5151 = vmatpush.msra.mxu2 %v4645_v15  ;;  %v15104_v41 = vld [vmem:[#allocation540_spill] sm:$0xff]  ;;  %5186 = vmatpush.msrb.mxu0 %v4478_v11  ;;  %v4758_v4 = vmul.f32 %v15108_v36, %v15107_v22  ;;  %v15110_v21 = vld [vmem:[#allocation537_spill] sm:$0xff]  ;;  %v15111_v62 = vld [vmem:[#allocation254_spill] sm:$0xff] }
 0x8ea   : > { %v4470_v55 = vmul.f32 %v15104_v41, %v15103_v0  ;;  %v15105_v59 = vld [vmem:[#allocation192_spill] sm:$0xff]  ;;  %5174 = vmatpush.msra.mxu3 %v4773_v51  ;;  %v4462_v54 = vmul.f32 %v15110_v21, %v15109_v24  ;;  %v4886_v15 = vmul.f32 %v11347_v58, %v15111_v62  ;;  %v15112_v26 = vld [vmem:[#allocation186_spill] sm:$0xff]  ;;  %v15113_v0 = vld [vmem:[#allocation183_spill] sm:$0xff] }
 0x8eb   : > { %v4765_v25 = vmul.f32 %v15106_v35, %v15105_v59  ;;  %5152 = vmatpush.msra.mxu2 %v4637_v34  ;;  %v4750_v35 = vmul.f32 %v15113_v0, %v15112_v26  ;;  %7212 = vmatmul.msk.f32.vlgmr.msrb.gmra.mxu3 %vm12347_vm12, %v15001_v30  ;;  %v15114_v11 = vld [vmem:[#allocation38_spill] sm:$0xff]  ;;  %v15118_v58 = vld [vmem:[#allocation589_spill] sm:$0xff]  ;;  %v15120_v22 = vld [vmem:[#allocation531_spill] sm:$0xff]  ;;  %v12561_v0 = vpop.f32.mrf.mxu3 }
 0x8ec   : > { %5187 = vmatpush.msrb.mxu0 %v4470_v55  ;;  %v15115_v51 = vld [vmem:[#allocation534_spill] sm:$0xff]  ;;  %v15119_v55 = vld [vmem:[#allocation35_spill] sm:$0xff]  ;;  %v15122_v24 = vld [vmem:[#allocation592_spill] sm:$0xff]  ;;  %15125 = vst [vmem:[#allocation41_spill] sm:$0xff] %v12561_v0 }
 0x8ed   : > { %5175 = vmatpush.msra.mxu3 %v4765_v25  ;;  %5229 = vmatpush.msrb.mxu2 %v4758_v4  ;;  %v4454_v34 = vmul.f32 %v15115_v51, %v15114_v11  ;;  %v15116_v47 = vld [vmem:[#allocation250_spill] sm:$0xff]  ;;  %v4446_v36 = vmul.f32 %v15120_v22, %v15119_v55  ;;  %v15127_v11 = vld [vmem:[#allocation528_spill] sm:$0xff]  ;;  %v15154_v0 = vld [vmem:[#allocation89_spill] sm:$0xff] }
 0x8ee   : > { %v4878_v41 = vmul.f32 %v11318_v3, %v15116_v47  ;;  %5188 = vmatpush.msrb.mxu0 %v4462_v54  ;;  %v15117_v59 = vld [vmem:[#allocation182_spill] sm:$0xff]  ;;  %v12555_v62 = vpop.f32.mrf.mxu0  ;;  %v12557_v3 = vpop.f32.mrf.mxu1  ;;  %v15132_v22 = vld [vmem:[#allocation28_spill] sm:$0xff]  ;;  %v5735_v13 = vld [vmem:[%s13999_s5 + $0x148] sm:$0xff] }
 0x8ef   : > { %5252 = vmatpush.msrb.mxu3 %v4886_v15  ;;  %v4742_v25 = vmul.f32 %v15118_v58, %v15117_v59  ;;  %5230 = vmatpush.msrb.mxu2 %v4750_v35  ;;  %v15121_v4 = vld [vmem:[#allocation246_spill] sm:$0xff]  ;;  %v15124_v15 = vld [vmem:[#allocation587_spill] sm:$0xff]  ;;  %v15126_v35 = vld [vmem:[#allocation32_spill] sm:$0xff] }
 0x8f0   : > { %7215 = vmatmul.msk.f32.gmra.mxu0 %vm12356_vm13, %v15001_v30  ;;  %v4870_v21 = vmul.f32 %v15122_v24, %v15121_v4  ;;  %v15123_v54 = vld [vmem:[#allocation178_spill] sm:$0xff]  ;;  %v4438_v51 = vmul.f32 %v15127_v11, %v15126_v35  ;;  %v15129_v59 = vld [vmem:[#allocation61_spill] sm:$0xff]  ;;  %7059 = vmatmul.msk.f32.gmra.mxu1 %vm2514_vm9, %v12109_v12  ;;  %v15137_v11 = vld [vmem:[#allocation583_spill] sm:$0xff] }
 0x8f1   : > { %5253 = vmatpush.msrb.mxu3 %v4878_v41  ;;  %5189 = vmatpush.msrb.mxu0 %v4454_v34  ;;  %v4734_v26 = vmul.f32 %v15124_v15, %v15123_v54  ;;  %v15128_v47 = vld [vmem:[#allocation242_spill] sm:$0xff]  ;;  %v15131_v34 = vld [vmem:[#allocation585_spill] sm:$0xff]  ;;  %v15545_v44 = vld [vmem:[#allocation424_spill] sm:$0xff] }
 0x8f2   : > { %5231 = vmatpush.msrb.mxu2 %v4742_v25  ;;  %v4862_v58 = vmul.f32 %v15129_v59, %v15128_v47  ;;  %v15130_v41 = vld [vmem:[#allocation174_spill] sm:$0xff]  ;;  %v15133_v4 = vld [vmem:[#allocation525_spill] sm:$0xff] }
 0x8f3   : > { %5254 = vmatpush.msrb.mxu3 %v4870_v21  ;;  %5190 = vmatpush.msrb.mxu0 %v4446_v36  ;;  %v4726_v55 = vmul.f32 %v15131_v34, %v15130_v41  ;;  %v4430_v24 = vmul.f32 %v15133_v4, %v15132_v22  ;;  %v15134_v54 = vld [vmem:[#allocation238_spill] sm:$0xff]  ;;  %v15135_v25 = vld [vmem:[#allocation73_spill] sm:$0xff] }
 0x8f4   : > { %5232 = vmatpush.msrb.mxu2 %v4734_v26  ;;  %v4854_v15 = vmul.f32 %v15135_v25, %v15134_v54  ;;  %v15136_v35 = vld [vmem:[#allocation170_spill] sm:$0xff]  ;;  %7213 = vmatmul.msk.f32.gmra.mxu3 %vm12483_vm15, %v15001_v30  ;;  %v15138_v36 = vld [vmem:[#allocation25_spill] sm:$0xff] }
 0x8f5   : > { %5255 = vmatpush.msrb.mxu3 %v4862_v58  ;;  %5191 = vmatpush.msrb.mxu0 %v4438_v51  ;;  %v4718_v47 = vmul.f32 %v15137_v11, %v15136_v35  ;;  %v15139_v21 = vld [vmem:[#allocation522_spill] sm:$0xff]  ;;  %v15141_v59 = vld [vmem:[#allocation81_spill] sm:$0xff]  ;;  %v12586_v51 = vpop.f32.mrf.mxu2 }
 0x8f6   : > { %5233 = vmatpush.msrb.mxu2 %v4726_v55  ;;  %v4422_v26 = vmul.f32 %v15139_v21, %v15138_v36  ;;  %v15140_v12 = vld [vmem:[#allocation234_spill] sm:$0xff]  ;;  %v15143_v22 = vld [vmem:[#allocation581_spill] sm:$0xff]  ;;  %15144 = vst [vmem:[#allocation535_spill] sm:$0xff] %v12586_v51  ;;  %v15146_v55 = vld [vmem:[#allocation519_spill] sm:$0xff]  ;;  %v12592_v36 = vpop.f32.mrf.mxu0  ;;  %v12594_v21 = vpop.f32.mrf.mxu1 }
 0x8f7   : > { %v4846_v41 = vmul.f32 %v15141_v59, %v15140_v12  ;;  %5256 = vmatpush.msrb.mxu3 %v4854_v15  ;;  %5192 = vmatpush.msrb.mxu0 %v4430_v24  ;;  %v15142_v34 = vld [vmem:[#allocation166_spill] sm:$0xff]  ;;  %v15148_v35 = vld [vmem:[#allocation85_spill] sm:$0xff]  ;;  %v15150_v24 = vld [vmem:[#allocation579_spill] sm:$0xff] }
 0x8f8   : > { %v4710_v58 = vmul.f32 %v15143_v22, %v15142_v34  ;;  %5234 = vmatpush.msrb.mxu2 %v4718_v47  ;;  %v15145_v4 = vld [vmem:[#allocation22_spill] sm:$0xff]  ;;  %v15151_v59 = vld [vmem:[#allocation19_spill] sm:$0xff]  ;;  %v15152_v34 = vld [vmem:[#allocation516_spill] sm:$0xff]  ;;  %7060 = vmatmul.msk.f32.gmra.mxu1 %vm2514_vm9, %v12128_v2 }
 0x8f9   : > { %v4414_v54 = vmul.f32 %v15146_v55, %v15145_v4  ;;  %v15147_v25 = vld [vmem:[#allocation230_spill] sm:$0xff]  ;;  %5257 = vmatpush.msrb.mxu3 %v4846_v41  ;;  %5193 = vmatpush.msrb.mxu0 %v4422_v26  ;;  %v4406_v22 = vmul.f32 %v15152_v34, %v15151_v59  ;;  %v15156_v55 = vld [vmem:[#allocation576_spill] sm:$0xff]  ;;  %v12604_v26 = vpop.f32.mrf.mxu3 }
 0x8fa   : > { %v4838_v11 = vmul.f32 %v15148_v35, %v15147_v25  ;;  %v15149_v15 = vld [vmem:[#allocation162_spill] sm:$0xff]  ;;  %5235 = vmatpush.msrb.mxu2 %v4710_v58  ;;  %15157 = vst [vmem:[#allocation184_spill] sm:$0xff] %v12604_v26  ;;  %v15158_v25 = vld [vmem:[#allocation16_spill] sm:$0xff]  ;;  %v15159_v35 = vld [vmem:[#allocation513_spill] sm:$0xff] }
 0x8fb   : > { %v4702_v12 = vmul.f32 %v15150_v24, %v15149_v15  ;;  %v15153_v47 = vld [vmem:[#allocation226_spill] sm:$0xff]  ;;  %5194 = vmatpush.msrb.mxu0 %v4414_v54  ;;  %v4398_v58 = vmul.f32 %v15159_v35, %v15158_v25  ;;  %v15161_v24 = vld [vmem:[#allocation143_spill] sm:$0xff]  ;;  %7211 = vmatmul.msk.f32.gmra.mxu2 %vm12394_vm14, %v15001_v30 }
 0x8fc   : > { %v4830_v51 = vmul.f32 %v15154_v0, %v15153_v47  ;;  %5258 = vmatpush.msrb.mxu3 %v4838_v11  ;;  %v15155_v4 = vld [vmem:[#allocation158_spill] sm:$0xff]  ;;  %v15163_v11 = vld [vmem:[#allocation573_spill] sm:$0xff] }
 0x8fd   : > { %v4694_v41 = vmul.f32 %v15156_v55, %v15155_v4  ;;  %5236 = vmatpush.msrb.mxu2 %v4702_v12  ;;  %v15160_v15 = vld [vmem:[#allocation222_spill] sm:$0xff]  ;;  %5195 = vmatpush.msrb.mxu0 %v4406_v22  ;;  %v15164_v12 = vld [vmem:[#allocation13_spill] sm:$0xff]  ;;  %v15167_v4 = vld [vmem:[#allocation147_spill] sm:$0xff] }
 0x8fe   : > { %v4822_v59 = vmul.f32 %v15161_v24, %v15160_v15  ;;  %5259 = vmatpush.msrb.mxu3 %v4830_v51  ;;  %v15162_v0 = vld [vmem:[#allocation154_spill] sm:$0xff]  ;;  %v15171_v15 = vld [vmem:[#allocation507_spill] sm:$0xff]  ;;  %v12627_v26 = vpop.f32.mrf.mxu0 }
 0x8ff   : > { %v4686_v54 = vmul.f32 %v15163_v11, %v15162_v0  ;;  %5237 = vmatpush.msrb.mxu2 %v4694_v41  ;;  %7220 = vmatmul.msk.f32.vlgmr.msra.gmra.mxu3 %vm12347_vm12, %v15001_v30  ;;  %v15165_v34 = vld [vmem:[#allocation510_spill] sm:$0xff]  ;;  %v15173_v0 = vld [vmem:[#allocation151_spill] sm:$0xff] }
 0x900   : > { %v4390_v47 = vmul.f32 %v15165_v34, %v15164_v12  ;;  %v15166_v2 = vld [vmem:[#allocation218_spill] sm:$0xff]  ;;  %5260 = vmatpush.msrb.mxu3 %v4822_v59  ;;  %5196 = vmatpush.msrb.mxu0 %v4398_v58  ;;  %v12629_v12 = vpop.f32.mrf.mxu1 }
 0x901   : > { %v4814_v55 = vmul.f32 %v15167_v4, %v15166_v2  ;;  %v15168_v25 = vld [vmem:[#allocation150_spill] sm:$0xff]  ;;  %5238 = vmatpush.msrb.mxu2 %v4686_v54  ;;  %v15175_v2 = vld [vmem:[#allocation567_spill] sm:$0xff]  ;;  %7061 = vmatmul.msk.f32.gmra.mxu1 %vm2514_vm9, %v12147_v19  ;;  %v15193_v19 = vld [vmem:[#allocation297_spill] sm:$0xff] }
 0x902   : > { %v15169_v35 = vld [vmem:[#allocation570_spill] sm:$0xff]  ;;  %5197 = vmatpush.msrb.mxu0 %v4390_v47  ;;  %v15180_v47 = vld [vmem:[#allocation564_spill] sm:$0xff] }
 0x903   : > { %v4678_v51 = vmul.f32 %v15169_v35, %v15168_v25  ;;  %v15170_v22 = vld [vmem:[#allocation10_spill] sm:$0xff]  ;;  %5261 = vmatpush.msrb.mxu3 %v4814_v55  ;;  %v12635_v25 = vpop.f32.mrf.mxu2  ;;  %v15178_v35 = vld [vmem:[#allocation155_spill] sm:$0xff]  ;;  %7218 = vmatmul.msk.f32.vlgmr.msra.gmra.mxu2 %vm12340_vm11, %v15001_v30 }
 0x904   : > { %v4382_v24 = vmul.f32 %v15171_v15, %v15170_v22  ;;  %v15172_v41 = vld [vmem:[#allocation214_spill] sm:$0xff] }
 0x905   : > { %v4806_v11 = vmul.f32 %v15173_v0, %v15172_v41  ;;  %v15174_v34 = vld [vmem:[#allocation146_spill] sm:$0xff]  ;;  %5239 = vmatpush.msrb.mxu2 %v4678_v51  ;;  %v15182_v0 = vld [vmem:[#allocation109_spill] sm:$0xff]  ;;  %v15185_v51 = vld [vmem:[#allocation71_spill] sm:$0xff] }
 0x906   : > { %v4670_v59 = vmul.f32 %v15175_v2, %v15174_v34  ;;  %v15176_v58 = vld [vmem:[#allocation306_spill] sm:$0xff]  ;;  %5198 = vmatpush.msrb.mxu0 %v4382_v24  ;;  %v15183_v34 = vld [vmem:[#allocation303_spill] sm:$0xff]  ;;  %v12650_v24 = vpop.f32.mrf.mxu3 }
 0x907   : > { %v4503_v4 = vmul.f32 %v11677_v42, %v15176_v58  ;;  %v15177_v54 = vld [vmem:[#allocation210_spill] sm:$0xff]  ;;  %5262 = vmatpush.msrb.mxu3 %v4806_v11  ;;  %v4495_v2 = vmul.f32 %v11662_v45, %v15183_v34  ;;  %v15187_v58 = vld [vmem:[#allocation113_spill] sm:$0xff]  ;;  %7222 = vmatmul.msk.f32.vlgmr.msrb.gmra.mxu0 %vm12306_vm10, %v15001_v30  ;;  %v12667_v34 = vpop.f32.mrf.mxu0 }
 0x908   : > { %v4798_v22 = vmul.f32 %v15178_v35, %v15177_v54  ;;  %v15179_v55 = vld [vmem:[#allocation142_spill] sm:$0xff]  ;;  %5240 = vmatpush.msrb.mxu2 %v4670_v59  ;;  %v15188_v54 = vld [vmem:[#allocation300_spill] sm:$0xff]  ;;  %7221 = vmatmul.msk.f32.gmra.mxu3 %vm12483_vm15, %v15001_v30 }
 0x909   : > { %v4662_v15 = vmul.f32 %v15180_v47, %v15179_v55  ;;  %5275 = vmatpush.msra.mxu0 %v4503_v4  ;;  %v15181_v41 = vld [vmem:[#allocation206_spill] sm:$0xff]  ;;  %v4487_v45 = vmul.f32 %v11645_v27, %v15188_v54  ;;  %v12669_v27 = vpop.f32.mrf.mxu1  ;;  %7062 = vmatmul.msk.f32.gmra.mxu1 %vm2514_vm9, %v12164_v14 }
 0x90a   : > { %v4790_v28 = vmul.f32 %v15182_v0, %v15181_v41  ;;  %5263 = vmatpush.msrb.mxu3 %v4798_v22  ;;  %v15184_v42 = vld [vmem:[#allocation138_spill] sm:$0xff]  ;;  %v15190_v22 = vld [vmem:[#allocation83_spill] sm:$0xff]  ;;  %v4479_v0 = vmul.f32 %v11630_v17, %v15193_v19 }
 0x90b   : > { %v4654_v11 = vmul.f32 %v15185_v51, %v15184_v42  ;;  %5241 = vmatpush.msrb.mxu2 %v4662_v15  ;;  %v15186_v59 = vld [vmem:[#allocation202_spill] sm:$0xff]  ;;  %5276 = vmatpush.msra.mxu0 %v4495_v2  ;;  %v15192_v15 = vld [vmem:[#allocation117_spill] sm:$0xff]  ;;  %v15195_v2 = vld [vmem:[#allocation95_spill] sm:$0xff] }
 0x90c   : > { %v4782_v4 = vmul.f32 %v15187_v58, %v15186_v59  ;;  %5264 = vmatpush.msrb.mxu3 %v4790_v28  ;;  %v15189_v35 = vld [vmem:[#allocation134_spill] sm:$0xff] }
 0x90d   : > { %v4646_v55 = vmul.f32 %v15190_v22, %v15189_v35  ;;  %5242 = vmatpush.msrb.mxu2 %v4654_v11  ;;  %v15191_v47 = vld [vmem:[#allocation198_spill] sm:$0xff]  ;;  %5277 = vmatpush.msra.mxu0 %v4487_v45  ;;  %v15197_v11 = vld [vmem:[#allocation121_spill] sm:$0xff] }
 0x90e   : > { %v4774_v41 = vmul.f32 %v15192_v15, %v15191_v47  ;;  %5265 = vmatpush.msrb.mxu3 %v4782_v4  ;;  %v15194_v28 = vld [vmem:[#allocation130_spill] sm:$0xff]  ;;  %v12680_v4 = vpop.f32.mrf.mxu2  ;;  %v12697_v19 = vpop.f32.mrf.mxu3  ;;  %7219 = vmatmul.msk.f32.gmra.mxu2 %vm12394_vm14, %v15001_v30 }
 0x90f   : > { %v4638_v42 = vmul.f32 %v15195_v2, %v15194_v28  ;;  %5243 = vmatpush.msrb.mxu2 %v4646_v55  ;;  %v15196_v51 = vld [vmem:[#allocation194_spill] sm:$0xff]  ;;  %5278 = vmatpush.msra.mxu0 %v4479_v0  ;;  %v12699_v0 = vpop.f32.mrf.mxu0 }
 0x910   : > { %v4766_v59 = vmul.f32 %v15197_v11, %v15196_v51  ;;  %5266 = vmatpush.msrb.mxu3 %v4774_v41  ;;  %v15198_v17 = vld [vmem:[#allocation294_spill] sm:$0xff]  ;;  %7223 = vmatmul.msk.f32.gmra.mxu0 %vm12356_vm13, %v15001_v30 }
 0x911   : > { %v4471_v58 = vmul.f32 %v11613_v6, %v15198_v17  ;;  %v15199_v54 = vld [vmem:[#allocation434_spill] sm:$0xff]  ;;  %5244 = vmatpush.msrb.mxu2 %v4638_v42  ;;  %v15202_v6 = vld [vmem:[#allocation287_spill] sm:$0xff]  ;;  %7063 = vmatmul.msk.f32.gmra.mxu1 %vm2514_vm9, %v12183_v20 }
 0x912   : > { %v4759_v45 = vmul.f32 %v12284_v31, %v15199_v54  ;;  %5267 = vmatpush.msrb.mxu3 %v4766_v59  ;;  %v15200_v35 = vld [vmem:[#allocation290_spill] sm:$0xff]  ;;  %v4455_v31 = vmul.f32 %v11575_v48, %v15202_v6 }
 0x913   : > { %v4463_v22 = vmul.f32 %v11594_v57, %v15200_v35  ;;  %v15201_v55 = vld [vmem:[#allocation430_spill] sm:$0xff]  ;;  %5279 = vmatpush.msra.mxu0 %v4471_v58  ;;  %v12701_v57 = vpop.f32.mrf.mxu1  ;;  %7228 = vmatmul.msk.f32.vlgmr.msrb.gmra.mxu3 %vm12347_vm12, %v15001_v30 }
 0x914   : > { %v4751_v47 = vmul.f32 %v12265_v39, %v15201_v55  ;;  %5321 = vmatpush.msra.mxu2 %v4759_v45  ;;  %v15203_v15 = vld [vmem:[#allocation426_spill] sm:$0xff]  ;;  %v15204_v39 = vld [vmem:[#allocation283_spill] sm:$0xff] }
 0x915   : > { %v4743_v41 = vmul.f32 %v12246_v53, %v15203_v15  ;;  %5280 = vmatpush.msra.mxu0 %v4463_v22  ;;  %v4447_v14 = vmul.f32 %v11556_v43, %v15204_v39  ;;  %v15205_v28 = vld [vmem:[#allocation422_spill] sm:$0xff]  ;;  %v15206_v53 = vld [vmem:[#allocation279_spill] sm:$0xff]  ;;  %v15220_v39 = vld [vmem:[#allocation620_spill] sm:$0xff] }
 0x916   : > { %5322 = vmatpush.msra.mxu2 %v4751_v47  ;;  %v4735_v48 = vmul.f32 %v12229_v60, %v15205_v28  ;;  %v4439_v2 = vmul.f32 %v11537_v56, %v15206_v53  ;;  %v15207_v42 = vld [vmem:[#allocation418_spill] sm:$0xff]  ;;  %v15208_v43 = vld [vmem:[#allocation275_spill] sm:$0xff]  ;;  %v12724_v17 = vpop.f32.mrf.mxu2  ;;  %v12740_v20 = vpop.f32.mrf.mxu3  ;;  %v15222_v53 = vld [vmem:[#allocation57_spill] sm:$0xff] }
 0x917   : > { %5281 = vmatpush.msra.mxu0 %v4455_v31  ;;  %v4727_v51 = vmul.f32 %v12210_v52, %v15207_v42  ;;  %v4431_v60 = vmul.f32 %v11518_v61, %v15208_v43  ;;  %v15209_v11 = vld [vmem:[#allocation414_spill] sm:$0xff]  ;;  %v15210_v56 = vld [vmem:[#allocation271_spill] sm:$0xff]  ;;  %v12732_v45 = vpop.f32.mrf.mxu0  ;;  %7226 = vmatmul.msk.f32.vlgmr.msrb.gmra.mxu2 %vm12340_vm11, %v15001_v30 }
 0x918   : > { %5323 = vmatpush.msra.mxu2 %v4743_v41  ;;  %v4719_v59 = vmul.f32 %v12193_v49, %v15209_v11  ;;  %v4423_v52 = vmul.f32 %v11497_v1, %v15210_v56  ;;  %v15211_v58 = vld [vmem:[#allocation410_spill] sm:$0xff]  ;;  %v15212_v49 = vld [vmem:[#allocation267_spill] sm:$0xff] }
 0x919   : > { %5282 = vmatpush.msra.mxu0 %v4447_v14  ;;  %v4711_v54 = vmul.f32 %v12174_v16, %v15211_v58  ;;  %v4415_v35 = vmul.f32 %v11470_v50, %v15212_v49  ;;  %v15213_v22 = vld [vmem:[#allocation406_spill] sm:$0xff]  ;;  %v15214_v1 = vld [vmem:[#allocation263_spill] sm:$0xff]  ;;  %7064 = vmatmul.msk.f32.gmra.mxu1 %vm2514_vm9, %v12200_v33 }
 0x91a   : > { %5324 = vmatpush.msra.mxu2 %v4735_v48  ;;  %v4703_v55 = vmul.f32 %v12155_v10, %v15213_v22  ;;  %v4407_v16 = vmul.f32 %v11437_v63, %v15214_v1  ;;  %v15215_v47 = vld [vmem:[#allocation402_spill] sm:$0xff]  ;;  %v15216_v50 = vld [vmem:[#allocation259_spill] sm:$0xff] }
 0x91b   : > { %5283 = vmatpush.msra.mxu0 %v4439_v2  ;;  %v12734_v61 = vpop.f32.mrf.mxu1  ;;  %7229 = vmatmul.msk.f32.gmra.mxu3 %vm12483_vm15, %v15001_v30  ;;  %v4695_v6 = vmul.f32 %v12138_v38, %v15215_v47  ;;  %v4399_v10 = vmul.f32 %v11394_v7, %v15216_v50  ;;  %v15217_v31 = vld [vmem:[#allocation398_spill] sm:$0xff]  ;;  %v15218_v63 = vld [vmem:[#allocation255_spill] sm:$0xff]  ;;  %v15237_v50 = vld [vmem:[#allocation605_spill] sm:$0xff] }
 0x91c   : > { %5325 = vmatpush.msra.mxu2 %v4727_v51  ;;  %v4687_v15 = vmul.f32 %v12119_v8, %v15217_v31  ;;  %v4391_v38 = vmul.f32 %v11355_v40, %v15218_v63  ;;  %v15219_v41 = vld [vmem:[#allocation394_spill] sm:$0xff]  ;;  %v15221_v8 = vld [vmem:[#allocation251_spill] sm:$0xff]  ;;  %v15224_v51 = vld [vmem:[#allocation616_spill] sm:$0xff] }
 0x91d   : > { %5284 = vmatpush.msra.mxu0 %v4431_v60  ;;  %v4679_v14 = vmul.f32 %v15220_v39, %v15219_v41  ;;  %v4383_v2 = vmul.f32 %v15222_v53, %v15221_v8  ;;  %v15223_v42 = vld [vmem:[#allocation390_spill] sm:$0xff]  ;;  %v15225_v40 = vld [vmem:[#allocation372_spill] sm:$0xff]  ;;  %v15226_v43 = vld [vmem:[#allocation603_spill] sm:$0xff] }
 0x91e   : > { %5326 = vmatpush.msra.mxu2 %v4719_v59  ;;  %v12762_v28 = vpop.f32.mrf.mxu2  ;;  %v4671_v33 = vmul.f32 %v15224_v51, %v15223_v42  ;;  %v4504_v60 = vmul.f32 %v15226_v43, %v15225_v40  ;;  %v15227_v11 = vld [vmem:[#allocation386_spill] sm:$0xff]  ;;  %v15228_v59 = vld [vmem:[#allocation612_spill] sm:$0xff]  ;;  %v15230_v58 = vld [vmem:[#allocation599_spill] sm:$0xff] }
 0x91f   : > { %5285 = vmatpush.msra.mxu0 %v4423_v52  ;;  %v12764_v48 = vpop.f32.mrf.mxu0  ;;  %v4663_v56 = vmul.f32 %v15228_v59, %v15227_v11  ;;  %v15229_v52 = vld [vmem:[#allocation368_spill] sm:$0xff]  ;;  %7227 = vmatmul.msk.f32.gmra.mxu2 %vm12394_vm14, %v15001_v30  ;;  %v15231_v49 = vld [vmem:[#allocation382_spill] sm:$0xff]  ;;  %v15234_v1 = vld [vmem:[#allocation595_spill] sm:$0xff] }
 0x920   : > { %5327 = vmatpush.msra.mxu2 %v4711_v54  ;;  %v4496_v54 = vmul.f32 %v15230_v58, %v15229_v52  ;;  %v15235_v47 = vld [vmem:[#allocation638_spill] sm:$0xff]  ;;  %v15238_v31 = vld [vmem:[#allocation360_spill] sm:$0xff]  ;;  %v15245_v40 = vld [vmem:[#allocation281_spill] sm:$0xff]  ;;  %v12814_v52 = vpop.f32.mrf.mxu3 }
 0x921   : > { %5286 = vmatpush.msra.mxu0 %v4415_v35  ;;  %v15232_v35 = vld [vmem:[#allocation609_spill] sm:$0xff]  ;;  %7065 = vmatmul.msk.f32.gmra.mxu1 %vm2514_vm9, %v15235_v47  ;;  %v15240_v39 = vld [vmem:[#allocation374_spill] sm:$0xff]  ;;  %v15242_v53 = vld [vmem:[#allocation356_spill] sm:$0xff]  ;;  %15249 = vst [vmem:[#allocation187_spill] sm:$0xff] %v12814_v52 }
 0x922   : > { %5328 = vmatpush.msra.mxu2 %v4703_v55  ;;  %v4655_v22 = vmul.f32 %v15232_v35, %v15231_v49  ;;  %v15233_v55 = vld [vmem:[#allocation364_spill] sm:$0xff]  ;;  %v15247_v11 = vld [vmem:[#allocation295_spill] sm:$0xff]  ;;  %v15564_v52 = vld [vmem:[#allocation617_spill] sm:$0xff] }
 0x923   : > { %5287 = vmatpush.msra.mxu0 %v4407_v16  ;;  %v12766_v7 = vpop.f32.mrf.mxu1  ;;  %v4488_v16 = vmul.f32 %v15234_v1, %v15233_v55  ;;  %v15250_v58 = vld [vmem:[#allocation344_spill] sm:$0xff]  ;;  %v15253_v1 = vld [vmem:[#allocation127_spill] sm:$0xff] }
 0x924   : > { %5329 = vmatpush.msra.mxu2 %v4695_v6  ;;  %v15236_v6 = vld [vmem:[#allocation378_spill] sm:$0xff]  ;;  %v15252_v55 = vld [vmem:[#allocation340_spill] sm:$0xff] }
 0x925   : > { %5288 = vmatpush.msra.mxu0 %v4399_v10  ;;  %v4647_v10 = vmul.f32 %v15237_v50, %v15236_v6  ;;  %v15254_v47 = vld [vmem:[#allocation336_spill] sm:$0xff]  ;;  %v15255_v6 = vld [vmem:[#allocation129_spill] sm:$0xff] }
 0x926   : > { %5330 = vmatpush.msra.mxu2 %v4687_v15  ;;  %v15239_v15 = vld [vmem:[#allocation253_spill] sm:$0xff]  ;;  %v12800_v51 = vpop.f32.mrf.mxu2  ;;  %v4432_v50 = vmul.f32 %v15255_v6, %v15254_v47  ;;  %v15269_v47 = vld [vmem:[#allocation316_spill] sm:$0xff] }
 0x927   : > { %5289 = vmatpush.msra.mxu0 %v4391_v38  ;;  %v4480_v63 = vmul.f32 %v15239_v15, %v15238_v31  ;;  %v3743_v38 = vpop.f32.mrf.mxu0  ;;  %v15256_v31 = vld [vmem:[#allocation332_spill] sm:$0xff]  ;;  %v15257_v15 = vld [vmem:[#allocation75_spill] sm:$0xff]  ;;  %v15270_v6 = vld [vmem:[#allocation157_spill] sm:$0xff] }
 0x928   : > { %5331 = vmatpush.msra.mxu2 %v4679_v14  ;;  %v15241_v14 = vld [vmem:[#allocation602_spill] sm:$0xff] }
 0x929   : > { %5290 = vmatpush.msra.mxu0 %v4383_v2  ;;  %v4639_v8 = vmul.f32 %v15241_v14, %v15240_v39  ;;  %v15243_v2 = vld [vmem:[#allocation269_spill] sm:$0xff]  ;;  %v15259_v14 = vld [vmem:[#allocation328_spill] sm:$0xff] }
 0x92a   : > { %5332 = vmatpush.msra.mxu2 %v4671_v33  ;;  %7230 = vmatmul.msk.f32.vlgmr.msra.gmra.mxu0 %vm12306_vm10, %v15001_v30  ;;  %v4472_v42 = vmul.f32 %v15243_v2, %v15242_v53  ;;  %v15244_v33 = vld [vmem:[#allocation352_spill] sm:$0xff]  ;;  %v15258_v39 = vld [vmem:[#allocation645_spill] sm:$0xff] }
 0x92b   : > { %5367 = vmatpush.msrb.mxu0 %v4504_v60  ;;  %v12794_v41 = vpop.f32.mrf.mxu1  ;;  %v4464_v43 = vmul.f32 %v15245_v40, %v15244_v33  ;;  %v15246_v60 = vld [vmem:[#allocation348_spill] sm:$0xff]  ;;  %v12833_v33 = vpop.f32.mrf.mxu3  ;;  %v15262_v40 = vld [vmem:[#allocation498_spill] sm:$0xff] }
 0x92c   : > { %5333 = vmatpush.msra.mxu2 %v4663_v56  ;;  %v4456_v59 = vmul.f32 %v15247_v11, %v15246_v60  ;;  %v15248_v56 = vld [vmem:[#allocation642_spill] sm:$0xff]  ;;  %15261 = vst [vmem:[#allocation248_spill] sm:$0xff] %v12833_v33  ;;  %v15263_v60 = vld [vmem:[#allocation324_spill] sm:$0xff]  ;;  %v15264_v11 = vld [vmem:[#allocation569_spill] sm:$0xff] }
 0x92d   : > { %5368 = vmatpush.msrb.mxu0 %v4496_v54  ;;  %7066 = vmatmul.msk.f32.gmra.mxu1 %vm2514_vm9, %v15248_v56  ;;  %v15251_v54 = vld [vmem:[#allocation308_spill] sm:$0xff]  ;;  %v15265_v56 = vld [vmem:[#allocation494_spill] sm:$0xff] }
 0x92e   : > { %5334 = vmatpush.msra.mxu2 %v4655_v22  ;;  %v4448_v49 = vmul.f32 %v15251_v54, %v15250_v58  ;;  %v15266_v54 = vld [vmem:[#allocation320_spill] sm:$0xff] }
 0x92f   : > { %5369 = vmatpush.msrb.mxu0 %v4488_v16  ;;  %v3746_v35 = vpop.f32.mrf.mxu0  ;;  %v4440_v16 = vmul.f32 %v15253_v1, %v15252_v55  ;;  %v15268_v1 = vld [vmem:[#allocation490_spill] sm:$0xff] }
 0x930   : > { %5335 = vmatpush.msra.mxu2 %v4647_v10  ;;  %v12822_v10 = vpop.f32.mrf.mxu2  ;;  %v4879_v58 = vmul.f32 %v3746_v35, %v15265_v56  ;;  %v15273_v35 = vld [vmem:[#allocation312_spill] sm:$0xff]  ;;  %v15279_v56 = vld [vmem:[#allocation307_spill] sm:$0xff] }
 0x931   : > { %5370 = vmatpush.msrb.mxu0 %v4480_v63  ;;  %v4424_v63 = vmul.f32 %v15257_v15, %v15256_v31  ;;  %v15271_v31 = vld [vmem:[#allocation649_spill] sm:$0xff]  ;;  %v15272_v15 = vld [vmem:[#allocation486_spill] sm:$0xff] }
 0x932   : > { %5336 = vmatpush.msra.mxu2 %v4639_v8  ;;  %7231 = vmatmul.msk.f32.gmra.mxu0 %vm12356_vm13, %v15001_v30  ;;  %v15260_v8 = vld [vmem:[#allocation141_spill] sm:$0xff] }
 0x933   : > { %5371 = vmatpush.msrb.mxu0 %v4472_v42  ;;  %7234 = vmatmul.msk.f32.vlgmr.msra.gmra.mxu2 %vm12340_vm11, %v15001_v30  ;;  %v3904_v22 = vpop.f32.mrf.mxu1  ;;  %v4416_v53 = vmul.f32 %v15260_v8, %v15259_v14 }
 0x935   : > { %5372 = vmatpush.msrb.mxu0 %v4464_v43  ;;  %7067 = vmatmul.msk.f32.gmra.mxu1 %vm2514_vm9, %v15258_v39  ;;  %v15274_v39 = vld [vmem:[#allocation161_spill] sm:$0xff] }
 0x936   : > { %v4384_v14 = vmul.f32 %v15274_v39, %v15273_v35  ;;  %v15289_v35 = vld [vmem:[#allocation48_spill] sm:$0xff]  ;;  %v15290_v39 = vld [vmem:[#allocation169_spill] sm:$0xff] }
 0x937   : > { %5373 = vmatpush.msrb.mxu0 %v4456_v59  ;;  %v3749_v2 = vpop.f32.mrf.mxu0  ;;  %v4408_v59 = vmul.f32 %v15264_v11, %v15263_v60  ;;  %v15278_v11 = vld [vmem:[#allocation500_spill] sm:$0xff] }
 0x938   : > { %v4887_v43 = vmul.f32 %v3749_v2, %v15262_v40  ;;  %v15276_v2 = vld [vmem:[#allocation191_spill] sm:$0xff]  ;;  %v12852_v40 = vpop.f32.mrf.mxu2 }
 0x939   : > { %5374 = vmatpush.msrb.mxu0 %v4448_v49  ;;  %v15267_v49 = vld [vmem:[#allocation153_spill] sm:$0xff] }
 0x93a   : > { %5344 = vmatpush.msra.mxu3 %v4887_v43  ;;  %v4400_v55 = vmul.f32 %v15267_v49, %v15266_v54  ;;  %v15277_v43 = vld [vmem:[#allocation482_spill] sm:$0xff]  ;;  %v12859_v54 = vpop.f32.mrf.mxu3 }
 0x93b   : > { %5375 = vmatpush.msrb.mxu0 %v4440_v16  ;;  %7235 = vmatmul.msk.f32.gmra.mxu2 %vm12394_vm14, %v15001_v30  ;;  %v3907_v42 = vpop.f32.mrf.mxu1  ;;  %v4871_v16 = vmul.f32 %v3743_v38, %v15268_v1  ;;  %v4855_v60 = vmul.f32 %v12732_v45, %v15277_v43  ;;  %15281 = vst [vmem:[#allocation37_spill] sm:$0xff] %v12859_v54  ;;  %v15282_v49 = vld [vmem:[#allocation478_spill] sm:$0xff]  ;;  %v15283_v1 = vld [vmem:[#allocation496_spill] sm:$0xff]  ;;  %v15284_v45 = vld [vmem:[#allocation53_spill] sm:$0xff] }
 0x93c   : > { %5345 = vmatpush.msra.mxu3 %v4879_v58  ;;  %v15294_v43 = vld [vmem:[#allocation221_spill] sm:$0xff] }
 0x93d   : > { %5376 = vmatpush.msrb.mxu0 %v4432_v50  ;;  %v4392_v50 = vmul.f32 %v15270_v6, %v15269_v47  ;;  %7068 = vmatmul.msk.f32.gmra.mxu1 %vm2514_vm9, %v15271_v31  ;;  %v15285_v47 = vld [vmem:[#allocation199_spill] sm:$0xff]  ;;  %v15566_v54 = vld [vmem:[#allocation613_spill] sm:$0xff] }
 0x93e   : > { %5346 = vmatpush.msra.mxu3 %v4871_v16  ;;  %v4752_v16 = vmul.f32 %v3907_v42, %v15283_v1  ;;  %v4489_v6 = vmul.f32 %v15285_v47, %v15284_v45  ;;  %v446_v42 = vperm.slane %v12289_v23, 1  ;;  %v15303_v45 = vld [vmem:[#allocation480_spill] sm:$0xff] }
 0x93f   : > { %5377 = vmatpush.msrb.mxu0 %v4424_v63  ;;  %v4863_v63 = vmul.f32 %v12764_v48, %v15272_v15  ;;  %v15280_v48 = vld [vmem:[#allocation195_spill] sm:$0xff]  ;;  %v15287_v15 = vld [vmem:[#allocation492_spill] sm:$0xff] }
 0x940   : > { %v4497_v58 = vmul.f32 %v15280_v48, %v15279_v56  ;;  %v15296_v56 = vld [vmem:[#allocation484_spill] sm:$0xff]  ;;  %v12898_v1 = vpop.f32.mrf.mxu2 }
 0x941   : > { %5378 = vmatpush.msrb.mxu0 %v4416_v53  ;;  %v15275_v53 = vld [vmem:[#allocation311_spill] sm:$0xff]  ;;  %5347 = vmatpush.msra.mxu3 %v4863_v63  ;;  %v4744_v63 = vmul.f32 %v3904_v22, %v15287_v15  ;;  %v15293_v22 = vld [vmem:[#allocation44_spill] sm:$0xff]  ;;  %v4728_v48 = vmul.f32 %v12766_v7, %v15296_v56  ;;  %v4720_v7 = vmul.f32 %v12734_v61, %v15303_v45  ;;  %v15318_v56 = vld [vmem:[#allocation562_spill] sm:$0xff] }
 0x942   : > { %v4505_v38 = vmul.f32 %v15276_v2, %v15275_v53  ;;  %v15292_v2 = vld [vmem:[#allocation488_spill] sm:$0xff]  ;;  %v15307_v15 = vld [vmem:[#allocation211_spill] sm:$0xff] }
 0x943   : > { %5379 = vmatpush.msrb.mxu0 %v4408_v59  ;;  %v3910_v8 = vpop.f32.mrf.mxu1  ;;  %5348 = vmatpush.msra.mxu3 %v4855_v60  ;;  %v4473_v60 = vmul.f32 %v15294_v43, %v15293_v22  ;;  %v15304_v47 = vld [vmem:[#allocation124_spill] sm:$0xff]  ;;  %v15315_v43 = vld [vmem:[#allocation454_spill] sm:$0xff] }
 0x944   : > { %v4760_v59 = vmul.f32 %v3910_v8, %v15278_v11  ;;  %v15291_v8 = vld [vmem:[#allocation470_spill] sm:$0xff]  ;;  %v15324_v45 = vld [vmem:[#allocation560_spill] sm:$0xff] }
 0x945   : > { %5380 = vmatpush.msrb.mxu0 %v4400_v55  ;;  %v4847_v55 = vmul.f32 %v12699_v0, %v15282_v49  ;;  %v15288_v0 = vld [vmem:[#allocation652_spill] sm:$0xff]  ;;  %v4831_v53 = vmul.f32 %v12627_v26, %v15291_v8  ;;  %v15295_v11 = vld [vmem:[#allocation466_spill] sm:$0xff]  ;;  %v15301_v49 = vld [vmem:[#allocation173_spill] sm:$0xff] }
 0x946   : > { %5413 = vmatpush.msrb.mxu2 %v4760_v59  ;;  %7069 = vmatmul.msk.f32.gmra.mxu1 %vm2514_vm9, %v15288_v0  ;;  %v4823_v59 = vmul.f32 %v12592_v36, %v15295_v11  ;;  %v15297_v26 = vld [vmem:[#allocation6_spill] sm:$0xff]  ;;  %v12911_v0 = vpop.f32.mrf.mxu3  ;;  %v15312_v8 = vld [vmem:[#allocation123_spill] sm:$0xff]  ;;  %v15356_v23 = vld [vmem:[#allocation552_spill] sm:$0xff] }
 0x947   : > { %5381 = vmatpush.msrb.mxu0 %v4392_v50  ;;  %v15286_v50 = vld [vmem:[#allocation474_spill] sm:$0xff]  ;;  %5349 = vmatpush.msra.mxu3 %v4847_v55  ;;  %vm12892_vm0 = vcmp.eq.s32.totalorder %v15297_v26, %v446_v42  ;;  %15308 = vst [vmem:[#allocation532_spill] sm:$0xff] %v12911_v0  ;;  %v15319_v26 = vld [vmem:[#allocation284_spill] sm:$0xff] }
 0x948   : > { %v4839_v31 = vmul.f32 %v12667_v34, %v15286_v50  ;;  %5414 = vmatpush.msrb.mxu2 %v4752_v16  ;;  %v4736_v34 = vmul.f32 %v12794_v41, %v15292_v2  ;;  %v15302_v16 = vld [vmem:[#allocation462_spill] sm:$0xff]  ;;  %v15672_v41 = vld [vmem:[#allocation485_spill] sm:$0xff] }
 0x949   : > { %5382 = vmatpush.msrb.mxu0 %v4384_v14  ;;  %v4481_v14 = vmul.f32 %v15290_v39, %v15289_v35  ;;  %v4815_v36 = vmul.f32 %v12555_v62, %v15302_v16  ;;  %v15309_v62 = vld [vmem:[#allocation458_spill] sm:$0xff]  ;;  %v15310_v39 = vld [vmem:[#allocation476_spill] sm:$0xff] }
 0x94a   : > { %7238 = vmatmul.msk.f32.vlgmr.msrb.gmra.mxu0 %vm12306_vm10, %v15001_v30  ;;  %5350 = vmatpush.msra.mxu3 %v4839_v31  ;;  %v15306_v31 = vld [vmem:[#allocation291_spill] sm:$0xff]  ;;  %v4807_v35 = vmul.f32 %v12519_v18, %v15309_v62  ;;  %v4712_v61 = vmul.f32 %v12701_v57, %v15310_v39  ;;  %v15313_v2 = vld [vmem:[#allocation30_spill] sm:$0xff]  ;;  %v15316_v18 = vld [vmem:[#allocation472_spill] sm:$0xff] }
 0x94b   : > { %5459 = vmatpush.msra.mxu0 %v4505_v38  ;;  %5415 = vmatpush.msrb.mxu2 %v4744_v63  ;;  %v12881_v38 = vpop.f32.mrf.mxu1  ;;  %v4457_v63 = vmul.f32 %v15307_v15, %v15306_v31  ;;  %v4704_v11 = vmul.f32 %v12669_v27, %v15316_v18  ;;  %v15323_v27 = vld [vmem:[#allocation112_spill] sm:$0xff]  ;;  %v15327_v31 = vld [vmem:[#allocation446_spill] sm:$0xff] }
 0x94c   : > { %5351 = vmatpush.msra.mxu3 %v4831_v53  ;;  %v15328_v15 = vld [vmem:[#allocation52_spill] sm:$0xff] }
 0x94d   : > { %5460 = vmatpush.msra.mxu0 %v4497_v58  ;;  %5416 = vmatpush.msrb.mxu2 %v4736_v34  ;;  %v15300_v58 = vld [vmem:[#allocation40_spill] sm:$0xff]  ;;  %v15314_v34 = vld [vmem:[#allocation229_spill] sm:$0xff] }
 0x94e   : > { %v4465_v55 = vmul.f32 %v15301_v49, %v15300_v58  ;;  %5352 = vmatpush.msra.mxu3 %v4823_v59  ;;  %7200 = vmatmul.msk.f32.vlgmr.msrb.gmra.mxu1 %vm12892_vm0, %v15001_v30  ;;  %v4449_v22 = vmul.f32 %v15314_v34, %v15313_v2  ;;  %v15317_v59 = vld [vmem:[#allocation116_spill] sm:$0xff]  ;;  %v15320_v58 = vld [vmem:[#allocation181_spill] sm:$0xff]  ;;  %v15334_v2 = vld [vmem:[#allocation442_spill] sm:$0xff] }
 0x94f   : > { %5461 = vmatpush.msra.mxu0 %v4489_v6  ;;  %5417 = vmatpush.msrb.mxu2 %v4728_v48  ;;  %v15305_v6 = vld [vmem:[#allocation115_spill] sm:$0xff]  ;;  %v4613_v48 = vmul.f32 %v15318_v56, %v15317_v59  ;;  %v4441_v49 = vmul.f32 %v15320_v58, %v15319_v26  ;;  %v15329_v62 = vld [vmem:[#allocation464_spill] sm:$0xff]  ;;  %v12960_v26 = vpop.f32.mrf.mxu3  ;;  %v15342_v58 = vld [vmem:[#allocation438_spill] sm:$0xff] }
 0x950   : > { %v4629_v50 = vmul.f32 %v15305_v6, %v15304_v47  ;;  %5353 = vmatpush.msra.mxu3 %v4815_v36  ;;  %v15322_v36 = vld [vmem:[#allocation468_spill] sm:$0xff]  ;;  %v15326_v6 = vld [vmem:[#allocation233_spill] sm:$0xff]  ;;  %v15335_v34 = vld [vmem:[#allocation47_spill] sm:$0xff]  ;;  %15341 = vst [vmem:[#allocation180_spill] sm:$0xff] %v12960_v26 }
 0x951   : > { %5462 = vmatpush.msra.mxu0 %v4481_v14  ;;  %5418 = vmatpush.msrb.mxu2 %v4720_v7  ;;  %v15311_v14 = vld [vmem:[#allocation120_spill] sm:$0xff]  ;;  %v4605_v7 = vmul.f32 %v15324_v45, %v15323_v27  ;;  %v15340_v56 = vld [vmem:[#allocation227_spill] sm:$0xff]  ;;  %v5753_v45 = vld [vmem:[%s13999_s5 + $0x1d8] sm:$0xff] }
 0x952   : > { %7239 = vmatmul.msk.f32.gmra.mxu0 %vm12356_vm13, %v15001_v30  ;;  %v4621_v53 = vmul.f32 %v15312_v8, %v15311_v14  ;;  %5114 = vmatpush.msrb.mxu1 %v4629_v50  ;;  %v15325_v47 = vld [vmem:[#allocation280_spill] sm:$0xff]  ;;  %v15333_v14 = vld [vmem:[#allocation223_spill] sm:$0xff] }
 0x953   : > { %5463 = vmatpush.msra.mxu0 %v4473_v60  ;;  %v4799_v60 = vmul.f32 %v12472_v5, %v15315_v43  ;;  %5354 = vmatpush.msra.mxu3 %v4807_v35  ;;  %v12928_v57 = vpop.f32.mrf.mxu1  ;;  %v4696_v5 = vmul.f32 %v12629_v12, %v15322_v36  ;;  %v4433_v50 = vmul.f32 %v15326_v6, %v15325_v47  ;;  %v15331_v12 = vld [vmem:[#allocation558_spill] sm:$0xff]  ;;  %v15336_v43 = vld [vmem:[#allocation460_spill] sm:$0xff]  ;;  %v15346_v27 = vld [vmem:[#allocation7_spill] sm:$0xff] }
 0x954   : > { %5419 = vmatpush.msrb.mxu2 %v4712_v61  ;;  %5115 = vmatpush.msrb.mxu1 %v4621_v53  ;;  %v4688_v35 = vmul.f32 %v12594_v21, %v15329_v62  ;;  %v15332_v61 = vld [vmem:[#allocation276_spill] sm:$0xff]  ;;  %v12950_v53 = vpop.f32.mrf.mxu2  ;;  %vm12971_vm1 = vcmp.eq.s32.totalorder %v15346_v27, %v446_v42  ;;  %v15350_v47 = vld [vmem:[#allocation554_spill] sm:$0xff]  ;;  %v15371_v27 = vld [vmem:[#allocation313_spill] sm:$0xff] }
 0x955   : > { %5464 = vmatpush.msra.mxu0 %v4465_v55  ;;  %v15321_v55 = vld [vmem:[#allocation450_spill] sm:$0xff]  ;;  %5355 = vmatpush.msra.mxu3 %v4799_v60  ;;  %v4425_v8 = vmul.f32 %v15333_v14, %v15332_v61  ;;  %v4680_v60 = vmul.f32 %v12557_v3, %v15336_v43  ;;  %v15337_v21 = vld [vmem:[#allocation104_spill] sm:$0xff] }
 0x956   : > { %v4791_v16 = vmul.f32 %v12432_v32, %v15321_v55  ;;  %5420 = vmatpush.msrb.mxu2 %v4704_v11  ;;  %5116 = vmatpush.msrb.mxu1 %v4613_v48  ;;  %v15330_v32 = vld [vmem:[#allocation108_spill] sm:$0xff] }
 0x957   : > { %5465 = vmatpush.msra.mxu0 %v4457_v63  ;;  %v4783_v63 = vmul.f32 %v15328_v15, %v15327_v31  ;;  %v4597_v39 = vmul.f32 %v15331_v12, %v15330_v32  ;;  %v15338_v18 = vld [vmem:[#allocation556_spill] sm:$0xff]  ;;  %v15352_v31 = vld [vmem:[#allocation231_spill] sm:$0xff]  ;;  %7201 = vmatmul.msk.f32.gmra.mxu1 %vm12971_vm1, %v15001_v30 }
 0x958   : > { %5356 = vmatpush.msra.mxu3 %v4791_v16  ;;  %5421 = vmatpush.msrb.mxu2 %v4696_v5  ;;  %v4589_v11 = vmul.f32 %v15338_v18, %v15337_v21  ;;  %v15339_v59 = vld [vmem:[#allocation272_spill] sm:$0xff]  ;;  %v15364_v21 = vld [vmem:[#allocation249_spill] sm:$0xff] }
 0x959   : > { %5466 = vmatpush.msra.mxu0 %v4449_v22  ;;  %5117 = vmatpush.msrb.mxu1 %v4605_v7  ;;  %v4775_v22 = vmul.f32 %v15335_v34, %v15334_v2  ;;  %v4417_v48 = vmul.f32 %v15340_v56, %v15339_v59  ;;  %v15344_v16 = vld [vmem:[#allocation456_spill] sm:$0xff] }
 0x95a   : > { %5357 = vmatpush.msra.mxu3 %v4783_v63  ;;  %5422 = vmatpush.msrb.mxu2 %v4688_v35  ;;  %v15345_v36 = vld [vmem:[#allocation252_spill] sm:$0xff] }
 0x95b   : > { %5467 = vmatpush.msra.mxu0 %v4441_v49  ;;  %5118 = vmatpush.msrb.mxu1 %v4597_v39  ;;  %v15343_v49 = vld [vmem:[#allocation654_spill] sm:$0xff]  ;;  %v4672_v5 = vmul.f32 %v15345_v36, %v15344_v16  ;;  %v12966_v3 = vpop.f32.mrf.mxu1  ;;  %v15349_v7 = vld [vmem:[#allocation100_spill] sm:$0xff]  ;;  %v15358_v39 = vld [vmem:[#allocation245_spill] sm:$0xff] }
 0x95c   : > { %v4767_v55 = vmul.f32 %v15343_v49, %v15342_v58  ;;  %5358 = vmatpush.msra.mxu3 %v4775_v22  ;;  %5423 = vmatpush.msrb.mxu2 %v4680_v60  ;;  %v4581_v6 = vmul.f32 %v15350_v47, %v15349_v7  ;;  %v15353_v63 = vld [vmem:[#allocation452_spill] sm:$0xff]  ;;  %v15362_v22 = vld [vmem:[#allocation550_spill] sm:$0xff]  ;;  %v15370_v16 = vld [vmem:[#allocation247_spill] sm:$0xff] }
 0x95d   : > { %5468 = vmatpush.msra.mxu0 %v4433_v50  ;;  %v15351_v50 = vld [vmem:[#allocation268_spill] sm:$0xff]  ;;  %5119 = vmatpush.msrb.mxu1 %v4589_v11  ;;  %v15372_v7 = vld [vmem:[#allocation205_spill] sm:$0xff] }
 0x95e   : > { %v4409_v15 = vmul.f32 %v15352_v31, %v15351_v50  ;;  %v15354_v62 = vld [vmem:[#allocation188_spill] sm:$0xff]  ;;  %5359 = vmatpush.msra.mxu3 %v4767_v55  ;;  %5424 = vmatpush.msrb.mxu2 %v4672_v5  ;;  %v13003_v5 = vpop.f32.mrf.mxu2  ;;  %v4506_v47 = vmul.f32 %v15372_v7, %v15371_v27  ;;  %v15394_v7 = vld [vmem:[#allocation299_spill] sm:$0xff] }
 0x95f   : > { %5469 = vmatpush.msra.mxu0 %v4425_v8  ;;  %v4664_v35 = vmul.f32 %v15354_v62, %v15353_v63  ;;  %v15355_v32 = vld [vmem:[#allocation96_spill] sm:$0xff]  ;;  %5120 = vmatpush.msrb.mxu1 %v4581_v6  ;;  %v15360_v8 = vld [vmem:[#allocation541_spill] sm:$0xff] }
 0x960   : > { %v4573_v12 = vmul.f32 %v15356_v23, %v15355_v32  ;;  %v15357_v42 = vld [vmem:[#allocation264_spill] sm:$0xff]  ;;  %7236 = vmatmul.msk.f32.vlgmr.msra.gmra.mxu3 %vm12347_vm12, %v15001_v30  ;;  %v15377_v32 = vld [vmem:[#allocation439_spill] sm:$0xff]  ;;  %7208 = vmatmul.msk.f32.vlgmr.msra.gmra.mxu1 %vm12892_vm0, %v15001_v30 }
 0x961   : > { %5470 = vmatpush.msra.mxu0 %v4417_v48  ;;  %v4401_v61 = vmul.f32 %v15358_v39, %v15357_v42  ;;  %v15359_v14 = vld [vmem:[#allocation448_spill] sm:$0xff]  ;;  %5425 = vmatpush.msrb.mxu2 %v4664_v35  ;;  %v4761_v23 = vmul.f32 %v12762_v28, %v15377_v32  ;;  %v15379_v42 = vld [vmem:[#allocation309_spill] sm:$0xff]  ;;  %v15380_v39 = vld [vmem:[#allocation578_spill] sm:$0xff] }
 0x962   : > { %v4656_v2 = vmul.f32 %v15360_v8, %v15359_v14  ;;  %v15361_v34 = vld [vmem:[#allocation92_spill] sm:$0xff]  ;;  %5121 = vmatpush.msrb.mxu1 %v4573_v12  ;;  %v13015_v12 = vpop.f32.mrf.mxu3  ;;  %v15382_v8 = vld [vmem:[#allocation14_spill] sm:$0xff] }
 0x963   : > { %5471 = vmatpush.msra.mxu0 %v4409_v15  ;;  %v4565_v43 = vmul.f32 %v15362_v22, %v15361_v34  ;;  %v15363_v60 = vld [vmem:[#allocation260_spill] sm:$0xff]  ;;  %v13009_v15 = vpop.f32.mrf.mxu1  ;;  %15378 = vst [vmem:[#allocation588_spill] sm:$0xff] %v13015_v12  ;;  %v15383_v34 = vld [vmem:[#allocation435_spill] sm:$0xff] }
 0x964   : > { %v4393_v18 = vmul.f32 %v15364_v21, %v15363_v60  ;;  %v15365_v11 = vld [vmem:[#allocation444_spill] sm:$0xff]  ;;  %5426 = vmatpush.msrb.mxu2 %v4656_v2  ;;  %v4753_v22 = vmul.f32 %v12724_v17, %v15383_v34  ;;  %v15385_v60 = vld [vmem:[#allocation165_spill] sm:$0xff] }
 0x965   : > { %5472 = vmatpush.msra.mxu0 %v4401_v61  ;;  %v15366_v59 = vld [vmem:[#allocation544_spill] sm:$0xff]  ;;  %5122 = vmatpush.msrb.mxu1 %v4565_v43  ;;  %v4498_v61 = vmul.f32 %v15380_v39, %v15379_v42  ;;  %v15384_v43 = vld [vmem:[#allocation305_spill] sm:$0xff]  ;;  %v15401_v42 = vld [vmem:[#allocation207_spill] sm:$0xff] }
 0x966   : > { %v4648_v56 = vmul.f32 %v15366_v59, %v15365_v11  ;;  %v15367_v48 = vld [vmem:[#allocation88_spill] sm:$0xff]  ;;  %v4490_v28 = vmul.f32 %v15385_v60, %v15384_v43  ;;  %v15388_v59 = vld [vmem:[#allocation431_spill] sm:$0xff]  ;;  %v15390_v17 = vld [vmem:[#allocation217_spill] sm:$0xff] }
 0x967   : > { %v15368_v58 = vld [vmem:[#allocation548_spill] sm:$0xff]  ;;  %5473 = vmatpush.msra.mxu0 %v4393_v18  ;;  %v15405_v34 = vld [vmem:[#allocation45_spill] sm:$0xff]  ;;  %v15406_v60 = vld [vmem:[#allocation126_spill] sm:$0xff] }
 0x968   : > { %v4557_v49 = vmul.f32 %v15368_v58, %v15367_v48  ;;  %v15369_v55 = vld [vmem:[#allocation256_spill] sm:$0xff]  ;;  %5427 = vmatpush.msrb.mxu2 %v4648_v56  ;;  %v4745_v56 = vmul.f32 %v12680_v4, %v15388_v59  ;;  %v15389_v48 = vld [vmem:[#allocation302_spill] sm:$0xff]  ;;  %v15395_v4 = vld [vmem:[#allocation203_spill] sm:$0xff]  ;;  %7237 = vmatmul.msk.f32.gmra.mxu3 %vm12483_vm15, %v15001_v30 }
 0x969   : > { %v4385_v36 = vmul.f32 %v15370_v16, %v15369_v55  ;;  %v15373_v6 = vld [vmem:[#allocation440_spill] sm:$0xff]  ;;  %v4482_v58 = vmul.f32 %v15390_v17, %v15389_v48  ;;  %v15392_v55 = vld [vmem:[#allocation26_spill] sm:$0xff]  ;;  %7209 = vmatmul.msk.f32.gmra.mxu1 %vm12971_vm1, %v15001_v30  ;;  %v15411_v48 = vld [vmem:[#allocation49_spill] sm:$0xff] }
 0x96a   : > { %v15374_v50 = vld [vmem:[#allocation56_spill] sm:$0xff]  ;;  %5123 = vmatpush.msrb.mxu1 %v4557_v49  ;;  %v13060_v43 = vpop.f32.mrf.mxu3 }
 0x96b   : > { %v4640_v31 = vmul.f32 %v15374_v50, %v15373_v6  ;;  %v15375_v63 = vld [vmem:[#allocation84_spill] sm:$0xff]  ;;  %5474 = vmatpush.msra.mxu0 %v4385_v36  ;;  %v15393_v36 = vld [vmem:[#allocation427_spill] sm:$0xff]  ;;  %v13043_v6 = vpop.f32.mrf.mxu1 }
 0x96c   : > { %v15376_v62 = vld [vmem:[#allocation8_spill] sm:$0xff]  ;;  %v4737_v27 = vmul.f32 %v12635_v25, %v15393_v36  ;;  %v15415_v36 = vld [vmem:[#allocation177_spill] sm:$0xff]  ;;  %7246 = vmatmul.msk.f32.vlgmr.msra.gmra.mxu0 %vm12306_vm10, %v15001_v30 }
 0x96d   : > { %v4549_v35 = vmul.f32 %v15376_v62, %v15375_v63  ;;  %5551 = vmatpush.msrb.mxu0 %v4506_v47  ;;  %5428 = vmatpush.msrb.mxu2 %v4640_v31  ;;  %v15381_v14 = vld [vmem:[#allocation80_spill] sm:$0xff]  ;;  %v4474_v47 = vmul.f32 %v15395_v4, %v15394_v7  ;;  %v15397_v31 = vld [vmem:[#allocation33_spill] sm:$0xff]  ;;  %v15398_v62 = vld [vmem:[#allocation423_spill] sm:$0xff] }
 0x96e   : > { %v4541_v2 = vmul.f32 %v15382_v8, %v15381_v14  ;;  %v15386_v21 = vld [vmem:[#allocation76_spill] sm:$0xff]  ;;  %7242 = vmatmul.msk.f32.vlgmr.msrb.gmra.mxu2 %vm12340_vm11, %v15001_v30  ;;  %v15403_v14 = vld [vmem:[#allocation39_spill] sm:$0xff] }
 0x96f   : > { %5124 = vmatpush.msrb.mxu1 %v4549_v35  ;;  %5505 = vmatpush.msra.mxu2 %v4761_v23  ;;  %v15387_v18 = vld [vmem:[#allocation20_spill] sm:$0xff]  ;;  %v15399_v35 = vld [vmem:[#allocation535_spill] sm:$0xff]  ;;  %v13052_v23 = vpop.f32.mrf.mxu2 }
 0x970   : > { %5552 = vmatpush.msrb.mxu0 %v4498_v61  ;;  %v4533_v11 = vmul.f32 %v15387_v18, %v15386_v21  ;;  %v15391_v49 = vld [vmem:[#allocation72_spill] sm:$0xff]  ;;  %v4729_v32 = vmul.f32 %v15399_v35, %v15398_v62  ;;  %v15408_v18 = vld [vmem:[#allocation293_spill] sm:$0xff]  ;;  %v15416_v7 = vld [vmem:[#allocation411_spill] sm:$0xff] }
 0x971   : > { %5125 = vmatpush.msrb.mxu1 %v4541_v2  ;;  %5506 = vmatpush.msra.mxu2 %v4753_v22  ;;  %v4525_v16 = vmul.f32 %v15392_v55, %v15391_v49  ;;  %v15396_v50 = vld [vmem:[#allocation68_spill] sm:$0xff]  ;;  %v15404_v2 = vld [vmem:[#allocation419_spill] sm:$0xff]  ;;  %v15420_v62 = vld [vmem:[#allocation286_spill] sm:$0xff] }
 0x972   : > { %5553 = vmatpush.msrb.mxu0 %v4490_v28  ;;  %v4517_v63 = vmul.f32 %v15397_v31, %v15396_v50  ;;  %v15400_v25 = vld [vmem:[#allocation296_spill] sm:$0xff]  ;;  %v4721_v22 = vmul.f32 %v15405_v34, %v15404_v2  ;;  %v15407_v28 = vld [vmem:[#allocation107_spill] sm:$0xff]  ;;  %v15418_v50 = vld [vmem:[#allocation118_spill] sm:$0xff] }
 0x973   : > { %5126 = vmatpush.msrb.mxu1 %v4533_v11  ;;  %5507 = vmatpush.msra.mxu2 %v4745_v56  ;;  %v4466_v39 = vmul.f32 %v15401_v42, %v15400_v25  ;;  %v15402_v61 = vld [vmem:[#allocation64_spill] sm:$0xff]  ;;  %v4630_v21 = vmul.f32 %v15407_v28, %v15406_v60  ;;  %v15409_v11 = vld [vmem:[#allocation225_spill] sm:$0xff]  ;;  %v15410_v56 = vld [vmem:[#allocation415_spill] sm:$0xff]  ;;  %v13084_v25 = vpop.f32.mrf.mxu1 }
 0x974   : > { %5554 = vmatpush.msrb.mxu0 %v4482_v58  ;;  %v4509_v8 = vmul.f32 %v15403_v14, %v15402_v61  ;;  %v4458_v59 = vmul.f32 %v15409_v11, %v15408_v18  ;;  %v4713_v17 = vmul.f32 %v15411_v48, %v15410_v56  ;;  %v15412_v58 = vld [vmem:[#allocation122_spill] sm:$0xff]  ;;  %v15413_v49 = vld [vmem:[#allocation119_spill] sm:$0xff]  ;;  %v15417_v4 = vld [vmem:[#allocation60_spill] sm:$0xff] }
 0x975   : > { %5127 = vmatpush.msrb.mxu1 %v4525_v16  ;;  %5508 = vmatpush.msra.mxu2 %v4737_v27  ;;  %v4622_v55 = vmul.f32 %v15413_v49, %v15412_v58  ;;  %v15414_v16 = vld [vmem:[#allocation289_spill] sm:$0xff]  ;;  %v15419_v31 = vld [vmem:[#allocation563_spill] sm:$0xff]  ;;  %v15424_v14 = vld [vmem:[#allocation114_spill] sm:$0xff] }
 0x976   : > { %5555 = vmatpush.msrb.mxu0 %v4474_v47  ;;  %v4450_v27 = vmul.f32 %v15415_v36, %v15414_v16  ;;  %v4705_v47 = vmul.f32 %v15417_v4, %v15416_v7  ;;  %v15421_v35 = vld [vmem:[#allocation215_spill] sm:$0xff]  ;;  %v15426_v34 = vld [vmem:[#allocation282_spill] sm:$0xff]  ;;  %v15433_v58 = vld [vmem:[#allocation185_spill] sm:$0xff]  ;;  %7243 = vmatmul.msk.f32.gmra.mxu2 %vm12394_vm14, %v15001_v30 }
 0x977   : > { %5128 = vmatpush.msrb.mxu1 %v4517_v63  ;;  %5509 = vmatpush.msra.mxu2 %v4729_v32  ;;  %v4614_v63 = vmul.f32 %v15419_v31, %v15418_v50  ;;  %v4442_v32 = vmul.f32 %v15421_v35, %v15420_v62  ;;  %v15422_v42 = vld [vmem:[#allocation407_spill] sm:$0xff]  ;;  %v13094_v11 = vpop.f32.mrf.mxu2  ;;  %v15435_v16 = vld [vmem:[#allocation644_spill] sm:$0xff]  ;;  %v15436_v7 = vld [vmem:[#allocation106_spill] sm:$0xff] }
 0x978   : > { %5556 = vmatpush.msrb.mxu0 %v4466_v39  ;;  %v15423_v39 = vld [vmem:[#allocation653_spill] sm:$0xff]  ;;  %v15428_v28 = vld [vmem:[#allocation403_spill] sm:$0xff]  ;;  %v15438_v50 = vld [vmem:[#allocation274_spill] sm:$0xff] }
 0x979   : > { %5129 = vmatpush.msrb.mxu1 %v4509_v8  ;;  %5510 = vmatpush.msra.mxu2 %v4721_v22  ;;  %v4697_v61 = vmul.f32 %v15423_v39, %v15422_v42  ;;  %v15425_v8 = vld [vmem:[#allocation561_spill] sm:$0xff]  ;;  %v15427_v22 = vld [vmem:[#allocation219_spill] sm:$0xff]  ;;  %v15442_v42 = vld [vmem:[#allocation102_spill] sm:$0xff] }
 0x97a   : > { %5557 = vmatpush.msrb.mxu0 %v4458_v59  ;;  %v4606_v2 = vmul.f32 %v15425_v8, %v15424_v14  ;;  %v4434_v60 = vmul.f32 %v15427_v22, %v15426_v34  ;;  %v15430_v59 = vld [vmem:[#allocation110_spill] sm:$0xff]  ;;  %v15431_v56 = vld [vmem:[#allocation559_spill] sm:$0xff]  ;;  %7216 = vmatmul.msk.f32.vlgmr.msrb.gmra.mxu1 %vm12892_vm0, %v15001_v30  ;;  %v15437_v4 = vld [vmem:[#allocation557_spill] sm:$0xff] }
 0x97b   : > { %5206 = vmatpush.msra.mxu1 %v4630_v21  ;;  %5511 = vmatpush.msra.mxu2 %v4713_v17  ;;  %v15429_v21 = vld [vmem:[#allocation648_spill] sm:$0xff]  ;;  %v4598_v48 = vmul.f32 %v15431_v56, %v15430_v59  ;;  %v15432_v17 = vld [vmem:[#allocation278_spill] sm:$0xff]  ;;  %v15439_v31 = vld [vmem:[#allocation237_spill] sm:$0xff]  ;;  %v13120_v34 = vpop.f32.mrf.mxu1 }
 0x97c   : > { %5558 = vmatpush.msrb.mxu0 %v4450_v27  ;;  %v4689_v18 = vmul.f32 %v15429_v21, %v15428_v28  ;;  %v4426_v49 = vmul.f32 %v15433_v58, %v15432_v17  ;;  %v13102_v27 = vpop.f32.mrf.mxu3  ;;  %v15440_v62 = vld [vmem:[#allocation395_spill] sm:$0xff]  ;;  %v15444_v14 = vld [vmem:[#allocation270_spill] sm:$0xff]  ;;  %v15445_v8 = vld [vmem:[#allocation241_spill] sm:$0xff] }
 0x97d   : > { %5207 = vmatpush.msra.mxu1 %v4622_v55  ;;  %5512 = vmatpush.msra.mxu2 %v4705_v47  ;;  %v15434_v55 = vld [vmem:[#allocation399_spill] sm:$0xff]  ;;  %v4590_v47 = vmul.f32 %v15437_v4, %v15436_v7  ;;  %v15448_v21 = vld [vmem:[#allocation98_spill] sm:$0xff] }
 0x97e   : > { %5559 = vmatpush.msrb.mxu0 %v4442_v32  ;;  %v4681_v36 = vmul.f32 %v15435_v16, %v15434_v55  ;;  %v15441_v35 = vld [vmem:[#allocation639_spill] sm:$0xff]  ;;  %v15450_v56 = vld [vmem:[#allocation266_spill] sm:$0xff] }
 0x97f   : > { %5208 = vmatpush.msra.mxu1 %v4614_v63  ;;  %5513 = vmatpush.msra.mxu2 %v4697_v61  ;;  %v4418_v63 = vmul.f32 %v15439_v31, %v15438_v50  ;;  %v4673_v32 = vmul.f32 %v15441_v35, %v15440_v62  ;;  %v15443_v39 = vld [vmem:[#allocation555_spill] sm:$0xff]  ;;  %v15454_v16 = vld [vmem:[#allocation94_spill] sm:$0xff]  ;;  %v13136_v35 = vpop.f32.mrf.mxu2 }
 0x980   : > { %5560 = vmatpush.msrb.mxu0 %v4434_v60  ;;  %v4582_v61 = vmul.f32 %v15443_v39, %v15442_v42  ;;  %v15446_v22 = vld [vmem:[#allocation391_spill] sm:$0xff]  ;;  %v15456_v4 = vld [vmem:[#allocation262_spill] sm:$0xff]  ;;  %v15461_v42 = vld [vmem:[#allocation549_spill] sm:$0xff] }
 0x981   : > { %5209 = vmatpush.msra.mxu1 %v4606_v2  ;;  %5514 = vmatpush.msra.mxu2 %v4689_v18  ;;  %v4410_v2 = vmul.f32 %v15445_v8, %v15444_v14  ;;  %v15447_v60 = vld [vmem:[#allocation635_spill] sm:$0xff]  ;;  %v15449_v18 = vld [vmem:[#allocation553_spill] sm:$0xff] }
 0x982   : > { %5561 = vmatpush.msrb.mxu0 %v4426_v49  ;;  %v4665_v28 = vmul.f32 %v15447_v60, %v15446_v22  ;;  %v4574_v59 = vmul.f32 %v15449_v18, %v15448_v21  ;;  %v15452_v58 = vld [vmem:[#allocation387_spill] sm:$0xff]  ;;  %v15453_v49 = vld [vmem:[#allocation632_spill] sm:$0xff]  ;;  %7217 = vmatmul.msk.f32.gmra.mxu1 %vm12971_vm1, %v15001_v30  ;;  %v15465_v22 = vld [vmem:[#allocation625_spill] sm:$0xff] }
 0x983   : > { %5210 = vmatpush.msra.mxu1 %v4598_v48  ;;  %5515 = vmatpush.msra.mxu2 %v4681_v36  ;;  %v15451_v48 = vld [vmem:[#allocation235_spill] sm:$0xff]  ;;  %v4657_v55 = vmul.f32 %v15453_v49, %v15452_v58  ;;  %v15466_v21 = vld [vmem:[#allocation86_spill] sm:$0xff] }
 0x984   : > { %7247 = vmatmul.msk.f32.gmra.mxu0 %vm12356_vm13, %v15001_v30  ;;  %v4402_v17 = vmul.f32 %v15451_v48, %v15450_v56  ;;  %v15455_v36 = vld [vmem:[#allocation551_spill] sm:$0xff]  ;;  %v15468_v56 = vld [vmem:[#allocation441_spill] sm:$0xff] }
 0x985   : > { %5211 = vmatpush.msra.mxu1 %v4590_v47  ;;  %5562 = vmatpush.msrb.mxu0 %v4418_v63  ;;  %v4566_v7 = vmul.f32 %v15455_v36, %v15454_v16  ;;  %v15457_v47 = vld [vmem:[#allocation239_spill] sm:$0xff]  ;;  %v15459_v63 = vld [vmem:[#allocation629_spill] sm:$0xff]  ;;  %v4762_v48 = vmul.f32 %v12740_v20, %v15468_v56  ;;  %v13160_v36 = vpop.f32.mrf.mxu1  ;;  %v15472_v20 = vld [vmem:[#allocation78_spill] sm:$0xff] }
 0x986   : > { %5516 = vmatpush.msra.mxu2 %v4673_v32  ;;  %v4394_v50 = vmul.f32 %v15457_v47, %v15456_v4  ;;  %v15458_v31 = vld [vmem:[#allocation383_spill] sm:$0xff]  ;;  %v15460_v32 = vld [vmem:[#allocation90_spill] sm:$0xff]  ;;  %v15474_v47 = vld [vmem:[#allocation433_spill] sm:$0xff] }
 0x987   : > { %5212 = vmatpush.msra.mxu1 %v4582_v61  ;;  %5563 = vmatpush.msrb.mxu0 %v4410_v2  ;;  %v4649_v62 = vmul.f32 %v15459_v63, %v15458_v31  ;;  %v4558_v39 = vmul.f32 %v15461_v42, %v15460_v32  ;;  %v15462_v61 = vld [vmem:[#allocation258_spill] sm:$0xff]  ;;  %v15463_v14 = vld [vmem:[#allocation243_spill] sm:$0xff]  ;;  %v4746_v37 = vmul.f32 %v12650_v24, %v15474_v47  ;;  %v13173_v42 = vpop.f32.mrf.mxu2 }
 0x988   : > { %5517 = vmatpush.msra.mxu2 %v4665_v28  ;;  %v4386_v8 = vmul.f32 %v15463_v14, %v15462_v61  ;;  %v15464_v2 = vld [vmem:[#allocation379_spill] sm:$0xff]  ;;  %v13147_v28 = vpop.f32.mrf.mxu3  ;;  %v15480_v61 = vld [vmem:[#allocation29_spill] sm:$0xff] }
 0x989   : > { %5213 = vmatpush.msra.mxu1 %v4574_v59  ;;  %5564 = vmatpush.msrb.mxu0 %v4402_v17  ;;  %v4641_v60 = vmul.f32 %v15465_v22, %v15464_v2  ;;  %v15467_v18 = vld [vmem:[#allocation547_spill] sm:$0xff]  ;;  %v15469_v17 = vld [vmem:[#allocation82_spill] sm:$0xff]  ;;  %v15482_v2 = vld [vmem:[#allocation41_spill] sm:$0xff] }
 0x98a   : > { %5518 = vmatpush.msra.mxu2 %v4657_v55  ;;  %v4550_v59 = vmul.f32 %v15467_v18, %v15466_v21  ;;  %v15470_v58 = vld [vmem:[#allocation11_spill] sm:$0xff]  ;;  %v15471_v55 = vld [vmem:[#allocation437_spill] sm:$0xff]  ;;  %v15484_v21 = vld [vmem:[#allocation36_spill] sm:$0xff] }
 0x98b   : > { %5214 = vmatpush.msra.mxu1 %v4566_v7  ;;  %5565 = vmatpush.msrb.mxu0 %v4394_v50  ;;  %v4542_v49 = vmul.f32 %v15470_v58, %v15469_v17  ;;  %v4754_v16 = vmul.f32 %v12697_v19, %v15471_v55  ;;  %v15473_v7 = vld [vmem:[#allocation17_spill] sm:$0xff]  ;;  %v15475_v50 = vld [vmem:[#allocation74_spill] sm:$0xff]  ;;  %v15476_v31 = vld [vmem:[#allocation23_spill] sm:$0xff] }
 0x98c   : > { %5519 = vmatpush.msra.mxu2 %v4649_v62  ;;  %v4534_v4 = vmul.f32 %v15473_v7, %v15472_v20  ;;  %v4526_v63 = vmul.f32 %v15476_v31, %v15475_v50  ;;  %v15477_v19 = vld [vmem:[#allocation429_spill] sm:$0xff]  ;;  %v15478_v62 = vld [vmem:[#allocation184_spill] sm:$0xff]  ;;  %v15486_v56 = vld [vmem:[#allocation179_spill] sm:$0xff] }
 0x98d   : > { %5215 = vmatpush.msra.mxu1 %v4558_v39  ;;  %5566 = vmatpush.msrb.mxu0 %v4386_v8  ;;  %v4738_v32 = vmul.f32 %v15478_v62, %v15477_v19  ;;  %v15479_v39 = vld [vmem:[#allocation70_spill] sm:$0xff]  ;;  %v15481_v8 = vld [vmem:[#allocation425_spill] sm:$0xff]  ;;  %v13190_v55 = vpop.f32.mrf.mxu1  ;;  %v15494_v50 = vld [vmem:[#allocation59_spill] sm:$0xff] }
 0x98e   : > { %5520 = vmatpush.msra.mxu2 %v4641_v60  ;;  %7254 = vmatmul.msk.f32.vlgmr.msrb.gmra.mxu0 %vm12306_vm10, %v15001_v30  ;;  %v4518_v14 = vmul.f32 %v15480_v61, %v15479_v39  ;;  %v4730_v22 = vmul.f32 %v15482_v2, %v15481_v8  ;;  %v15483_v60 = vld [vmem:[#allocation66_spill] sm:$0xff]  ;;  %v15496_v19 = vld [vmem:[#allocation257_spill] sm:$0xff]  ;;  %v15498_v39 = vld [vmem:[#allocation656_spill] sm:$0xff] }
 0x98f   : > { %5216 = vmatpush.msra.mxu1 %v4550_v59  ;;  %v4510_v18 = vmul.f32 %v15484_v21, %v15483_v60  ;;  %v15485_v59 = vld [vmem:[#allocation421_spill] sm:$0xff]  ;;  %v15487_v17 = vld [vmem:[#allocation370_spill] sm:$0xff]  ;;  %7250 = vmatmul.msk.f32.vlgmr.msra.gmra.mxu2 %vm12340_vm11, %v15001_v30 }
 0x990   : > { %5597 = vmatpush.msrb.mxu2 %v4762_v48  ;;  %v13179_v24 = vpop.f32.mrf.mxu3  ;;  %v4722_v48 = vmul.f32 %v15486_v56, %v15485_v59  ;;  %v15488_v58 = vld [vmem:[#allocation598_spill] sm:$0xff]  ;;  %v15500_v8 = vld [vmem:[#allocation273_spill] sm:$0xff] }
 0x991   : > { %5217 = vmatpush.msra.mxu1 %v4542_v49  ;;  %v4631_v49 = vmul.f32 %v15488_v58, %v15487_v17  ;;  %v15491_v7 = vld [vmem:[#allocation366_spill] sm:$0xff]  ;;  %v15501_v60 = vld [vmem:[#allocation405_spill] sm:$0xff] }
 0x992   : > { %5598 = vmatpush.msrb.mxu2 %v4754_v16  ;;  %v15489_v16 = vld [vmem:[#allocation417_spill] sm:$0xff]  ;;  %v15502_v21 = vld [vmem:[#allocation650_spill] sm:$0xff] }
 0x993   : > { %5218 = vmatpush.msra.mxu1 %v4534_v4  ;;  %v4714_v20 = vmul.f32 %v15490_v9, %v15489_v16  ;;  %v15492_v4 = vld [vmem:[#allocation594_spill] sm:$0xff]  ;;  %v15504_v56 = vld [vmem:[#allocation285_spill] sm:$0xff] }
 0x994   : > { %5599 = vmatpush.msrb.mxu2 %v4746_v37  ;;  %v4623_v47 = vmul.f32 %v15492_v4, %v15491_v7  ;;  %v15493_v37 = vld [vmem:[#allocation413_spill] sm:$0xff]  ;;  %v15503_v59 = vld [vmem:[#allocation354_spill] sm:$0xff] }
 0x995   : > { %5219 = vmatpush.msra.mxu1 %v4526_v63  ;;  %v4706_v31 = vmul.f32 %v15494_v50, %v15493_v37  ;;  %v15495_v63 = vld [vmem:[#allocation362_spill] sm:$0xff]  ;;  %v13218_v58 = vpop.f32.mrf.mxu1  ;;  %v15510_v37 = vld [vmem:[#allocation641_spill] sm:$0xff] }
 0x996   : > { %5600 = vmatpush.msrb.mxu2 %v4738_v32  ;;  %7255 = vmatmul.msk.f32.gmra.mxu0 %vm12356_vm13, %v15001_v30  ;;  %v4615_v62 = vmul.f32 %v15496_v19, %v15495_v63  ;;  %v15497_v32 = vld [vmem:[#allocation409_spill] sm:$0xff]  ;;  %v15506_v16 = vld [vmem:[#allocation646_spill] sm:$0xff] }
 0x997   : > { %5220 = vmatpush.msra.mxu1 %v4518_v14  ;;  %v4698_v61 = vmul.f32 %v15498_v39, %v15497_v32  ;;  %v15499_v14 = vld [vmem:[#allocation358_spill] sm:$0xff]  ;;  %7251 = vmatmul.msk.f32.gmra.mxu2 %vm12394_vm14, %v15001_v30  ;;  %v15514_v32 = vld [vmem:[#allocation637_spill] sm:$0xff] }
 0x998   : > { %5601 = vmatpush.msrb.mxu2 %v4730_v22  ;;  %v4607_v2 = vmul.f32 %v15500_v8, %v15499_v14  ;;  %v13210_v22 = vpop.f32.mrf.mxu2  ;;  %v13216_v17 = vpop.f32.mrf.mxu3  ;;  %v15508_v7 = vld [vmem:[#allocation298_spill] sm:$0xff]  ;;  %v15516_v14 = vld [vmem:[#allocation111_spill] sm:$0xff] }
 0x999   : > { %5221 = vmatpush.msra.mxu1 %v4510_v18  ;;  %v4690_v18 = vmul.f32 %v15502_v21, %v15501_v60  ;;  %v15512_v63 = vld [vmem:[#allocation590_spill] sm:$0xff]  ;;  %v15518_v60 = vld [vmem:[#allocation633_spill] sm:$0xff] }
 0x99a   : > { %5602 = vmatpush.msrb.mxu2 %v4722_v48  ;;  %7224 = vmatmul.msk.f32.vlgmr.msra.gmra.mxu1 %vm12892_vm0, %v15001_v30  ;;  %v4599_v48 = vmul.f32 %v15504_v56, %v15503_v59  ;;  %v15520_v59 = vld [vmem:[#allocation87_spill] sm:$0xff] }
 0x99b   : > { %5298 = vmatpush.msrb.mxu1 %v4631_v49  ;;  %v15505_v49 = vld [vmem:[#allocation401_spill] sm:$0xff] }
 0x99c   : > { %5603 = vmatpush.msrb.mxu2 %v4714_v20  ;;  %v4682_v9 = vmul.f32 %v15506_v16, %v15505_v49  ;;  %v15507_v20 = vld [vmem:[#allocation350_spill] sm:$0xff]  ;;  %v15521_v16 = vld [vmem:[#allocation385_spill] sm:$0xff] }
 0x99d   : > { %5299 = vmatpush.msrb.mxu1 %v4623_v47  ;;  %v4591_v4 = vmul.f32 %v15508_v7, %v15507_v20  ;;  %v15509_v47 = vld [vmem:[#allocation397_spill] sm:$0xff]  ;;  %v13244_v49 = vpop.f32.mrf.mxu1  ;;  %v15523_v7 = vld [vmem:[#allocation334_spill] sm:$0xff] }
 0x99e   : > { %5604 = vmatpush.msrb.mxu2 %v4706_v31  ;;  %v4674_v50 = vmul.f32 %v15510_v37, %v15509_v47  ;;  %v15511_v31 = vld [vmem:[#allocation346_spill] sm:$0xff] }
 0x99f   : > { %5300 = vmatpush.msrb.mxu1 %v4615_v62  ;;  %v4583_v19 = vmul.f32 %v15512_v63, %v15511_v31  ;;  %v15513_v62 = vld [vmem:[#allocation393_spill] sm:$0xff]  ;;  %v15526_v31 = vld [vmem:[#allocation627_spill] sm:$0xff] }
 0x9a0   : > { %5605 = vmatpush.msrb.mxu2 %v4698_v61  ;;  %v4666_v39 = vmul.f32 %v15514_v32, %v15513_v62  ;;  %v15515_v61 = vld [vmem:[#allocation342_spill] sm:$0xff]  ;;  %v13250_v37 = vpop.f32.mrf.mxu3  ;;  %v15528_v62 = vld [vmem:[#allocation193_spill] sm:$0xff] }
 0x9a1   : > { %5301 = vmatpush.msrb.mxu1 %v4607_v2  ;;  %v4575_v8 = vmul.f32 %v15516_v14, %v15515_v61  ;;  %v15517_v2 = vld [vmem:[#allocation389_spill] sm:$0xff] }
 0x9a2   : > { %5606 = vmatpush.msrb.mxu2 %v4690_v18  ;;  %7225 = vmatmul.msk.f32.gmra.mxu1 %vm12971_vm1, %v15001_v30  ;;  %v4658_v21 = vmul.f32 %v15518_v60, %v15517_v2  ;;  %v15519_v18 = vld [vmem:[#allocation338_spill] sm:$0xff]  ;;  %v15530_v61 = vld [vmem:[#allocation197_spill] sm:$0xff] }
 0x9a3   : > { %5302 = vmatpush.msrb.mxu1 %v4599_v48  ;;  %v4567_v56 = vmul.f32 %v15520_v59, %v15519_v18  ;;  %v13242_v48 = vpop.f32.mrf.mxu2  ;;  %v15532_v2 = vld [vmem:[#allocation201_spill] sm:$0xff]  ;;  %v15533_v18 = vld [vmem:[#allocation318_spill] sm:$0xff]  ;;  %v15534_v59 = vld [vmem:[#allocation575_spill] sm:$0xff] }
 0x9a4   : > { %5607 = vmatpush.msrb.mxu2 %v4682_v9  ;;  %v15522_v9 = vld [vmem:[#allocation630_spill] sm:$0xff] }
 0x9a5   : > { %5303 = vmatpush.msrb.mxu1 %v4591_v4  ;;  %v4650_v20 = vmul.f32 %v15522_v9, %v15521_v16  ;;  %v15524_v4 = vld [vmem:[#allocation137_spill] sm:$0xff]  ;;  %v15535_v9 = vld [vmem:[#allocation314_spill] sm:$0xff] }
 0x9a6   : > { %5608 = vmatpush.msrb.mxu2 %v4674_v50  ;;  %v4559_v47 = vmul.f32 %v15524_v4, %v15523_v7  ;;  %v15525_v50 = vld [vmem:[#allocation381_spill] sm:$0xff] }
 0x9a7   : > { %5304 = vmatpush.msrb.mxu1 %v4583_v19  ;;  %v4642_v63 = vmul.f32 %v15526_v31, %v15525_v50  ;;  %v15527_v19 = vld [vmem:[#allocation330_spill] sm:$0xff]  ;;  %v15539_v31 = vld [vmem:[#allocation436_spill] sm:$0xff] }
 0x9a8   : > { %5609 = vmatpush.msrb.mxu2 %v4666_v39  ;;  %v4551_v32 = vmul.f32 %v15528_v62, %v15527_v19  ;;  %v15529_v39 = vld [vmem:[#allocation326_spill] sm:$0xff]  ;;  %v13271_v4 = vpop.f32.mrf.mxu3 }
 0x9a9   : > { %5305 = vmatpush.msrb.mxu1 %v4575_v8  ;;  %v4543_v14 = vmul.f32 %v15530_v61, %v15529_v39  ;;  %v15531_v8 = vld [vmem:[#allocation322_spill] sm:$0xff]  ;;  %v15542_v39 = vld [vmem:[#allocation651_spill] sm:$0xff] }
 0x9aa   : > { %5610 = vmatpush.msrb.mxu2 %v4658_v21  ;;  %v4535_v60 = vmul.f32 %v15532_v2, %v15531_v8  ;;  %v13263_v21 = vpop.f32.mrf.mxu1  ;;  %v15544_v8 = vld [vmem:[#allocation647_spill] sm:$0xff] }
 0x9ab   : > { %5306 = vmatpush.msrb.mxu1 %v4567_v56  ;;  %v4527_v56 = vmul.f32 %v15534_v59, %v15533_v18  ;;  %v13267_v16 = vpop.f32.mrf.mxu2  ;;  %v15546_v18 = vld [vmem:[#allocation643_spill] sm:$0xff] }
 0x9ac   : > { %5611 = vmatpush.msrb.mxu2 %v4650_v20  ;;  %v15536_v20 = vld [vmem:[#allocation209_spill] sm:$0xff]  ;;  %v4608_v59 = vmul.f32 %v15546_v18, %v15545_v44  ;;  %v15556_v44 = vld [vmem:[#allocation628_spill] sm:$0xff] }
 0x9ad   : > { %5307 = vmatpush.msrb.mxu1 %v4559_v47  ;;  %v4519_v7 = vmul.f32 %v15536_v20, %v15535_v9  ;;  %v15538_v47 = vld [vmem:[#allocation213_spill] sm:$0xff]  ;;  %v15547_v9 = vld [vmem:[#allocation420_spill] sm:$0xff] }
 0x9ae   : > { %5612 = vmatpush.msrb.mxu2 %v4642_v63  ;;  %v4511_v50 = vmul.f32 %v15538_v47, %v15537_v29  ;;  %v15540_v63 = vld [vmem:[#allocation655_spill] sm:$0xff]  ;;  %v15548_v20 = vld [vmem:[#allocation640_spill] sm:$0xff] }
 0x9af   : > { %5308 = vmatpush.msrb.mxu1 %v4551_v32  ;;  %7258 = vmatmul.msk.f32.vlgmr.msrb.gmra.mxu2 %vm12340_vm11, %v15001_v30  ;;  %v4632_v19 = vmul.f32 %v15540_v63, %v15539_v31  ;;  %v15541_v32 = vld [vmem:[#allocation432_spill] sm:$0xff] }
 0x9b0   : > { %v4624_v61 = vmul.f32 %v15542_v39, %v15541_v32  ;;  %v15549_v47 = vld [vmem:[#allocation416_spill] sm:$0xff] }
 0x9b1   : > { %5309 = vmatpush.msrb.mxu1 %v4543_v14  ;;  %v15543_v14 = vld [vmem:[#allocation428_spill] sm:$0xff] }
 0x9b2   : > { %v3949_v62 = vpop.f32.mrf.mxu1  ;;  %v4616_v2 = vmul.f32 %v15544_v8, %v15543_v14  ;;  %v15551_v63 = vld [vmem:[#allocation412_spill] sm:$0xff] }
 0x9b3   : > { %5310 = vmatpush.msrb.mxu1 %v4535_v60  ;;  %v13287_v60 = vpop.f32.mrf.mxu2  ;;  %v15553_v39 = vld [vmem:[#allocation408_spill] sm:$0xff] }
 0x9b5   : > { %5311 = vmatpush.msrb.mxu1 %v4527_v56  ;;  %v13291_v56 = vpop.f32.mrf.mxu3 }
 0x9b7   : > { %5312 = vmatpush.msrb.mxu1 %v4519_v7  ;;  %7259 = vmatmul.msk.f32.gmra.mxu2 %vm12394_vm14, %v15001_v30  ;;  %v4600_v7 = vmul.f32 %v15548_v20, %v15547_v9  ;;  %v15557_v20 = vld [vmem:[#allocation400_spill] sm:$0xff] }
 0x9b9   : > { %5313 = vmatpush.msrb.mxu1 %v4511_v50  ;;  %v15550_v50 = vld [vmem:[#allocation636_spill] sm:$0xff] }
 0x9ba   : > { %7232 = vmatmul.msk.f32.vlgmr.msrb.gmra.mxu1 %vm12892_vm0, %v15001_v30  ;;  %v3952_v29 = vpop.f32.mrf.mxu1  ;;  %v4592_v31 = vmul.f32 %v15550_v50, %v15549_v47  ;;  %v15559_v50 = vld [vmem:[#allocation396_spill] sm:$0xff] }
 0x9bb   : > { %5390 = vmatpush.msra.mxu1 %v4632_v19  ;;  %v15552_v19 = vld [vmem:[#allocation634_spill] sm:$0xff]  ;;  %v13304_v8 = vpop.f32.mrf.mxu2 }
 0x9bc   : > { %v4584_v32 = vmul.f32 %v15552_v19, %v15551_v63  ;;  %v15560_v63 = vld [vmem:[#allocation623_spill] sm:$0xff]  ;;  %v15561_v19 = vld [vmem:[#allocation392_spill] sm:$0xff] }
 0x9bd   : > { %5391 = vmatpush.msra.mxu1 %v4624_v61  ;;  %v15554_v61 = vld [vmem:[#allocation631_spill] sm:$0xff] }
 0x9be   : > { %v4576_v14 = vmul.f32 %v15554_v61, %v15553_v39  ;;  %v15562_v39 = vld [vmem:[#allocation621_spill] sm:$0xff]  ;;  %v15563_v61 = vld [vmem:[#allocation388_spill] sm:$0xff] }
 0x9bf   : > { %5392 = vmatpush.msra.mxu1 %v4616_v2  ;;  %v15555_v2 = vld [vmem:[#allocation404_spill] sm:$0xff]  ;;  %v4536_v33 = vmul.f32 %v15564_v52, %v15563_v61  ;;  %v15573_v61 = vld [vmem:[#allocation542_spill] sm:$0xff] }
 0x9c0   : > { %v4568_v18 = vmul.f32 %v15556_v44, %v15555_v2  ;;  %v15565_v44 = vld [vmem:[#allocation384_spill] sm:$0xff]  ;;  %v4872_v26 = vmul.f32 %v3952_v29, %v15573_v61 }
 0x9c1   : > { %5393 = vmatpush.msra.mxu1 %v4608_v59  ;;  %v13308_v59 = vpop.f32.mrf.mxu3  ;;  %v4528_v0 = vmul.f32 %v15566_v54, %v15565_v44  ;;  %v15571_v52 = vld [vmem:[#allocation376_spill] sm:$0xff]  ;;  %v15574_v54 = vld [vmem:[#allocation375_spill] sm:$0xff]  ;;  %v15575_v44 = vld [vmem:[#allocation622_spill] sm:$0xff] }
 0x9c2   : > { %7233 = vmatmul.msk.f32.gmra.mxu1 %vm12971_vm1, %v15001_v30  ;;  %v3955_v9 = vpop.f32.mrf.mxu1 }
 0x9c3   : > { %5394 = vmatpush.msra.mxu1 %v4600_v7  ;;  %v15558_v7 = vld [vmem:[#allocation626_spill] sm:$0xff] }
 0x9c4   : > { %v4560_v47 = vmul.f32 %v15558_v7, %v15557_v20  ;;  %v15567_v20 = vld [vmem:[#allocation55_spill] sm:$0xff] }
 0x9c5   : > { %5395 = vmatpush.msra.mxu1 %v4592_v31  ;;  %v4552_v31 = vmul.f32 %v15560_v63, %v15559_v50  ;;  %v15569_v50 = vld [vmem:[#allocation610_spill] sm:$0xff] }
 0x9c7   : > { %5396 = vmatpush.msra.mxu1 %v4584_v32  ;;  %v4544_v32 = vmul.f32 %v15562_v39, %v15561_v19  ;;  %v15570_v19 = vld [vmem:[#allocation545_spill] sm:$0xff]  ;;  %v15572_v39 = vld [vmem:[#allocation606_spill] sm:$0xff] }
 0x9c9   : > { %5397 = vmatpush.msra.mxu1 %v4576_v14  ;;  %v13318_v14 = vpop.f32.mrf.mxu2  ;;  %v13323_v7 = vpop.f32.mrf.mxu3 }
 0x9ca   : > { %v3958_v2 = vpop.f32.mrf.mxu1 }
 0x9cb   : > { %5398 = vmatpush.msra.mxu1 %v4568_v18  ;;  %v4888_v18 = vmul.f32 %v3958_v2, %v15567_v20  ;;  %v4633_v2 = vmul.f32 %v15575_v44, %v15574_v54  ;;  %v15576_v20 = vld [vmem:[#allocation539_spill] sm:$0xff]  ;;  %v15584_v44 = vld [vmem:[#allocation608_spill] sm:$0xff] }
 0x9cc   : > { %v4864_v12 = vmul.f32 %v3949_v62, %v15576_v20  ;;  %v15583_v54 = vld [vmem:[#allocation363_spill] sm:$0xff] }
 0x9cd   : > { %5399 = vmatpush.msra.mxu1 %v4560_v47  ;;  %v15568_v47 = vld [vmem:[#allocation380_spill] sm:$0xff]  ;;  %5436 = vmatpush.msrb.mxu3 %v4888_v18 }
 0x9ce   : > { %v4520_v63 = vmul.f32 %v15569_v50, %v15568_v47  ;;  %v15577_v47 = vld [vmem:[#allocation371_spill] sm:$0xff]  ;;  %v15578_v50 = vld [vmem:[#allocation618_spill] sm:$0xff] }
 0x9cf   : > { %5400 = vmatpush.msra.mxu1 %v4552_v31  ;;  %v4880_v31 = vmul.f32 %v3955_v9, %v15570_v19  ;;  %v4625_v9 = vmul.f32 %v15578_v50, %v15577_v47  ;;  %v15579_v19 = vld [vmem:[#allocation536_spill] sm:$0xff]  ;;  %v15586_v47 = vld [vmem:[#allocation359_spill] sm:$0xff] }
 0x9d0   : > { %v15587_v50 = vld [vmem:[#allocation604_spill] sm:$0xff] }
 0x9d1   : > { %5401 = vmatpush.msra.mxu1 %v4544_v32  ;;  %v4512_v32 = vmul.f32 %v15572_v39, %v15571_v52  ;;  %5437 = vmatpush.msrb.mxu3 %v4880_v31  ;;  %v4970_v18 = vpop.f32.mrf.mxu2  ;;  %v4856_v52 = vmul.f32 %v13263_v21, %v15579_v19  ;;  %v15581_v31 = vld [vmem:[#allocation614_spill] sm:$0xff]  ;;  %v15582_v39 = vld [vmem:[#allocation533_spill] sm:$0xff]  ;;  %v15589_v19 = vld [vmem:[#allocation355_spill] sm:$0xff] }
 0x9d2   : > { %v15585_v21 = vld [vmem:[#allocation530_spill] sm:$0xff] }
 0x9d3   : > { %5402 = vmatpush.msra.mxu1 %v4536_v33  ;;  %v4924_v33 = vpop.f32.mrf.mxu0  ;;  %5438 = vmatpush.msrb.mxu3 %v4872_v26  ;;  %v4993_v26 = vpop.f32.mrf.mxu3 }
 0x9d5   : > { %5403 = vmatpush.msra.mxu1 %v4528_v0  ;;  %v4947_v0 = vpop.f32.mrf.mxu1  ;;  %5439 = vmatpush.msrb.mxu3 %v4864_v12  ;;  %v5725_v12 = vld [vmem:[%s13999_s5 + $0xf8] sm:$0xff] }
 0x9d6   : > { %v4948_v29 = vadd.f32 %v4947_v0, %v4924_v33  ;;  %v4840_v33 = vmul.f32 %v13218_v58, %v15585_v21  ;;  %5886 = vmatpush.msra.mxu2 %v5725_v12  ;;  %v15588_v0 = vld [vmem:[#allocation527_spill] sm:$0xff]  ;;  %v15597_v12 = vld [vmem:[#allocation518_spill] sm:$0xff] }
 0x9d7   : > { %5404 = vmatpush.msra.mxu1 %v4520_v63  ;;  %v15580_v63 = vld [vmem:[#allocation367_spill] sm:$0xff]  ;;  %5440 = vmatpush.msrb.mxu3 %v4856_v52  ;;  %v15590_v52 = vld [vmem:[#allocation600_spill] sm:$0xff]  ;;  %v4808_v21 = vmul.f32 %v13084_v25, %v15597_v12 }
 0x9d8   : > { %v4617_v62 = vmul.f32 %v15581_v31, %v15580_v63  ;;  %v4971_v61 = vadd.f32 %v4970_v18, %v4948_v29  ;;  %v4832_v18 = vmul.f32 %v13190_v55, %v15588_v0  ;;  %v4593_v58 = vmul.f32 %v15590_v52, %v15589_v19  ;;  %v5723_v29 = vld [vmem:[%s13999_s5 + $0xe8] sm:$0xff]  ;;  %v15591_v63 = vld [vmem:[#allocation524_spill] sm:$0xff] }
 0x9d9   : > { %5405 = vmatpush.msra.mxu1 %v4512_v32  ;;  %v4848_v32 = vmul.f32 %v13244_v49, %v15582_v39  ;;  %v4601_v49 = vmul.f32 %v15587_v50, %v15586_v47  ;;  %v4824_v31 = vmul.f32 %v13160_v36, %v15591_v63  ;;  %v15593_v55 = vld [vmem:[#allocation596_spill] sm:$0xff]  ;;  %v5722_v39 = vld [vmem:[%s13999_s5 + $0xe0] sm:$0xff]  ;;  %v15596_v36 = vld [vmem:[#allocation261_spill] sm:$0xff]  ;;  %v4973_v12 = vpop.f32.mrf.mxu2 }
 0x9da   : > { %7240 = vmatmul.msk.f32.vlgmr.msra.gmra.mxu1 %vm12892_vm0, %v15001_v30  ;;  %v13352_v20 = vadd.f32 %v4993_v26, %v4971_v61  ;;  %v15599_v47 = vld [vmem:[#allocation277_spill] sm:$0xff]  ;;  %v15601_v0 = vld [vmem:[#allocation339_spill] sm:$0xff]  ;;  %v15603_v52 = vld [vmem:[#allocation512_spill] sm:$0xff] }
 0x9db   : > { %5482 = vmatpush.msrb.mxu1 %v4633_v2  ;;  %v4609_v2 = vmul.f32 %v15584_v44, %v15583_v54  ;;  %5441 = vmatpush.msrb.mxu3 %v4848_v32  ;;  %v15594_v32 = vld [vmem:[#allocation521_spill] sm:$0xff]  ;;  %v15595_v54 = vld [vmem:[#allocation347_spill] sm:$0xff]  ;;  %v15605_v63 = vld [vmem:[#allocation304_spill] sm:$0xff] }
 0x9dc   : > { %v4816_v61 = vmul.f32 %v13120_v34, %v15594_v32  ;;  %v4577_v44 = vmul.f32 %v15596_v36, %v15595_v54  ;;  %v5720_v34 = vld [vmem:[%s13999_s5 + $0xd0] sm:$0xff]  ;;  %v5719_v25 = vld [vmem:[%s13999_s5 + $0xc8] sm:$0xff]  ;;  %v5717_v36 = vld [vmem:[%s13999_s5 + $0xb8] sm:$0xff] }
 0x9dd   : > { %5483 = vmatpush.msrb.mxu1 %v4625_v9  ;;  %v5724_v9 = vld [vmem:[%s13999_s5 + $0xf0] sm:$0xff]  ;;  %5442 = vmatpush.msrb.mxu3 %v4840_v33  ;;  %v15598_v33 = vld [vmem:[#allocation343_spill] sm:$0xff] }
 0x9de   : > { %5887 = vmatpush.msra.mxu2 %v5724_v9  ;;  %v4569_v50 = vmul.f32 %v15599_v47, %v15598_v33  ;;  %v15607_v32 = vld [vmem:[#allocation331_spill] sm:$0xff] }
 0x9df   : > { %5484 = vmatpush.msrb.mxu1 %v4617_v62  ;;  %5443 = vmatpush.msrb.mxu3 %v4832_v18  ;;  %v15592_v62 = vld [vmem:[#allocation351_spill] sm:$0xff]  ;;  %v15602_v18 = vld [vmem:[#allocation292_spill] sm:$0xff] }
 0x9e0   : > { %v4585_v26 = vmul.f32 %v15593_v55, %v15592_v62  ;;  %5888 = vmatpush.msra.mxu2 %v5723_v29  ;;  %v4561_v19 = vmul.f32 %v15602_v18, %v15601_v0  ;;  %v15604_v29 = vld [vmem:[#allocation335_spill] sm:$0xff]  ;;  %v15606_v62 = vld [vmem:[#allocation509_spill] sm:$0xff] }
 0x9e1   : > { %5485 = vmatpush.msrb.mxu1 %v4609_v2  ;;  %5444 = vmatpush.msrb.mxu3 %v4824_v31  ;;  %v5721_v2 = vld [vmem:[%s13999_s5 + $0xd8] sm:$0xff]  ;;  %v4553_v31 = vmul.f32 %v15605_v63, %v15604_v29  ;;  %v4784_v55 = vmul.f32 %v12966_v3, %v15606_v62  ;;  %v15613_v0 = vld [vmem:[#allocation323_spill] sm:$0xff]  ;;  %v5714_v62 = vld [vmem:[%s13999_s5 + $0xa0] sm:$0xff] }
 0x9e2   : > { %7241 = vmatmul.msk.f32.gmra.mxu1 %vm12971_vm1, %v15001_v30  ;;  %5889 = vmatpush.msra.mxu2 %v5722_v39  ;;  %v4950_v39 = vpop.f32.mrf.mxu1  ;;  %v15611_v3 = vld [vmem:[#allocation133_spill] sm:$0xff]  ;;  %v15614_v18 = vld [vmem:[#allocation63_spill] sm:$0xff] }
 0x9e3   : > { %5486 = vmatpush.msrb.mxu1 %v4601_v49  ;;  %5445 = vmatpush.msrb.mxu3 %v4816_v61  ;;  %v15600_v49 = vld [vmem:[#allocation515_spill] sm:$0xff]  ;;  %v15608_v61 = vld [vmem:[#allocation125_spill] sm:$0xff] }
 0x9e4   : > { %5890 = vmatpush.msra.mxu2 %v5721_v2  ;;  %v4800_v9 = vmul.f32 %v13043_v6, %v15600_v49  ;;  %v5718_v6 = vld [vmem:[%s13999_s5 + $0xc0] sm:$0xff]  ;;  %v4545_v54 = vmul.f32 %v15608_v61, %v15607_v32  ;;  %v15616_v29 = vld [vmem:[#allocation319_spill] sm:$0xff]  ;;  %v15617_v63 = vld [vmem:[#allocation145_spill] sm:$0xff] }
 0x9e5   : > { %5487 = vmatpush.msrb.mxu1 %v4593_v58  ;;  %5446 = vmatpush.msrb.mxu3 %v4808_v21  ;;  %v4792_v58 = vmul.f32 %v13009_v15, %v15603_v52  ;;  %v15610_v21 = vld [vmem:[#allocation327_spill] sm:$0xff]  ;;  %v15615_v52 = vld [vmem:[#allocation502_spill] sm:$0xff]  ;;  %v15622_v32 = vld [vmem:[#allocation624_spill] sm:$0xff] }
 0x9e6   : > { %5891 = vmatpush.msra.mxu2 %v5720_v34  ;;  %v4537_v33 = vmul.f32 %v15611_v3, %v15610_v21  ;;  %v15612_v34 = vld [vmem:[#allocation503_spill] sm:$0xff] }
 0x9e7   : > { %5488 = vmatpush.msrb.mxu1 %v4585_v26  ;;  %5447 = vmatpush.msrb.mxu3 %v4800_v9  ;;  %v4927_v26 = vpop.f32.mrf.mxu0  ;;  %v4768_v49 = vmul.f32 %v12881_v38, %v15612_v34  ;;  %v4996_v9 = vpop.f32.mrf.mxu3  ;;  %v4521_v38 = vmul.f32 %v15617_v63, %v15616_v29  ;;  %v15625_v21 = vld [vmem:[#allocation619_spill] sm:$0xff] }
 0x9e8   : > { %5892 = vmatpush.msra.mxu2 %v5719_v25  ;;  %v4951_v15 = vadd.f32 %v4950_v39, %v4927_v26  ;;  %v5715_v25 = vld [vmem:[%s13999_s5 + $0xa8] sm:$0xff]  ;;  %v15621_v39 = vld [vmem:[#allocation377_spill] sm:$0xff] }
 0x9e9   : > { %5489 = vmatpush.msrb.mxu1 %v4577_v44  ;;  %5448 = vmatpush.msrb.mxu3 %v4792_v58  ;;  %v15609_v44 = vld [vmem:[#allocation506_spill] sm:$0xff]  ;;  %v4889_v58 = vmul.f32 %v13318_v14, %v15615_v52  ;;  %v15620_v14 = vld [vmem:[#allocation572_spill] sm:$0xff]  ;;  %v4634_v61 = vmul.f32 %v15622_v32, %v15621_v39  ;;  %v15630_v52 = vld [vmem:[#allocation365_spill] sm:$0xff] }
 0x9ea   : > { %5893 = vmatpush.msra.mxu2 %v5718_v6  ;;  %v4776_v2 = vmul.f32 %v12928_v57, %v15609_v44  ;;  %v4974_v47 = vadd.f32 %v4973_v12, %v4951_v15  ;;  %v4529_v57 = vmul.f32 %v15614_v18, %v15613_v0  ;;  %v5713_v44 = vld [vmem:[%s13999_s5 + $0x98] sm:$0xff]  ;;  %v15629_v18 = vld [vmem:[#allocation487_spill] sm:$0xff] }
 0x9eb   : > { %5490 = vmatpush.msrb.mxu1 %v4569_v50  ;;  %5449 = vmatpush.msrb.mxu3 %v4784_v55  ;;  %v5716_v50 = vld [vmem:[%s13999_s5 + $0xb0] sm:$0xff]  ;;  %v15619_v55 = vld [vmem:[#allocation315_spill] sm:$0xff]  ;;  %v15624_v12 = vld [vmem:[#allocation373_spill] sm:$0xff] }
 0x9ec   : > { %5894 = vmatpush.msra.mxu2 %v5717_v36  ;;  %v4513_v26 = vmul.f32 %v15620_v14, %v15619_v55  ;;  %v4626_v3 = vmul.f32 %v15625_v21, %v15624_v12  ;;  %v15632_v63 = vld [vmem:[#allocation483_spill] sm:$0xff]  ;;  %v15636_v39 = vld [vmem:[#allocation357_spill] sm:$0xff] }
 0x9ed   : > { %5491 = vmatpush.msrb.mxu1 %v4561_v19  ;;  %5450 = vmatpush.msrb.mxu3 %v4776_v2  ;;  %v13422_v19 = vadd.f32 %v4996_v9, %v4974_v47  ;;  %v15628_v9 = vld [vmem:[#allocation615_spill] sm:$0xff]  ;;  %v15637_v32 = vld [vmem:[#allocation601_spill] sm:$0xff] }
 0x9ee   : > { %5895 = vmatpush.msra.mxu2 %v5716_v50  ;;  %v5062_v50 = vpop.f32.mrf.mxu2  ;;  %v15635_v14 = vld [vmem:[#allocation479_spill] sm:$0xff]  ;;  %v15643_v12 = vld [vmem:[#allocation593_spill] sm:$0xff] }
 0x9ef   : > { %5492 = vmatpush.msrb.mxu1 %v4553_v31  ;;  %5451 = vmatpush.msrb.mxu3 %v4768_v49  ;;  %v15618_v31 = vld [vmem:[#allocation499_spill] sm:$0xff]  ;;  %v5016_v36 = vpop.f32.mrf.mxu0  ;;  %v15627_v49 = vld [vmem:[#allocation369_spill] sm:$0xff] }
 0x9f0   : > { %7244 = vmatmul.msk.f32.vlgmr.msrb.gmra.mxu3 %vm12347_vm12, %v15001_v30  ;;  %v4881_v6 = vmul.f32 %v13304_v8, %v15618_v31  ;;  %5896 = vmatpush.msra.mxu2 %v5715_v25  ;;  %v5039_v8 = vpop.f32.mrf.mxu1  ;;  %v4618_v0 = vmul.f32 %v15628_v9, %v15627_v49  ;;  %v5711_v25 = vld [vmem:[%s13999_s5 + $0x88] sm:$0xff]  ;;  %v15648_v49 = vld [vmem:[#allocation341_spill] sm:$0xff] }
 0x9f1   : > { %5493 = vmatpush.msrb.mxu1 %v4545_v54  ;;  %5528 = vmatpush.msra.mxu3 %v4889_v58  ;;  %v15623_v54 = vld [vmem:[#allocation495_spill] sm:$0xff]  ;;  %v5040_v2 = vadd.f32 %v5039_v8, %v5016_v36  ;;  %v15640_v36 = vld [vmem:[#allocation597_spill] sm:$0xff] }
 0x9f2   : > { %v4873_v15 = vmul.f32 %v13287_v60, %v15623_v54  ;;  %5897 = vmatpush.msra.mxu2 %v5714_v62  ;;  %v5712_v60 = vld [vmem:[%s13999_s5 + $0x90] sm:$0xff]  ;;  %v15631_v58 = vld [vmem:[#allocation611_spill] sm:$0xff] }
 0x9f3   : > { %5494 = vmatpush.msrb.mxu1 %v4537_v33  ;;  %5529 = vmatpush.msra.mxu3 %v4881_v6  ;;  %v15626_v33 = vld [vmem:[#allocation491_spill] sm:$0xff]  ;;  %v5063_v34 = vadd.f32 %v5062_v50, %v5040_v2  ;;  %v4610_v29 = vmul.f32 %v15631_v58, %v15630_v52  ;;  %v15633_v6 = vld [vmem:[#allocation361_spill] sm:$0xff] }
 0x9f4   : > { %v4865_v47 = vmul.f32 %v13267_v16, %v15626_v33  ;;  %5898 = vmatpush.msra.mxu2 %v5713_v44  ;;  %v5085_v16 = vpop.f32.mrf.mxu3  ;;  %v15634_v62 = vld [vmem:[#allocation607_spill] sm:$0xff]  ;;  %v15642_v2 = vld [vmem:[#allocation349_spill] sm:$0xff] }
 0x9f5   : > { %5495 = vmatpush.msrb.mxu1 %v4529_v57  ;;  %5530 = vmatpush.msra.mxu3 %v4873_v15  ;;  %v4857_v57 = vmul.f32 %v13242_v48, %v15629_v18  ;;  %v5710_v48 = vld [vmem:[%s13999_s5 + $0x80] sm:$0xff]  ;;  %v5086_v31 = vadd.f32 %v5085_v16, %v5063_v34  ;;  %v4602_v55 = vmul.f32 %v15634_v62, %v15633_v6  ;;  %v15639_v15 = vld [vmem:[#allocation353_spill] sm:$0xff]  ;;  %v15658_v62 = vld [vmem:[#allocation99_spill] sm:$0xff] }
 0x9f6   : > { %5899 = vmatpush.msra.mxu2 %v5712_v60  ;;  %v4586_v8 = vmul.f32 %v15640_v36, %v15639_v15  ;;  %v4578_v21 = vmul.f32 %v15643_v12, %v15642_v2  ;;  %v15645_v33 = vld [vmem:[#allocation345_spill] sm:$0xff]  ;;  %v15647_v60 = vld [vmem:[#allocation463_spill] sm:$0xff]  ;;  %v15665_v12 = vld [vmem:[#allocation504_spill] sm:$0xff] }
 0x9f7   : > { %5496 = vmatpush.msrb.mxu1 %v4521_v38  ;;  %5531 = vmatpush.msra.mxu3 %v4865_v47  ;;  %v4849_v38 = vmul.f32 %v13210_v22, %v15632_v63  ;;  %v4594_v22 = vmul.f32 %v15637_v32, %v15636_v39  ;;  %v15646_v47 = vld [vmem:[#allocation265_spill] sm:$0xff]  ;;  %v4809_v34 = vmul.f32 %v13003_v5, %v15647_v60  ;;  %v15656_v63 = vld [vmem:[#allocation451_spill] sm:$0xff]  ;;  %v5824_v60 = vld [vmem:[%s14000_s6] sm:$0xff] }
 0x9f8   : > { %7245 = vmatmul.msk.f32.gmra.mxu3 %vm12483_vm15, %v15001_v30  ;;  %5900 = vmatpush.msra.mxu2 %v5711_v25  ;;  %v4570_v50 = vmul.f32 %v15646_v47, %v15645_v33  ;;  %v15653_v25 = vld [vmem:[#allocation455_spill] sm:$0xff]  ;;  %v15654_v58 = vld [vmem:[#allocation333_spill] sm:$0xff] }
 0x9f9   : > { %5497 = vmatpush.msrb.mxu1 %v4513_v26  ;;  %5532 = vmatpush.msra.mxu3 %v4857_v57  ;;  %v4841_v26 = vmul.f32 %v13173_v42, %v15635_v14  ;;  %v15641_v42 = vld [vmem:[#allocation471_spill] sm:$0xff]  ;;  %v15651_v57 = vld [vmem:[#allocation337_spill] sm:$0xff]  ;;  %v4793_v52 = vmul.f32 %v12898_v1, %v15653_v25  ;;  %v5065_v1 = vpop.f32.mrf.mxu2 }
 0x9fa   : > { %7248 = vmatmul.msk.f32.vlgmr.msrb.gmra.mxu1 %vm12892_vm0, %v15001_v30  ;;  %5901 = vmatpush.msra.mxu2 %v5710_v48  ;;  %v4825_v44 = vmul.f32 %v13094_v11, %v15641_v42  ;;  %v15649_v11 = vld [vmem:[#allocation288_spill] sm:$0xff]  ;;  %v15655_v5 = vld [vmem:[#allocation69_spill] sm:$0xff]  ;;  %v5019_v48 = vpop.f32.mrf.mxu0  ;;  %v15659_v14 = vld [vmem:[#allocation447_spill] sm:$0xff] }
 0x9fb   : > { %5574 = vmatpush.msra.mxu1 %v4634_v61  ;;  %5533 = vmatpush.msra.mxu3 %v4849_v38  ;;  %v15638_v61 = vld [vmem:[#allocation475_spill] sm:$0xff]  ;;  %v4562_v9 = vmul.f32 %v15649_v11, %v15648_v49  ;;  %v4785_v38 = vmul.f32 %v12852_v40, %v15656_v63  ;;  %v15657_v6 = vld [vmem:[#allocation329_spill] sm:$0xff]  ;;  %v5822_v11 = vld [vmem:[%s13995_s1] sm:$0xff] }
 0x9fc   : > { %v4833_v54 = vmul.f32 %v13136_v35, %v15638_v61  ;;  %5902 = vmatmul.f32.vlgmr.msra.gmra.mxu2 %v5086_v31  ;;  %v5827_v39 = vld [vmem:[%s14000_s6 + $0x18] sm:$0xff]  ;;  %v5088_v36 = vpop.f32.mrf.mxu3  ;;  %v5823_v63 = vld [vmem:[%s13995_s1 + $0x8] sm:$0xff] }
 0x9fd   : > { %5575 = vmatpush.msra.mxu1 %v4626_v3  ;;  %5534 = vmatpush.msra.mxu3 %v4841_v26  ;;  %v15644_v3 = vld [vmem:[#allocation467_spill] sm:$0xff]  ;;  %v4777_v26 = vmul.f32 %v12822_v10, %v15659_v14  ;;  %v15660_v40 = vld [vmem:[#allocation325_spill] sm:$0xff]  ;;  %v5826_v10 = vld [vmem:[%s14000_s6 + $0x10] sm:$0xff] }
 0x9fe   : > { %v4817_v35 = vmul.f32 %v13052_v23, %v15644_v3  ;;  %v15652_v23 = vld [vmem:[#allocation301_spill] sm:$0xff]  ;;  %5846 = vmatpush.msra.mxu0 %v5827_v39  ;;  %v5752_v39 = vld [vmem:[%s13999_s5 + $0x1d0] sm:$0xff] }
 0x9ff   : > { %5576 = vmatpush.msra.mxu1 %v4618_v0  ;;  %5535 = vmatpush.msra.mxu3 %v4833_v54  ;;  %v15650_v0 = vld [vmem:[#allocation459_spill] sm:$0xff]  ;;  %v4554_v16 = vmul.f32 %v15652_v23, %v15651_v57  ;;  %v15663_v42 = vld [vmem:[#allocation321_spill] sm:$0xff]  ;;  %v5706_v23 = vld [vmem:[%s13999_s5 + $0x60] sm:$0xff] }
 0xa00   : > { %v4801_v18 = vmul.f32 %v12950_v53, %v15650_v0  ;;  %v5042_v53 = vpop.f32.mrf.mxu1  ;;  %v15662_v54 = vld [vmem:[#allocation443_spill] sm:$0xff]  ;;  %5847 = vmatpush.msra.mxu0 %v5826_v10  ;;  %v15666_v3 = vld [vmem:[#allocation317_spill] sm:$0xff]  ;;  %v15680_v10 = vld [vmem:[#allocation180_spill] sm:$0xff] }
 0xa01   : > { %5577 = vmatpush.msra.mxu1 %v4610_v29  ;;  %5536 = vmatpush.msra.mxu3 %v4825_v44  ;;  %v4546_v29 = vmul.f32 %v15655_v5, %v15654_v58  ;;  %v5043_v31 = vadd.f32 %v5042_v53, %v5019_v48  ;;  %v4769_v15 = vmul.f32 %v12800_v51, %v15662_v54  ;;  %v15664_v44 = vld [vmem:[#allocation566_spill] sm:$0xff]  ;;  %v5825_v51 = vld [vmem:[%s14000_s6 + $0x8] sm:$0xff]  ;;  %v15668_v47 = vld [vmem:[#allocation501_spill] sm:$0xff] }
 0xa02   : > { %7249 = vmatmul.msk.f32.gmra.mxu1 %vm12971_vm1, %v15001_v30  ;;  %v4522_v2 = vmul.f32 %v15664_v44, %v15663_v42  ;;  %5848 = vmatpush.msra.mxu0 %v5825_v51  ;;  %v13577_v25 = vpop.f32.mrf.mxu0  ;;  %v5756_v58 = vld [vmem:[%s13999_s5 + $0x1f0] sm:$0xff]  ;;  %v15673_v5 = vld [vmem:[#allocation481_spill] sm:$0xff]  ;;  %v5703_v53 = vld [vmem:[%s13999_s5 + $0x48] sm:$0xff] }
 0xa03   : > { %5578 = vmatpush.msra.mxu1 %v4602_v55  ;;  %5537 = vmatpush.msra.mxu3 %v4817_v35  ;;  %v4538_v55 = vmul.f32 %v15658_v62, %v15657_v6  ;;  %v5066_v32 = vadd.f32 %v5065_v1, %v5043_v31  ;;  %v15667_v35 = vld [vmem:[#allocation149_spill] sm:$0xff]  ;;  %v13604_v31 = vpop.f32.mrf.mxu2  ;;  %v5754_v6 = vld [vmem:[%s13999_s5 + $0x1e0] sm:$0xff]  ;;  %v5699_v42 = vld [vmem:[%s13999_s5 + $0x28] sm:$0xff] }
 0xa04   : > { %v4514_v33 = vmul.f32 %v15667_v35, %v15666_v3  ;;  %5849 = vmatpush.msra.mxu0 %v5824_v60  ;;  %v15674_v48 = vld [vmem:[#allocation477_spill] sm:$0xff]  ;;  %v5750_v44 = vld [vmem:[%s13999_s5 + $0x1c0] sm:$0xff]  ;;  %v5748_v60 = vld [vmem:[%s13999_s5 + $0x1b0] sm:$0xff] }
 0xa05   : > { %5579 = vmatpush.msra.mxu1 %v4594_v22  ;;  %5538 = vmatpush.msra.mxu3 %v4809_v34  ;;  %v15661_v22 = vld [vmem:[#allocation189_spill] sm:$0xff]  ;;  %v5698_v51 = vld [vmem:[%s13999_s5 + $0x20] sm:$0xff] }
 0xa06   : > { %v4530_v61 = vmul.f32 %v15661_v22, %v15660_v40  ;;  %v15669_v34 = vld [vmem:[#allocation497_spill] sm:$0xff]  ;;  %7262 = vmatmul.msk.f32.vlgmr.msra.gmra.mxu0 %vm2514_vm9, %v5822_v11  ;;  %v15678_v40 = vld [vmem:[#allocation588_spill] sm:$0xff] }
 0xa07   : > { %5580 = vmatpush.msra.mxu1 %v4586_v8  ;;  %5539 = vmatpush.msra.mxu3 %v4801_v18  ;;  %v5089_v8 = vadd.f32 %v5088_v36, %v5066_v32  ;;  %v4874_v49 = vmul.f32 %v13291_v56, %v15669_v34  ;;  %v5707_v56 = vld [vmem:[%s13999_s5 + $0x68] sm:$0xff]  ;;  %v15671_v18 = vld [vmem:[#allocation489_spill] sm:$0xff]  ;;  %v5696_v11 = vld [vmem:[%s13999_s5 + $0x10] sm:$0xff] }
 0xa08   : > { %v4858_v57 = vmul.f32 %v13250_v37, %v15671_v18  ;;  %v5705_v37 = vld [vmem:[%s13999_s5 + $0x58] sm:$0xff]  ;;  %v15688_v18 = vld [vmem:[#allocation187_spill] sm:$0xff] }
 0xa09   : > { %5581 = vmatpush.msra.mxu1 %v4578_v21  ;;  %5540 = vmatpush.msra.mxu3 %v4793_v52  ;;  %v4890_v21 = vmul.f32 %v13323_v7, %v15665_v12  ;;  %v5709_v7 = vld [vmem:[%s13999_s5 + $0x78] sm:$0xff]  ;;  %v13579_v52 = vpop.f32.mrf.mxu1  ;;  %v15682_v12 = vld [vmem:[#allocation532_spill] sm:$0xff] }
 0xa0a   : > { %5905 = vmatmul.f32.gmra.mxu2 %v5089_v8  ;;  %v15675_v62 = vld [vmem:[#allocation473_spill] sm:$0xff] }
 0xa0b   : > { %5582 = vmatpush.msra.mxu1 %v4570_v50  ;;  %5541 = vmatpush.msra.mxu3 %v4785_v38  ;;  %v4882_v50 = vmul.f32 %v13308_v59, %v15668_v47  ;;  %v5708_v59 = vld [vmem:[%s13999_s5 + $0x70] sm:$0xff]  ;;  %v5755_v38 = vld [vmem:[%s13999_s5 + $0x1e8] sm:$0xff]  ;;  %v15676_v14 = vld [vmem:[#allocation469_spill] sm:$0xff]  ;;  %v13652_v3 = vpop.f32.mrf.mxu2 }
 0xa0c   : > { %v5701_v1 = vld [vmem:[%s13999_s5 + $0x38] sm:$0xff] }
 0xa0d   : > { %5583 = vmatpush.msra.mxu1 %v4562_v9  ;;  %5542 = vmatpush.msra.mxu3 %v4777_v26  ;;  %v15670_v9 = vld [vmem:[#allocation493_spill] sm:$0xff]  ;;  %v4818_v26 = vmul.f32 %v13060_v43, %v15676_v14  ;;  %v5700_v43 = vld [vmem:[%s13999_s5 + $0x30] sm:$0xff] }
 0xa0e   : > { %v4866_v0 = vmul.f32 %v13271_v4, %v15670_v9  ;;  %v5757_v4 = vld [vmem:[%s13999_s5 + $0x1f8] sm:$0xff]  ;;  %7263 = vmatmul.msk.f32.gmra.mxu0 %vm2514_vm9, %v5823_v63  ;;  %v5736_v14 = vld [vmem:[%s13999_s5 + $0x150] sm:$0xff] }
 0xa0f   : > { %5584 = vmatpush.msra.mxu1 %v4554_v16  ;;  %5543 = vmatpush.msra.mxu3 %v4769_v15  ;;  %v4850_v16 = vmul.f32 %v13216_v17, %v15672_v41  ;;  %v5704_v17 = vld [vmem:[%s13999_s5 + $0x50] sm:$0xff]  ;;  %v15677_v32 = vld [vmem:[#allocation465_spill] sm:$0xff]  ;;  %v5751_v15 = vld [vmem:[%s13999_s5 + $0x1c8] sm:$0xff] }
 0xa10   : > { %7252 = vmatmul.msk.f32.vlgmr.msra.gmra.mxu3 %vm12347_vm12, %v15001_v30  ;;  %5932 = vmatpush.msrb.mxu0 %v5757_v4  ;;  %v4810_v22 = vmul.f32 %v15678_v40, %v15677_v32  ;;  %v15679_v36 = vld [vmem:[#allocation461_spill] sm:$0xff] }
 0xa11   : > { %5585 = vmatpush.msra.mxu1 %v4546_v29  ;;  %5620 = vmatpush.msrb.mxu3 %v4890_v21  ;;  %v4842_v29 = vmul.f32 %v13179_v24, %v15673_v5  ;;  %v4834_v24 = vmul.f32 %v13147_v28, %v15674_v48  ;;  %v4826_v28 = vmul.f32 %v13102_v27, %v15675_v62  ;;  %v13622_v27 = vpop.f32.mrf.mxu3  ;;  %v13634_v54 = vpop.f32.mrf.mxu1  ;;  %v5749_v35 = vld [vmem:[%s13999_s5 + $0x1b8] sm:$0xff]  ;;  %v5740_v5 = vld [vmem:[%s13999_s5 + $0x170] sm:$0xff] }
 0xa12   : > { %5933 = vmatpush.msrb.mxu0 %v5756_v58  ;;  %v4802_v8 = vmul.f32 %v15680_v10, %v15679_v36  ;;  %v15684_v47 = vld [vmem:[#allocation37_spill] sm:$0xff]  ;;  %v5694_v58 = vld [vmem:[%s13999_s5] sm:$0xff]  ;;  %v5772_v48 = vld [vmem:[%s13999_s5 + $0x270] sm:$0xff] }
 0xa13   : > { %5586 = vmatpush.msra.mxu1 %v4538_v55  ;;  %5621 = vmatpush.msrb.mxu3 %v4882_v50  ;;  %v5702_v55 = vld [vmem:[%s13999_s5 + $0x40] sm:$0xff]  ;;  %v15685_v34 = vld [vmem:[#allocation449_spill] sm:$0xff] }
 0xa14   : > { %5934 = vmatpush.msrb.mxu0 %v5755_v38  ;;  %v5741_v4 = vld [vmem:[%s13999_s5 + $0x178] sm:$0xff]  ;;  %v5246_v38 = vpop.f32.mrf.mxu2  ;;  %v5734_v36 = vld [vmem:[%s13999_s5 + $0x140] sm:$0xff] }
 0xa15   : > { %5587 = vmatpush.msra.mxu1 %v4530_v61  ;;  %5622 = vmatpush.msrb.mxu3 %v4874_v49  ;;  %v13632_v61 = vpop.f32.mrf.mxu0  ;;  %v15686_v49 = vld [vmem:[#allocation248_spill] sm:$0xff]  ;;  %v5745_v63 = vld [vmem:[%s13999_s5 + $0x198] sm:$0xff] }
 0xa16   : > { %5935 = vmatpush.msrb.mxu0 %v5754_v6  ;;  %v5771_v6 = vld [vmem:[%s13999_s5 + $0x268] sm:$0xff]  ;;  %v5737_v62 = vld [vmem:[%s13999_s5 + $0x158] sm:$0xff] }
 0xa17   : > { %5588 = vmatpush.msra.mxu1 %v4522_v2  ;;  %5623 = vmatpush.msrb.mxu3 %v4866_v0  ;;  %v15681_v2 = vld [vmem:[#allocation457_spill] sm:$0xff]  ;;  %v5747_v0 = vld [vmem:[%s13999_s5 + $0x1a8] sm:$0xff] }
 0xa18   : > { %7253 = vmatmul.msk.f32.gmra.mxu3 %vm12483_vm15, %v15001_v30  ;;  %5936 = vmatpush.msrb.mxu0 %v5753_v45  ;;  %v4794_v21 = vmul.f32 %v15682_v12, %v15681_v2  ;;  %v5770_v45 = vld [vmem:[%s13999_s5 + $0x260] sm:$0xff]  ;;  %v5769_v32 = vld [vmem:[%s13999_s5 + $0x258] sm:$0xff] }
 0xa19   : > { %5589 = vmatpush.msra.mxu1 %v4514_v33  ;;  %5624 = vmatpush.msrb.mxu3 %v4858_v57  ;;  %v15683_v33 = vld [vmem:[#allocation453_spill] sm:$0xff]  ;;  %v13670_v9 = vpop.f32.mrf.mxu3  ;;  %v5766_v2 = vld [vmem:[%s13999_s5 + $0x240] sm:$0xff] }
 0xa1a   : > { %7256 = vmatmul.msk.f32.vlgmr.msra.gmra.mxu1 %vm12892_vm0, %v15001_v30  ;;  %5937 = vmatpush.msrb.mxu0 %v5752_v39  ;;  %v4786_v50 = vmul.f32 %v15684_v47, %v15683_v33  ;;  %v5789_v39 = vld [vmem:[%s13999_s5 + $0x2f8] sm:$0xff]  ;;  %v5786_v12 = vld [vmem:[%s13999_s5 + $0x2e0] sm:$0xff] }
 0xa1b   : > { %5863 = vmatpush.msrb.mxu1 %v5709_v7  ;;  %5625 = vmatpush.msrb.mxu3 %v4850_v16  ;;  %v5697_v7 = vld [vmem:[%s13999_s5 + $0x18] sm:$0xff]  ;;  %v5223_v16 = vpop.f32.mrf.mxu1 }
 0xa1c   : > { %5938 = vmatpush.msrb.mxu0 %v5751_v15  ;;  %5978 = vmatpush.msrb.mxu2 %v5789_v39  ;;  %v5788_v15 = vld [vmem:[%s13999_s5 + $0x2f0] sm:$0xff]  ;;  %v5249_v10 = vpop.f32.mrf.mxu2  ;;  %v5785_v47 = vld [vmem:[%s13999_s5 + $0x2d8] sm:$0xff] }
 0xa1d   : > { %5864 = vmatpush.msrb.mxu1 %v5708_v59  ;;  %5626 = vmatpush.msrb.mxu3 %v4842_v29  ;;  %v4778_v59 = vmul.f32 %v15686_v49, %v15685_v34  ;;  %v5200_v41 = vpop.f32.mrf.mxu0  ;;  %v5773_v29 = vld [vmem:[%s13999_s5 + $0x278] sm:$0xff]  ;;  %v5764_v34 = vld [vmem:[%s13999_s5 + $0x230] sm:$0xff] }
 0xa1e   : > { %5939 = vmatpush.msrb.mxu0 %v5750_v44  ;;  %v5733_v44 = vld [vmem:[%s13999_s5 + $0x138] sm:$0xff]  ;;  %5979 = vmatpush.msrb.mxu2 %v5788_v15  ;;  %v5784_v49 = vld [vmem:[%s13999_s5 + $0x2d0] sm:$0xff]  ;;  %v5799_v15 = vld [vmem:[%s13999_s5 + $0x348] sm:$0xff] }
 0xa1f   : > { %5865 = vmatpush.msrb.mxu1 %v5707_v56  ;;  %5627 = vmatpush.msrb.mxu3 %v4834_v24  ;;  %v15687_v56 = vld [vmem:[#allocation445_spill] sm:$0xff]  ;;  %v5744_v24 = vld [vmem:[%s13999_s5 + $0x190] sm:$0xff] }
 0xa20   : > { %5940 = vmatpush.msrb.mxu0 %v5749_v35  ;;  %v4770_v57 = vmul.f32 %v15688_v18, %v15687_v56  ;;  %v5765_v35 = vld [vmem:[%s13999_s5 + $0x238] sm:$0xff]  ;;  %v5132_v56 = vadd.f32 %v13579_v52, %v13577_v25  ;;  %v5728_v25 = vld [vmem:[%s13999_s5 + $0x110] sm:$0xff] }
 0xa21   : > { %5866 = vmatpush.msrb.mxu1 %v5706_v23  ;;  %5628 = vmatpush.msrb.mxu3 %v4826_v28  ;;  %v5695_v23 = vld [vmem:[%s13999_s5 + $0x8] sm:$0xff]  ;;  %v5269_v28 = vpop.f32.mrf.mxu3  ;;  %v5729_v18 = vld [vmem:[%s13999_s5 + $0x118] sm:$0xff] }
 0xa22   : > { %7257 = vmatmul.msk.f32.gmra.mxu1 %vm12971_vm1, %v15001_v30  ;;  %5941 = vmatpush.msrb.mxu0 %v5748_v60  ;;  %v5761_v52 = vld [vmem:[%s13999_s5 + $0x218] sm:$0xff] }
 0xa23   : > { %5867 = vmatpush.msrb.mxu1 %v5705_v37  ;;  %5629 = vmatpush.msrb.mxu3 %v4818_v26  ;;  %v5746_v37 = vld [vmem:[%s13999_s5 + $0x1a0] sm:$0xff]  ;;  %v5805_v39 = vld [vmem:[%s13999_s5 + $0x378] sm:$0xff] }
 0xa24   : > { %5942 = vmatpush.msrb.mxu0 %v5747_v0  ;;  %v5783_v0 = vld [vmem:[%s13999_s5 + $0x2c8] sm:$0xff] }
 0xa25   : > { %5868 = vmatpush.msrb.mxu1 %v5704_v17  ;;  %5630 = vmatpush.msrb.mxu3 %v4810_v22  ;;  %v5224_v17 = vadd.f32 %v5223_v16, %v5200_v41  ;;  %v5203_v26 = vpop.f32.mrf.mxu0  ;;  %v5782_v41 = vld [vmem:[%s13999_s5 + $0x2c0] sm:$0xff]  ;;  %v5781_v16 = vld [vmem:[%s13999_s5 + $0x2b8] sm:$0xff] }
 0xa26   : > { %5943 = vmatpush.msrb.mxu0 %v5746_v37  ;;  %v5155_v37 = vadd.f32 %v13604_v31, %v5132_v56  ;;  %v5726_v31 = vld [vmem:[%s13999_s5 + $0x100] sm:$0xff] }
 0xa27   : > { %5869 = vmatpush.msrb.mxu1 %v5703_v53  ;;  %5631 = vmatpush.msrb.mxu3 %v4802_v8  ;;  %v5738_v53 = vld [vmem:[%s13999_s5 + $0x160] sm:$0xff] }
 0xa28   : > { %5944 = vmatpush.msrb.mxu0 %v5745_v63  ;;  %v5780_v63 = vld [vmem:[%s13999_s5 + $0x2b0] sm:$0xff] }
 0xa29   : > { %5870 = vmatpush.msrb.mxu1 %v5702_v55  ;;  %5632 = vmatpush.msrb.mxu3 %v4794_v21  ;;  %v5743_v55 = vld [vmem:[%s13999_s5 + $0x188] sm:$0xff]  ;;  %v5732_v21 = vld [vmem:[%s13999_s5 + $0x130] sm:$0xff] }
 0xa2a   : > { %5945 = vmatpush.msrb.mxu0 %v5744_v24  ;;  %v5178_v24 = vadd.f32 %v13622_v27, %v5155_v37  ;;  %v5778_v27 = vld [vmem:[%s13999_s5 + $0x2a0] sm:$0xff] }
 0xa2b   : > { %5871 = vmatpush.msrb.mxu1 %v5701_v1  ;;  %5633 = vmatpush.msrb.mxu3 %v4786_v50  ;;  %v5226_v1 = vpop.f32.mrf.mxu1  ;;  %v5731_v50 = vld [vmem:[%s13999_s5 + $0x128] sm:$0xff]  ;;  %v5814_v37 = vld [vmem:[%s13999_s5 + $0x3c0] sm:$0xff] }
 0xa2c   : > { %v5227_v22 = vadd.f32 %v5226_v1, %v5203_v26  ;;  %5946 = vmatpush.msrb.mxu0 %v5743_v55  ;;  %v5776_v26 = vld [vmem:[%s13999_s5 + $0x290] sm:$0xff] }
 0xa2d   : > { %5872 = vmatpush.msrb.mxu1 %v5700_v43  ;;  %5634 = vmatpush.msrb.mxu3 %v4778_v59  ;;  %v5768_v43 = vld [vmem:[%s13999_s5 + $0x250] sm:$0xff]  ;;  %v5730_v59 = vld [vmem:[%s13999_s5 + $0x120] sm:$0xff] }
 0xa2e   : > { %v5250_v8 = vadd.f32 %v5249_v10, %v5227_v22  ;;  %v5803_v22 = vld [vmem:[%s13999_s5 + $0x368] sm:$0xff]  ;;  %v5797_v10 = vld [vmem:[%s13999_s5 + $0x338] sm:$0xff] }
 0xa2f   : > { %5873 = vmatpush.msrb.mxu1 %v5699_v42  ;;  %5635 = vmatpush.msrb.mxu3 %v4770_v57  ;;  %v5787_v42 = vld [vmem:[%s13999_s5 + $0x2e8] sm:$0xff]  ;;  %v5338_v57 = vpop.f32.mrf.mxu2 }
 0xa30   : > { %7260 = vmatmul.msk.f32.vlgmr.msrb.gmra.mxu3 %vm12347_vm12, %v15001_v30  ;;  %5980 = vmatpush.msrb.mxu2 %v5787_v42  ;;  %v5796_v42 = vld [vmem:[%s13999_s5 + $0x330] sm:$0xff] }
 0xa31   : > { %5874 = vmatpush.msrb.mxu1 %v5698_v51  ;;  %5909 = vmatpush.msra.mxu3 %v5741_v4  ;;  %v5272_v51 = vpop.f32.mrf.mxu3 }
 0xa32   : > { %v5273_v33 = vadd.f32 %v5272_v51, %v5250_v8  ;;  %5981 = vmatpush.msrb.mxu2 %v5786_v12  ;;  %v5793_v51 = vld [vmem:[%s13999_s5 + $0x318] sm:$0xff] }
 0xa33   : > { %5875 = vmatpush.msrb.mxu1 %v5697_v7  ;;  %5910 = vmatpush.msra.mxu3 %v5740_v5  ;;  %v5292_v7 = vpop.f32.mrf.mxu0 }
 0xa34   : > { %5982 = vmatpush.msrb.mxu2 %v5785_v47 }
 0xa35   : > { %5876 = vmatpush.msrb.mxu1 %v5696_v11  ;;  %5911 = vmatpush.msra.mxu3 %v5739_v46  ;;  %v5763_v11 = vld [vmem:[%s13999_s5 + $0x228] sm:$0xff] }
 0xa36   : > { %5983 = vmatpush.msrb.mxu2 %v5784_v49  ;;  %v5791_v49 = vld [vmem:[%s13999_s5 + $0x308] sm:$0xff] }
 0xa37   : > { %5877 = vmatpush.msrb.mxu1 %v5695_v23  ;;  %5912 = vmatpush.msra.mxu3 %v5738_v53  ;;  %v5315_v60 = vpop.f32.mrf.mxu1  ;;  %v5762_v23 = vld [vmem:[%s13999_s5 + $0x220] sm:$0xff]  ;;  %v5135_v53 = vadd.f32 %v13634_v54, %v13632_v61  ;;  %v5341_v55 = vpop.f32.mrf.mxu2  ;;  %v5777_v54 = vld [vmem:[%s13999_s5 + $0x298] sm:$0xff] }
 0xa38   : > { %7261 = vmatmul.msk.f32.gmra.mxu3 %vm12483_vm15, %v15001_v30  ;;  %v5742_v30 = vld [vmem:[%s13999_s5 + $0x180] sm:$0xff]  ;;  %v5316_v4 = vadd.f32 %v5315_v60, %v5292_v7  ;;  %5984 = vmatpush.msrb.mxu2 %v5783_v0  ;;  %v5820_v0 = vld [vmem:[%s13999_s5 + $0x3f0] sm:$0xff] }
 0xa39   : > { %5878 = vmatpush.msrb.mxu1 %v5694_v58  ;;  %5913 = vmatpush.msra.mxu3 %v5737_v62  ;;  %v5727_v58 = vld [vmem:[%s13999_s5 + $0x108] sm:$0xff]  ;;  %v5361_v5 = vpop.f32.mrf.mxu3  ;;  %v5758_v62 = vld [vmem:[%s13999_s5 + $0x200] sm:$0xff]  ;;  %v5158_v61 = vadd.f32 %v13652_v3, %v5135_v53 }
 0xa3a   : > { %5879 = vmatmul.f32.vlgmr.msrb.gmra.mxu1 %v13352_v20  ;;  %v5247_v20 = vadd.f32 %v5246_v38, %v5224_v17  ;;  %5947 = vmatpush.msrb.mxu0 %v5742_v30  ;;  %v5760_v17 = vld [vmem:[%s13999_s5 + $0x210] sm:$0xff]  ;;  %v5775_v3 = vld [vmem:[%s13999_s5 + $0x288] sm:$0xff]  ;;  %v5802_v30 = vld [vmem:[%s13999_s5 + $0x360] sm:$0xff] }
 0xa3b   : > { %5955 = vmatpush.msra.mxu1 %v5773_v29  ;;  %5914 = vmatpush.msra.mxu3 %v5736_v14  ;;  %v5339_v29 = vadd.f32 %v5338_v57, %v5316_v4  ;;  %v5295_v46 = vpop.f32.mrf.mxu0  ;;  %v5181_v1 = vadd.f32 %v13670_v9, %v5158_v61  ;;  %v5774_v9 = vld [vmem:[%s13999_s5 + $0x280] sm:$0xff]  ;;  %v5819_v57 = vld [vmem:[%s13999_s5 + $0x3e8] sm:$0xff] }
 0xa3c   : > { %v5270_v40 = vadd.f32 %v5269_v28, %v5247_v20  ;;  %5985 = vmatpush.msrb.mxu2 %v5782_v41  ;;  %v5818_v41 = vld [vmem:[%s13999_s5 + $0x3e0] sm:$0xff] }
 0xa3d   : > { %5956 = vmatpush.msra.mxu1 %v5772_v48  ;;  %5915 = vmatpush.msra.mxu3 %v5735_v13  ;;  %v5759_v48 = vld [vmem:[%s13999_s5 + $0x208] sm:$0xff]  ;;  %v5362_v20 = vadd.f32 %v5361_v5, %v5339_v29  ;;  %v5801_v13 = vld [vmem:[%s13999_s5 + $0x358] sm:$0xff]  ;;  %v5812_v5 = vld [vmem:[%s13999_s5 + $0x3b0] sm:$0xff] }
 0xa3e   : > { %5948 = vmatmul.f32.vlgmr.msrb.gmra.mxu0 %v5270_v40  ;;  %5986 = vmatpush.msrb.mxu2 %v5781_v16  ;;  %v5815_v16 = vld [vmem:[%s13999_s5 + $0x3c8] sm:$0xff]  ;;  %v5806_v61 = vld [vmem:[%s13999_s5 + $0x380] sm:$0xff] }
 0xa3f   : > { %5957 = vmatpush.msra.mxu1 %v5771_v6  ;;  %5916 = vmatpush.msra.mxu3 %v5734_v36  ;;  %v5318_v38 = vpop.f32.mrf.mxu1  ;;  %v5779_v6 = vld [vmem:[%s13999_s5 + $0x2a8] sm:$0xff]  ;;  %v5798_v36 = vld [vmem:[%s13999_s5 + $0x340] sm:$0xff] }
 0xa40   : > { %5987 = vmatpush.msrb.mxu2 %v5780_v63  ;;  %v5319_v28 = vadd.f32 %v5318_v38, %v5295_v46  ;;  %v5811_v63 = vld [vmem:[%s13999_s5 + $0x3a8] sm:$0xff]  ;;  %v5809_v38 = vld [vmem:[%s13999_s5 + $0x398] sm:$0xff] }
 0xa41   : > { %5958 = vmatpush.msra.mxu1 %v5770_v45  ;;  %5917 = vmatpush.msra.mxu3 %v5733_v44  ;;  %v5364_v14 = vpop.f32.mrf.mxu3  ;;  %v5795_v44 = vld [vmem:[%s13999_s5 + $0x328] sm:$0xff] }
 0xa42   : > { %5882 = vmatmul.f32.gmra.mxu1 %v13422_v19  ;;  %v5767_v19 = vld [vmem:[%s13999_s5 + $0x248] sm:$0xff]  ;;  %5988 = vmatpush.msrb.mxu2 %v5779_v6  ;;  %v5342_v45 = vadd.f32 %v5341_v55, %v5319_v28 }
 0xa43   : > { %5959 = vmatpush.msra.mxu1 %v5769_v32  ;;  %5918 = vmatpush.msra.mxu3 %v5732_v21  ;;  %v5804_v32 = vld [vmem:[%s13999_s5 + $0x370] sm:$0xff]  ;;  %v5430_v21 = vpop.f32.mrf.mxu2  ;;  %v5807_v28 = vld [vmem:[%s13999_s5 + $0x388] sm:$0xff] }
 0xa44   : > { %5989 = vmatpush.msrb.mxu2 %v5778_v27  ;;  %v5365_v40 = vadd.f32 %v5364_v14, %v5342_v45 }
 0xa45   : > { %5960 = vmatpush.msra.mxu1 %v5768_v43  ;;  %5919 = vmatpush.msra.mxu3 %v5731_v50  ;;  %v5800_v43 = vld [vmem:[%s13999_s5 + $0x350] sm:$0xff] }
 0xa46   : > { %5951 = vmatmul.f32.gmra.mxu0 %v5273_v33  ;;  %5990 = vmatpush.msrb.mxu2 %v5777_v54 }
 0xa47   : > { %5961 = vmatpush.msra.mxu1 %v5767_v19  ;;  %5920 = vmatpush.msra.mxu3 %v5730_v59  ;;  %v5384_v19 = vpop.f32.mrf.mxu0  ;;  %v5790_v59 = vld [vmem:[%s13999_s5 + $0x300] sm:$0xff] }
 0xa48   : > { %5991 = vmatpush.msrb.mxu2 %v5776_v26 }
 0xa49   : > { %5962 = vmatpush.msra.mxu1 %v5766_v2  ;;  %5921 = vmatpush.msra.mxu3 %v5729_v18  ;;  %v5794_v2 = vld [vmem:[%s13999_s5 + $0x320] sm:$0xff] }
 0xa4a   : > { %5992 = vmatpush.msrb.mxu2 %v5775_v3 }
 0xa4b   : > { %5963 = vmatpush.msra.mxu1 %v5765_v35  ;;  %5922 = vmatpush.msra.mxu3 %v5728_v25  ;;  %v5792_v35 = vld [vmem:[%s13999_s5 + $0x310] sm:$0xff]  ;;  %v5433_v56 = vpop.f32.mrf.mxu2  ;;  %v5817_v25 = vld [vmem:[%s13999_s5 + $0x3d8] sm:$0xff] }
 0xa4c   : > { %5993 = vmatpush.msrb.mxu2 %v5774_v9 }
 0xa4d   : > { %5964 = vmatpush.msra.mxu1 %v5764_v34  ;;  %5923 = vmatpush.msra.mxu3 %v5727_v58  ;;  %v5813_v58 = vld [vmem:[%s13999_s5 + $0x3b8] sm:$0xff] }
 0xa4f   : > { %5965 = vmatpush.msra.mxu1 %v5763_v11  ;;  %5924 = vmatpush.msra.mxu3 %v5726_v31  ;;  %v5387_v47 = vpop.f32.mrf.mxu0  ;;  %v5821_v11 = vld [vmem:[%s13999_s5 + $0x3f8] sm:$0xff]  ;;  %v5810_v31 = vld [vmem:[%s13999_s5 + $0x3a0] sm:$0xff] }
 0xa50   : > { %5925 = vmatmul.f32.vlgmr.msra.gmra.mxu3 %v5178_v24  ;;  %6024 = vmatpush.msra.mxu0 %v5821_v11 }
 0xa51   : > { %5966 = vmatpush.msra.mxu1 %v5762_v23  ;;  %6001 = vmatpush.msrb.mxu3 %v5805_v39 }
 0xa52   : > { %6025 = vmatpush.msra.mxu0 %v5820_v0 }
 0xa53   : > { %5967 = vmatpush.msra.mxu1 %v5761_v52  ;;  %6002 = vmatpush.msrb.mxu3 %v5804_v32  ;;  %v5816_v52 = vld [vmem:[%s13999_s5 + $0x3d0] sm:$0xff] }
 0xa54   : > { %6026 = vmatpush.msra.mxu0 %v5819_v57 }
 0xa55   : > { %5968 = vmatpush.msra.mxu1 %v5760_v17  ;;  %6003 = vmatpush.msrb.mxu3 %v5803_v22 }
 0xa56   : > { %6027 = vmatpush.msra.mxu0 %v5818_v41 }
 0xa57   : > { %5969 = vmatpush.msra.mxu1 %v5759_v48  ;;  %6004 = vmatpush.msrb.mxu3 %v5802_v30  ;;  %v5407_v8 = vpop.f32.mrf.mxu1  ;;  %v5476_v29 = vpop.f32.mrf.mxu0 }
 0xa58   : > { %5928 = vmatmul.f32.gmra.mxu3 %v5181_v1  ;;  %v5408_v12 = vadd.f32 %v5407_v8, %v5384_v19  ;;  %6028 = vmatpush.msra.mxu0 %v5817_v25  ;;  %v5522_v48 = vpop.f32.mrf.mxu2 }
 0xa59   : > { %5970 = vmatpush.msra.mxu1 %v5758_v62  ;;  %6005 = vmatpush.msrb.mxu3 %v5801_v13 }
 0xa5a   : > { %5971 = vmatmul.f32.vlgmr.msra.gmra.mxu1 %v5362_v20  ;;  %v5431_v33 = vadd.f32 %v5430_v21, %v5408_v12  ;;  %6029 = vmatpush.msra.mxu0 %v5816_v52  ;;  %v5808_v20 = vld [vmem:[%s13999_s5 + $0x390] sm:$0xff] }
 0xa5b   : > { %6006 = vmatpush.msrb.mxu3 %v5800_v43 }
 0xa5c   : > { %6030 = vmatpush.msra.mxu0 %v5815_v16 }
 0xa5d   : > { %6007 = vmatpush.msrb.mxu3 %v5799_v15 }
 0xa5e   : > { %6031 = vmatpush.msra.mxu0 %v5814_v37 }
 0xa5f   : > { %6008 = vmatpush.msrb.mxu3 %v5798_v36  ;;  %v5410_v50 = vpop.f32.mrf.mxu1  ;;  %v5479_v53 = vpop.f32.mrf.mxu0 }
 0xa60   : > { %v5411_v34 = vadd.f32 %v5410_v50, %v5387_v47  ;;  %6032 = vmatpush.msra.mxu0 %v5813_v58  ;;  %v5525_v54 = vpop.f32.mrf.mxu2 }
 0xa61   : > { %6009 = vmatpush.msrb.mxu3 %v5797_v10 }
 0xa62   : > { %5974 = vmatmul.f32.gmra.mxu1 %v5365_v40  ;;  %v5434_v18 = vadd.f32 %v5433_v56, %v5411_v34  ;;  %6033 = vmatpush.msra.mxu0 %v5812_v5 }
 0xa63   : > { %6010 = vmatpush.msrb.mxu3 %v5796_v42  ;;  %v5859_v42 = vstv %s5858_s21 }
 0xa64   : > { %6034 = vmatpush.msra.mxu0 %v5811_v63  ;;  %vm5860_vm2 = vcmp.eq.s32.totalorder %v5859_v42, 1 }
 0xa65   : > { %6011 = vmatpush.msrb.mxu3 %v5795_v44 }
 0xa66   : > { %6035 = vmatpush.msra.mxu0 %v5810_v31 }
 0xa67   : > { %6012 = vmatpush.msrb.mxu3 %v5794_v2  ;;  %v5568_v1 = vpop.f32.mrf.mxu0 }
 0xa68   : > { %6036 = vmatpush.msra.mxu0 %v5809_v38  ;;  %v5614_v32 = vpop.f32.mrf.mxu2 }
 0xa69   : > { %6013 = vmatpush.msrb.mxu3 %v5793_v51 }
 0xa6a   : > { %6037 = vmatpush.msra.mxu0 %v5808_v20 }
 0xa6b   : > { %6014 = vmatpush.msrb.mxu3 %v5792_v35 }
 0xa6c   : > { %6038 = vmatpush.msra.mxu0 %v5807_v28 }
 0xa6d   : > { %6015 = vmatpush.msrb.mxu3 %v5791_v49 }
 0xa6e   : > { %6039 = vmatpush.msra.mxu0 %v5806_v61 }
 0xa6f   : > { %6016 = vmatpush.msrb.mxu3 %v5790_v59  ;;  %v5571_v9 = vpop.f32.mrf.mxu0 }
 0xa70   : > { %v5617_v15 = vpop.f32.mrf.mxu2 }
 0xa73   : > { %v5453_v7 = vpop.f32.mrf.mxu3 }
 0xa74   : > { %v5454_v60 = vadd.f32 %v5453_v7, %v5431_v33 }
 0xa76   : > { %5994 = vmatmul.f32.vlgmr.msrb.gmra.mxu2 %v5454_v60 }
 0xa77   : > { %v5499_v17 = vpop.f32.mrf.mxu1 }
 0xa78   : > { %v5500_v46 = vadd.f32 %v5499_v17, %v5476_v29 }
 0xa7a   : > { %v5523_v24 = vadd.f32 %v5522_v48, %v5500_v46 }
 0xa7b   : > { %v5456_v23 = vpop.f32.mrf.mxu3 }
 0xa7c   : > { %v5457_v4 = vadd.f32 %v5456_v23, %v5434_v18 }
 0xa7e   : > { %5997 = vmatmul.f32.gmra.mxu2 %v5457_v4 }
 0xa7f   : > { %v5502_v6 = vpop.f32.mrf.mxu1  ;;  %v5903_v12 = vpop.f32.mrf.mxu2 }
 0xa80   : > { %v5503_v27 = vadd.f32 %v5502_v6, %v5479_v53 }
 0xa82   : > { %v5526_v45 = vadd.f32 %v5525_v54, %v5503_v27 }
 0xa83   : > { %v5851_v8 = vpop.f32.mrf.mxu0 }
 0xa84   : > { %v5861_v51 = vsel %vm5860_vm2, %v5851_v8, 0.0 }
 0xa8b   : > { %v5854_v2 = vpop.f32.mrf.mxu0 }
 0xa8c   : > { %v5862_v60 = vsel %vm5860_vm2, %v5854_v2, 0.0 }
 0xa8d   : > { %v5906_v50 = vpop.f32.mrf.mxu2 }
 0xa93   : > { %v5545_v62 = vpop.f32.mrf.mxu3 }
 0xa94   : > { %v5546_v55 = vadd.f32 %v5545_v62, %v5523_v24 }
 0xa96   : > { %6017 = vmatmul.f32.vlgmr.msrb.gmra.mxu3 %v5546_v55 }
 0xa97   : > { %v5591_v3 = vpop.f32.mrf.mxu1 }
 0xa98   : > { %v5592_v39 = vadd.f32 %v5591_v3, %v5568_v1 }
 0xa9a   : > { %v5615_v40 = vadd.f32 %v5614_v32, %v5592_v39 }
 0xa9b   : > { %v5548_v14 = vpop.f32.mrf.mxu3 }
 0xa9c   : > { %v5549_v26 = vadd.f32 %v5548_v14, %v5526_v45 }
 0xa9e   : > { %6020 = vmatmul.f32.gmra.mxu3 %v5549_v26 }
 0xa9f   : > { %v5594_v22 = vpop.f32.mrf.mxu1 }
 0xaa0   : > { %v5595_v13 = vadd.f32 %v5594_v22, %v5571_v9 }
 0xaa2   : > { %v5618_v36 = vadd.f32 %v5617_v15, %v5595_v13 }
 0xab3   : > { %v5637_v30 = vpop.f32.mrf.mxu3 }
 0xab4   : > { %v5638_v43 = vadd.f32 %v5637_v30, %v5615_v40 }
 0xab6   : > { %6040 = vmatmul.f32.vlgmr.msra.gmra.mxu0 %v5638_v43 }
 0xab7   : > { %v5880_v44 = vpop.f32.mrf.mxu1 }
 0xab8   : > { %v5881_v35 = vadd.f32 %v5880_v44, %v5861_v51 }
 0xaba   : > { %v5904_v7 = vadd.f32 %v5903_v12, %v5881_v35 }
 0xabb   : > { %v5640_v10 = vpop.f32.mrf.mxu3  ;;  %v5949_v47 = vpop.f32.mrf.mxu0 }
 0xabc   : > { %v5641_v19 = vadd.f32 %v5640_v10, %v5618_v36 }
 0xabe   : > { %6043 = vmatmul.f32.gmra.mxu0 %v5641_v19 }
 0xabf   : > { %v5883_v33 = vpop.f32.mrf.mxu1 }
 0xac0   : > { %v5884_v59 = vadd.f32 %v5883_v33, %v5862_v60 }
 0xac2   : > { %v5907_v57 = vadd.f32 %v5906_v50, %v5884_v59 }
 0xac3   : > { %v5952_v56 = vpop.f32.mrf.mxu0 }
 0xad3   : > { %v5926_v21 = vpop.f32.mrf.mxu3 }
 0xad4   : > { %v5927_v49 = vadd.f32 %v5926_v21, %v5904_v7 }
 0xad6   : > { %v5950_v0 = vadd.f32 %v5949_v47, %v5927_v49 }
 0xad7   : > { %v5972_v11 = vpop.f32.mrf.mxu1 }
 0xad8   : > { %v5973_v4 = vadd.f32 %v5972_v11, %v5950_v0 }
 0xadb   : > { %v5929_v34 = vpop.f32.mrf.mxu3 }
 0xadc   : > { %v5930_v41 = vadd.f32 %v5929_v34, %v5907_v57 }
 0xade   : > { %v5953_v52 = vadd.f32 %v5952_v56, %v5930_v41 }
 0xadf   : > { %v5975_v37 = vpop.f32.mrf.mxu1 }
 0xae0   : > { %v5976_v17 = vadd.f32 %v5975_v37, %v5953_v52 }
 0xaf9   : > { %v5995_v18 = vpop.f32.mrf.mxu2 }
 0xafa   : > { %v5996_v25 = vadd.f32 %v5995_v18, %v5973_v4 }
 0xb01   : > { %v5998_v29 = vpop.f32.mrf.mxu2 }
 0xb02   : > { %v5999_v31 = vadd.f32 %v5998_v29, %v5976_v17 }
 0xb19   : > { %v6018_v23 = vpop.f32.mrf.mxu3 }
 0xb1a   : > { %v6019_v16 = vadd.f32 %v6018_v23, %v5996_v25 }
 0xb21   : > { %v6021_v63 = vpop.f32.mrf.mxu3 }
 0xb22   : > { %v6022_v46 = vadd.f32 %v6021_v63, %v5999_v31 }
 0xb33   : > { %v6041_v58 = vpop.f32.mrf.mxu0 }
 0xb34   : > { %v6042_v5 = vadd.f32 %v6041_v58, %v6019_v16 }
 0xb36   : > { %6047 = vst.msk [vmem:[%s310_s10] sm:$0xff] %vm2514_vm9, %v6042_v5 }
 0xb3b   : > { %v6044_v38 = vpop.f32.mrf.mxu0 }
 0xb3c   : > { %v6045_v48 = vadd.f32 %v6044_v38, %v6022_v46 }
 0xb3e   : > { %6048 = vst.msk [vmem:[%s310_s10 + $0x8] sm:$0xff] %vm2514_vm9, %v6045_v48 }
 0xb3f   : > { %7422 = shalt.err (!%p7419_p7)
}
 0xb40   : > { %s7477_s22 = smov 128   ;;  %s7478_s10 = smov 8  }
 0xb41   : > { %7272 = dma.vmem_to_hbm [thread:$0]  (%p7559_p4), %s6063_s16, 256, %s6065_s17, %s6050_s27, %s7477_s22, %s7477_s22, %s7478_s10  }
 0xb42 PF: > { %p7278_p9 = scmp.ge.s32.totalorder %s7473_s29, 2  ;;  %s6079_s8 = sand.u32 1, %s7453_s24  }
 0xb43   : > { %s6080_s12 = scalar_lea.sflag [#allocation4], %s6079_s8 }
 0xb44   : > { %p7275_p10 = pnand %p7278_p9, %p7566_p8 }
 0xb46   : > { %p7276_p11 = pneg %p7275_p10 }
 0xb48   : > { %7448 = dma.done.wait (%p7276_p11), %s6080_s12, 256  }
 0xb49   : > { %7450 = vsyncadd (%p7276_p11), %s6080_s12, 4294967040  ;;  %s20_s29 = sadd.s32 1, %s7473_s29   ;;  %s15689_s24 = smov %s7457_s25 }
 0xb4a   : > { %p17_p12 = scmp.ge.s32.totalorder %s20_s29, 4   ;;  %s15690_s25 = smov %s7461_s26 }
 0xb4b   : > { %s15691_s26 = smov %s7572_s14  ;;  %s15692_s27 = smov %s7469_s28 }
 0xb4c   : > { %s15693_s28 = smov %s15695_s9  ;;  %19 = sbr.rel (!%p17_p12) target bundleno = 4 (0x4), region = 95 }
 0xb51   :  { %6086 = vsyncpa [#allocation4], 1 }
 0xb52   :  { %6088 = vsyncpa [#allocation4 + $0x1], 1 }

</bundles_post_ra>
